<compile_context>
chip_gen: v5e
topology: v5e:2x2
jax: 0.10.0
libtpu: 0.0.40
codegen_flags: <defaults>
</compile_context>

<pallas_src>
import functools
import math

import jax
import jax.numpy as jnp
from jax import lax
from jax.experimental import pallas as pl
from jax.experimental.pallas import tpu as pltpu

_VMEM_LIMIT = 48 * 1024 * 1024


def _round_up(v, m):
    return ((v + m - 1) // m) * m


# ---------------------------------------------------------------------------
# Pallas kernels
# ---------------------------------------------------------------------------
def _conv_plane_kernel(*refs, kd, kh, kw, wp, h, w, slope, d_nc, split, project):
    """One (n, d_out) plane of a stride-1 Conv3d + LeakyReLU (+fused conv4).

    refs = kd plane refs (1,1,rp,Cin) bf16, w_ref (taps*Cin,Cout) bf16,
           b_ref (1,Cout) f32, [pw_ref (r_nc,d_nc) bf16, pb_ref (1,d_nc) f32],
           then outputs: split -> (d_ref, r_ref, sum_ref)
                         project -> (y_ref, sum_ref).
    """
    planes = refs[:kd]
    pos = kd
    w_ref, b_ref = refs[pos], refs[pos + 1]
    pos += 2
    if project:
        pw_ref, pb_ref = refs[pos], refs[pos + 1]
        pos += 2
    if split:
        d_ref, r_ref, sum_ref = refs[pos], refs[pos + 1], refs[pos + 2]
    else:
        y_ref, sum_ref = refs[pos], refs[pos + 1]

    r_out = h * wp
    span = (kh - 1) * wp + r_out

    # Build the wide-K LHS: tap order is (depth i, lane-shift k, row-shift j),
    # matching the host-side weight slab layout.  wp is a multiple of 16 so
    # the j*wp shifts are sublane-aligned; each unaligned k-shift happens once.
    cols = []
    for i in range(kd):
        base = planes[i][0, 0]                       # (rp, Cin) bf16
        for k in range(kw):
            shifted = base[k:k + span, :]            # one unaligned slice / (i,k)
            for j in range(kh):
                cols.append(shifted[j * wp:j * wp + r_out, :])   # aligned
    lhs = cols[0] if len(cols) == 1 else jnp.concatenate(cols, axis=-1)

    acc = jnp.dot(lhs, w_ref[...], preferred_element_type=jnp.float32)
    acc = acc + b_ref[...]
    acc = jnp.where(acc >= 0, acc, jnp.float32(slope) * acc)      # LeakyReLU

    if project:                                      # fused conv4 (1x1x1) on r3
        d4 = jnp.dot(acc[:, d_nc:].astype(jnp.bfloat16), pw_ref[...],
                     preferred_element_type=jnp.float32) + pb_ref[...]
        acc = jnp.concatenate([acc[:, :d_nc], d4], axis=-1)       # (r_out, 2*d_nc)

    # CA global-mean fused here: per-plane channel sums over VALID pixels only
    # (junk padded-W columns masked out), so `cat` is never re-read for the mean.
    col = lax.broadcasted_iota(jnp.int32, (r_out, 1), 0) % wp
    valid = (col < w).astype(jnp.float32)
    sum_ref[0, 0] = jnp.sum(acc * valid, axis=0, keepdims=True)

    # De-junk the padded-W row grid in VMEM -> clean (h, w, C) stores; no extra
    # HBM slicing pass in the wrapper, outputs are directly consumable.
    block = acc.reshape(h, wp, acc.shape[-1])[:, :w, :]
    if split:
        d_ref[0, 0] = block[..., :d_nc].astype(d_ref.dtype)
        r_ref[0, 0] = block[..., d_nc:].astype(r_ref.dtype)
    else:
        y_ref[0, 0] = block.astype(y_ref.dtype)


def _ca_apply_kernel(d1_ref, d2_ref, y34_ref, x_ref, w5s_ref, b5_ref, o_ref, *,
                     d_nc):
    """out = concat(d1,d2,d3,d4) @ (diag(s) @ Wc5) + b_c5 + x for one (n, S-tile).

    The channel-attention scale is pre-folded into per-batch c5 weights, so the
    kernel is three narrow-K MXU dots + a residual add, and the HBM concat of
    (d1, d2, d3, d4) never materializes.
    """
    w5s = w5s_ref[0]                                           # (C, C) f32
    out = jnp.dot(d1_ref[0].astype(jnp.float32), w5s[:d_nc, :],
                  preferred_element_type=jnp.float32)
    out = out + jnp.dot(d2_ref[0].astype(jnp.float32), w5s[d_nc:2 * d_nc, :],
                        preferred_element_type=jnp.float32)
    out = out + jnp.dot(y34_ref[0].astype(jnp.float32), w5s[2 * d_nc:, :],
                        preferred_element_type=jnp.float32)
    o_ref[0] = out + b5_ref[...] + x_ref[0]


# ---------------------------------------------------------------------------
# Conv3d wrapper (stride 1) -- wide-K tap matmul, no HBM im2col
# ---------------------------------------------------------------------------
def conv3d_pallas(x, w, b, pad, slope, d_nc, proj_w=None, proj_b=None):
    """x: (N, D, H, W, Cin) NDHWC; w: PyTorch OIDHW (Cout, Cin, kd, kh, kw).

    Returns (d_part, r_part, plane_channel_sums) when splitting at d_nc, or
    (y34, plane_channel_sums) when the fused conv4 projection is supplied.
    """
    cout, cin, kd, kh, kw = w.shape
    n, dd, hh, wd, _ = x.shape
    pd, ph, pw = pad
    dp, hp = dd + 2 * pd, hh + 2 * ph
    wp_ = _round_up(wd + 2 * pw, 16)            # sublane-aligned padded width
    rp = _round_up(hp * wp_ + (kw - 1), 8)      # rows per input plane (+tail)

    xp = jnp.pad(x.astype(jnp.bfloat16),
                 ((0, 0), (pd, pd), (ph, ph), (pw, wp_ - wd - pw), (0, 0)))
    xp = xp.reshape(n, dp, hp * wp_, cin)
    if rp > hp * wp_:
        xp = jnp.pad(xp, ((0, 0), (0, 0), (0, rp - hp * wp_), (0, 0)))

    # Weight slab laid out to match the kernel's (i, k, j, cin) concat order.
    taps = kd * kh * kw
    wt = jnp.transpose(w, (2, 4, 3, 1, 0)).reshape(taps * cin, cout)
    wt = wt.astype(jnp.bfloat16)
    bt = b.reshape(1, cout).astype(jnp.float32)

    project = proj_w is not None
    split = not project

    args = [xp] * kd + [wt, bt]
    in_specs = [pl.BlockSpec((1, 1, rp, cin),
                             (lambda ni, di, _i=i: (ni, di + _i, 0, 0)))
                for i in range(kd)]
    in_specs += [
        pl.BlockSpec((taps * cin, cout), lambda ni, di: (0, 0)),
        pl.BlockSpec((1, cout), lambda ni, di: (0, 0)),
    ]

    if project:
        cproj = proj_w.shape[1]
        c_eff = d_nc + cproj
        args += [proj_w.astype(jnp.bfloat16),
                 proj_b.reshape(1, cproj).astype(jnp.float32)]
        in_specs += [pl.BlockSpec(proj_w.shape, lambda ni, di: (0, 0)),
                     pl.BlockSpec((1, cproj), lambda ni, di: (0, 0))]
        out_shape = (jax.ShapeDtypeStruct((n, dd, hh, wd, c_eff), jnp.bfloat16),
                     jax.ShapeDtypeStruct((n, dd, 1, c_eff), jnp.float32))
        out_specs = (pl.BlockSpec((1, 1, hh, wd, c_eff),
                                  lambda ni, di: (ni, di, 0, 0, 0)),
                     pl.BlockSpec((1, 1, 1, c_eff),
                                  lambda ni, di: (ni, di, 0, 0)))
    else:
        r_nc = cout - d_nc
        out_shape = (jax.ShapeDtypeStruct((n, dd, hh, wd, d_nc), jnp.bfloat16),
                     jax.ShapeDtypeStruct((n, dd, hh, wd, r_nc), jnp.bfloat16),
                     jax.ShapeDtypeStruct((n, dd, 1, cout), jnp.float32))
        out_specs = (pl.BlockSpec((1, 1, hh, wd, d_nc),
                                  lambda ni, di: (ni, di, 0, 0, 0)),
                     pl.BlockSpec((1, 1, hh, wd, r_nc),
                                  lambda ni, di: (ni, di, 0, 0, 0)),
                     pl.BlockSpec((1, 1, 1, cout),
                                  lambda ni, di: (ni, di, 0, 0)))

    kernel = functools.partial(_conv_plane_kernel, kd=kd, kh=kh, kw=kw, wp=wp_,
                               h=hh, w=wd, slope=slope, d_nc=d_nc,
                               split=split, project=project)
    return pl.pallas_call(
        kernel,
        out_shape=out_shape,
        grid=(n, dd),
        in_specs=in_specs,
        out_specs=out_specs,
        compiler_params=pltpu.CompilerParams(
            dimension_semantics=("parallel", "parallel"),
            vmem_limit_bytes=_VMEM_LIMIT),
    )(*args)


# ---------------------------------------------------------------------------
# PMCB forward
# ---------------------------------------------------------------------------
def _pick_spatial_tile(s_len, max_tile=4096):
    if s_len <= max_tile:
        return s_len
    for cand in range(max_tile - (max_tile % 8), 7, -8):
        if s_len % cand == 0:
            return cand
    return None


def pmcb_forward(x_ndhwc, p, d_nc, slope=0.05):
    n, d, h, w, c = x_ndhwc.shape
    r_nc = c - d_nc
    assert 4 * d_nc == c, "PMCB residual requires 4*d_nc == in_channels"

    d1, r1, sums1 = conv3d_pallas(x_ndhwc, p['w1'], p['b1'], (1, 1, 1), slope, d_nc)
    d2, r2, sums2 = conv3d_pallas(r1, p['w2'], p['b2'], (1, 0, 0), slope, d_nc)

    # conv4 (1x1x1, no activation) fused into conv3: applied only to r3.
    pw4 = p['w4'].reshape(d_nc, r_nc).T                          # (r_nc, d_nc)
    pb4 = p['b4'].reshape(1, d_nc)
    y34, sums3 = conv3d_pallas(r2, p['w3'], p['b3'], (0, 1, 1), slope, d_nc,
                               proj_w=pw4, proj_b=pb4)           # (..., 2*d_nc)

    # CA global mean from the per-plane channel sums emitted by the conv
    # kernels (cat is never re-read from HBM); tiny (N, C) SE MLP in plain JAX.
    npix = d * h * w
    m1 = jnp.sum(sums1, axis=(1, 2))[:, :d_nc]
    m2 = jnp.sum(sums2, axis=(1, 2))[:, :d_nc]
    m3 = jnp.sum(sums3, axis=(1, 2))
    mean = jnp.concatenate([m1, m2, m3], axis=-1) / jnp.float32(npix)   # (N, C)

    cr = p['w_du1'].shape[0]
    z = jnp.maximum(mean @ p['w_du1'].reshape(cr, c).T + p['b_du1'], 0.0)
    s = jax.nn.sigmoid(z @ p['w_du2'].reshape(c, cr).T + p['b_du2'])    # (N, C)

    # Fold the SE scale into per-batch c5 weights: (cat*s)@W5^T == cat@(diag(s)W5^T)
    w5t = p['w_c5'].reshape(c, c).T.astype(jnp.float32)          # (Cin, Cout)
    w5s = s[:, :, None].astype(jnp.float32) * w5t[None]          # (N, Cin, Cout)
    b5 = p['b_c5'].reshape(1, c).astype(jnp.float32)

    # Channel attention apply + c5 + residual, tiled over (N, S).
    s_len = d * h * w
    ts = _pick_spatial_tile(s_len)
    if ts is None:
        # TODO(synk): mask the tail block instead of padding for pathological S.
        ts = 2048
        s_pad = _round_up(s_len, ts)
    else:
        s_pad = s_len

    d1f = d1.reshape(n, s_len, d_nc)
    d2f = d2.reshape(n, s_len, d_nc)
    y34f = y34.reshape(n, s_len, 2 * d_nc)
    xf = x_ndhwc.astype(jnp.float32).reshape(n, s_len, c)
    if s_pad != s_len:
        padw = ((0, 0), (0, s_pad - s_len), (0, 0))
        d1f = jnp.pad(d1f, padw)
        d2f = jnp.pad(d2f, padw)
        y34f = jnp.pad(y34f, padw)
        xf = jnp.pad(xf, padw)

    out = pl.pallas_call(
        functools.partial(_ca_apply_kernel, d_nc=d_nc),
        out_shape=jax.ShapeDtypeStruct((n, s_pad, c), jnp.float32),
        grid=(n, s_pad // ts),
        in_specs=[
            pl.BlockSpec((1, ts, d_nc), lambda ni, ti: (ni, ti, 0)),
            pl.BlockSpec((1, ts, d_nc), lambda ni, ti: (ni, ti, 0)),
            pl.BlockSpec((1, ts, 2 * d_nc), lambda ni, ti: (ni, ti, 0)),
            pl.BlockSpec((1, ts, c), lambda ni, ti: (ni, ti, 0)),
            pl.BlockSpec((1, c, c), lambda ni, ti: (ni, 0, 0)),
            pl.BlockSpec((1, c), lambda ni, ti: (0, 0)),
        ],
        out_specs=pl.BlockSpec((1, ts, c), lambda ni, ti: (ni, ti, 0)),
        compiler_params=pltpu.CompilerParams(
            dimension_semantics=("parallel", "parallel"),
            vmem_limit_bytes=_VMEM_LIMIT),
    )(d1f, d2f, y34f, xf, w5s, b5)
    if s_pad != s_len:
        out = out[:, :s_len, :]
    return out.reshape(n, d, h, w, c)


# ---------------------------------------------------------------------------
# Deterministic parameter init (PyTorch Conv3d-style shapes)
# ---------------------------------------------------------------------------
def _conv_params(key, cout, cin, kd, kh, kw):
    kw_key, kb_key = jax.random.split(key)
    fan_in = cin * kd * kh * kw
    bound = 1.0 / math.sqrt(fan_in)
    w = jax.random.uniform(kw_key, (cout, cin, kd, kh, kw), jnp.float32, -bound, bound)
    b = jax.random.uniform(kb_key, (cout,), jnp.float32, -bound, bound)
    return w, b


def init_pmcb_params(key, in_channels=64, d_rate=0.25, reduction=16):
    d_nc = int(in_channels * d_rate)
    r_nc = in_channels - d_nc
    ca_ch = d_nc * 4
    keys = jax.random.split(key, 7)
    p = {}
    p['w1'], p['b1'] = _conv_params(keys[0], in_channels, in_channels, 3, 3, 3)
    p['w2'], p['b2'] = _conv_params(keys[1], in_channels, r_nc, 3, 1, 1)
    p['w3'], p['b3'] = _conv_params(keys[2], in_channels, r_nc, 1, 3, 3)
    p['w4'], p['b4'] = _conv_params(keys[3], d_nc, r_nc, 1, 1, 1)
    p['w_c5'], p['b_c5'] = _conv_params(keys[4], in_channels, in_channels, 1, 1, 1)
    p['w_du1'], p['b_du1'] = _conv_params(keys[5], ca_ch // reduction, ca_ch, 1, 1, 1)
    p['w_du2'], p['b_du2'] = _conv_params(keys[6], ca_ch, ca_ch // reduction, 1, 1, 1)
    return p, d_nc, r_nc


# ---------------------------------------------------------------------------
# Pure-JAX reference (NCDHW, mirrors the PyTorch forward) for verification
# ---------------------------------------------------------------------------
def _ref_conv(x, w, b, pad):
    y = lax.conv_general_dilated(
        x, w, window_strides=(1, 1, 1),
        padding=[(pad[0], pad[0]), (pad[1], pad[1]), (pad[2], pad[2])],
        dimension_numbers=('NCDHW', 'OIDHW', 'NCDHW'),
        precision=lax.Precision.HIGHEST)
    return y + b.reshape(1, -1, 1, 1, 1)


def pmcb_reference(x_ncdhw, p, d_nc, slope=0.05):
    lrelu = lambda t: jnp.where(t >= 0, t, slope * t)
    y1 = lrelu(_ref_conv(x_ncdhw, p['w1'], p['b1'], (1, 1, 1)))
    d1, r1 = y1[:, :d_nc], y1[:, d_nc:]
    y2 = lrelu(_ref_conv(r1, p['w2'], p['b2'], (1, 0, 0)))
    d2, r2 = y2[:, :d_nc], y2[:, d_nc:]
    y3 = lrelu(_ref_conv(r2, p['w3'], p['b3'], (0, 1, 1)))
    d3, r3 = y3[:, :d_nc], y3[:, d_nc:]
    d4 = _ref_conv(r3, p['w4'], p['b4'], (0, 0, 0))
    cat = jnp.concatenate([d1, d2, d3, d4], axis=1)
    y = jnp.mean(cat, axis=(2, 3, 4), keepdims=True)
    z = jnp.maximum(_ref_conv(y, p['w_du1'], p['b_du1'], (0, 0, 0)), 0.0)
    s = jax.nn.sigmoid(_ref_conv(z, p['w_du2'], p['b_du2'], (0, 0, 0)))
    return _ref_conv(cat * s, p['w_c5'], p['b_c5'], (0, 0, 0)) + x_ncdhw


# ---------------------------------------------------------------------------
if __name__ == "__main__":
    key = jax.random.PRNGKey(0)
    pkey, xkey = jax.random.split(key)

    in_channels, d_rate = 64, 0.25
    n, dd, hh, ww = 2, 4, 8, 8                       # small spatial dims

    params, d_nc, r_nc = init_pmcb_params(pkey, in_channels, d_rate)
    x_ncdhw = jax.random.normal(xkey, (n, in_channels, dd, hh, ww), jnp.float32)
    x_ndhwc = jnp.transpose(x_ncdhw, (0, 2, 3, 4, 1))

    fwd = jax.jit(functools.partial(pmcb_forward, d_nc=d_nc))
    out_ndhwc = jax.block_until_ready(fwd(x_ndhwc, params))

    ref = pmcb_reference(x_ncdhw, params, d_nc)
    out_ncdhw = jnp.transpose(out_ndhwc, (0, 4, 1, 2, 3))
    err = float(jnp.max(jnp.abs(out_ncdhw - ref)))
    # Conv path runs bf16 operands with f32 MXU accumulation (incl. the fused
    # conv4 projection), so the bound is looser than a pure-f32 run.
    assert err < 3e-2, f"max abs error {err}"
    print("KERNEL_OK")
</pallas_src>

<mosaic_0001>
module attributes {stable_mosaic.version = 11 : i64} {
  func.func @_conv_plane_kernel(%arg0: i32, %arg1: i32, %arg2: memref<1x1x168x64xbf16, #tpu.memory_space<vmem>>, %arg3: memref<1x1x168x64xbf16, #tpu.memory_space<vmem>>, %arg4: memref<1x1x168x64xbf16, #tpu.memory_space<vmem>>, %arg5: memref<1728x64xbf16, #tpu.memory_space<vmem>>, %arg6: memref<1x64xf32, #tpu.memory_space<vmem>>, %arg7: memref<1x1x8x8x16xbf16, #tpu.memory_space<vmem>>, %arg8: memref<1x1x8x8x48xbf16, #tpu.memory_space<vmem>>, %arg9: memref<1x1x1x64xf32, #tpu.memory_space<vmem>>) attributes {dimension_semantics = [#tpu.dimension_semantics<parallel>, #tpu.dimension_semantics<parallel>], iteration_bounds = array<i64: 2, 4>, scalar_prefetch = 0 : i64, scratch_operands = 0 : i64, tpu.core_type = #tpu.core_type<tc>, window_params = [{transform_indices = @transform_0, window_bounds = array<i64: 1, 1, 168, 64>}, {transform_indices = @transform_1, window_bounds = array<i64: 1, 1, 168, 64>}, {transform_indices = @transform_2, window_bounds = array<i64: 1, 1, 168, 64>}, {pipeline_mode = #tpu.pipeline_mode<synchronous>, transform_indices = @transform_3, window_bounds = array<i64: 1728, 64>}, {pipeline_mode = #tpu.pipeline_mode<synchronous>, transform_indices = @transform_4, window_bounds = array<i64: 1, 64>}, {transform_indices = @transform_5, window_bounds = array<i64: 1, 1, 8, 8, 16>}, {transform_indices = @transform_6, window_bounds = array<i64: 1, 1, 8, 8, 48>}, {transform_indices = @transform_7, window_bounds = array<i64: 1, 1, 1, 64>}]} {
    %c0 = arith.constant 0 : index
    %c0_0 = arith.constant 0 : index
    %c0_1 = arith.constant 0 : index
    %c0_2 = arith.constant 0 : index
    %0 = vector.load %arg2[%c0, %c0_0, %c0_1, %c0_2] : memref<1x1x168x64xbf16, #tpu.memory_space<vmem>>, vector<1x1x168x64xbf16>
    %1 = vector.shape_cast %0 : vector<1x1x168x64xbf16> to vector<168x64xbf16>
    %2 = vector.extract_strided_slice %1 {offsets = [0, 0], sizes = [160, 64], strides = [1, 1]} : vector<168x64xbf16> to vector<160x64xbf16>
    %3 = vector.extract_strided_slice %2 {offsets = [0, 0], sizes = [128, 64], strides = [1, 1]} : vector<160x64xbf16> to vector<128x64xbf16>
    %4 = vector.extract_strided_slice %2 {offsets = [16, 0], sizes = [128, 64], strides = [1, 1]} : vector<160x64xbf16> to vector<128x64xbf16>
    %5 = vector.extract_strided_slice %2 {offsets = [32, 0], sizes = [128, 64], strides = [1, 1]} : vector<160x64xbf16> to vector<128x64xbf16>
    %6 = vector.extract_strided_slice %1 {offsets = [1, 0], sizes = [160, 64], strides = [1, 1]} : vector<168x64xbf16> to vector<160x64xbf16>
    %7 = vector.extract_strided_slice %6 {offsets = [0, 0], sizes = [128, 64], strides = [1, 1]} : vector<160x64xbf16> to vector<128x64xbf16>
    %8 = vector.extract_strided_slice %6 {offsets = [16, 0], sizes = [128, 64], strides = [1, 1]} : vector<160x64xbf16> to vector<128x64xbf16>
    %9 = vector.extract_strided_slice %6 {offsets = [32, 0], sizes = [128, 64], strides = [1, 1]} : vector<160x64xbf16> to vector<128x64xbf16>
    %10 = vector.extract_strided_slice %1 {offsets = [2, 0], sizes = [160, 64], strides = [1, 1]} : vector<168x64xbf16> to vector<160x64xbf16>
    %11 = vector.extract_strided_slice %10 {offsets = [0, 0], sizes = [128, 64], strides = [1, 1]} : vector<160x64xbf16> to vector<128x64xbf16>
    %12 = vector.extract_strided_slice %10 {offsets = [16, 0], sizes = [128, 64], strides = [1, 1]} : vector<160x64xbf16> to vector<128x64xbf16>
    %13 = vector.extract_strided_slice %10 {offsets = [32, 0], sizes = [128, 64], strides = [1, 1]} : vector<160x64xbf16> to vector<128x64xbf16>
    %c0_3 = arith.constant 0 : index
    %c0_4 = arith.constant 0 : index
    %c0_5 = arith.constant 0 : index
    %c0_6 = arith.constant 0 : index
    %14 = vector.load %arg3[%c0_3, %c0_4, %c0_5, %c0_6] : memref<1x1x168x64xbf16, #tpu.memory_space<vmem>>, vector<1x1x168x64xbf16>
    %15 = vector.shape_cast %14 : vector<1x1x168x64xbf16> to vector<168x64xbf16>
    %16 = vector.extract_strided_slice %15 {offsets = [0, 0], sizes = [160, 64], strides = [1, 1]} : vector<168x64xbf16> to vector<160x64xbf16>
    %17 = vector.extract_strided_slice %16 {offsets = [0, 0], sizes = [128, 64], strides = [1, 1]} : vector<160x64xbf16> to vector<128x64xbf16>
    %18 = vector.extract_strided_slice %16 {offsets = [16, 0], sizes = [128, 64], strides = [1, 1]} : vector<160x64xbf16> to vector<128x64xbf16>
    %19 = vector.extract_strided_slice %16 {offsets = [32, 0], sizes = [128, 64], strides = [1, 1]} : vector<160x64xbf16> to vector<128x64xbf16>
    %20 = vector.extract_strided_slice %15 {offsets = [1, 0], sizes = [160, 64], strides = [1, 1]} : vector<168x64xbf16> to vector<160x64xbf16>
    %21 = vector.extract_strided_slice %20 {offsets = [0, 0], sizes = [128, 64], strides = [1, 1]} : vector<160x64xbf16> to vector<128x64xbf16>
    %22 = vector.extract_strided_slice %20 {offsets = [16, 0], sizes = [128, 64], strides = [1, 1]} : vector<160x64xbf16> to vector<128x64xbf16>
    %23 = vector.extract_strided_slice %20 {offsets = [32, 0], sizes = [128, 64], strides = [1, 1]} : vector<160x64xbf16> to vector<128x64xbf16>
    %24 = vector.extract_strided_slice %15 {offsets = [2, 0], sizes = [160, 64], strides = [1, 1]} : vector<168x64xbf16> to vector<160x64xbf16>
    %25 = vector.extract_strided_slice %24 {offsets = [0, 0], sizes = [128, 64], strides = [1, 1]} : vector<160x64xbf16> to vector<128x64xbf16>
    %26 = vector.extract_strided_slice %24 {offsets = [16, 0], sizes = [128, 64], strides = [1, 1]} : vector<160x64xbf16> to vector<128x64xbf16>
    %27 = vector.extract_strided_slice %24 {offsets = [32, 0], sizes = [128, 64], strides = [1, 1]} : vector<160x64xbf16> to vector<128x64xbf16>
    %c0_7 = arith.constant 0 : index
    %c0_8 = arith.constant 0 : index
    %c0_9 = arith.constant 0 : index
    %c0_10 = arith.constant 0 : index
    %28 = vector.load %arg4[%c0_7, %c0_8, %c0_9, %c0_10] : memref<1x1x168x64xbf16, #tpu.memory_space<vmem>>, vector<1x1x168x64xbf16>
    %29 = vector.shape_cast %28 : vector<1x1x168x64xbf16> to vector<168x64xbf16>
    %30 = vector.extract_strided_slice %29 {offsets = [0, 0], sizes = [160, 64], strides = [1, 1]} : vector<168x64xbf16> to vector<160x64xbf16>
    %31 = vector.extract_strided_slice %30 {offsets = [0, 0], sizes = [128, 64], strides = [1, 1]} : vector<160x64xbf16> to vector<128x64xbf16>
    %32 = vector.extract_strided_slice %30 {offsets = [16, 0], sizes = [128, 64], strides = [1, 1]} : vector<160x64xbf16> to vector<128x64xbf16>
    %33 = vector.extract_strided_slice %30 {offsets = [32, 0], sizes = [128, 64], strides = [1, 1]} : vector<160x64xbf16> to vector<128x64xbf16>
    %34 = vector.extract_strided_slice %29 {offsets = [1, 0], sizes = [160, 64], strides = [1, 1]} : vector<168x64xbf16> to vector<160x64xbf16>
    %35 = vector.extract_strided_slice %34 {offsets = [0, 0], sizes = [128, 64], strides = [1, 1]} : vector<160x64xbf16> to vector<128x64xbf16>
    %36 = vector.extract_strided_slice %34 {offsets = [16, 0], sizes = [128, 64], strides = [1, 1]} : vector<160x64xbf16> to vector<128x64xbf16>
    %37 = vector.extract_strided_slice %34 {offsets = [32, 0], sizes = [128, 64], strides = [1, 1]} : vector<160x64xbf16> to vector<128x64xbf16>
    %38 = vector.extract_strided_slice %29 {offsets = [2, 0], sizes = [160, 64], strides = [1, 1]} : vector<168x64xbf16> to vector<160x64xbf16>
    %39 = vector.extract_strided_slice %38 {offsets = [0, 0], sizes = [128, 64], strides = [1, 1]} : vector<160x64xbf16> to vector<128x64xbf16>
    %40 = vector.extract_strided_slice %38 {offsets = [16, 0], sizes = [128, 64], strides = [1, 1]} : vector<160x64xbf16> to vector<128x64xbf16>
    %41 = vector.extract_strided_slice %38 {offsets = [32, 0], sizes = [128, 64], strides = [1, 1]} : vector<160x64xbf16> to vector<128x64xbf16>
    %42 = tpu.concatenate %3, %4, %5, %7, %8, %9, %11, %12, %13, %17, %18, %19, %21, %22, %23, %25 in 1 : vector<128x64xbf16>, vector<128x64xbf16>, vector<128x64xbf16>, vector<128x64xbf16>, vector<128x64xbf16>, vector<128x64xbf16>, vector<128x64xbf16>, vector<128x64xbf16>, vector<128x64xbf16>, vector<128x64xbf16>, vector<128x64xbf16>, vector<128x64xbf16>, vector<128x64xbf16>, vector<128x64xbf16>, vector<128x64xbf16>, vector<128x64xbf16> -> vector<128x1024xbf16>
    %43 = tpu.concatenate %26, %27, %31, %32, %33, %35, %36, %37, %39, %40, %41 in 1 : vector<128x64xbf16>, vector<128x64xbf16>, vector<128x64xbf16>, vector<128x64xbf16>, vector<128x64xbf16>, vector<128x64xbf16>, vector<128x64xbf16>, vector<128x64xbf16>, vector<128x64xbf16>, vector<128x64xbf16>, vector<128x64xbf16> -> vector<128x704xbf16>
    %44 = tpu.concatenate %42, %43 in 1 : vector<128x1024xbf16>, vector<128x704xbf16> -> vector<128x1728xbf16>
    %c0_11 = arith.constant 0 : index
    %c0_12 = arith.constant 0 : index
    %45 = vector.load %arg5[%c0_11, %c0_12] : memref<1728x64xbf16, #tpu.memory_space<vmem>>, vector<1728x64xbf16>
    %cst = arith.constant dense<0.000000e+00> : vector<128x64xf32>
    %46 = tpu.matmul %44, %45, %cst {dimension_numbers = #tpu.dot_dimension_numbers<[1], [0], [0], [1], [0, 0, 1, 1], [], []>} : vector<128x1728xbf16>, vector<1728x64xbf16>, vector<128x64xf32> -> vector<128x64xf32>
    %c0_13 = arith.constant 0 : index
    %c0_14 = arith.constant 0 : index
    %47 = vector.load %arg6[%c0_13, %c0_14] : memref<1x64xf32, #tpu.memory_space<vmem>>, vector<1x64xf32>
    %48 = vector.broadcast %47 : vector<1x64xf32> to vector<128x64xf32>
    %49 = arith.addf %46, %48 : vector<128x64xf32>
    %cst_15 = arith.constant 0.000000e+00 : f32
    %50 = vector.broadcast %cst_15 : f32 to vector<128x64xf32>
    %51 = arith.cmpf oge, %49, %50 : vector<128x64xf32>
    %cst_16 = arith.constant 5.000000e-02 : f32
    %52 = vector.broadcast %cst_16 : f32 to vector<128x64xf32>
    %53 = arith.mulf %52, %49 : vector<128x64xf32>
    %54 = arith.select %51, %49, %53 : vector<128x64xi1>, vector<128x64xf32>
    %55 = tpu.iota {dimensions = array<i32: 0>} : vector<128x1xi32>
    %c16_i32 = arith.constant 16 : i32
    %c0_i32 = arith.constant 0 : i32
    %56 = arith.cmpi eq, %c16_i32, %c0_i32 : i32
    %c1_i32 = arith.constant 1 : i32
    %57 = arith.select %56, %c1_i32, %c16_i32 : i32
    %58 = vector.broadcast %57 : i32 to vector<128x1xi32>
    %59 = arith.remsi %55, %58 : vector<128x1xi32>
    %c0_i32_17 = arith.constant 0 : i32
    %60 = vector.broadcast %c0_i32_17 : i32 to vector<128x1xi32>
    %61 = arith.cmpi ne, %59, %60 : vector<128x1xi32>
    %c0_i32_18 = arith.constant 0 : i32
    %62 = vector.broadcast %c0_i32_18 : i32 to vector<128x1xi32>
    %63 = arith.cmpi slt, %59, %62 : vector<128x1xi32>
    %c0_i32_19 = arith.constant 0 : i32
    %64 = arith.cmpi slt, %57, %c0_i32_19 : i32
    %65 = vector.broadcast %64 : i1 to vector<128x1xi1>
    %66 = vector.broadcast %65 : vector<128x1xi1> to vector<128x1xi1>
    %67 = arith.xori %63, %66 : vector<128x1xi1>
    %68 = arith.andi %67, %61 : vector<128x1xi1>
    %69 = vector.broadcast %57 : i32 to vector<128x1xi32>
    %70 = arith.addi %59, %69 : vector<128x1xi32>
    %71 = arith.select %68, %70, %59 : vector<128x1xi1>, vector<128x1xi32>
    %c8_i32 = arith.constant 8 : i32
    %72 = vector.broadcast %c8_i32 : i32 to vector<128x1xi32>
    %73 = arith.cmpi slt, %71, %72 : vector<128x1xi32>
    %74 = arith.extui %73 : vector<128x1xi1> to vector<128x1xi32>
    %75 = arith.sitofp %74 : vector<128x1xi32> to vector<128x1xf32>
    %76 = vector.broadcast %75 : vector<128x1xf32> to vector<128x64xf32>
    %77 = arith.mulf %54, %76 : vector<128x64xf32>
    %cst_20 = arith.constant dense<0.000000e+00> : vector<64xf32>
    %78 = vector.multi_reduction <add>, %77, %cst_20 [0] : vector<128x64xf32> to vector<64xf32>
    %79 = vector.shape_cast %78 : vector<64xf32> to vector<1x64xf32>
    %c0_21 = arith.constant 0 : index
    %c0_22 = arith.constant 0 : index
    %c0_23 = arith.constant 0 : index
    %c0_24 = arith.constant 0 : index
    %80 = vector.load %arg9[%c0_21, %c0_22, %c0_23, %c0_24] : memref<1x1x1x64xf32, #tpu.memory_space<vmem>>, vector<1x1x1x64xf32>
    %81 = vector.shape_cast %80 : vector<1x1x1x64xf32> to vector<1x64xf32>
    %82 = vector.shape_cast %79 : vector<1x64xf32> to vector<1x1x1x64xf32>
    tpu.vector_store %arg9[%c0_21, %c0_22, %c0_23, %c0_24], %82 {strides = array<i32>} : memref<1x1x1x64xf32, #tpu.memory_space<vmem>>, vector<1x1x1x64xf32>,
    %83 = vector.shape_cast %54 : vector<128x64xf32> to vector<8x16x64xf32>
    %84 = vector.extract_strided_slice %83 {offsets = [0, 0, 0], sizes = [8, 8, 64], strides = [1, 1, 1]} : vector<8x16x64xf32> to vector<8x8x64xf32>
    %85 = vector.extract_strided_slice %84 {offsets = [0, 0, 0], sizes = [8, 8, 16], strides = [1, 1, 1]} : vector<8x8x64xf32> to vector<8x8x16xf32>
    %86 = arith.truncf %85 : vector<8x8x16xf32> to vector<8x8x16xbf16>
    %c0_25 = arith.constant 0 : index
    %c0_26 = arith.constant 0 : index
    %c0_27 = arith.constant 0 : index
    %c0_28 = arith.constant 0 : index
    %c0_29 = arith.constant 0 : index
    %87 = vector.load %arg7[%c0_25, %c0_26, %c0_27, %c0_28, %c0_29] : memref<1x1x8x8x16xbf16, #tpu.memory_space<vmem>>, vector<1x1x8x8x16xbf16>
    %88 = vector.shape_cast %87 : vector<1x1x8x8x16xbf16> to vector<8x8x16xbf16>
    %89 = vector.shape_cast %86 : vector<8x8x16xbf16> to vector<1x1x8x8x16xbf16>
    tpu.vector_store %arg7[%c0_25, %c0_26, %c0_27, %c0_28, %c0_29], %89 {strides = array<i32>} : memref<1x1x8x8x16xbf16, #tpu.memory_space<vmem>>, vector<1x1x8x8x16xbf16>,
    %90 = vector.extract_strided_slice %84 {offsets = [0, 0, 16], sizes = [8, 8, 48], strides = [1, 1, 1]} : vector<8x8x64xf32> to vector<8x8x48xf32>
    %91 = arith.truncf %90 : vector<8x8x48xf32> to vector<8x8x48xbf16>
    %c0_30 = arith.constant 0 : index
    %c0_31 = arith.constant 0 : index
    %c0_32 = arith.constant 0 : index
    %c0_33 = arith.constant 0 : index
    %c0_34 = arith.constant 0 : index
    %92 = vector.load %arg8[%c0_30, %c0_31, %c0_32, %c0_33, %c0_34] : memref<1x1x8x8x48xbf16, #tpu.memory_space<vmem>>, vector<1x1x8x8x48xbf16>
    %93 = vector.shape_cast %92 : vector<1x1x8x8x48xbf16> to vector<8x8x48xbf16>
    %94 = vector.shape_cast %91 : vector<8x8x48xbf16> to vector<1x1x8x8x48xbf16>
    tpu.vector_store %arg8[%c0_30, %c0_31, %c0_32, %c0_33, %c0_34], %94 {strides = array<i32>} : memref<1x1x8x8x48xbf16, #tpu.memory_space<vmem>>, vector<1x1x8x8x48xbf16>,
    return
  }
  func.func @transform_0(%arg0: i32, %arg1: i32) -> (i32, i32, i32, i32) {
    %c0_i32 = arith.constant 0 : i32
    %0 = arith.addi %arg1, %c0_i32 : i32
    %c0_i32_0 = arith.constant 0 : i32
    %c0_i32_1 = arith.constant 0 : i32
    %c0_i32_2 = arith.constant 0 : i32
    return %arg0, %0, %c0_i32_0, %c0_i32_1 : i32, i32, i32, i32
  }
  func.func @transform_1(%arg0: i32, %arg1: i32) -> (i32, i32, i32, i32) {
    %c1_i32 = arith.constant 1 : i32
    %0 = arith.addi %arg1, %c1_i32 : i32
    %c0_i32 = arith.constant 0 : i32
    %c0_i32_0 = arith.constant 0 : i32
    %c0_i32_1 = arith.constant 0 : i32
    return %arg0, %0, %c0_i32, %c0_i32_0 : i32, i32, i32, i32
  }
  func.func @transform_2(%arg0: i32, %arg1: i32) -> (i32, i32, i32, i32) {
    %c2_i32 = arith.constant 2 : i32
    %0 = arith.addi %arg1, %c2_i32 : i32
    %c0_i32 = arith.constant 0 : i32
    %c0_i32_0 = arith.constant 0 : i32
    %c0_i32_1 = arith.constant 0 : i32
    return %arg0, %0, %c0_i32, %c0_i32_0 : i32, i32, i32, i32
  }
  func.func @transform_3(%arg0: i32, %arg1: i32) -> (i32, i32) {
    %c0_i32 = arith.constant 0 : i32
    %c0_i32_0 = arith.constant 0 : i32
    %c0_i32_1 = arith.constant 0 : i32
    return %c0_i32, %c0_i32_0 : i32, i32
  }
  func.func @transform_4(%arg0: i32, %arg1: i32) -> (i32, i32) {
    %c0_i32 = arith.constant 0 : i32
    %c0_i32_0 = arith.constant 0 : i32
    %c0_i32_1 = arith.constant 0 : i32
    return %c0_i32, %c0_i32_0 : i32, i32
  }
  func.func @transform_5(%arg0: i32, %arg1: i32) -> (i32, i32, i32, i32, i32) {
    %c0_i32 = arith.constant 0 : i32
    %c0_i32_0 = arith.constant 0 : i32
    %c0_i32_1 = arith.constant 0 : i32
    %c0_i32_2 = arith.constant 0 : i32
    return %arg0, %arg1, %c0_i32, %c0_i32_0, %c0_i32_1 : i32, i32, i32, i32, i32
  }
  func.func @transform_6(%arg0: i32, %arg1: i32) -> (i32, i32, i32, i32, i32) {
    %c0_i32 = arith.constant 0 : i32
    %c0_i32_0 = arith.constant 0 : i32
    %c0_i32_1 = arith.constant 0 : i32
    %c0_i32_2 = arith.constant 0 : i32
    return %arg0, %arg1, %c0_i32, %c0_i32_0, %c0_i32_1 : i32, i32, i32, i32, i32
  }
  func.func @transform_7(%arg0: i32, %arg1: i32) -> (i32, i32, i32, i32) {
    %c0_i32 = arith.constant 0 : i32
    %c0_i32_0 = arith.constant 0 : i32
    %c0_i32_1 = arith.constant 0 : i32
    return %arg0, %arg1, %c0_i32, %c0_i32_0 : i32, i32, i32, i32
  }
}

module attributes {stable_mosaic.version = 11 : i64} {
  func.func @_conv_plane_kernel(%arg0: i32, %arg1: i32, %arg2: memref<1x1x128x48xbf16, #tpu.memory_space<vmem>>, %arg3: memref<1x1x128x48xbf16, #tpu.memory_space<vmem>>, %arg4: memref<1x1x128x48xbf16, #tpu.memory_space<vmem>>, %arg5: memref<144x64xbf16, #tpu.memory_space<vmem>>, %arg6: memref<1x64xf32, #tpu.memory_space<vmem>>, %arg7: memref<1x1x8x8x16xbf16, #tpu.memory_space<vmem>>, %arg8: memref<1x1x8x8x48xbf16, #tpu.memory_space<vmem>>, %arg9: memref<1x1x1x64xf32, #tpu.memory_space<vmem>>) attributes {dimension_semantics = [#tpu.dimension_semantics<parallel>, #tpu.dimension_semantics<parallel>], iteration_bounds = array<i64: 2, 4>, scalar_prefetch = 0 : i64, scratch_operands = 0 : i64, tpu.core_type = #tpu.core_type<tc>, window_params = [{transform_indices = @transform_0, window_bounds = array<i64: 1, 1, 128, 48>}, {transform_indices = @transform_1, window_bounds = array<i64: 1, 1, 128, 48>}, {transform_indices = @transform_2, window_bounds = array<i64: 1, 1, 128, 48>}, {pipeline_mode = #tpu.pipeline_mode<synchronous>, transform_indices = @transform_3, window_bounds = array<i64: 144, 64>}, {pipeline_mode = #tpu.pipeline_mode<synchronous>, transform_indices = @transform_4, window_bounds = array<i64: 1, 64>}, {transform_indices = @transform_5, window_bounds = array<i64: 1, 1, 8, 8, 16>}, {transform_indices = @transform_6, window_bounds = array<i64: 1, 1, 8, 8, 48>}, {transform_indices = @transform_7, window_bounds = array<i64: 1, 1, 1, 64>}]} {
    %c0 = arith.constant 0 : index
    %c0_0 = arith.constant 0 : index
    %c0_1 = arith.constant 0 : index
    %c0_2 = arith.constant 0 : index
    %0 = vector.load %arg2[%c0, %c0_0, %c0_1, %c0_2] : memref<1x1x128x48xbf16, #tpu.memory_space<vmem>>, vector<1x1x128x48xbf16>
    %1 = vector.shape_cast %0 : vector<1x1x128x48xbf16> to vector<128x48xbf16>
    %c0_3 = arith.constant 0 : index
    %c0_4 = arith.constant 0 : index
    %c0_5 = arith.constant 0 : index
    %c0_6 = arith.constant 0 : index
    %2 = vector.load %arg3[%c0_3, %c0_4, %c0_5, %c0_6] : memref<1x1x128x48xbf16, #tpu.memory_space<vmem>>, vector<1x1x128x48xbf16>
    %3 = vector.shape_cast %2 : vector<1x1x128x48xbf16> to vector<128x48xbf16>
    %c0_7 = arith.constant 0 : index
    %c0_8 = arith.constant 0 : index
    %c0_9 = arith.constant 0 : index
    %c0_10 = arith.constant 0 : index
    %4 = vector.load %arg4[%c0_7, %c0_8, %c0_9, %c0_10] : memref<1x1x128x48xbf16, #tpu.memory_space<vmem>>, vector<1x1x128x48xbf16>
    %5 = vector.shape_cast %4 : vector<1x1x128x48xbf16> to vector<128x48xbf16>
    %6 = tpu.concatenate %1, %3, %5 in 1 : vector<128x48xbf16>, vector<128x48xbf16>, vector<128x48xbf16> -> vector<128x144xbf16>
    %c0_11 = arith.constant 0 : index
    %c0_12 = arith.constant 0 : index
    %7 = vector.load %arg5[%c0_11, %c0_12] : memref<144x64xbf16, #tpu.memory_space<vmem>>, vector<144x64xbf16>
    %cst = arith.constant dense<0.000000e+00> : vector<128x64xf32>
    %8 = tpu.matmul %6, %7, %cst {dimension_numbers = #tpu.dot_dimension_numbers<[1], [0], [0], [1], [0, 0, 1, 1], [], []>} : vector<128x144xbf16>, vector<144x64xbf16>, vector<128x64xf32> -> vector<128x64xf32>
    %c0_13 = arith.constant 0 : index
    %c0_14 = arith.constant 0 : index
    %9 = vector.load %arg6[%c0_13, %c0_14] : memref<1x64xf32, #tpu.memory_space<vmem>>, vector<1x64xf32>
    %10 = vector.broadcast %9 : vector<1x64xf32> to vector<128x64xf32>
    %11 = arith.addf %8, %10 : vector<128x64xf32>
    %cst_15 = arith.constant 0.000000e+00 : f32
    %12 = vector.broadcast %cst_15 : f32 to vector<128x64xf32>
    %13 = arith.cmpf oge, %11, %12 : vector<128x64xf32>
    %cst_16 = arith.constant 5.000000e-02 : f32
    %14 = vector.broadcast %cst_16 : f32 to vector<128x64xf32>
    %15 = arith.mulf %14, %11 : vector<128x64xf32>
    %16 = arith.select %13, %11, %15 : vector<128x64xi1>, vector<128x64xf32>
    %17 = tpu.iota {dimensions = array<i32: 0>} : vector<128x1xi32>
    %c16_i32 = arith.constant 16 : i32
    %c0_i32 = arith.constant 0 : i32
    %18 = arith.cmpi eq, %c16_i32, %c0_i32 : i32
    %c1_i32 = arith.constant 1 : i32
    %19 = arith.select %18, %c1_i32, %c16_i32 : i32
    %20 = vector.broadcast %19 : i32 to vector<128x1xi32>
    %21 = arith.remsi %17, %20 : vector<128x1xi32>
    %c0_i32_17 = arith.constant 0 : i32
    %22 = vector.broadcast %c0_i32_17 : i32 to vector<128x1xi32>
    %23 = arith.cmpi ne, %21, %22 : vector<128x1xi32>
    %c0_i32_18 = arith.constant 0 : i32
    %24 = vector.broadcast %c0_i32_18 : i32 to vector<128x1xi32>
    %25 = arith.cmpi slt, %21, %24 : vector<128x1xi32>
    %c0_i32_19 = arith.constant 0 : i32
    %26 = arith.cmpi slt, %19, %c0_i32_19 : i32
    %27 = vector.broadcast %26 : i1 to vector<128x1xi1>
    %28 = vector.broadcast %27 : vector<128x1xi1> to vector<128x1xi1>
    %29 = arith.xori %25, %28 : vector<128x1xi1>
    %30 = arith.andi %29, %23 : vector<128x1xi1>
    %31 = vector.broadcast %19 : i32 to vector<128x1xi32>
    %32 = arith.addi %21, %31 : vector<128x1xi32>
    %33 = arith.select %30, %32, %21 : vector<128x1xi1>, vector<128x1xi32>
    %c8_i32 = arith.constant 8 : i32
    %34 = vector.broadcast %c8_i32 : i32 to vector<128x1xi32>
    %35 = arith.cmpi slt, %33, %34 : vector<128x1xi32>
    %36 = arith.extui %35 : vector<128x1xi1> to vector<128x1xi32>
    %37 = arith.sitofp %36 : vector<128x1xi32> to vector<128x1xf32>
    %38 = vector.broadcast %37 : vector<128x1xf32> to vector<128x64xf32>
    %39 = arith.mulf %16, %38 : vector<128x64xf32>
    %cst_20 = arith.constant dense<0.000000e+00> : vector<64xf32>
    %40 = vector.multi_reduction <add>, %39, %cst_20 [0] : vector<128x64xf32> to vector<64xf32>
    %41 = vector.shape_cast %40 : vector<64xf32> to vector<1x64xf32>
    %c0_21 = arith.constant 0 : index
    %c0_22 = arith.constant 0 : index
    %c0_23 = arith.constant 0 : index
    %c0_24 = arith.constant 0 : index
    %42 = vector.load %arg9[%c0_21, %c0_22, %c0_23, %c0_24] : memref<1x1x1x64xf32, #tpu.memory_space<vmem>>, vector<1x1x1x64xf32>
    %43 = vector.shape_cast %42 : vector<1x1x1x64xf32> to vector<1x64xf32>
    %44 = vector.shape_cast %41 : vector<1x64xf32> to vector<1x1x1x64xf32>
    tpu.vector_store %arg9[%c0_21, %c0_22, %c0_23, %c0_24], %44 {strides = array<i32>} : memref<1x1x1x64xf32, #tpu.memory_space<vmem>>, vector<1x1x1x64xf32>,
    %45 = vector.shape_cast %16 : vector<128x64xf32> to vector<8x16x64xf32>
    %46 = vector.extract_strided_slice %45 {offsets = [0, 0, 0], sizes = [8, 8, 64], strides = [1, 1, 1]} : vector<8x16x64xf32> to vector<8x8x64xf32>
    %47 = vector.extract_strided_slice %46 {offsets = [0, 0, 0], sizes = [8, 8, 16], strides = [1, 1, 1]} : vector<8x8x64xf32> to vector<8x8x16xf32>
    %48 = arith.truncf %47 : vector<8x8x16xf32> to vector<8x8x16xbf16>
    %c0_25 = arith.constant 0 : index
    %c0_26 = arith.constant 0 : index
    %c0_27 = arith.constant 0 : index
    %c0_28 = arith.constant 0 : index
    %c0_29 = arith.constant 0 : index
    %49 = vector.load %arg7[%c0_25, %c0_26, %c0_27, %c0_28, %c0_29] : memref<1x1x8x8x16xbf16, #tpu.memory_space<vmem>>, vector<1x1x8x8x16xbf16>
    %50 = vector.shape_cast %49 : vector<1x1x8x8x16xbf16> to vector<8x8x16xbf16>
    %51 = vector.shape_cast %48 : vector<8x8x16xbf16> to vector<1x1x8x8x16xbf16>
    tpu.vector_store %arg7[%c0_25, %c0_26, %c0_27, %c0_28, %c0_29], %51 {strides = array<i32>} : memref<1x1x8x8x16xbf16, #tpu.memory_space<vmem>>, vector<1x1x8x8x16xbf16>,
    %52 = vector.extract_strided_slice %46 {offsets = [0, 0, 16], sizes = [8, 8, 48], strides = [1, 1, 1]} : vector<8x8x64xf32> to vector<8x8x48xf32>
    %53 = arith.truncf %52 : vector<8x8x48xf32> to vector<8x8x48xbf16>
    %c0_30 = arith.constant 0 : index
    %c0_31 = arith.constant 0 : index
    %c0_32 = arith.constant 0 : index
    %c0_33 = arith.constant 0 : index
    %c0_34 = arith.constant 0 : index
    %54 = vector.load %arg8[%c0_30, %c0_31, %c0_32, %c0_33, %c0_34] : memref<1x1x8x8x48xbf16, #tpu.memory_space<vmem>>, vector<1x1x8x8x48xbf16>
    %55 = vector.shape_cast %54 : vector<1x1x8x8x48xbf16> to vector<8x8x48xbf16>
    %56 = vector.shape_cast %53 : vector<8x8x48xbf16> to vector<1x1x8x8x48xbf16>
    tpu.vector_store %arg8[%c0_30, %c0_31, %c0_32, %c0_33, %c0_34], %56 {strides = array<i32>} : memref<1x1x8x8x48xbf16, #tpu.memory_space<vmem>>, vector<1x1x8x8x48xbf16>,
    return
  }
  func.func @transform_0(%arg0: i32, %arg1: i32) -> (i32, i32, i32, i32) {
    %c0_i32 = arith.constant 0 : i32
    %0 = arith.addi %arg1, %c0_i32 : i32
    %c0_i32_0 = arith.constant 0 : i32
    %c0_i32_1 = arith.constant 0 : i32
    %c0_i32_2 = arith.constant 0 : i32
    return %arg0, %0, %c0_i32_0, %c0_i32_1 : i32, i32, i32, i32
  }
  func.func @transform_1(%arg0: i32, %arg1: i32) -> (i32, i32, i32, i32) {
    %c1_i32 = arith.constant 1 : i32
    %0 = arith.addi %arg1, %c1_i32 : i32
    %c0_i32 = arith.constant 0 : i32
    %c0_i32_0 = arith.constant 0 : i32
    %c0_i32_1 = arith.constant 0 : i32
    return %arg0, %0, %c0_i32, %c0_i32_0 : i32, i32, i32, i32
  }
  func.func @transform_2(%arg0: i32, %arg1: i32) -> (i32, i32, i32, i32) {
    %c2_i32 = arith.constant 2 : i32
    %0 = arith.addi %arg1, %c2_i32 : i32
    %c0_i32 = arith.constant 0 : i32
    %c0_i32_0 = arith.constant 0 : i32
    %c0_i32_1 = arith.constant 0 : i32
    return %arg0, %0, %c0_i32, %c0_i32_0 : i32, i32, i32, i32
  }
  func.func @transform_3(%arg0: i32, %arg1: i32) -> (i32, i32) {
    %c0_i32 = arith.constant 0 : i32
    %c0_i32_0 = arith.constant 0 : i32
    %c0_i32_1 = arith.constant 0 : i32
    return %c0_i32, %c0_i32_0 : i32, i32
  }
  func.func @transform_4(%arg0: i32, %arg1: i32) -> (i32, i32) {
    %c0_i32 = arith.constant 0 : i32
    %c0_i32_0 = arith.constant 0 : i32
    %c0_i32_1 = arith.constant 0 : i32
    return %c0_i32, %c0_i32_0 : i32, i32
  }
  func.func @transform_5(%arg0: i32, %arg1: i32) -> (i32, i32, i32, i32, i32) {
    %c0_i32 = arith.constant 0 : i32
    %c0_i32_0 = arith.constant 0 : i32
    %c0_i32_1 = arith.constant 0 : i32
    %c0_i32_2 = arith.constant 0 : i32
    return %arg0, %arg1, %c0_i32, %c0_i32_0, %c0_i32_1 : i32, i32, i32, i32, i32
  }
  func.func @transform_6(%arg0: i32, %arg1: i32) -> (i32, i32, i32, i32, i32) {
    %c0_i32 = arith.constant 0 : i32
    %c0_i32_0 = arith.constant 0 : i32
    %c0_i32_1 = arith.constant 0 : i32
    %c0_i32_2 = arith.constant 0 : i32
    return %arg0, %arg1, %c0_i32, %c0_i32_0, %c0_i32_1 : i32, i32, i32, i32, i32
  }
  func.func @transform_7(%arg0: i32, %arg1: i32) -> (i32, i32, i32, i32) {
    %c0_i32 = arith.constant 0 : i32
    %c0_i32_0 = arith.constant 0 : i32
    %c0_i32_1 = arith.constant 0 : i32
    return %arg0, %arg1, %c0_i32, %c0_i32_0 : i32, i32, i32, i32
  }
}

module attributes {stable_mosaic.version = 11 : i64} {
  func.func @_conv_plane_kernel(%arg0: i32, %arg1: i32, %arg2: memref<1x1x168x48xbf16, #tpu.memory_space<vmem>>, %arg3: memref<432x64xbf16, #tpu.memory_space<vmem>>, %arg4: memref<1x64xf32, #tpu.memory_space<vmem>>, %arg5: memref<48x16xbf16, #tpu.memory_space<vmem>>, %arg6: memref<1x16xf32, #tpu.memory_space<vmem>>, %arg7: memref<1x1x8x8x32xbf16, #tpu.memory_space<vmem>>, %arg8: memref<1x1x1x32xf32, #tpu.memory_space<vmem>>) attributes {dimension_semantics = [#tpu.dimension_semantics<parallel>, #tpu.dimension_semantics<parallel>], iteration_bounds = array<i64: 2, 4>, scalar_prefetch = 0 : i64, scratch_operands = 0 : i64, tpu.core_type = #tpu.core_type<tc>, window_params = [{transform_indices = @transform_0, window_bounds = array<i64: 1, 1, 168, 48>}, {pipeline_mode = #tpu.pipeline_mode<synchronous>, transform_indices = @transform_1, window_bounds = array<i64: 432, 64>}, {pipeline_mode = #tpu.pipeline_mode<synchronous>, transform_indices = @transform_2, window_bounds = array<i64: 1, 64>}, {pipeline_mode = #tpu.pipeline_mode<synchronous>, transform_indices = @transform_3, window_bounds = array<i64: 48, 16>}, {pipeline_mode = #tpu.pipeline_mode<synchronous>, transform_indices = @transform_4, window_bounds = array<i64: 1, 16>}, {transform_indices = @transform_5, window_bounds = array<i64: 1, 1, 8, 8, 32>}, {transform_indices = @transform_6, window_bounds = array<i64: 1, 1, 1, 32>}]} {
    %c0 = arith.constant 0 : index
    %c0_0 = arith.constant 0 : index
    %c0_1 = arith.constant 0 : index
    %c0_2 = arith.constant 0 : index
    %0 = vector.load %arg2[%c0, %c0_0, %c0_1, %c0_2] : memref<1x1x168x48xbf16, #tpu.memory_space<vmem>>, vector<1x1x168x48xbf16>
    %1 = vector.shape_cast %0 : vector<1x1x168x48xbf16> to vector<168x48xbf16>
    %2 = vector.extract_strided_slice %1 {offsets = [0, 0], sizes = [160, 48], strides = [1, 1]} : vector<168x48xbf16> to vector<160x48xbf16>
    %3 = vector.extract_strided_slice %2 {offsets = [0, 0], sizes = [128, 48], strides = [1, 1]} : vector<160x48xbf16> to vector<128x48xbf16>
    %4 = vector.extract_strided_slice %2 {offsets = [16, 0], sizes = [128, 48], strides = [1, 1]} : vector<160x48xbf16> to vector<128x48xbf16>
    %5 = vector.extract_strided_slice %2 {offsets = [32, 0], sizes = [128, 48], strides = [1, 1]} : vector<160x48xbf16> to vector<128x48xbf16>
    %6 = vector.extract_strided_slice %1 {offsets = [1, 0], sizes = [160, 48], strides = [1, 1]} : vector<168x48xbf16> to vector<160x48xbf16>
    %7 = vector.extract_strided_slice %6 {offsets = [0, 0], sizes = [128, 48], strides = [1, 1]} : vector<160x48xbf16> to vector<128x48xbf16>
    %8 = vector.extract_strided_slice %6 {offsets = [16, 0], sizes = [128, 48], strides = [1, 1]} : vector<160x48xbf16> to vector<128x48xbf16>
    %9 = vector.extract_strided_slice %6 {offsets = [32, 0], sizes = [128, 48], strides = [1, 1]} : vector<160x48xbf16> to vector<128x48xbf16>
    %10 = vector.extract_strided_slice %1 {offsets = [2, 0], sizes = [160, 48], strides = [1, 1]} : vector<168x48xbf16> to vector<160x48xbf16>
    %11 = vector.extract_strided_slice %10 {offsets = [0, 0], sizes = [128, 48], strides = [1, 1]} : vector<160x48xbf16> to vector<128x48xbf16>
    %12 = vector.extract_strided_slice %10 {offsets = [16, 0], sizes = [128, 48], strides = [1, 1]} : vector<160x48xbf16> to vector<128x48xbf16>
    %13 = vector.extract_strided_slice %10 {offsets = [32, 0], sizes = [128, 48], strides = [1, 1]} : vector<160x48xbf16> to vector<128x48xbf16>
    %14 = tpu.concatenate %3, %4, %5, %7, %8, %9, %11, %12, %13 in 1 : vector<128x48xbf16>, vector<128x48xbf16>, vector<128x48xbf16>, vector<128x48xbf16>, vector<128x48xbf16>, vector<128x48xbf16>, vector<128x48xbf16>, vector<128x48xbf16>, vector<128x48xbf16> -> vector<128x432xbf16>
    %c0_3 = arith.constant 0 : index
    %c0_4 = arith.constant 0 : index
    %15 = vector.load %arg3[%c0_3, %c0_4] : memref<432x64xbf16, #tpu.memory_space<vmem>>, vector<432x64xbf16>
    %cst = arith.constant dense<0.000000e+00> : vector<128x64xf32>
    %16 = tpu.matmul %14, %15, %cst {dimension_numbers = #tpu.dot_dimension_numbers<[1], [0], [0], [1], [0, 0, 1, 1], [], []>} : vector<128x432xbf16>, vector<432x64xbf16>, vector<128x64xf32> -> vector<128x64xf32>
    %c0_5 = arith.constant 0 : index
    %c0_6 = arith.constant 0 : index
    %17 = vector.load %arg4[%c0_5, %c0_6] : memref<1x64xf32, #tpu.memory_space<vmem>>, vector<1x64xf32>
    %18 = vector.broadcast %17 : vector<1x64xf32> to vector<128x64xf32>
    %19 = arith.addf %16, %18 : vector<128x64xf32>
    %cst_7 = arith.constant 0.000000e+00 : f32
    %20 = vector.broadcast %cst_7 : f32 to vector<128x64xf32>
    %21 = arith.cmpf oge, %19, %20 : vector<128x64xf32>
    %cst_8 = arith.constant 5.000000e-02 : f32
    %22 = vector.broadcast %cst_8 : f32 to vector<128x64xf32>
    %23 = arith.mulf %22, %19 : vector<128x64xf32>
    %24 = arith.select %21, %19, %23 : vector<128x64xi1>, vector<128x64xf32>
    %25 = vector.extract_strided_slice %24 {offsets = [0, 16], sizes = [128, 48], strides = [1, 1]} : vector<128x64xf32> to vector<128x48xf32>
    %26 = arith.truncf %25 : vector<128x48xf32> to vector<128x48xbf16>
    %c0_9 = arith.constant 0 : index
    %c0_10 = arith.constant 0 : index
    %27 = vector.load %arg5[%c0_9, %c0_10] : memref<48x16xbf16, #tpu.memory_space<vmem>>, vector<48x16xbf16>
    %cst_11 = arith.constant dense<0.000000e+00> : vector<128x16xf32>
    %28 = tpu.matmul %26, %27, %cst_11 {dimension_numbers = #tpu.dot_dimension_numbers<[1], [0], [0], [1], [0, 0, 1, 1], [], []>} : vector<128x48xbf16>, vector<48x16xbf16>, vector<128x16xf32> -> vector<128x16xf32>
    %c0_12 = arith.constant 0 : index
    %c0_13 = arith.constant 0 : index
    %29 = vector.load %arg6[%c0_12, %c0_13] : memref<1x16xf32, #tpu.memory_space<vmem>>, vector<1x16xf32>
    %30 = vector.broadcast %29 : vector<1x16xf32> to vector<128x16xf32>
    %31 = arith.addf %28, %30 : vector<128x16xf32>
    %32 = vector.extract_strided_slice %24 {offsets = [0, 0], sizes = [128, 16], strides = [1, 1]} : vector<128x64xf32> to vector<128x16xf32>
    %33 = tpu.concatenate %32, %31 in 1 : vector<128x16xf32>, vector<128x16xf32> -> vector<128x32xf32>
    %34 = tpu.iota {dimensions = array<i32: 0>} : vector<128x1xi32>
    %c16_i32 = arith.constant 16 : i32
    %c0_i32 = arith.constant 0 : i32
    %35 = arith.cmpi eq, %c16_i32, %c0_i32 : i32
    %c1_i32 = arith.constant 1 : i32
    %36 = arith.select %35, %c1_i32, %c16_i32 : i32
    %37 = vector.broadcast %36 : i32 to vector<128x1xi32>
    %38 = arith.remsi %34, %37 : vector<128x1xi32>
    %c0_i32_14 = arith.constant 0 : i32
    %39 = vector.broadcast %c0_i32_14 : i32 to vector<128x1xi32>
    %40 = arith.cmpi ne, %38, %39 : vector<128x1xi32>
    %c0_i32_15 = arith.constant 0 : i32
    %41 = vector.broadcast %c0_i32_15 : i32 to vector<128x1xi32>
    %42 = arith.cmpi slt, %38, %41 : vector<128x1xi32>
    %c0_i32_16 = arith.constant 0 : i32
    %43 = arith.cmpi slt, %36, %c0_i32_16 : i32
    %44 = vector.broadcast %43 : i1 to vector<128x1xi1>
    %45 = vector.broadcast %44 : vector<128x1xi1> to vector<128x1xi1>
    %46 = arith.xori %42, %45 : vector<128x1xi1>
    %47 = arith.andi %46, %40 : vector<128x1xi1>
    %48 = vector.broadcast %36 : i32 to vector<128x1xi32>
    %49 = arith.addi %38, %48 : vector<128x1xi32>
    %50 = arith.select %47, %49, %38 : vector<128x1xi1>, vector<128x1xi32>
    %c8_i32 = arith.constant 8 : i32
    %51 = vector.broadcast %c8_i32 : i32 to vector<128x1xi32>
    %52 = arith.cmpi slt, %50, %51 : vector<128x1xi32>
    %53 = arith.extui %52 : vector<128x1xi1> to vector<128x1xi32>
    %54 = arith.sitofp %53 : vector<128x1xi32> to vector<128x1xf32>
    %55 = vector.broadcast %54 : vector<128x1xf32> to vector<128x32xf32>
    %56 = arith.mulf %33, %55 : vector<128x32xf32>
    %cst_17 = arith.constant dense<0.000000e+00> : vector<32xf32>
    %57 = vector.multi_reduction <add>, %56, %cst_17 [0] : vector<128x32xf32> to vector<32xf32>
    %58 = vector.shape_cast %57 : vector<32xf32> to vector<1x32xf32>
    %c0_18 = arith.constant 0 : index
    %c0_19 = arith.constant 0 : index
    %c0_20 = arith.constant 0 : index
    %c0_21 = arith.constant 0 : index
    %59 = vector.load %arg8[%c0_18, %c0_19, %c0_20, %c0_21] : memref<1x1x1x32xf32, #tpu.memory_space<vmem>>, vector<1x1x1x32xf32>
    %60 = vector.shape_cast %59 : vector<1x1x1x32xf32> to vector<1x32xf32>
    %61 = vector.shape_cast %58 : vector<1x32xf32> to vector<1x1x1x32xf32>
    tpu.vector_store %arg8[%c0_18, %c0_19, %c0_20, %c0_21], %61 {strides = array<i32>} : memref<1x1x1x32xf32, #tpu.memory_space<vmem>>, vector<1x1x1x32xf32>,
    %62 = vector.shape_cast %33 : vector<128x32xf32> to vector<8x16x32xf32>
    %63 = vector.extract_strided_slice %62 {offsets = [0, 0, 0], sizes = [8, 8, 32], strides = [1, 1, 1]} : vector<8x16x32xf32> to vector<8x8x32xf32>
    %64 = arith.truncf %63 : vector<8x8x32xf32> to vector<8x8x32xbf16>
    %c0_22 = arith.constant 0 : index
    %c0_23 = arith.constant 0 : index
    %c0_24 = arith.constant 0 : index
    %c0_25 = arith.constant 0 : index
    %c0_26 = arith.constant 0 : index
    %65 = vector.load %arg7[%c0_22, %c0_23, %c0_24, %c0_25, %c0_26] : memref<1x1x8x8x32xbf16, #tpu.memory_space<vmem>>, vector<1x1x8x8x32xbf16>
    %66 = vector.shape_cast %65 : vector<1x1x8x8x32xbf16> to vector<8x8x32xbf16>
    %67 = vector.shape_cast %64 : vector<8x8x32xbf16> to vector<1x1x8x8x32xbf16>
    tpu.vector_store %arg7[%c0_22, %c0_23, %c0_24, %c0_25, %c0_26], %67 {strides = array<i32>} : memref<1x1x8x8x32xbf16, #tpu.memory_space<vmem>>, vector<1x1x8x8x32xbf16>,
    return
  }
  func.func @transform_0(%arg0: i32, %arg1: i32) -> (i32, i32, i32, i32) {
    %c0_i32 = arith.constant 0 : i32
    %0 = arith.addi %arg1, %c0_i32 : i32
    %c0_i32_0 = arith.constant 0 : i32
    %c0_i32_1 = arith.constant 0 : i32
    %c0_i32_2 = arith.constant 0 : i32
    return %arg0, %0, %c0_i32_0, %c0_i32_1 : i32, i32, i32, i32
  }
  func.func @transform_1(%arg0: i32, %arg1: i32) -> (i32, i32) {
    %c0_i32 = arith.constant 0 : i32
    %c0_i32_0 = arith.constant 0 : i32
    %c0_i32_1 = arith.constant 0 : i32
    return %c0_i32, %c0_i32_0 : i32, i32
  }
  func.func @transform_2(%arg0: i32, %arg1: i32) -> (i32, i32) {
    %c0_i32 = arith.constant 0 : i32
    %c0_i32_0 = arith.constant 0 : i32
    %c0_i32_1 = arith.constant 0 : i32
    return %c0_i32, %c0_i32_0 : i32, i32
  }
  func.func @transform_3(%arg0: i32, %arg1: i32) -> (i32, i32) {
    %c0_i32 = arith.constant 0 : i32
    %c0_i32_0 = arith.constant 0 : i32
    %c0_i32_1 = arith.constant 0 : i32
    return %c0_i32, %c0_i32_0 : i32, i32
  }
  func.func @transform_4(%arg0: i32, %arg1: i32) -> (i32, i32) {
    %c0_i32 = arith.constant 0 : i32
    %c0_i32_0 = arith.constant 0 : i32
    %c0_i32_1 = arith.constant 0 : i32
    return %c0_i32, %c0_i32_0 : i32, i32
  }
  func.func @transform_5(%arg0: i32, %arg1: i32) -> (i32, i32, i32, i32, i32) {
    %c0_i32 = arith.constant 0 : i32
    %c0_i32_0 = arith.constant 0 : i32
    %c0_i32_1 = arith.constant 0 : i32
    %c0_i32_2 = arith.constant 0 : i32
    return %arg0, %arg1, %c0_i32, %c0_i32_0, %c0_i32_1 : i32, i32, i32, i32, i32
  }
  func.func @transform_6(%arg0: i32, %arg1: i32) -> (i32, i32, i32, i32) {
    %c0_i32 = arith.constant 0 : i32
    %c0_i32_0 = arith.constant 0 : i32
    %c0_i32_1 = arith.constant 0 : i32
    return %arg0, %arg1, %c0_i32, %c0_i32_0 : i32, i32, i32, i32
  }
}

module attributes {stable_mosaic.version = 11 : i64} {
  func.func @_ca_apply_kernel(%arg0: i32, %arg1: i32, %arg2: memref<1x256x16xbf16, #tpu.memory_space<vmem>>, %arg3: memref<1x256x16xbf16, #tpu.memory_space<vmem>>, %arg4: memref<1x256x32xbf16, #tpu.memory_space<vmem>>, %arg5: memref<1x256x64xf32, #tpu.memory_space<vmem>>, %arg6: memref<1x64x64xf32, #tpu.memory_space<vmem>>, %arg7: memref<1x64xf32, #tpu.memory_space<vmem>>, %arg8: memref<1x256x64xf32, #tpu.memory_space<vmem>>) attributes {dimension_semantics = [#tpu.dimension_semantics<parallel>, #tpu.dimension_semantics<parallel>], iteration_bounds = array<i64: 2, 1>, scalar_prefetch = 0 : i64, scratch_operands = 0 : i64, tpu.core_type = #tpu.core_type<tc>, window_params = [{transform_indices = @transform_0, window_bounds = array<i64: 1, 256, 16>}, {transform_indices = @transform_1, window_bounds = array<i64: 1, 256, 16>}, {transform_indices = @transform_2, window_bounds = array<i64: 1, 256, 32>}, {transform_indices = @transform_3, window_bounds = array<i64: 1, 256, 64>}, {transform_indices = @transform_4, window_bounds = array<i64: 1, 64, 64>}, {pipeline_mode = #tpu.pipeline_mode<synchronous>, transform_indices = @transform_5, window_bounds = array<i64: 1, 64>}, {transform_indices = @transform_6, window_bounds = array<i64: 1, 256, 64>}]} {
    %c0 = arith.constant 0 : index
    %c0_0 = arith.constant 0 : index
    %c0_1 = arith.constant 0 : index
    %0 = vector.load %arg6[%c0, %c0_0, %c0_1] : memref<1x64x64xf32, #tpu.memory_space<vmem>>, vector<1x64x64xf32>
    %1 = vector.shape_cast %0 : vector<1x64x64xf32> to vector<64x64xf32>
    %c0_2 = arith.constant 0 : index
    %c0_3 = arith.constant 0 : index
    %c0_4 = arith.constant 0 : index
    %2 = vector.load %arg2[%c0_2, %c0_3, %c0_4] : memref<1x256x16xbf16, #tpu.memory_space<vmem>>, vector<1x256x16xbf16>
    %3 = vector.shape_cast %2 : vector<1x256x16xbf16> to vector<256x16xbf16>
    %4 = arith.extf %3 : vector<256x16xbf16> to vector<256x16xf32>
    %5 = vector.extract_strided_slice %1 {offsets = [0, 0], sizes = [16, 64], strides = [1, 1]} : vector<64x64xf32> to vector<16x64xf32>
    %cst = arith.constant dense<0.000000e+00> : vector<256x64xf32>
    %6 = tpu.matmul %4, %5, %cst {dimension_numbers = #tpu.dot_dimension_numbers<[1], [0], [0], [1], [0, 0, 1, 1], [], []>} : vector<256x16xf32>, vector<16x64xf32>, vector<256x64xf32> -> vector<256x64xf32>
    %c0_5 = arith.constant 0 : index
    %c0_6 = arith.constant 0 : index
    %c0_7 = arith.constant 0 : index
    %7 = vector.load %arg3[%c0_5, %c0_6, %c0_7] : memref<1x256x16xbf16, #tpu.memory_space<vmem>>, vector<1x256x16xbf16>
    %8 = vector.shape_cast %7 : vector<1x256x16xbf16> to vector<256x16xbf16>
    %9 = arith.extf %8 : vector<256x16xbf16> to vector<256x16xf32>
    %10 = vector.extract_strided_slice %1 {offsets = [16, 0], sizes = [16, 64], strides = [1, 1]} : vector<64x64xf32> to vector<16x64xf32>
    %cst_8 = arith.constant dense<0.000000e+00> : vector<256x64xf32>
    %11 = tpu.matmul %9, %10, %cst_8 {dimension_numbers = #tpu.dot_dimension_numbers<[1], [0], [0], [1], [0, 0, 1, 1], [], []>} : vector<256x16xf32>, vector<16x64xf32>, vector<256x64xf32> -> vector<256x64xf32>
    %12 = arith.addf %6, %11 : vector<256x64xf32>
    %c0_9 = arith.constant 0 : index
    %c0_10 = arith.constant 0 : index
    %c0_11 = arith.constant 0 : index
    %13 = vector.load %arg4[%c0_9, %c0_10, %c0_11] : memref<1x256x32xbf16, #tpu.memory_space<vmem>>, vector<1x256x32xbf16>
    %14 = vector.shape_cast %13 : vector<1x256x32xbf16> to vector<256x32xbf16>
    %15 = arith.extf %14 : vector<256x32xbf16> to vector<256x32xf32>
    %16 = vector.extract_strided_slice %1 {offsets = [32, 0], sizes = [32, 64], strides = [1, 1]} : vector<64x64xf32> to vector<32x64xf32>
    %cst_12 = arith.constant dense<0.000000e+00> : vector<256x64xf32>
    %17 = tpu.matmul %15, %16, %cst_12 {dimension_numbers = #tpu.dot_dimension_numbers<[1], [0], [0], [1], [0, 0, 1, 1], [], []>} : vector<256x32xf32>, vector<32x64xf32>, vector<256x64xf32> -> vector<256x64xf32>
    %18 = arith.addf %12, %17 : vector<256x64xf32>
    %c0_13 = arith.constant 0 : index
    %c0_14 = arith.constant 0 : index
    %19 = vector.load %arg7[%c0_13, %c0_14] : memref<1x64xf32, #tpu.memory_space<vmem>>, vector<1x64xf32>
    %20 = vector.broadcast %19 : vector<1x64xf32> to vector<256x64xf32>
    %21 = arith.addf %18, %20 : vector<256x64xf32>
    %c0_15 = arith.constant 0 : index
    %c0_16 = arith.constant 0 : index
    %c0_17 = arith.constant 0 : index
    %22 = vector.load %arg5[%c0_15, %c0_16, %c0_17] : memref<1x256x64xf32, #tpu.memory_space<vmem>>, vector<1x256x64xf32>
    %23 = vector.shape_cast %22 : vector<1x256x64xf32> to vector<256x64xf32>
    %24 = arith.addf %21, %23 : vector<256x64xf32>
    %c0_18 = arith.constant 0 : index
    %c0_19 = arith.constant 0 : index
    %c0_20 = arith.constant 0 : index
    %25 = vector.load %arg8[%c0_18, %c0_19, %c0_20] : memref<1x256x64xf32, #tpu.memory_space<vmem>>, vector<1x256x64xf32>
    %26 = vector.shape_cast %25 : vector<1x256x64xf32> to vector<256x64xf32>
    %27 = vector.shape_cast %24 : vector<256x64xf32> to vector<1x256x64xf32>
    tpu.vector_store %arg8[%c0_18, %c0_19, %c0_20], %27 {strides = array<i32>} : memref<1x256x64xf32, #tpu.memory_space<vmem>>, vector<1x256x64xf32>,
    return
  }
  func.func @transform_0(%arg0: i32, %arg1: i32) -> (i32, i32, i32) {
    %c0_i32 = arith.constant 0 : i32
    %c0_i32_0 = arith.constant 0 : i32
    return %arg0, %arg1, %c0_i32 : i32, i32, i32
  }
  func.func @transform_1(%arg0: i32, %arg1: i32) -> (i32, i32, i32) {
    %c0_i32 = arith.constant 0 : i32
    %c0_i32_0 = arith.constant 0 : i32
    return %arg0, %arg1, %c0_i32 : i32, i32, i32
  }
  func.func @transform_2(%arg0: i32, %arg1: i32) -> (i32, i32, i32) {
    %c0_i32 = arith.constant 0 : i32
    %c0_i32_0 = arith.constant 0 : i32
    return %arg0, %arg1, %c0_i32 : i32, i32, i32
  }
  func.func @transform_3(%arg0: i32, %arg1: i32) -> (i32, i32, i32) {
    %c0_i32 = arith.constant 0 : i32
    %c0_i32_0 = arith.constant 0 : i32
    return %arg0, %arg1, %c0_i32 : i32, i32, i32
  }
  func.func @transform_4(%arg0: i32, %arg1: i32) -> (i32, i32, i32) {
    %c0_i32 = arith.constant 0 : i32
    %c0_i32_0 = arith.constant 0 : i32
    %c0_i32_1 = arith.constant 0 : i32
    return %arg0, %c0_i32, %c0_i32_0 : i32, i32, i32
  }
  func.func @transform_5(%arg0: i32, %arg1: i32) -> (i32, i32) {
    %c0_i32 = arith.constant 0 : i32
    %c0_i32_0 = arith.constant 0 : i32
    %c0_i32_1 = arith.constant 0 : i32
    return %c0_i32, %c0_i32_0 : i32, i32
  }
  func.func @transform_6(%arg0: i32, %arg1: i32) -> (i32, i32, i32) {
    %c0_i32 = arith.constant 0 : i32
    %c0_i32_0 = arith.constant 0 : i32
    return %arg0, %arg1, %c0_i32 : i32, i32, i32
  }
}

</mosaic_0001>

<bundles_post_ra>
// kernel: pmcb_forward.5
= control target key start
LH: loop header
LB: loop body
LE: loop exit
PB: predicated region body
PF: predicated region fallthrough
CT: control target
= control target key end

     0   :  { %s1860_s24 = smov 0   ;;  %s1862_s25 = smov 0   ;;  %s2154_s0 = inlined_call_operand.vmem [shape: bf16[2,6,128,48], index: 0, kind: input, shape index: {}, may-alias: {0,1,2}]   ;;  %s2155_s1 = inlined_call_operand.vmem [shape: bf16[2,6,128,48], index: 1, kind: input, shape index: {}, may-alias: {0,1,2}]   ;;  %s2156_s2 = inlined_call_operand.vmem [shape: bf16[2,6,128,48], index: 2, kind: input, shape index: {}, may-alias: {0,1,2}]   ;;  %s2157_s3 = inlined_call_operand.vmem [shape: bf16[144,64], index: 3, kind: input, shape index: {}]   ;;  %s2158_s4 = inlined_call_operand.vmem [shape: f32[1,64], index: 4, kind: input, shape index: {}]   ;;  %s2159_s5 = inlined_call_operand.vmem [shape: bf16[2,4,8,8,16], index: 5, kind: output, shape index: {0}]   ;;  %s2160_s6 = inlined_call_operand.vmem [shape: bf16[2,4,8,8,48], index: 6, kind: output, shape index: {1}]   ;;  %s2161_s7 = inlined_call_operand.vmem [shape: f32[2,4,1,64], index: 7, kind: output, shape index: {2}]  }
   0x1   :  { %s1864_s26 = smov 0   ;;  %s1866_s27 = smov 0  }
   0x2   :  { %s1868_s28 = smov 0  }
   0x3 LB: > { %s27_s29 = sadd.s32 1, %s1807_s26  ;;  %s30_s30 = sadd.s32 1, %s1811_s27  ;;  %s1815_s28 = sphi %s1868_s28, %s18_s28   ;;  %s1811_s27 = sphi %s1866_s27, %s2165_s27   ;;  %s1807_s26 = sphi %s1864_s26, %s2164_s26   ;;  %s1803_s25 = sphi %s1862_s25, %s2163_s25   ;;  %s1799_s24 = sphi %s1860_s24, %s2162_s24  }
   0x4   : > { %p28_p0 = scmp.ge.s32.totalorder %s27_s29, 4  ;;  %p1534_p1 = scmp.ge.s32.totalorder %s1815_s28, 1 }
   0x5   : > { %p306_p2 = scmp.lt.s32.totalorder %s1815_s28, 9 }
   0x6   : > { %s2167_s29 = smov (%p28_p0, %s27_s29), 0  ;;  %s2169_s30 = smov (!%p28_p0, %s30_s30), %s1811_s27 }
   0x7   : > { %p307_p3 = pnand %p1534_p1, %p306_p2  ;;  %p32_p4 = scmp.ge.s32.totalorder %s2169_s30, 2 }
   0x8   : > { %p382_p5 = scmp.lt.s32.totalorder (!%p307_p3), %s1803_s25, 1  ;;  %s402_s8 = sadd.s32 (!%p307_p3), 2, %s1799_s24 }
   0x9   : > { %s2171_s30 = smov (%p32_p4, %s2169_s30), 0  ;;  %310 = sbr.rel (%p307_p3) target bundleno = 453 (0x1c5), region = 40 }
   0xa   : > { %p405_p6 = scmp.lt.s32.totalorder (!%p307_p3), %s402_s8, 5  ;;  %s391_s10 = sadd.s32 (!%p307_p3), 1, %s1799_s24 }
   0xb   : > { %p394_p7 = scmp.lt.s32.totalorder (!%p307_p3), %s391_s10, 5  ;;  %s1817_s17 = smov (!%p307_p3), 96  }
   0xc   : > { %p384_p8 = scmp.lt.s32.totalorder (!%p307_p3), %s1799_s24, 5  ;;  %p415_p9 = scmp.lt.s32.totalorder (!%p307_p3), %s1799_s24, 3 }
   0xe   : > { %s2173_s25 = smov (!%p382_p5, %s1803_s25), 1  ;;  %s2175_s8 = smov (!%p405_p6, %s402_s8), 5  ;;  %v1721_v6 = vld [vmem:[%s2157_s3 + $0x38] sm:$0xff]  ;;  %v1720_v7 = vld [vmem:[%s2157_s3 + $0x30] sm:$0xff]  ;;  %v1722_v8 = vld [vmem:[%s2157_s3 + $0x40] sm:$0xff]  ;;  %vm765_vm0 = vcmask 130048  }
   0xf   : > { %s1896_s9 = smul.u32 96, %s2173_s25  ;;  %s1539_s11 = sshll.u32 %s2175_s8, 4  ;;  %782 = vmatpush.bf16.msra.mxu0 %v1721_v6  ;;  %1723 = vmatpush.bf16.msra.mxu2 %v1721_v6  ;;  %v1719_v12 = vld [vmem:[%s2157_s3 + $0x28] sm:$0xff]  ;;  %v1718_v13 = vld [vmem:[%s2157_s3 + $0x20] sm:$0xff]  ;;  %v1717_v17 = vld [vmem:[%s2157_s3 + $0x18] sm:$0xff]  ;;  %vm639_vm1 = vcmask 392192  }
  0x10   : > { %s2177_s10 = smov (!%p394_p7, %s391_s10), 5  ;;  %s1818_s8 = smov 48   ;;  %838 = vmatpush.bf16.msra.mxu1 %v1722_v8  ;;  %1731 = vmatpush.bf16.msra.mxu3 %v1722_v8  ;;  %v1716_v18 = vld [vmem:[%s2157_s3 + $0x10] sm:$0xff]  ;;  %v1715_v23 = vld [vmem:[%s2157_s3 + $0x8] sm:$0xff]  ;;  %v1714_v24 = vld [vmem:[%s2157_s3] sm:$0xff]  ;;  %vm664_vm2 = vcmask 785408  }
  0x11   : > { %s409_s12 = sadd.s32 %s1896_s9, %s1539_s11  ;;  %s1537_s18 = sshll.u32 %s2177_s10, 4  ;;  %vm1249_vm4 = vcmask 125952   ;;  %vm1201_vm12 = vcmask 523264  }
  0x12   : > { %s1540_s13 = sshll.u32 %s409_s12, 2  ;;  %s398_s19 = sadd.s32 %s1896_s9, %s1537_s18 }
  0x13   : > { %s1903_s16 = scalar_lea.vmem %s2156_s2, %s1540_s13  ;;  %s1538_s20 = sshll.u32 %s398_s19, 2  ;;  %783 = vmatpush.bf16.msra.mxu0 %v1720_v7  ;;  %1724 = vmatpush.bf16.msra.mxu2 %v1720_v7 }
  0x14   : > { %v1710_v0 = vld [vmem:[%s1903_s16 + $0x20] sm:$0xff]  ;;  %v1707_v2 = vld [vmem:[%s1903_s16 + $0x8] sm:$0xff]  ;;  %s1915_s23 = scalar_lea.vmem %s2155_s1, %s1538_s20  ;;  %v1708_v11 = vld [vmem:[%s1903_s16 + $0x10] sm:$0xff]  ;;  %s1542_s11 = sshll.u32 %s2173_s25, 5 }
  0x15   : > { %v1706_v1 = vld [vmem:[%s1903_s16] sm:$0xff]  ;;  %631 = vrot.lane.b32.xlu1 %v1710_v0, %s1817_s17  ;;  %625 = vrot.lane.b32.xlu2 %v1707_v2, %s1817_s17  ;;  %v1703_v5 = vld [vmem:[%s1915_s23 + $0x28] sm:$0xff]  ;;  %s385_s18 = scalar_select %p384_p8, %s1799_s24, 5 }
  0x16   : > { %623 = vrot.lane.b32.xlu0 %v1706_v1, %s1817_s17  ;;  %v1702_v3 = vld [vmem:[%s1915_s23 + $0x20] sm:$0xff]  ;;  %v1699_v9 = vld [vmem:[%s1915_s23 + $0x8] sm:$0xff]  ;;  %v1704_v14 = vld [vmem:[%s1915_s23 + $0x30] sm:$0xff]  ;;  %s2179_s24 = smov (!%p415_p9, %s1799_s24), 3 }
  0x17   : > { %v1698_v4 = vld [vmem:[%s1915_s23] sm:$0xff]  ;;  %v1711_v10 = vld [vmem:[%s1903_s16 + $0x28] sm:$0xff]  ;;  %784 = vmatpush.bf16.msra.mxu0 %v1719_v12  ;;  %1725 = vmatpush.bf16.msra.mxu2 %v1719_v12  ;;  %v1712_v15 = vld [vmem:[%s1903_s16 + $0x30] sm:$0xff]  ;;  %s1535_s19 = sshll.u32 %s385_s18, 4  ;;  %s1541_s10 = sshll.u32 %s2179_s24, 3 }
  0x18   : > { %v1700_v16 = vld [vmem:[%s1915_s23 + $0x10] sm:$0xff]  ;;  %v1709_v19 = vld [vmem:[%s1903_s16 + $0x18] sm:$0xff]  ;;  %s388_s20 = sadd.s32 %s1896_s9, %s1535_s19  ;;  %v2017_v2 = vld [vmem:[%s2158_s4] ss:$0 sm:$0xff]  ;;  %s2022_s12 = sadd.s32 %s1542_s11, %s1541_s10 }
  0x19   : > { %v1705_v20 = vld [vmem:[%s1915_s23 + $0x38] sm:$0xff]  ;;  %s1543_s13 = sshll.u32 %s2022_s12, 2  ;;  %s1819_s18 = smov 112  }
  0x1a   : > { %v1713_v21 = vld [vmem:[%s1903_s16 + $0x38] sm:$0xff]  ;;  %s2032_s16 = scalar_lea.vmem %s2159_s5, %s1543_s13  ;;  %s1547_s19 = sshll.u32 %s2173_s25, 2 }
  0x1b   : > { %785 = vmatpush.bf16.msra.mxu0 %v1718_v13  ;;  %1726 = vmatpush.bf16.msra.mxu2 %v1718_v13  ;;  %v1701_v22 = vld [vmem:[%s1915_s23 + $0x18] sm:$0xff]  ;;  %s430_s22 = scalar_lea.vmem %s2160_s6, %s1543_s13 }
  0x1d   : > { %567 = vrot.lane.b32.xlu1 %v1698_v4, %s1818_s8  ;;  %577 = vrot.lane.b32.xlu2 %v1703_v5, %s1818_s8 }
  0x1e   : > { %575 = vrot.lane.b32.xlu0 %v1702_v3, %s1818_s8 }
  0x1f   : > { %786 = vmatpush.bf16.msra.mxu0 %v1717_v17  ;;  %1727 = vmatpush.bf16.msra.mxu2 %v1717_v17 }
  0x23   : > { %787 = vmatpush.bf16.msra.mxu0 %v1716_v18  ;;  %1728 = vmatpush.bf16.msra.mxu2 %v1716_v18 }
  0x25   : > { %569 = vrot.lane.b32.xlu1 %v1699_v9, %s1818_s8  ;;  %627 = vrot.lane.b32.xlu2 %v1708_v11, %s1817_s17 }
  0x26   : > { %633 = vrot.lane.b32.xlu0 %v1711_v10, %s1817_s17 }
  0x27   : > { %788 = vmatpush.bf16.msra.mxu0 %v1715_v23  ;;  %1729 = vmatpush.bf16.msra.mxu2 %v1715_v23 }
  0x2b   : > { %789 = vmatpush.bf16.msra.mxu0 %v1714_v24  ;;  %1730 = vmatpush.bf16.msra.mxu2 %v1714_v24 }
  0x2d   : > { %635 = vrot.lane.b32.xlu1 %v1712_v15, %s1817_s17  ;;  %571 = vrot.lane.b32.xlu2 %v1700_v16, %s1818_s8 }
  0x2e   : > { %579 = vrot.lane.b32.xlu0 %v1704_v14, %s1818_s8 }
  0x35   : > { %581 = vrot.lane.b32.xlu1 %v1705_v20, %s1818_s8  ;;  %637 = vrot.lane.b32.xlu2 %v1713_v21, %s1817_s17 }
  0x36   : > { %629 = vrot.lane.b32.xlu0 %v1709_v19, %s1817_s17  ;;  %s1536_s17 = sshll.u32 %s388_s20, 2  ;;  %s436_s20 = sadd.s32 %s1547_s19, %s2179_s24 }
  0x37   : > { %s1977_s21 = scalar_lea.vmem %s2154_s0, %s1536_s17 }
  0x38   : > { %v1694_v27 = vld [vmem:[%s1977_s21 + $0x20] sm:$0xff]  ;;  %v1695_v38 = vld [vmem:[%s1977_s21 + $0x28] sm:$0xff]  ;;  %v1696_v48 = vld [vmem:[%s1977_s21 + $0x30] sm:$0xff] }
  0x39   : > { %v1690_v28 = vld [vmem:[%s1977_s21] sm:$0xff]  ;;  %v1691_v39 = vld [vmem:[%s1977_s21 + $0x8] sm:$0xff]  ;;  %v1692_v49 = vld [vmem:[%s1977_s21 + $0x10] sm:$0xff] }
  0x3a   : > { %v1697_v57 = vld [vmem:[%s1977_s21 + $0x38] sm:$0xff] }
  0x3b   : > { %v1693_v59 = vld [vmem:[%s1977_s21 + $0x18] sm:$0xff] }
  0x3e   : > { %573 = vrot.lane.b32.xlu0 %v1701_v22, %s1818_s8  ;;  %s437_s8 = scalar_lea.vmem %s2161_s7, %s436_s20 }
  0x6f   : > { %v626_v29 = vpop.permute.xlu2 %625 }
  0x77   : > { %v578_v36 = vpop.permute.xlu2 %577 }
  0x78   : > { %v657_v41 = vsel %vm639_vm1, %v1695_v38, %v578_v36 }
  0x7f   : > { %v628_v44 = vpop.permute.xlu2 %627 }
  0x87   : > { %v632_v25 = vpop.permute.xlu1 %631  ;;  %v572_v50 = vpop.permute.xlu2 %571 }
  0x88   : > { %v624_v26 = vpop.permute.xlu0 %623  ;;  %v648_v52 = vsel %vm639_vm1, %v1692_v49, %v572_v50 }
  0x89   : > { %1680 = vmatmul.msk.bf16.vlgmr.msra.gmra.mxu1 %vm765_vm0, %v624_v26  ;;  %v672_v55 = vsel %vm664_vm2, %v648_v52, %v628_v44 }
  0x8f   : > { %v568_v31 = vpop.permute.xlu1 %567  ;;  %v638_v56 = vpop.permute.xlu2 %637 }
  0x90   : > { %v576_v30 = vpop.permute.xlu0 %575  ;;  %v642_v33 = vsel %vm639_vm1, %v1690_v28, %v568_v31 }
  0x91   : > { %v654_v32 = vsel %vm639_vm1, %v1694_v27, %v576_v30  ;;  %v666_v34 = vsel %vm664_vm2, %v642_v33, %v624_v26 }
  0x92   : > { %v678_v35 = vsel %vm664_vm2, %v654_v32, %v632_v25  ;;  %790 = vmatmul.bf16.vlgmr.msra.gmra.mxu0 %v666_v34 }
  0x93   : > { %810 = vmatmul.bf16.vlgmr.msra.gmra.mxu2 %v678_v35 }
  0x97   : > { %v570_v40 = vpop.permute.xlu1 %569 }
  0x98   : > { %v634_v37 = vpop.permute.xlu0 %633  ;;  %v645_v42 = vsel %vm639_vm1, %v1691_v39, %v570_v40 }
  0x99   : > { %1681 = vmatmul.msk.bf16.gmra.mxu1 %vm765_vm0, %v626_v29  ;;  %1685 = vmatmul.msk.bf16.vlgmr.msra.gmra.mxu3 %vm765_vm0, %v634_v37  ;;  %v681_v43 = vsel %vm664_vm2, %v657_v41, %v634_v37  ;;  %v669_v45 = vsel %vm664_vm2, %v645_v42, %v626_v29 }
  0x9f   : > { %v636_v47 = vpop.permute.xlu1 %635 }
  0xa0   : > { %v580_v46 = vpop.permute.xlu0 %579 }
  0xa1   : > { %v660_v51 = vsel %vm639_vm1, %v1696_v48, %v580_v46 }
  0xa2   : > { %795 = vmatmul.bf16.gmra.mxu0 %v669_v45  ;;  %v684_v53 = vsel %vm664_vm2, %v660_v51, %v636_v47 }
  0xa3   : > { %815 = vmatmul.bf16.gmra.mxu2 %v681_v43 }
  0xa7   : > { %v582_v58 = vpop.permute.xlu1 %581 }
  0xa8   : > { %v630_v54 = vpop.permute.xlu0 %629  ;;  %v663_v61 = vsel %vm639_vm1, %v1697_v57, %v582_v58 }
  0xa9   : > { %1682 = vmatmul.msk.bf16.gmra.mxu1 %vm765_vm0, %v628_v44  ;;  %1686 = vmatmul.msk.bf16.gmra.mxu3 %vm765_vm0, %v636_v47  ;;  %v687_v63 = vsel %vm664_vm2, %v663_v61, %v638_v56 }
  0xb0   : > { %v574_v60 = vpop.permute.xlu0 %573 }
  0xb1   : > { %v651_v62 = vsel %vm639_vm1, %v1693_v59, %v574_v60 }
  0xb2   : > { %800 = vmatmul.bf16.gmra.mxu0 %v672_v55  ;;  %v675_v0 = vsel %vm664_vm2, %v651_v62, %v630_v54 }
  0xb3   : > { %820 = vmatmul.bf16.gmra.mxu2 %v684_v53 }
  0xb9   : > { %1683 = vmatmul.msk.bf16.gmra.mxu1 %vm765_vm0, %v630_v54  ;;  %1687 = vmatmul.msk.bf16.gmra.mxu3 %vm765_vm0, %v638_v56 }
  0xc2   : > { %805 = vmatmul.bf16.gmra.mxu0 %v675_v0 }
  0xc3   : > { %825 = vmatmul.bf16.gmra.mxu2 %v687_v63 }
  0xc9   : > { %1684 = vmatmul.msk.bf16.gmra.mxu1 %vm765_vm0, %v632_v25 }
 0x106   : > { %v840_v1 = vpop.f32.mrf.mxu1 }
 0x10e   : > { %v842_v3 = vpop.f32.mrf.mxu1 }
 0x10f   : > { %v791_v4 = vpop.f32.mrf.mxu0 }
 0x110   : > { %v792_v5 = vadd.f32 %v2017_v2, %v791_v4 }
 0x112   : > { %v841_v6 = vadd.f32 %v840_v1, %v792_v5 }
 0x114   : > { %vm880_vm3 = vcmp.ge.f32.partialorder %v841_v6, 0.0  ;;  %v896_v7 = vmul.f32 0.05, %v841_v6 }
 0x116   : > { %v2025_v8 = vpop.f32.mrf.mxu2  ;;  %v845_v9 = vpop.f32.mrf.mxu1  ;;  %v2034_v10 = vsel %vm880_vm3, %v841_v6, %v896_v7 }
 0x117   : > { %v793_v11 = vpop.f32.mrf.mxu0  ;;  %v1241_v12 = vpack.c.bf16 %v2034_v10, %v2034_v10  ;;  %v812_v6 = vadd.f32 %v2017_v2, %v2025_v8 }
 0x118   : > { %v794_v33 = vadd.f32 %v2017_v2, %v793_v11  ;;  %v1202_v11 = vsel %vm1201_vm12, %v2034_v10, 0.0 }
 0x119   : > { %1266 = vrot.lane.b32.xlu1 %v1241_v12, %s1819_s18  ;;  %1250 = vst.msk [vmem:[%s2032_s16] sm:$0xf] %vm1249_vm4, %v1241_v12 }
 0x11a   : > { %v843_v39 = vadd.f32 %v842_v3, %v794_v33 }
 0x11c   : > { %v865_v15 = vpop.f32.mrf.mxu3  ;;  %v897_v46 = vmul.f32 0.05, %v843_v39  ;;  %vm881_vm8 = vcmp.ge.f32.partialorder %v843_v39, 0.0 }
 0x11e   : > { %v2041_v13 = vpop.f32.mrf.mxu2  ;;  %v847_v14 = vpop.f32.mrf.mxu1  ;;  %v913_v54 = vsel %vm881_vm8, %v843_v39, %v897_v46 }
 0x11f   : > { %v796_v16 = vpop.f32.mrf.mxu0  ;;  %v1186_v60 = vmul.f32 0.0, %v913_v54 }
 0x120   : > { %v797_v17 = vadd.f32 %v2017_v2, %v796_v16 }
 0x121   : > { %v1203_v3 = vsel %vm1201_vm12, %v1186_v60, 0.0 }
 0x122   : > { %v846_v18 = vadd.f32 %v845_v9, %v797_v17 }
 0x124   : > { %vm882_vm5 = vcmp.ge.f32.partialorder %v846_v18, 0.0  ;;  %v898_v19 = vmul.f32 0.05, %v846_v18  ;;  %v2049_v27 = vpop.f32.mrf.mxu3 }
 0x126   : > { %v816_v20 = vpop.f32.mrf.mxu2  ;;  %v850_v21 = vpop.f32.mrf.mxu1  ;;  %v2045_v23 = vsel %vm882_vm5, %v846_v18, %v898_v19 }
 0x127   : > { %v817_v22 = vadd.f32 %v2017_v2, %v816_v20  ;;  %v798_v24 = vpop.f32.mrf.mxu0  ;;  %v1242_v25 = vpack.c.bf16 %v2045_v23, %v2045_v23  ;;  %v1205_v12 = vsel %vm1201_vm12, %v2045_v23, 0.0 }
 0x128   : > { %v799_v37 = vadd.f32 %v2017_v2, %v798_v24 }
 0x129   : > { %v866_v26 = vadd.f32 %v865_v15, %v817_v22  ;;  %1268 = vrot.lane.b32.xlu2 %v1242_v25, %s1819_s18  ;;  %1251 = vst.msk [vmem:[%s2032_s16 + $0x4] sm:$0xf] %vm1249_vm4, %v1242_v25  ;;  %v1204_v15 = vadd.f32 %v1203_v3, %v1202_v11 }
 0x12a   : > { %v848_v43 = vadd.f32 %v847_v14, %v799_v37 }
 0x12b   : > { %vm890_vm6 = vcmp.ge.f32.partialorder %v866_v26, 0.0  ;;  %v906_v28 = vmul.f32 0.05, %v866_v26  ;;  %v1206_v22 = vadd.f32 %v1205_v12, %v1204_v15 }
 0x12c   : > { %v870_v36 = vpop.f32.mrf.mxu3  ;;  %v899_v51 = vmul.f32 0.05, %v848_v43  ;;  %vm883_vm10 = vcmp.ge.f32.partialorder %v848_v43, 0.0 }
 0x12d   : > { %v2054_v29 = vsel %vm890_vm6, %v866_v26, %v906_v28  ;;  %vm1290_vm6 = vcmask 388096  }
 0x12e   : > { %v818_v30 = vpop.f32.mrf.mxu2  ;;  %v852_v31 = vpop.f32.mrf.mxu1  ;;  %v1246_v32 = vpack.c.bf16 %v2054_v29, %v2054_v29  ;;  %v915_v61 = vsel %vm883_vm10, %v848_v43, %v899_v51 }
 0x12f   : > { %v801_v34 = vpop.f32.mrf.mxu0  ;;  %v1188_v1 = vmul.f32 0.0, %v915_v61  ;;  %v819_v7 = vadd.f32 %v2017_v2, %v818_v30 }
 0x130   : > { %1255 = vst.msk [vmem:[%s2032_s16 + $0x14] sm:$0xf] %vm1249_vm4, %v1246_v32  ;;  %v802_v35 = vadd.f32 %v2017_v2, %v801_v34 }
 0x131   : > { %v1207_v16 = vsel %vm1201_vm12, %v1188_v1, 0.0  ;;  %v868_v24 = vadd.f32 %v2049_v27, %v819_v7 }
 0x132   : > { %v851_v38 = vadd.f32 %v850_v21, %v802_v35  ;;  %v1208_v30 = vadd.f32 %v1207_v16, %v1206_v22 }
 0x133   : > { %vm891_vm1 = vcmp.ge.f32.partialorder %v868_v24, 0.0 }
 0x134   : > { %vm884_vm7 = vcmp.ge.f32.partialorder %v851_v38, 0.0  ;;  %v900_v40 = vmul.f32 0.05, %v851_v38  ;;  %v872_v53 = vpop.f32.mrf.mxu3 }
 0x136   : > { %v821_v41 = vpop.f32.mrf.mxu2  ;;  %v855_v42 = vpop.f32.mrf.mxu1  ;;  %v916_v45 = vsel %vm884_vm7, %v851_v38, %v900_v40  ;;  %v814_v38 = vadd.f32 %v2017_v2, %v2041_v13 }
 0x137   : > { %v822_v44 = vadd.f32 %v2017_v2, %v821_v41  ;;  %v803_v47 = vpop.f32.mrf.mxu0  ;;  %v1243_v48 = vpack.c.bf16 %v916_v45, %v916_v45  ;;  %v1209_v23 = vsel %vm1201_vm12, %v916_v45, 0.0  ;;  %v907_v41 = vmul.f32 0.05, %v868_v24 }
 0x138   : > { %v804_v49 = vadd.f32 %v2017_v2, %v803_v47  ;;  %v1210_v35 = vadd.f32 %v1209_v23, %v1208_v30 }
 0x139   : > { %v871_v50 = vadd.f32 %v870_v36, %v822_v44  ;;  %1270 = vrot.lane.b32.xlu0 %v1243_v48, %s1819_s18  ;;  %1252 = vst.msk [vmem:[%s2032_s16 + $0x8] sm:$0xf] %vm1249_vm4, %v1243_v48 }
 0x13a   : > { %v853_v55 = vadd.f32 %v852_v31, %v804_v49 }
 0x13b   : > { %vm892_vm9 = vcmp.ge.f32.partialorder %v871_v50, 0.0  ;;  %v908_v52 = vmul.f32 0.05, %v871_v50 }
 0x13c   : > { %v901_v62 = vmul.f32 0.05, %v853_v55  ;;  %vm885_vm11 = vcmp.ge.f32.partialorder %v853_v55, 0.0  ;;  %v875_v5 = vpop.f32.mrf.mxu3 }
 0x13d   : > { %v2068_v56 = vsel %vm892_vm9, %v871_v50, %v908_v52 }
 0x13e   : > { %v823_v57 = vpop.f32.mrf.mxu2  ;;  %v857_v58 = vpop.f32.mrf.mxu1  ;;  %v2072_v59 = vpack.c.bf16 %v2068_v56, %v2068_v56  ;;  %v917_v9 = vsel %vm885_vm11, %v853_v55, %v901_v62 }
 0x13f   : > { %v806_v63 = vpop.f32.mrf.mxu0  ;;  %v1190_v19 = vmul.f32 0.0, %v917_v9  ;;  %v824_v31 = vadd.f32 %v2017_v2, %v823_v57  ;;  %v923_v57 = vsel %vm891_vm1, %v868_v24, %v907_v41 }
 0x140   : > { %1256 = vst.msk [vmem:[%s2032_s16 + $0x18] sm:$0xf] %vm1249_vm4, %v2072_v59  ;;  %v807_v0 = vadd.f32 %v2017_v2, %v806_v63  ;;  %v1196_v1 = vmul.f32 0.0, %v923_v57 }
 0x141   : > { %1276 = vrot.lane.b32.xlu0 %v1246_v32, %s1819_s18  ;;  %v1211_v33 = vsel %vm1201_vm12, %v1190_v19, 0.0 }
 0x142   : > { %v856_v4 = vadd.f32 %v855_v42, %v807_v0  ;;  %v873_v42 = vadd.f32 %v872_v53, %v824_v31  ;;  %v1212_v44 = vadd.f32 %v1211_v33, %v1210_v35  ;;  %v1223_v9 = vsel %vm1201_vm12, %v1196_v1, 0.0 }
 0x144   : > { %vm886_vm13 = vcmp.ge.f32.partialorder %v856_v4, 0.0  ;;  %v902_v14 = vmul.f32 0.05, %v856_v4  ;;  %v877_v40 = vpop.f32.mrf.mxu3  ;;  %vm893_vm3 = vcmp.ge.f32.partialorder %v873_v42, 0.0 }
 0x146   : > { %v860_v17 = vpop.f32.mrf.mxu1  ;;  %v826_v18 = vpop.f32.mrf.mxu2  ;;  %v918_v8 = vsel %vm886_vm13, %v856_v4, %v902_v14  ;;  %v1225_v14 = vsel %vm1201_vm12, %v2068_v56, 0.0 }
 0x147   : > { %v861_v20 = vadd.f32 %v860_v17, %v812_v6  ;;  %v827_v21 = vadd.f32 %v2017_v2, %v826_v18  ;;  %v808_v10 = vpop.f32.mrf.mxu0  ;;  %v1244_v25 = vpack.c.bf16 %v918_v8, %v918_v8  ;;  %v1213_v43 = vsel %vm1201_vm12, %v918_v8, 0.0 }
 0x148   : > { %v809_v28 = vadd.f32 %v2017_v2, %v808_v10  ;;  %v1214_v52 = vadd.f32 %v1213_v43, %v1212_v44 }
 0x149   : > { %vm888_vm14 = vcmp.ge.f32.partialorder %v861_v20, 0.0  ;;  %v904_v26 = vmul.f32 0.05, %v861_v20  ;;  %1253 = vst.msk [vmem:[%s2032_s16 + $0xc] sm:$0xf] %vm1249_vm4, %v1244_v25  ;;  %1272 = vrot.lane.b32.xlu1 %v1244_v25, %s1819_s18  ;;  %v876_v32 = vadd.f32 %v875_v5, %v827_v21  ;;  %v1221_v5 = vsel %vm1201_vm12, %v2054_v29, 0.0 }
 0x14a   : > { %v858_v27 = vadd.f32 %v857_v58, %v809_v28  ;;  %v909_v58 = vmul.f32 0.05, %v873_v42 }
 0x14b   : > { %v920_v34 = vsel %vm888_vm14, %v861_v20, %v904_v26  ;;  %vm894_vm15 = vcmp.ge.f32.partialorder %v876_v32, 0.0  ;;  %v910_v37 = vmul.f32 0.05, %v876_v32 }
 0x14c   : > { %v1245_v36 = vpack.c.bf16 %v920_v34, %v920_v34  ;;  %vm887_vm0 = vcmp.ge.f32.partialorder %v858_v27, 0.0  ;;  %v903_v39 = vmul.f32 0.05, %v858_v27  ;;  %v1217_v62 = vsel %vm1201_vm12, %v920_v34, 0.0 }
 0x14d   : > { %v926_v13 = vsel %vm894_vm15, %v876_v32, %v910_v37  ;;  %v925_v4 = vsel %vm893_vm3, %v873_v42, %v909_v58 }
 0x14e   : > { %v862_v45 = vpop.f32.mrf.mxu1  ;;  %1254 = vst.msk [vmem:[%s2032_s16 + $0x10] sm:$0xf] %vm1249_vm4, %v1245_v36  ;;  %1274 = vrot.lane.b32.xlu2 %v1245_v36, %s1819_s18  ;;  %v828_v46 = vpop.f32.mrf.mxu2  ;;  %v919_v47 = vsel %vm887_vm0, %v858_v27, %v903_v39  ;;  %v1248_v51 = vpack.c.bf16 %v926_v13, %v926_v13  ;;  %v1198_v11 = vmul.f32 0.0, %v925_v4  ;;  %v1229_v18 = vsel %vm1201_vm12, %v926_v13, 0.0 }
 0x14f   : > { %v863_v48 = vadd.f32 %v862_v45, %v814_v38  ;;  %v829_v49 = vadd.f32 %v2017_v2, %v828_v46  ;;  %v1192_v50 = vmul.f32 0.0, %v919_v47 }
 0x150   : > { %1257 = vst.msk [vmem:[%s2032_s16 + $0x1c] sm:$0xf] %vm1249_vm4, %v1248_v51  ;;  %v1227_v17 = vsel %vm1201_vm12, %v1198_v11, 0.0  ;;  %vm1239_vm4 = vcmask 516096  }
 0x151   : > { %vm889_vm2 = vcmp.ge.f32.partialorder %v863_v48, 0.0  ;;  %v905_v53 = vmul.f32 0.05, %v863_v48  ;;  %v878_v54 = vadd.f32 %v877_v40, %v829_v49  ;;  %v1215_v55 = vsel %vm1201_vm12, %v1192_v50, 0.0  ;;  %1278 = vrot.lane.b32.xlu1 %v2072_v59, %s1819_s18 }
 0x152   : > { %v1216_v2 = vadd.f32 %v1215_v55, %v1214_v52 }
 0x153   : > { %v921_v60 = vsel %vm889_vm2, %v863_v48, %v905_v53  ;;  %v911_v0 = vmul.f32 0.05, %v878_v54  ;;  %vm895_vm5 = vcmp.ge.f32.partialorder %v878_v54, 0.0 }
 0x154   : > { %v1194_v61 = vmul.f32 0.0, %v921_v60  ;;  %v1218_v63 = vadd.f32 %v1217_v62, %v1216_v2 }
 0x155   : > { %v927_v7 = vsel %vm895_vm5, %v878_v54, %v911_v0 }
 0x156   : > { %v1219_v3 = vsel %vm1201_vm12, %v1194_v61, 0.0  ;;  %1280 = vrot.lane.b32.xlu2 %v1248_v51, %s1819_s18  ;;  %v1200_v15 = vmul.f32 0.0, %v927_v7 }
 0x157   : > { %v1220_v59 = vadd.f32 %v1219_v3, %v1218_v63 }
 0x158   : > { %v1231_v29 = vsel %vm1201_vm12, %v1200_v15, 0.0 }
 0x159   : > { %v1222_v6 = vadd.f32 %v1221_v5, %v1220_v59 }
 0x15b   : > { %v1224_v12 = vadd.f32 %v1223_v9, %v1222_v6 }
 0x15d   : > { %v1226_v16 = vadd.f32 %v1225_v14, %v1224_v12 }
 0x15f   : > { %v1228_v19 = vadd.f32 %v1227_v17, %v1226_v16 }
 0x161   : > { %v1230_v20 = vadd.f32 %v1229_v18, %v1228_v19 }
 0x163   : > { %v1232_v8 = vadd.f32 %v1231_v29, %v1230_v20 }
 0x165   : > { %v1233_v21 = vrot.slane %v1232_v8, 4 }
 0x167   : > { %v1234_v22 = vadd.f32 %v1233_v21, %v1232_v8 }
 0x169   : > { %v1235_v24 = vrot.slane %v1234_v22, 2 }
 0x16b   : > { %v1236_v10 = vadd.f32 %v1235_v24, %v1234_v22 }
 0x16d   : > { %v1237_v25 = vrot.slane %v1236_v10, 1 }
 0x16f   : > { %v1238_v56 = vadd.f32 %v1237_v25, %v1236_v10 }
 0x171   : > { %1240 = vst.msk [vmem:[%s437_s8] sm:$0x1] %vm1239_vm4, %v1238_v56 }
 0x183   : > { %v1269_v23 = vpop.permute.xlu2 %1268 }
 0x184   : > { %1292 = vst.msk [vmem:[%s430_s22 + $0x4] sm:$0xf] %vm1290_vm6, %v1269_v23 }
 0x18b   : > { %v1267_v26 = vpop.permute.xlu1 %1266 }
 0x18c   : > { %1291 = vst.msk [vmem:[%s430_s22] sm:$0xf] %vm1290_vm6, %v1267_v26 }
 0x1a8   : > { %v1275_v28 = vpop.permute.xlu2 %1274 }
 0x1a9   : > { %1295 = vst.msk [vmem:[%s430_s22 + $0x10] sm:$0xf] %vm1290_vm6, %v1275_v28 }
 0x1ab   : > { %v1271_v30 = vpop.permute.xlu0 %1270 }
 0x1ac   : > { %1293 = vst.msk [vmem:[%s430_s22 + $0x8] sm:$0xf] %vm1290_vm6, %v1271_v30 }
 0x1b0   : > { %v1281_v31 = vpop.permute.xlu2 %1280 }
 0x1b1   : > { %1298 = vst.msk [vmem:[%s430_s22 + $0x1c] sm:$0xf] %vm1290_vm6, %v1281_v31 }
 0x1b3   : > { %v1277_v32 = vpop.permute.xlu0 %1276 }
 0x1b4   : > { %1296 = vst.msk [vmem:[%s430_s22 + $0x14] sm:$0xf] %vm1290_vm6, %v1277_v32 }
 0x1bb   : > { %v1273_v33 = vpop.permute.xlu1 %1272 }
 0x1bc   : > { %1294 = vst.msk [vmem:[%s430_s22 + $0xc] sm:$0xf] %vm1290_vm6, %v1273_v33 }
 0x1c3   : > { %v1279_v27 = vpop.permute.xlu1 %1278 }
 0x1c4   : > { %1297 = vst.msk [vmem:[%s430_s22 + $0x18] sm:$0xf] %vm1290_vm6, %v1279_v27 }
 0x1c5 PF: > { %s18_s28 = sadd.s32 1, %s1815_s28   ;;  %s2162_s24 = smov %s1807_s26 }
 0x1c6   : > { %p15_p10 = scmp.ge.s32.totalorder %s18_s28, 10   ;;  %s2163_s25 = smov %s1811_s27 }
 0x1c7   : > { %s2164_s26 = smov %s2167_s29  ;;  %s2165_s27 = smov %s2171_s30 }
 0x1c8   :  { %17 = sbr.rel (!%p15_p10) target bundleno = 3 (0x3), region = 100 }

// kernel: pmcb_forward.4
= control target key start
LH: loop header
LB: loop body
LE: loop exit
PB: predicated region body
PF: predicated region fallthrough
CT: control target
= control target key end

     0   :  { %s4768_s24 = smov 0   ;;  %s4770_s25 = smov 0   ;;  %s6455_s0 = inlined_call_operand.vmem [shape: bf16[2,6,168,64], index: 0, kind: input, shape index: {}, may-alias: {0,1,2}]   ;;  %s6456_s1 = inlined_call_operand.vmem [shape: bf16[2,6,168,64], index: 1, kind: input, shape index: {}, may-alias: {0,1,2}]   ;;  %s6457_s2 = inlined_call_operand.vmem [shape: bf16[2,6,168,64], index: 2, kind: input, shape index: {}, may-alias: {0,1,2}]   ;;  %s6458_s3 = inlined_call_operand.vmem [shape: bf16[1728,64], index: 3, kind: input, shape index: {}]   ;;  %s6459_s4 = inlined_call_operand.vmem [shape: f32[1,64], index: 4, kind: input, shape index: {}]   ;;  %s6460_s5 = inlined_call_operand.vmem [shape: bf16[2,4,8,8,16], index: 5, kind: output, shape index: {0}]   ;;  %s6461_s6 = inlined_call_operand.vmem [shape: bf16[2,4,8,8,48], index: 6, kind: output, shape index: {1}]   ;;  %s6462_s7 = inlined_call_operand.vmem [shape: f32[2,4,1,64], index: 7, kind: output, shape index: {2}]  }
   0x1   :  { %s4772_s26 = smov 0   ;;  %s4774_s27 = smov 0  }
   0x2   :  { %s4776_s28 = smov 0  }
   0x3 LB: > { %s27_s29 = sadd.s32 1, %s4716_s26  ;;  %s30_s30 = sadd.s32 1, %s4720_s27  ;;  %s4724_s28 = sphi %s4776_s28, %s18_s28   ;;  %s4720_s27 = sphi %s4774_s27, %s6565_s27   ;;  %s4716_s26 = sphi %s4772_s26, %s6564_s26   ;;  %s4712_s25 = sphi %s4770_s25, %s6563_s25   ;;  %s4708_s24 = sphi %s4768_s24, %s6562_s24  }
   0x4   : > { %p28_p0 = scmp.ge.s32.totalorder %s27_s29, 4  ;;  %p3902_p1 = scmp.ge.s32.totalorder %s4724_s28, 1 }
   0x5   : > { %p306_p2 = scmp.lt.s32.totalorder %s4724_s28, 9 }
   0x6   : > { %s6567_s29 = smov (%p28_p0, %s27_s29), 0  ;;  %s6569_s30 = smov (!%p28_p0, %s30_s30), %s4720_s27 }
   0x7   : > { %p307_p3 = pnand %p3902_p1, %p306_p2  ;;  %p32_p4 = scmp.ge.s32.totalorder %s6569_s30, 2 }
   0x9   : > { %s6571_s30 = smov (%p32_p4, %s6569_s30), 0  ;;  %310 = sbr.rel (%p307_p3) target bundleno = 824 (0x338), region = 40 }
   0xe   : > { %p382_p5 = scmp.lt.s32.totalorder %s4712_s25, 1  ;;  %p384_p6 = scmp.lt.s32.totalorder %s4708_s24, 5  ;;  %vm569_vm0 = vsmask.f32 7424  ;;  %v4482_v47 = vld [vmem:[%s6458_s3 + $0x38] sm:$0xff]  ;;  %v4481_v51 = vld [vmem:[%s6458_s3 + $0x30] sm:$0xff] }
   0xf   : > { %s4726_s16 = smov 64   ;;  %s391_s17 = sadd.s32 1, %s4708_s24  ;;  %v4490_v50 = vld [vmem:[%s6458_s3 + $0x78] sm:$0xff]  ;;  %2563 = vmatpush.bf16.msra.mxu0 %v4482_v47  ;;  %4613 = vmatpush.bf16.msra.mxu2 %v4482_v47  ;;  %v4489_v52 = vld [vmem:[%s6458_s3 + $0x70] sm:$0xff]  ;;  %v4480_v55 = vld [vmem:[%s6458_s3 + $0x28] sm:$0xff]  ;;  %vm690_vm1 = vcmask 1046528  }
  0x10   : > { %s6573_s25 = smov (!%p382_p5, %s4712_s25), 1  ;;  %p394_p7 = scmp.lt.s32.totalorder %s391_s17, 5  ;;  %2612 = vmatpush.bf16.msra.mxu1 %v4490_v50  ;;  %4621 = vmatpush.bf16.msra.mxu3 %v4490_v50  ;;  %v4488_v56 = vld [vmem:[%s6458_s3 + $0x68] sm:$0xff]  ;;  %v4479_v60 = vld [vmem:[%s6458_s3 + $0x20] sm:$0xff]  ;;  %vm1204_vm2 = vcmask 1040384   ;;  %vm950_vm3 = vcmask 523264  }
  0x11   : > { %s385_s8 = scalar_select %p384_p6, %s4708_s24, 5  ;;  %v4487_v61 = vld [vmem:[%s6458_s3 + $0x60] sm:$0xff]  ;;  %vm1253_vm4 = vsmask.f32 256  ;;  %vm3617_vm6 = vcmask 125952  }
  0x12   : > { %s4805_s9 = smul.u32 126, %s6573_s25  ;;  %s6575_s17 = smov (!%p394_p7, %s391_s17), 5 }
  0x13   : > { %s4629_s10 = smul.u32 21, %s385_s8  ;;  %2564 = vmatpush.bf16.msra.mxu0 %v4481_v51  ;;  %4614 = vmatpush.bf16.msra.mxu2 %v4481_v51  ;;  %p415_p9 = scmp.lt.s32.totalorder %s4708_s24, 3 }
  0x14   : > { %s4631_s8 = smul.u32 21, %s6575_s17  ;;  %2613 = vmatpush.bf16.msra.mxu1 %v4489_v52  ;;  %4622 = vmatpush.bf16.msra.mxu3 %v4489_v52  ;;  %s3912_s22 = sshll.u32 %s6573_s25, 2 }
  0x15   : > { %s388_s11 = sadd.s32 %s4805_s9, %s4629_s10 }
  0x16   : > { %s3903_s12 = sshll.u32 %s388_s11, 2  ;;  %s398_s14 = sadd.s32 %s4631_s8, %s4805_s9 }
  0x17   : > { %s4811_s15 = scalar_lea.vmem %s6455_s0, %s3903_s12  ;;  %s3904_s19 = sshll.u32 %s398_s14, 2  ;;  %2565 = vmatpush.bf16.msra.mxu0 %v4480_v55  ;;  %4615 = vmatpush.bf16.msra.mxu2 %v4480_v55  ;;  %v4497_v55 = vld [vmem:[%s6458_s3 + $0xb0] sm:$0xff] }
  0x18   : > { %v4814_v0 = vld [vmem:[%s4811_s15 + $0x28] sm:$0xff]  ;;  %v4820_v2 = vld [vmem:[%s4811_s15 + $0x20] sm:$0xff]  ;;  %v4834_v8 = vld [vmem:[%s4811_s15 + $0x30] sm:$0xff]  ;;  %2614 = vmatpush.bf16.msra.mxu1 %v4488_v56  ;;  %s4946_s11 = scalar_lea.vmem %s6456_s1, %s3904_s19  ;;  %4623 = vmatpush.bf16.msra.mxu3 %v4488_v56  ;;  %s402_s12 = sadd.s32 2, %s4708_s24 }
  0x19   : > { %v4817_v1 = vld [vmem:[%s4811_s15 + $0x8] sm:$0xff]  ;;  %v4823_v3 = vld [vmem:[%s4811_s15] sm:$0xff]  ;;  %555 = vrot.lane.b32.xlu0 %v4814_v0, %s4726_s16  ;;  %v602_v4 = vshll.u32 %v4820_v2, 16  ;;  %v606_v5 = vshrl.u32 %v4820_v2, 16  ;;  %v610_v6 = vshll.u32 %v4814_v0, 16  ;;  %557 = vrot.lane.b32.xlu2 %v4834_v8, %s4726_s16  ;;  %v618_v13 = vshll.u32 %v4834_v8, 16 }
  0x1a   : > { %547 = vrot.lane.b32.xlu1 %v4817_v1, %s4726_s16  ;;  %v578_v7 = vshll.u32 %v4817_v1, 16  ;;  %v571_v9 = vshrl.u32 %v4823_v3, 16  ;;  %v573_v10 = vshll.u32 %v4823_v3, 16  ;;  %v4844_v16 = vld [vmem:[%s4811_s15 + $0x10] sm:$0xff]  ;;  %v614_v18 = vshrl.u32 %v4814_v0, 16  ;;  %v4861_v29 = vld [vmem:[%s4811_s15 + $0x38] sm:$0xff] }
  0x1b   : > { %v4838_v11 = vrot.slane %v602_v4, 1  ;;  %v612_v12 = vrot.slane %v610_v6, 1  ;;  %v582_v20 = vshrl.u32 %v4817_v1, 16  ;;  %v586_v21 = vshll.u32 %v4844_v16, 16  ;;  %v4866_v30 = vld [vmem:[%s4811_s15 + $0x40] sm:$0xff]   ;;  %v4875_v35 = vld [vmem:[%s4811_s15 + $0x18] sm:$0xff]  ;;  %2566 = vmatpush.bf16.msra.mxu0 %v4479_v60  ;;  %4616 = vmatpush.bf16.msra.mxu2 %v4479_v60 }
  0x1c   : > { %v575_v14 = vrot.slane %v573_v10, 1  ;;  %v580_v15 = vrot.slane %v578_v7, 1  ;;  %v620_v23 = vrot.slane %v618_v13, 1  ;;  %v622_v32 = vshrl.u32 %v4834_v8, 16  ;;  %v4954_v4 = vld [vmem:[%s4946_s11] sm:$0xff]  ;;  %2615 = vmatpush.bf16.msra.mxu1 %v4487_v61  ;;  %v4486_v6 = vld [vmem:[%s6458_s3 + $0x58] sm:$0xff]  ;;  %4624 = vmatpush.bf16.msra.mxu3 %v4487_v61 }
  0x1d   : > { %v608_v17 = vor.u32 %v606_v5, %v4838_v11  ;;  %v616_v24 = vor.u32 %v614_v18, %v612_v12  ;;  %v588_v28 = vrot.slane %v586_v21, 1  ;;  %v626_v33 = vshll.u32 %v4861_v29, 16  ;;  %v4478_v5 = vld [vmem:[%s6458_s3 + $0x18] sm:$0xff]  ;;  %v4485_v10 = vld [vmem:[%s6458_s3 + $0x50] sm:$0xff]  ;;  %v4982_v13 = vld [vmem:[%s4946_s11 + $0x8] sm:$0xff]  ;;  %p405_p8 = scmp.lt.s32.totalorder %s402_s12, 5 }
  0x1e   : > { %v576_v19 = vor.u32 %v575_v14, %v571_v9  ;;  %v584_v27 = vor.u32 %v582_v20, %v580_v15  ;;  %v4585_v34 = vunpack.c.l.b16 %v4866_v30  ;;  %v590_v36 = vshrl.u32 %v4844_v16, 16  ;;  %v4477_v9 = vld [vmem:[%s6458_s3 + $0x10] sm:$0xff]  ;;  %v4476_v14 = vld [vmem:[%s6458_s3 + $0x8] sm:$0xff]  ;;  %v4998_v18 = vld [vmem:[%s4946_s11 + $0x18] sm:$0xff]  ;;  %s6579_s24 = smov (!%p415_p9, %s4708_s24), 3 }
  0x1f   : > { %v4851_v22 = vsel %vm569_vm0, %v608_v17, %v612_v12  ;;  %v4858_v26 = vsel %vm569_vm0, %v616_v24, %v620_v23  ;;  %v624_v37 = vor.u32 %v622_v32, %v620_v23  ;;  %v628_v38 = vrot.slane %v626_v33, 1  ;;  %2567 = vmatpush.bf16.msra.mxu0 %v4478_v5  ;;  %4617 = vmatpush.bf16.msra.mxu2 %v4478_v5  ;;  %v4475_v17 = vld [vmem:[%s6458_s3] sm:$0xff]  ;;  %v5008_v20 = vld [vmem:[%s4946_s11 + $0x28] sm:$0xff]  ;;  %s6577_s12 = smov (!%p405_p8, %s402_s12), 5  ;;  %v5067_v56 = vld [vmem:[%s4946_s11 + $0x30] sm:$0xff]  ;;  %s436_s23 = sadd.s32 %s3912_s22, %s6579_s24 }
  0x20   : > { %v581_v25 = vsel %vm569_vm0, %v576_v19, %v580_v15  ;;  %v4869_v31 = vsel %vm569_vm0, %v584_v27, %v588_v28  ;;  %v594_v39 = vshll.u32 %v4875_v35, 16  ;;  %v4884_v40 = vpack.c.b16 %v4585_v34, %v4585_v34  ;;  %2616 = vmatpush.bf16.msra.mxu1 %v4486_v6  ;;  %4625 = vmatpush.bf16.msra.mxu3 %v4486_v6  ;;  %v459_v34 = vld [vmem:[%s4811_s15 + $0x50] sm:$0xf]  ;;  %v5053_v51 = vld [vmem:[%s4946_s11 + $0x20] sm:$0xff]  ;;  %s4632_s20 = smul.u32 21, %s6577_s12 }
  0x21   : > { %646 = vrot.lane.b32.xlu0 %v4851_v22, %s4726_s16  ;;  %648 = vrot.lane.b32.xlu2 %v4858_v26, %s4726_s16  ;;  %v592_v41 = vor.u32 %v590_v36, %v588_v28  ;;  %v4889_v42 = vsel %vm569_vm0, %v624_v37, %v628_v38  ;;  %v630_v44 = vshrl.u32 %v4861_v29, 16  ;;  %v598_v53 = vshrl.u32 %v4875_v35, 16 }
  0x22   : > { %638 = vrot.lane.b32.xlu1 %v581_v25, %s4726_s16  ;;  %v596_v43 = vrot.slane %v594_v39, 1  ;;  %v634_v45 = vshll.u32 %v4884_v40, 16  ;;  %v6463_v58 = vrot.slane %v4817_v1, 1  ;;  %v694_v59 = vrot.slane %v4844_v16, 1  ;;  %v5020_v25 = vld [vmem:[%s4811_s15 + $0x48] sm:$0xff]   ;;  %s409_s10 = sadd.s32 %s4632_s20, %s4805_s9  ;;  %s4727_s15 = smov 112  }
  0x23   : > { %v4903_v48 = vor.u32 %v630_v44, %v628_v38  ;;  %v696_v7 = vrot.slane %v4875_v35, 1  ;;  %2568 = vmatpush.bf16.msra.mxu0 %v4477_v9  ;;  %4618 = vmatpush.bf16.msra.mxu2 %v4477_v9  ;;  %v698_v15 = vrot.slane %v4820_v2, 1  ;;  %v656_v21 = vshll.u32 %v4866_v30, 16  ;;  %v4484_v38 = vld [vmem:[%s6458_s3 + $0x48] sm:$0xff]  ;;  %v4483_v44 = vld [vmem:[%s6458_s3 + $0x40] sm:$0xff]  ;;  %s3905_s12 = sshll.u32 %s409_s10, 2 }
  0x24   : > { %v4894_v46 = vsel %vm569_vm0, %v592_v41, %v596_v43  ;;  %v636_v49 = vrot.slane %v634_v45, 1  ;;  %v600_v57 = vor.u32 %v598_v53, %v596_v43  ;;  %v4951_v63 = vsel %vm690_vm1, %v6463_v58, %v694_v59  ;;  %2617 = vmatpush.bf16.msra.mxu1 %v4485_v10  ;;  %4626 = vmatpush.bf16.msra.mxu3 %v4485_v10  ;;  %v4498_v43 = vld [vmem:[%s6458_s3 + $0xb8] sm:$0xff]  ;;  %s5088_s14 = scalar_lea.vmem %s6457_s2, %s3905_s12  ;;  %s437_s12 = scalar_lea.vmem %s6462_s7, %s436_s23 }
  0x25   : > { %v4979_v12 = vsel %vm690_vm1, %v694_v59, %v696_v7  ;;  %v5001_v19 = vsel %vm690_vm1, %v696_v7, %v698_v15  ;;  %v658_v23 = vrot.slane %v656_v21, 1  ;;  %v660_v27 = vshrl.u32 %v4866_v30, 16  ;;  %v4505_v7 = vld [vmem:[%s6458_s3 + $0xf0] sm:$0xff]  ;;  %v4514_v9 = vld [vmem:[%s6458_s3 + $0x138] sm:$0xff] }
  0x26   : > { %v637_v54 = vsel %vm569_vm0, %v4903_v48, %v636_v49  ;;  %v4941_v62 = vsel %vm569_vm0, %v600_v57, %v4838_v11  ;;  %v4976_v11 = vld [vmem:[%s4946_s11 + $0x10] sm:$0xff]  ;;  %v672_v28 = vshll.u32 %v5020_v25, 16  ;;  %v669_v37 = vunpack.c.l.b16 %v459_v34  ;;  %v4522_v10 = vld [vmem:[%s6458_s3 + $0x178] sm:$0xff] }
  0x27   : > { %2569 = vmatpush.bf16.msra.mxu0 %v4476_v14  ;;  %4619 = vmatpush.bf16.msra.mxu2 %v4476_v14  ;;  %v5015_v24 = vsel %vm569_vm0, %v4903_v48, %v658_v23  ;;  %v5025_v32 = vor.u32 %v660_v27, %v658_v23  ;;  %v700_v41 = vrot.slane %v4814_v0, 1  ;;  %v676_v45 = vshrl.u32 %v5020_v25, 16  ;;  %v4496_v14 = vld [vmem:[%s6458_s3 + $0xa8] sm:$0xff]  ;;  %v4521_v34 = vld [vmem:[%s6458_s3 + $0x170] sm:$0xff] }
  0x28   : > { %v674_v33 = vrot.slane %v672_v28, 1  ;;  %v5034_v39 = vpack.c.b16 %v669_v37, %v669_v37  ;;  %2618 = vmatpush.bf16.msra.mxu1 %v4484_v38  ;;  %4627 = vmatpush.bf16.msra.mxu3 %v4484_v38  ;;  %v811_v53 = vshll.u32 %v4982_v13, 16  ;;  %v815_v59 = vshrl.u32 %v4982_v13, 16  ;;  %v4504_v28 = vld [vmem:[%s6458_s3 + $0xe8] sm:$0xff]  ;;  %v5134_v37 = vld [vmem:[%s4946_s11 + $0x38] sm:$0xff] }
  0x29   : > { %549 = vrot.lane.b32.xlu0 %v4844_v16, %s4726_s16  ;;  %559 = vrot.lane.b32.xlu2 %v4861_v29, %s4726_s16  ;;  %v5048_v48 = vsel %vm690_vm1, %v698_v15, %v700_v41  ;;  %v819_v60 = vshll.u32 %v4976_v11, 16  ;;  %v5103_v15 = vld [vmem:[%s5088_s14 + $0x8] sm:$0xff]  ;;  %v5137_v38 = vld [vmem:[%s5088_s14 + $0x18] sm:$0xff] }
  0x2a   : > { %640 = vrot.lane.b32.xlu1 %v4869_v31, %s4726_s16  ;;  %v675_v36 = vsel %vm569_vm0, %v5025_v32, %v674_v33  ;;  %v680_v47 = vshll.u32 %v5034_v39, 16  ;;  %v678_v49 = vor.u32 %v676_v45, %v674_v33  ;;  %v5070_v57 = vrot.slane %v811_v53, 1  ;;  %v4513_v33 = vld [vmem:[%s6458_s3 + $0x130] sm:$0xff]  ;;  %v4503_v53 = vld [vmem:[%s6458_s3 + $0xe0] sm:$0xff] }
  0x2b   : > { %2570 = vmatpush.bf16.msra.mxu0 %v4475_v17  ;;  %4620 = vmatpush.bf16.msra.mxu2 %v4475_v17  ;;  %v5077_v5 = vrot.slane %v819_v60, 1  ;;  %v5106_v17 = vld [vmem:[%s5088_s14 + $0x10] sm:$0xff]  ;;  %v5109_v21 = vrot.slane %v5103_v15, 7  ;;  %v5165_v60 = vld [vmem:[%s5088_s14 + $0x20] sm:$0xff] }
  0x2c   : > { %v682_v50 = vrot.slane %v680_v47, 1  ;;  %2619 = vmatpush.bf16.msra.mxu1 %v4483_v44  ;;  %4628 = vmatpush.bf16.msra.mxu3 %v4483_v44  ;;  %6498 = vst [vmem:[#allocation2_spill] sm:$0xff] %v5070_v57  ;;  %v817_v61 = vor.u32 %v815_v59, %v5070_v57  ;;  %v5112_v23 = vrot.slane %v5106_v17, 7  ;;  %v4494_v59 = vld [vmem:[%s6458_s3 + $0x98] sm:$0xff] }
  0x2d   : > { %6500 = vst [vmem:[#allocation4_spill] sm:$0xff] %v5109_v21 }
  0x2e   : > { %v683_v52 = vsel %vm569_vm0, %v678_v49, %v682_v50  ;;  %v5081_v6 = vsel %vm569_vm0, %v817_v61, %v5077_v5  ;;  %6501 = vst [vmem:[#allocation5_spill] sm:$0xff] %v5112_v23  ;;  %v5117_v27 = vsel %vm1204_vm2, %v5109_v21, %v5112_v23  ;;  %v1212_v61 = vrot.slane %v5165_v60, 7 }
  0x2f   : > { %2661 = vmatpush.bf16.msrb.mxu2 %v4498_v43  ;;  %6499 = vst [vmem:[#allocation3_spill] sm:$0xff] %v5081_v6  ;;  %2759 = vmatpush.bf16.msrb.mxu0 %v4514_v9  ;;  %v1210_v43 = vrot.slane %v5137_v38, 7 }
  0x30   : > { %2808 = vmatpush.bf16.msrb.mxu1 %v4522_v10  ;;  %6502 = vst [vmem:[#allocation6_spill] sm:$0xff] %v5117_v27 }
  0x31   : > { %650 = vrot.lane.b32.xlu0 %v4889_v42, %s4726_s16  ;;  %642 = vrot.lane.b32.xlu2 %v4894_v46, %s4726_s16  ;;  %v5144_v44 = vsel %vm1204_vm2, %v5112_v23, %v1210_v43 }
  0x32   : > { %551 = vrot.lane.b32.xlu1 %v4875_v35, %s4726_s16  ;;  %6503 = vst [vmem:[#allocation7_spill] sm:$0xff] %v5144_v44 }
  0x33   : > { %2662 = vmatpush.bf16.msrb.mxu2 %v4497_v55  ;;  %2760 = vmatpush.bf16.msrb.mxu0 %v4513_v33  ;;  %v4520_v55 = vld [vmem:[%s6458_s3 + $0x168] sm:$0xff]  ;;  %v4502_v33 = vld [vmem:[%s6458_s3 + $0xd8] sm:$0xff] }
  0x34   : > { %2809 = vmatpush.bf16.msrb.mxu1 %v4521_v34  ;;  %v4511_v34 = vld [vmem:[%s6458_s3 + $0x120] sm:$0xff] }
  0x37   : > { %2663 = vmatpush.bf16.msrb.mxu2 %v4496_v14 }
  0x38   : > { %2810 = vmatpush.bf16.msrb.mxu1 %v4520_v55 }
  0x39   : > { %561 = vrot.lane.b32.xlu0 %v4866_v30, %s4726_s16  ;;  %553 = vrot.lane.b32.xlu2 %v4820_v2, %s4726_s16 }
  0x3a   : > { %652 = vrot.lane.b32.xlu1 %v637_v54, %s4726_s16  ;;  %v4506_v54 = vld [vmem:[%s6458_s3 + $0xf8] sm:$0xff] }
  0x3b   : > { %2710 = vmatpush.bf16.msrb.mxu3 %v4506_v54  ;;  %v4512_v54 = vld [vmem:[%s6458_s3 + $0x128] sm:$0xff] }
  0x3c   : > { %2761 = vmatpush.bf16.msrb.mxu0 %v4512_v54 }
  0x3f   : > { %2711 = vmatpush.bf16.msrb.mxu3 %v4505_v7  ;;  %v5169_v7 = vsel %vm1204_vm2, %v1210_v43, %v1212_v61  ;;  %v702_v43 = vrot.slane %v4834_v8, 1 }
  0x40   : > { %6504 = vst [vmem:[#allocation8_spill] sm:$0xff] %v5169_v7  ;;  %2762 = vmatpush.bf16.msrb.mxu0 %v4511_v34  ;;  %v4492_v34 = vld [vmem:[%s6458_s3 + $0x88] sm:$0xff] }
  0x41   : > { %644 = vrot.lane.b32.xlu0 %v4941_v62, %s4726_s16  ;;  %772 = vrot.lane.b32.xlu2 %v4954_v4, %s4726_s16 }
  0x42   : > { %712 = vrot.lane.b32.xlu1 %v4951_v63, %s4726_s16 }
  0x43   : > { %2712 = vmatpush.bf16.msrb.mxu3 %v4504_v28 }
  0x47   : > { %2713 = vmatpush.bf16.msrb.mxu3 %v4503_v53  ;;  %v5204_v53 = vsel %vm690_vm1, %v700_v41, %v702_v43 }
  0x49   : > { %776 = vrot.lane.b32.xlu0 %v4976_v11, %s4726_s16  ;;  %774 = vrot.lane.b32.xlu2 %v4982_v13, %s4726_s16 }
  0x4a   : > { %714 = vrot.lane.b32.xlu1 %v4979_v12, %s4726_s16 }
  0x4b   : > { %2714 = vmatpush.bf16.msrb.mxu3 %v4502_v33  ;;  %v4509_v33 = vld [vmem:[%s6458_s3 + $0x110] sm:$0xff] }
  0x51   : > { %778 = vrot.lane.b32.xlu0 %v4998_v18, %s4726_s16  ;;  %780 = vrot.lane.b32.xlu2 %v5053_v51, %s4726_s16 }
  0x52   : > { %716 = vrot.lane.b32.xlu1 %v5001_v19, %s4726_s16 }
  0x59   : > { %718 = vrot.lane.b32.xlu0 %v5048_v48, %s4726_s16  ;;  %720 = vrot.lane.b32.xlu2 %v5204_v53, %s4726_s16 }
  0x5a   : > { %782 = vrot.lane.b32.xlu1 %v5008_v20, %s4726_s16 }
  0x61   : > { %784 = vrot.lane.b32.xlu0 %v5067_v56, %s4726_s16 }
  0x62   : > { %684 = vrot.lane.b32.xlu1 %v5015_v24, %s4726_s16 }
  0x69   : > { %786 = vrot.lane.b32.xlu0 %v5134_v37, %s4726_s16 }
  0x6a   : > { %686 = vrot.lane.b32.xlu1 %v675_v36, %s4726_s16  ;;  %v4495_v36 = vld [vmem:[%s6458_s3 + $0xa0] sm:$0xff] }
  0x6b   : > { %2664 = vmatpush.bf16.msrb.mxu2 %v4495_v36  ;;  %v4519_v36 = vld [vmem:[%s6458_s3 + $0x160] sm:$0xff] }
  0x6c   : > { %2811 = vmatpush.bf16.msrb.mxu1 %v4519_v36  ;;  %v4473_v36 = vld [vmem:[%s5088_s14 + $0x30] sm:$0xff] }
  0x6f   : > { %2665 = vmatpush.bf16.msrb.mxu2 %v4494_v59 }
  0x72   : > { %688 = vrot.lane.b32.xlu1 %v683_v52, %s4726_s16 }
  0x73   : > { %v558_v52 = vpop.permute.xlu2 %557 }
  0x74   : > { %v967_v55 = vsel %vm950_vm3, %v4814_v0, %v558_v52  ;;  %v4501_v52 = vld [vmem:[%s6458_s3 + $0xd0] sm:$0xff] }
  0x75   : > { %2715 = vmatpush.bf16.msrb.mxu3 %v4501_v52  ;;  %v4508_v52 = vld [vmem:[%s6458_s3 + $0x108] sm:$0xff] }
  0x7a   : > { %885 = vrot.lane.b32.xlu1 %v5081_v6, %s4726_s16 }
  0x82   : > { %1229 = vrot.lane.b32.xlu1 %v5117_v27, %s4726_s16 }
  0x8a   : > { %1231 = vrot.lane.b32.xlu1 %v5144_v44, %s4726_s16 }
  0x8b   : > { %v556_v45 = vpop.permute.xlu0 %555 }
  0x8c   : > { %v548_v47 = vpop.permute.xlu1 %547  ;;  %v964_v50 = vsel %vm950_vm3, %v4820_v2, %v556_v45  ;;  %v4493_v45 = vld [vmem:[%s6458_s3 + $0x90] sm:$0xff] }
  0x8d   : > { %v952_v49 = vsel %vm950_vm3, %v4823_v3, %v548_v47  ;;  %2591 = vmatmul.bf16.vlgmr.msra.gmra.mxu2 %v964_v50  ;;  %v5194_v47 = vld [vmem:[%s4946_s11 + $0x40] sm:$0xff]   ;;  %v5199_v50 = vpop.permute.xlu2 %648 }
  0x8e   : > { %2571 = vmatmul.bf16.vlgmr.msra.gmra.mxu0 %v952_v49  ;;  %v5197_v49 = vld [vmem:[%s5088_s14 + $0x28] sm:$0xff]  ;;  %2666 = vmatpush.bf16.msrb.mxu2 %v4493_v45  ;;  %v1216_v45 = vrot.slane %v4473_v36, 7  ;;  %v4507_v36 = vld [vmem:[%s6458_s3 + $0x100] sm:$0xff] }
  0x8f   : > { %6505 = vst [vmem:[#allocation9_spill] sm:$0xff] %v5197_v49  ;;  %v1214_v54 = vrot.slane %v5197_v49, 7  ;;  %798 = vrot.lane.b32.xlu0 %v5194_v47, %s4726_s16 }
  0x91   : > { %v5214_v59 = vsel %vm1204_vm2, %v1212_v61, %v1214_v54  ;;  %v4518_v61 = vld [vmem:[%s6458_s3 + $0x158] sm:$0xff] }
  0x92   : > { %1233 = vrot.lane.b32.xlu1 %v5169_v7, %s4726_s16  ;;  %6506 = vst [vmem:[#allocation10_spill] sm:$0xff] %v5214_v59  ;;  %2812 = vmatpush.bf16.msrb.mxu1 %v4518_v61  ;;  %v4500_v61 = vld [vmem:[%s6458_s3 + $0xc8] sm:$0xff] }
  0x93   : > { %v5171_v9 = vpop.permute.xlu0 %646  ;;  %2667 = vmatpush.bf16.msrb.mxu2 %v4492_v34  ;;  %v4491_v34 = vld [vmem:[%s6458_s3 + $0x80] sm:$0xff]  ;;  %2716 = vmatpush.bf16.msrb.mxu3 %v4500_v61 }
  0x94   : > { %v639_v10 = vpop.permute.xlu1 %638  ;;  %v988_v28 = vsel %vm950_vm3, %v4834_v8, %v5171_v9 }
  0x95   : > { %v976_v14 = vsel %vm950_vm3, %v4844_v16, %v639_v10  ;;  %2640 = vmatmul.bf16.vlgmr.msra.gmra.mxu3 %v988_v28  ;;  %v4510_v28 = vld [vmem:[%s6458_s3 + $0x118] sm:$0xff] }
  0x96   : > { %2620 = vmatmul.bf16.vlgmr.msra.gmra.mxu1 %v976_v14  ;;  %2763 = vmatpush.bf16.msrb.mxu0 %v4510_v28  ;;  %v5242_v28 = vsel %vm1204_vm2, %v1214_v54, %v1216_v45  ;;  %v4517_v54 = vld [vmem:[%s6458_s3 + $0x150] sm:$0xff] }
  0x97   : > { %6507 = vst [vmem:[#allocation11_spill] sm:$0xff] %v5242_v28  ;;  %2813 = vmatpush.bf16.msrb.mxu1 %v4517_v54  ;;  %2668 = vmatpush.bf16.msrb.mxu2 %v4491_v34 }
  0x9a   : > { %1235 = vrot.lane.b32.xlu1 %v5214_v59, %s4726_s16  ;;  %2764 = vmatpush.bf16.msrb.mxu0 %v4509_v33  ;;  %v5258_v33 = vrot.slane %v4861_v29, 1  ;;  %v4516_v59 = vld [vmem:[%s6458_s3 + $0x148] sm:$0xff] }
  0x9b   : > { %v550_v10 = vpop.permute.xlu0 %549  ;;  %2814 = vmatpush.bf16.msrb.mxu1 %v4516_v59 }
  0x9c   : > { %v641_v41 = vpop.permute.xlu1 %640  ;;  %v955_v14 = vsel %vm950_vm3, %v4817_v1, %v550_v10  ;;  %v5274_v23 = vsel %vm690_vm1, %v702_v43, %v5258_v33 }
  0x9d   : > { %2596 = vmatmul.bf16.gmra.mxu2 %v967_v55  ;;  %v560_v55 = vpop.permute.xlu2 %559  ;;  %v979_v10 = vsel %vm950_vm3, %v4875_v35, %v641_v41  ;;  %722 = vrot.lane.b32.xlu2 %v5274_v23, %s4726_s16 }
  0x9e   : > { %2576 = vmatmul.bf16.gmra.mxu0 %v955_v14  ;;  %v991_v14 = vsel %vm950_vm3, %v4861_v29, %v5199_v50  ;;  %v970_v61 = vsel %vm950_vm3, %v4834_v8, %v560_v55  ;;  %v4499_v8 = vld [vmem:[%s6458_s3 + $0xc0] sm:$0xff] }
  0x9f   : > { %2765 = vmatpush.bf16.msrb.mxu0 %v4508_v52  ;;  %v4515_v55 = vld [vmem:[%s6458_s3 + $0x140] sm:$0xff]  ;;  %2717 = vmatpush.bf16.msrb.mxu3 %v4499_v8 }
  0xa0   : > { %2815 = vmatpush.bf16.msrb.mxu1 %v4515_v55 }
  0xa2   : > { %1237 = vrot.lane.b32.xlu1 %v5242_v28, %s4726_s16 }
  0xa3   : > { %v5244_v58 = vpop.permute.xlu0 %650  ;;  %2766 = vmatpush.bf16.msrb.mxu0 %v4507_v36 }
  0xa4   : > { %v552_v41 = vpop.permute.xlu1 %551 }
  0xa5   : > { %2645 = vmatmul.bf16.gmra.mxu3 %v991_v14  ;;  %v5270_v14 = vld [vmem:[%s5088_s14 + $0x38] sm:$0xff]  ;;  %v958_v28 = vsel %vm950_vm3, %v4844_v16, %v552_v41  ;;  %v5291_v54 = vpop.permute.xlu2 %642  ;;  %v4611_v41 = vld [vmem:[%s5088_s14 + $0x40] sm:$0xff]  }
  0xa6   : > { %2625 = vmatmul.bf16.gmra.mxu1 %v979_v10  ;;  %v5267_v10 = vld [vmem:[%s4946_s11 + $0x48] sm:$0xff]   ;;  %6508 = vst [vmem:[#allocation12_spill] sm:$0xff] %v5270_v14  ;;  %v5279_v52 = vrot.slane %v5270_v14, 7  ;;  %v982_v59 = vsel %vm950_vm3, %v4820_v2, %v5291_v54  ;;  %v5333_v2 = vrot.slane %v4866_v30, 1 }
  0xa7   : > { %800 = vrot.lane.b32.xlu0 %v5267_v10, %s4726_s16 }
  0xa8   : > { %6509 = vst [vmem:[#allocation13_spill] sm:$0xff] %v5279_v52  ;;  %v5289_v43 = vsel %vm1204_vm2, %v1216_v45, %v5279_v52  ;;  %v4530_v45 = vld [vmem:[%s6458_s3 + $0x1b8] sm:$0xff]  ;;  %v5339_v55 = vsel %vm690_vm1, %v5258_v33, %v5333_v2 }
  0xa9   : > { %6510 = vst [vmem:[#allocation14_spill] sm:$0xff] %v5289_v43  ;;  %2857 = vmatpush.bf16.msra.mxu2 %v4530_v45  ;;  %724 = vrot.lane.b32.xlu2 %v5339_v55, %s4726_s16 }
  0xaa   : > { %1239 = vrot.lane.b32.xlu1 %v5289_v43, %s4726_s16  ;;  %v480_v43 = vld [vmem:[%s4946_s11 + $0x50] sm:$0xf] }
  0xab   : > { %v562_v34 = vpop.permute.xlu0 %561  ;;  %v902_v7 = vunpack.c.l.b16 %v480_v43  ;;  %v4546_v43 = vld [vmem:[%s6458_s3 + $0x238] sm:$0xff] }
  0xac   : > { %v653_v16 = vpop.permute.xlu1 %652  ;;  %2955 = vmatpush.bf16.msra.mxu0 %v4546_v43 }
  0xad   : > { %2601 = vmatmul.bf16.gmra.mxu2 %v970_v61  ;;  %v994_v61 = vsel %vm950_vm3, %v4866_v30, %v5244_v58  ;;  %v554_v45 = vpop.permute.xlu2 %553  ;;  %v973_v30 = vsel %vm950_vm3, %v4861_v29, %v562_v34  ;;  %v4529_v29 = vld [vmem:[%s6458_s3 + $0x1b0] sm:$0xff] }
  0xae   : > { %2581 = vmatmul.bf16.gmra.mxu0 %v958_v28  ;;  %v5308_v28 = vrot.slane %v4611_v41, 7  ;;  %2858 = vmatpush.bf16.msra.mxu2 %v4529_v29  ;;  %v4537_v29 = vld [vmem:[%s6458_s3 + $0x1f0] sm:$0xff] }
  0xaf   : > { %1227 = vrot.lane.b32.xlu0 %v5109_v21, %s4726_s16  ;;  %v1000_v21 = vsel %vm950_vm3, %v4869_v31, %v5291_v54  ;;  %v4528_v31 = vld [vmem:[%s6458_s3 + $0x1a8] sm:$0xff]  ;;  %v6515_v54 = vrot.slane %v4817_v1, 1 }
  0xb0   : > { %6511 = vst [vmem:[#allocation15_spill] sm:$0xff] %v5308_v28  ;;  %v5313_v36 = vsel %vm1204_vm2, %v5279_v52, %v5308_v28  ;;  %v4538_v52 = vld [vmem:[%s6458_s3 + $0x1f8] sm:$0xff]  ;;  %v4536_v1 = vld [vmem:[%s6458_s3 + $0x1e8] sm:$0xff] }
  0xb1   : > { %6512 = vst [vmem:[#allocation16_spill] sm:$0xff] %v5313_v36  ;;  %2906 = vmatpush.bf16.msra.mxu3 %v4538_v52 }
  0xb2   : > { %1241 = vrot.lane.b32.xlu1 %v5313_v36, %s4726_s16  ;;  %2859 = vmatpush.bf16.msra.mxu2 %v4528_v31 }
  0xb3   : > { %v5323_v8 = vpop.permute.xlu0 %644 }
  0xb4   : > { %v5327_v41 = vpop.permute.xlu1 %712  ;;  %v985_v34 = vsel %vm950_vm3, %v4814_v0, %v5323_v8 }
  0xb5   : > { %2650 = vmatmul.bf16.gmra.mxu3 %v994_v61  ;;  %v961_v61 = vsel %vm950_vm3, %v4875_v35, %v554_v45  ;;  %v773_v52 = vpop.permute.xlu2 %772  ;;  %v4554_v35 = vld [vmem:[%s6458_s3 + $0x278] sm:$0xff]  ;;  %v997_v45 = vsel %vm950_vm3, %v5020_v25, %v653_v16 }
  0xb6   : > { %2630 = vmatmul.bf16.gmra.mxu1 %v982_v59  ;;  %v5343_v59 = vpack.c.b16 %v902_v7, %v902_v7  ;;  %2907 = vmatpush.bf16.msra.mxu3 %v4537_v29 }
  0xb7   : > { %3004 = vmatpush.bf16.msra.mxu1 %v4554_v35 }
  0xb8   : > { %6513 = vst [vmem:[#allocation17_spill] sm:$0xff] %v5343_v59 }
  0xba   : > { %1162 = vrot.lane.b32.xlu1 %v5343_v59, %s4726_s16  ;;  %2908 = vmatpush.bf16.msra.mxu3 %v4536_v1 }
  0xbb   : > { %v5349_v36 = vpop.permute.xlu0 %776 }
  0xbc   : > { %v5356_v7 = vpop.permute.xlu1 %714 }
  0xbd   : > { %2606 = vmatmul.bf16.gmra.mxu2 %v973_v30  ;;  %v4589_v30 = vunpack.c.l.b16 %v5020_v25  ;;  %v775_v0 = vpop.permute.xlu2 %774 }
  0xbe   : > { %2586 = vmatmul.bf16.gmra.mxu0 %v961_v61  ;;  %v1085_v61 = vsel %vm950_vm3, %v4982_v13, %v5349_v36 }
  0xbf   : > { %v1529_v59 = vrot.slane %v1085_v61, 1  ;;  %v5380_v35 = vpack.c.b16 %v4589_v30, %v4589_v30 }
  0xc1   : > { %v710_v27 = vrot.slane %v5380_v35, 1 }
  0xc3   : > { %v5373_v44 = vpop.permute.xlu0 %778  ;;  %v711_v30 = vsel %vm690_vm1, %v5333_v2, %v710_v27 }
  0xc4   : > { %v5378_v43 = vsel %vm950_vm3, %v4976_v11, %v5373_v44  ;;  %v5386_v14 = vpop.permute.xlu1 %716  ;;  %726 = vrot.lane.b32.xlu2 %v711_v30, %s4726_s16  ;;  %v920_v30 = vrot.slane %v4976_v11, 1 }
  0xc5   : > { %2655 = vmatmul.bf16.gmra.mxu3 %v997_v45  ;;  %v1530_v16 = vrot.slane %v5378_v43, 1  ;;  %v691_v45 = vrot.slane %v4823_v3, 1  ;;  %v5401_v29 = vpop.permute.xlu2 %780  ;;  %v918_v3 = vrot.slane %v4982_v13, 1 }
  0xc6   : > { %2635 = vmatmul.bf16.gmra.mxu1 %v985_v34  ;;  %v1059_v34 = vsel %vm950_vm3, %v4979_v12, %v773_v52  ;;  %v4553_v52 = vld [vmem:[%s6458_s3 + $0x270] sm:$0xff] }
  0xc7   : > { %v5390_v6 = vsel %vm690_vm1, %v1529_v59, %v1530_v16  ;;  %v4545_v59 = vld [vmem:[%s6458_s3 + $0x230] sm:$0xff]  ;;  %3005 = vmatpush.bf16.msra.mxu1 %v4553_v52 }
  0xc8   : > { %6514 = vst [vmem:[#allocation18_spill] sm:$0xff] %v5390_v6  ;;  %2956 = vmatpush.bf16.msra.mxu0 %v4545_v59  ;;  %v921_v6 = vsel %vm690_vm1, %v918_v3, %v920_v30  ;;  %v917_v59 = vrot.slane %v4954_v4, 1  ;;  %v4544_v4 = vld [vmem:[%s6458_s3 + $0x228] sm:$0xff] }
  0xc9   : > { %936 = vrot.lane.b32.xlu0 %v921_v6, %s4726_s16 }
  0xca   : > { %v919_v6 = vsel %vm690_vm1, %v917_v59, %v918_v3  ;;  %v922_v3 = vrot.slane %v4998_v18, 1  ;;  %v1032_v59 = vsel %vm950_vm3, %v4951_v63, %v5356_v7  ;;  %v1065_v63 = vsel %vm950_vm3, %v5048_v48, %v5349_v36 }
  0xcb   : > { %v831_v7 = vshrl.u32 %v4998_v18, 16 }
  0xcc   : > { %v5406_v27 = vpop.permute.xlu1 %782  ;;  %934 = vrot.lane.b32.xlu2 %v919_v6, %s4726_s16  ;;  %2957 = vmatpush.bf16.msra.mxu0 %v4544_v4  ;;  %v719_v6 = vpop.permute.xlu0 %718 }
  0xcd   : > { %2669 = vmatmul.bf16.vlgmr.msrb.gmra.mxu2 %v1000_v21  ;;  %v5419_v21 = vsel %vm950_vm3, %v4998_v18, %v5401_v29  ;;  %v5463_v31 = vsel %vm950_vm3, %v5053_v51, %v5406_v27 }
  0xce   : > { %2767 = vmatmul.bf16.vlgmr.msrb.gmra.mxu0 %v1059_v34  ;;  %v693_v34 = vsel %vm690_vm1, %v691_v45, %v6515_v54  ;;  %v1547_v13 = vrot.slane %v5419_v21, 1  ;;  %v923_v54 = vsel %vm690_vm1, %v920_v30, %v922_v3  ;;  %v4535_v30 = vld [vmem:[%s6458_s3 + $0x1e0] sm:$0xff] }
  0xcf   : > { %v1028_v57 = vsel %vm950_vm3, %v693_v34, %v5327_v41  ;;  %v823_v41 = vshrl.u32 %v4976_v11, 16  ;;  %v1559_v34 = vrot.slane %v5463_v31, 1  ;;  %2909 = vmatpush.bf16.msra.mxu3 %v4535_v30 }
  0xd0   : > { %v5428_v49 = vsel %vm690_vm1, %v1530_v16, %v1547_v13  ;;  %v1062_v16 = vsel %vm950_vm3, %v5001_v19, %v775_v0  ;;  %v4552_v0 = vld [vmem:[%s6458_s3 + $0x268] sm:$0xff] }
  0xd1   : > { %v825_v11 = vor.u32 %v823_v41, %v5077_v5  ;;  %3006 = vmatpush.bf16.msra.mxu1 %v4552_v0  ;;  %938 = vrot.lane.b32.xlu0 %v923_v54, %s4726_s16  ;;  %v5474_v5 = vsel %vm690_vm1, %v1547_v13, %v1559_v34  ;;  %v1006_v13 = vsel %vm950_vm3, %v4941_v62, %v5171_v9  ;;  %v4543_v41 = vld [vmem:[%s6458_s3 + $0x220] sm:$0xff]  ;;  %v924_v9 = vrot.slane %v5053_v51, 1 }
  0xd2   : > { %v4551_v62 = vld [vmem:[%s6458_s3 + $0x260] sm:$0xff]  ;;  %2958 = vmatpush.bf16.msra.mxu0 %v4543_v41  ;;  %v1036_v54 = vsel %vm950_vm3, %v4979_v12, %v5386_v14  ;;  %v1068_v12 = vsel %vm950_vm3, %v5204_v53, %v5373_v44  ;;  %v926_v44 = vrot.slane %v5008_v20, 1 }
  0xd4   : > { %v5435_v45 = vpop.permute.xlu1 %684  ;;  %v927_v41 = vsel %vm690_vm1, %v924_v9, %v926_v44 }
  0xd5   : > { %2718 = vmatmul.bf16.vlgmr.msrb.gmra.mxu3 %v1028_v57  ;;  %v1003_v57 = vsel %vm950_vm3, %v4894_v46, %v5323_v8  ;;  %v4527_v46 = vld [vmem:[%s6458_s3 + $0x1a0] sm:$0xff]  ;;  %3007 = vmatpush.bf16.msra.mxu1 %v4551_v62 }
  0xd6   : > { %2816 = vmatmul.bf16.vlgmr.msrb.gmra.mxu1 %v1085_v61  ;;  %v827_v61 = vshll.u32 %v4998_v18, 16  ;;  %2860 = vmatpush.bf16.msra.mxu2 %v4527_v46  ;;  %v925_v46 = vsel %vm690_vm1, %v922_v3, %v924_v9  ;;  %v4534_v3 = vld [vmem:[%s6458_s3 + $0x1d8] sm:$0xff]  ;;  %v4525_v9 = vld [vmem:[%s6458_s3 + $0x190] sm:$0xff] }
  0xd7   : > { %2910 = vmatpush.bf16.msra.mxu3 %v4534_v3 }
  0xd8   : > { %v829_v8 = vrot.slane %v827_v61, 1 }
  0xd9   : > { %940 = vrot.lane.b32.xlu0 %v925_v46, %s4726_s16 }
  0xda   : > { %v5469_v1 = vsel %vm569_vm0, %v825_v11, %v829_v8  ;;  %v833_v4 = vor.u32 %v831_v7, %v829_v8 }
  0xdb   : > { %887 = vrot.lane.b32.xlu2 %v5469_v1, %s4726_s16 }
  0xdc   : > { %v5450_v52 = vpop.permute.xlu1 %686 }
  0xdd   : > { %2674 = vmatmul.bf16.gmra.mxu2 %v1003_v57  ;;  %v5485_v57 = vpop.permute.xlu0 %784 }
  0xde   : > { %2772 = vmatmul.bf16.gmra.mxu0 %v1062_v16  ;;  %v5507_v18 = vsel %vm950_vm3, %v5008_v20, %v5485_v57 }
  0xdf   : > { %v1571_v0 = vrot.slane %v5507_v18, 1 }
  0xe1   : > { %v5518_v8 = vsel %vm690_vm1, %v1559_v34, %v1571_v0  ;;  %v1009_v34 = vsel %vm950_vm3, %v4851_v22, %v5199_v50  ;;  %v4550_v22 = vld [vmem:[%s6458_s3 + $0x258] sm:$0xff]  ;;  %942 = vrot.lane.b32.xlu0 %v927_v41, %s4726_s16 }
  0xe2   : > { %3008 = vmatpush.bf16.msra.mxu1 %v4550_v22  ;;  %v721_v22 = vpop.permute.xlu2 %720 }
  0xe4   : > { %v5483_v16 = vpop.permute.xlu1 %688 }
  0xe5   : > { %2723 = vmatmul.bf16.gmra.mxu3 %v1032_v59  ;;  %v4526_v59 = vld [vmem:[%s6458_s3 + $0x198] sm:$0xff]  ;;  %v5538_v14 = vpop.permute.xlu0 %786 }
  0xe6   : > { %2821 = vmatmul.bf16.gmra.mxu1 %v5378_v43  ;;  %v835_v43 = vshll.u32 %v5053_v51, 16  ;;  %2861 = vmatpush.bf16.msra.mxu2 %v4526_v59 }
  0xe8   : > { %v837_v36 = vrot.slane %v835_v43, 1 }
  0xea   : > { %v5512_v11 = vsel %vm569_vm0, %v833_v4, %v837_v36  ;;  %2862 = vmatpush.bf16.msra.mxu2 %v4525_v9 }
  0xeb   : > { %889 = vrot.lane.b32.xlu2 %v5512_v11, %s4726_s16 }
  0xec   : > { %v5498_v61 = vpop.permute.xlu1 %885 }
  0xed   : > { %2679 = vmatmul.bf16.gmra.mxu2 %v1006_v13  ;;  %v843_v13 = vshll.u32 %v5008_v20, 16 }
  0xee   : > { %2777 = vmatmul.bf16.gmra.mxu0 %v1065_v63  ;;  %v4542_v63 = vld [vmem:[%s6458_s3 + $0x218] sm:$0xff] }
  0xef   : > { %v845_v43 = vrot.slane %v843_v13, 1  ;;  %2959 = vmatpush.bf16.msra.mxu0 %v4542_v63 }
  0xf4   : > { %v5530_v30 = vpop.permute.xlu1 %1229 }
  0xf5   : > { %2728 = vmatmul.bf16.gmra.mxu3 %v1036_v54  ;;  %v4533_v54 = vld [vmem:[%s6458_s3 + $0x1d0] sm:$0xff] }
  0xf6   : > { %2826 = vmatmul.bf16.gmra.mxu1 %v5419_v21  ;;  %v839_v21 = vshrl.u32 %v5053_v51, 16  ;;  %v5554_v51 = vsel %vm950_vm3, %v5067_v56, %v5538_v14  ;;  %2911 = vmatpush.bf16.msra.mxu3 %v4533_v54 }
  0xf7   : > { %v1583_v4 = vrot.slane %v5554_v51, 1 }
  0xf8   : > { %v841_v50 = vor.u32 %v839_v21, %v837_v36  ;;  %v1040_v36 = vsel %vm950_vm3, %v5001_v19, %v719_v6  ;;  %v1012_v19 = vsel %vm950_vm3, %v4858_v26, %v5244_v58  ;;  %v1071_v6 = vsel %vm950_vm3, %v5274_v23, %v5401_v29  ;;  %v4541_v26 = vld [vmem:[%s6458_s3 + $0x210] sm:$0xff] }
  0xf9   : > { %v5567_v46 = vsel %vm690_vm1, %v1571_v0, %v1583_v4  ;;  %v4549_v29 = vld [vmem:[%s6458_s3 + $0x250] sm:$0xff]  ;;  %2960 = vmatpush.bf16.msra.mxu0 %v4541_v26  ;;  %v4532_v26 = vld [vmem:[%s6458_s3 + $0x1c8] sm:$0xff] }
  0xfa   : > { %v5558_v62 = vsel %vm569_vm0, %v841_v50, %v845_v43  ;;  %3009 = vmatpush.bf16.msra.mxu1 %v4549_v29  ;;  %2912 = vmatpush.bf16.msra.mxu3 %v4532_v26  ;;  %v859_v26 = vshll.u32 %v5134_v37, 16 }
  0xfb   : > { %891 = vrot.lane.b32.xlu2 %v5558_v62, %s4726_s16 }
  0xfc   : > { %v5545_v7 = vpop.permute.xlu1 %1231 }
  0xfd   : > { %2684 = vmatmul.bf16.gmra.mxu2 %v1009_v34  ;;  %v851_v34 = vshll.u32 %v5067_v56, 16 }
  0xfe   : > { %2782 = vmatmul.bf16.gmra.mxu0 %v1068_v12  ;;  %v5589_v12 = vld [vmem:[%s6459_s4] ss:$0 sm:$0xff] }
  0xff   : > { %v853_v13 = vrot.slane %v851_v34, 1  ;;  %v4524_v34 = vld [vmem:[%s6458_s3 + $0x188] sm:$0xff] }
 0x100   : > { %2863 = vmatpush.bf16.msra.mxu2 %v4524_v34  ;;  %v1075_v34 = vsel %vm950_vm3, %v5339_v55, %v5406_v27  ;;  %v4593_v55 = vunpack.c.l.b16 %v5194_v47 }
 0x101   : > { %v799_v0 = vpop.permute.xlu0 %798 }
 0x102   : > { %v5603_v50 = vsel %vm950_vm3, %v5134_v37, %v799_v0 }
 0x103   : > { %v1595_v54 = vrot.slane %v5603_v50, 1 }
 0x104   : > { %v5576_v59 = vpop.permute.xlu1 %1233 }
 0x105   : > { %2733 = vmatmul.bf16.gmra.mxu3 %v1040_v36  ;;  %v5617_v0 = vsel %vm690_vm1, %v1583_v4, %v1595_v54 }
 0x106   : > { %2831 = vmatmul.bf16.gmra.mxu1 %v5463_v31  ;;  %v847_v31 = vshrl.u32 %v5008_v20, 16  ;;  %v928_v20 = vrot.slane %v5067_v56, 1  ;;  %6516 = vst [vmem:[#allocation19_spill] sm:$0xff] %v5617_v0 }
 0x108   : > { %v849_v21 = vor.u32 %v847_v31, %v845_v43  ;;  %v929_v36 = vsel %vm690_vm1, %v926_v44, %v928_v20 }
 0x109   : > { %944 = vrot.lane.b32.xlu0 %v929_v36, %s4726_s16 }
 0x10a   : > { %v5607_v9 = vsel %vm569_vm0, %v849_v21, %v853_v13 }
 0x10b   : > { %v2572_v3 = vpop.f32.mrf.mxu0  ;;  %893 = vrot.lane.b32.xlu2 %v5607_v9, %s4726_s16 }
 0x10c   : > { %v5594_v58 = vpop.permute.xlu1 %1235  ;;  %v2573_v63 = vadd.f32 %v5589_v12, %v2572_v3 }
 0x10d   : > { %2689 = vmatmul.bf16.gmra.mxu2 %v1012_v19 }
 0x10e   : > { %2787 = vmatmul.bf16.gmra.mxu0 %v1071_v6  ;;  %v1044_v6 = vsel %vm950_vm3, %v5048_v48, %v721_v22  ;;  %v930_v22 = vrot.slane %v5134_v37, 1 }
 0x110   : > { %v2592_v41 = vpop.f32.mrf.mxu2 }
 0x111   : > { %v2593_v43 = vadd.f32 %v5589_v12, %v2592_v41 }
 0x113   : > { %v2574_v3 = vpop.f32.mrf.mxu0  ;;  %v2621_v19 = vpop.f32.mrf.mxu1 }
 0x114   : > { %v2575_v44 = vadd.f32 %v5589_v12, %v2574_v3  ;;  %v5620_v31 = vadd.f32 %v2621_v19, %v2573_v63  ;;  %v5629_v29 = vpop.permute.xlu1 %1237  ;;  %v931_v19 = vsel %vm690_vm1, %v928_v20, %v930_v22  ;;  %v4548_v20 = vld [vmem:[%s6458_s3 + $0x248] sm:$0xff] }
 0x115   : > { %2738 = vmatmul.bf16.gmra.mxu3 %v1044_v6  ;;  %946 = vrot.lane.b32.xlu0 %v931_v19, %s4726_s16 }
 0x116   : > { %2836 = vmatmul.bf16.gmra.mxu1 %v5507_v18  ;;  %v1016_v18 = vsel %vm950_vm3, %v4889_v42, %v5435_v45  ;;  %v4540_v42 = vld [vmem:[%s6458_s3 + $0x208] sm:$0xff] }
 0x117   : > { %2961 = vmatpush.bf16.msra.mxu0 %v4540_v42  ;;  %3010 = vmatpush.bf16.msra.mxu1 %v4548_v20 }
 0x118   : > { %v2594_v48 = vpop.f32.mrf.mxu2  ;;  %v2641_v4 = vpop.f32.mrf.mxu3 }
 0x119   : > { %v2595_v21 = vadd.f32 %v5589_v12, %v2594_v48  ;;  %v5632_v63 = vadd.f32 %v2641_v4, %v2593_v43  ;;  %v801_v6 = vpop.permute.xlu0 %800  ;;  %v855_v43 = vshrl.u32 %v5067_v56, 16  ;;  %v723_v4 = vpop.permute.xlu2 %722 }
 0x11a   : > { %v5658_v56 = vsel %vm950_vm3, %v5194_v47, %v801_v6  ;;  %v5674_v6 = vld [vmem:[%s5088_s14] sm:$0xff]  ;;  %v1048_v20 = vsel %vm950_vm3, %v5204_v53, %v723_v4  ;;  %v1262_v4 = vshrl.u32 %v5103_v15, 16 }
 0x11b   : > { %v2577_v41 = vpop.f32.mrf.mxu0  ;;  %v2623_v36 = vpop.f32.mrf.mxu1  ;;  %v857_v27 = vor.u32 %v855_v43, %v853_v13  ;;  %v4531_v53 = vld [vmem:[%s6458_s3 + $0x1c0] sm:$0xff] }
 0x11c   : > { %v5638_v3 = vadd.f32 %v2623_v36, %v2575_v44  ;;  %v5650_v45 = vpop.permute.xlu1 %1239  ;;  %v861_v44 = vrot.slane %v859_v26, 1  ;;  %v2578_v48 = vadd.f32 %v5589_v12, %v2577_v41  ;;  %v5661_v36 = vpack.c.b16 %v4593_v55, %v4593_v55  ;;  %2913 = vmatpush.bf16.msra.mxu3 %v4531_v53 }
 0x11d   : > { %2694 = vmatmul.bf16.gmra.mxu2 %v1016_v18  ;;  %6517 = vst [vmem:[#allocation20_spill] sm:$0xff] %v5650_v45  ;;  %v6487_v18 = vrot.slane %v5658_v56, 1 }
 0x11e   : > { %2792 = vmatmul.bf16.gmra.mxu0 %v1075_v34  ;;  %6518 = vst [vmem:[#allocation21_spill] sm:$0xff] %v5661_v36  ;;  %v5665_v0 = vsel %vm569_vm0, %v857_v27, %v861_v44  ;;  %v932_v41 = vrot.slane %v5661_v36, 1  ;;  %v6488_v36 = vrot.slane %v5020_v25, 1 }
 0x11f   : > { %895 = vrot.lane.b32.xlu2 %v5665_v0, %s4726_s16  ;;  %v5681_v55 = vsel %vm690_vm1, %v1595_v54, %v6487_v18  ;;  %v863_v18 = vshrl.u32 %v5134_v37, 16 }
 0x120   : > { %v2597_v19 = vpop.f32.mrf.mxu2  ;;  %v2643_v34 = vpop.f32.mrf.mxu3  ;;  %6520 = vst [vmem:[#allocation23_spill] sm:$0xff] %v5681_v55 }
 0x121   : > { %v2598_v13 = vadd.f32 %v5589_v12, %v2597_v19  ;;  %v5668_v43 = vadd.f32 %v2643_v34, %v2595_v21  ;;  %v4523_v19 = vld [vmem:[%s6458_s3 + $0x180] sm:$0xff]  ;;  %v933_v34 = vsel %vm690_vm1, %v930_v22, %v932_v41 }
 0x122   : > { %948 = vrot.lane.b32.xlu0 %v933_v34, %s4726_s16  ;;  %2864 = vmatpush.bf16.msra.mxu2 %v4523_v19  ;;  %v1258_v19 = vshll.u32 %v5674_v6, 16 }
 0x123   : > { %6519 = vst [vmem:[#allocation22_spill] sm:$0xff] %v5668_v43  ;;  %v2579_v26 = vpop.f32.mrf.mxu0  ;;  %v2626_v42 = vpop.f32.mrf.mxu1  ;;  %v5722_v43 = vor.u32 %v863_v18, %v861_v44  ;;  %v4547_v44 = vld [vmem:[%s6458_s3 + $0x240] sm:$0xff] }
 0x124   : > { %v2580_v21 = vadd.f32 %v5589_v12, %v2579_v26  ;;  %v5684_v27 = vadd.f32 %v2626_v42, %v2578_v48  ;;  %v5696_v54 = vpop.permute.xlu1 %1241  ;;  %v1255_v48 = vshrl.u32 %v5674_v6, 16  ;;  %v1020_v26 = vsel %vm950_vm3, %v5015_v24, %v5450_v52  ;;  %v4539_v42 = vld [vmem:[%s6458_s3 + $0x200] sm:$0xff]  ;;  %3011 = vmatpush.bf16.msra.mxu1 %v4547_v44  ;;  %v4562_v44 = vld [vmem:[%s6458_s3 + $0x2b8] sm:$0xff] }
 0x125   : > { %2743 = vmatmul.bf16.gmra.mxu3 %v1048_v20  ;;  %6521 = vst [vmem:[#allocation24_spill] sm:$0xff] %v5696_v54  ;;  %v873_v24 = vshll.u32 %v5194_v47, 16  ;;  %2962 = vmatpush.bf16.msra.mxu0 %v4539_v42 }
 0x126   : > { %2841 = vmatmul.bf16.gmra.mxu1 %v5554_v51  ;;  %v729_v51 = vsel %vm690_vm1, %v5333_v2, %v6488_v36  ;;  %v1257_v20 = vrot.slane %v1255_v48, 7  ;;  %v4597_v2 = vunpack.c.l.b16 %v5267_v10  ;;  %v5717_v36 = vrot.slane %v1262_v4, 7  ;;  %3053 = vmatpush.bf16.msrb.mxu2 %v4562_v44 }
 0x127   : > { %v1265_v48 = vshll.u32 %v5103_v15, 16  ;;  %v1079_v37 = vsel %vm950_vm3, %v729_v51, %v5485_v57  ;;  %v664_v57 = vshll.u32 %v5380_v35, 16 }
 0x128   : > { %v2599_v22 = vpop.f32.mrf.mxu2  ;;  %v2646_v41 = vpop.f32.mrf.mxu3  ;;  %v1260_v54 = vor.u32 %v1258_v19, %v1257_v20 }
 0x129   : > { %v2600_v34 = vadd.f32 %v5589_v12, %v2599_v22  ;;  %v5712_v53 = vadd.f32 %v2646_v41, %v2598_v13  ;;  %v875_v13 = vrot.slane %v873_v24, 1  ;;  %v871_v22 = vpack.c.b16 %v4597_v2, %v4597_v2 }
 0x12a   : > { %1321 = vrot.lane.b32.xlu0 %v1260_v54, %s4726_s16  ;;  %v5728_v41 = vor.u32 %v1265_v48, %v5717_v36  ;;  %v1270_v54 = vshrl.u32 %v5106_v17, 16  ;;  %v1273_v24 = vshll.u32 %v5106_v17, 16  ;;  %v6522_v17 = vrot.slane %v5658_v56, 1 }
 0x12b   : > { %v2582_v52 = vpop.f32.mrf.mxu0  ;;  %v2628_v55 = vpop.f32.mrf.mxu1 }
 0x12c   : > { %v5720_v45 = vadd.f32 %v2628_v55, %v2580_v21  ;;  %v1163_v10 = vpop.permute.xlu1 %1162  ;;  %v5732_v55 = vsel %vm569_vm0, %v5722_v43, %v875_v13  ;;  %v1268_v21 = vsel %vm1253_vm4, %v1257_v20, %v5728_v41  ;;  %v2583_v4 = vadd.f32 %v5589_v12, %v2582_v52 }
 0x12d   : > { %2699 = vmatmul.bf16.gmra.mxu2 %v1020_v26  ;;  %v1394_v18 = vsel %vm950_vm3, %v871_v22, %v1163_v10  ;;  %897 = vrot.lane.b32.xlu2 %v5732_v55, %s4726_s16  ;;  %v725_v26 = vpop.permute.xlu2 %724  ;;  %v5746_v35 = vrot.slane %v1270_v54, 7  ;;  %v877_v20 = vshrl.u32 %v5194_v47, 16 }
 0x12e   : > { %2797 = vmatmul.bf16.gmra.mxu0 %v1079_v37  ;;  %v1619_v51 = vrot.slane %v1394_v18, 1  ;;  %1323 = vrot.lane.b32.xlu1 %v1268_v21, %s4726_s16  ;;  %v881_v37 = vshll.u32 %v871_v22, 16  ;;  %v1052_v18 = vsel %vm950_vm3, %v5274_v23, %v725_v26  ;;  %v666_v21 = vrot.slane %v664_v57, 1  ;;  %v4570_v57 = vld [vmem:[%s6458_s3 + $0x2f8] sm:$0xff] }
 0x12f   : > { %v1275_v54 = vor.u32 %v1273_v24, %v5746_v35  ;;  %v730_v23 = vrot.slane %v5034_v39, 1  ;;  %3102 = vmatpush.bf16.msrb.mxu3 %v4570_v57  ;;  %v1286_v39 = vshrl.u32 %v5165_v60, 16 }
 0x130   : > { %v2602_v42 = vpop.f32.mrf.mxu2  ;;  %v2648_v19 = vpop.f32.mrf.mxu3 }
 0x131   : > { %v2603_v2 = vadd.f32 %v5589_v12, %v2602_v42  ;;  %v5750_v48 = vadd.f32 %v2648_v19, %v2600_v34  ;;  %v5762_v34 = vsel %vm690_vm1, %v6522_v17, %v1619_v51  ;;  %v5767_v42 = vor.u32 %v877_v20, %v875_v13 }
 0x132   : > { %v883_v19 = vrot.slane %v881_v37, 1  ;;  %1367 = vrot.lane.b32.xlu0 %v1275_v54, %s4726_s16  ;;  %v667_v13 = vsel %vm569_vm0, %v5025_v32, %v666_v21  ;;  %v6523_v51 = vrot.slane %v5020_v25, 1  ;;  %v4676_v32 = vld [vmem:[%s4946_s11] sm:$0xff]  ;;  %v1289_v17 = vshll.u32 %v5165_v60, 16 }
 0x133   : > { %v2584_v10 = vpop.f32.mrf.mxu0  ;;  %v2631_v52 = vpop.f32.mrf.mxu1  ;;  %v1024_v44 = vsel %vm950_vm3, %v667_v13, %v5483_v16  ;;  %v4578_v16 = vld [vmem:[%s6458_s3 + $0x338] sm:$0xff] }
 0x134   : > { %v2585_v47 = vadd.f32 %v5589_v12, %v2584_v10  ;;  %v5765_v22 = vadd.f32 %v2631_v52, %v2583_v4  ;;  %v884_v4 = vsel %vm569_vm0, %v5767_v42, %v883_v19  ;;  %v731_v24 = vsel %vm690_vm1, %v6523_v51, %v730_v23  ;;  %3151 = vmatpush.bf16.msrb.mxu0 %v4578_v16  ;;  %v1228_v16 = vpop.permute.xlu0 %1227 }
 0x135   : > { %2748 = vmatmul.bf16.gmra.mxu3 %v1052_v18  ;;  %899 = vrot.lane.b32.xlu2 %v884_v4, %s4726_s16  ;;  %v1278_v10 = vshrl.u32 %v5137_v38, 16  ;;  %v5790_v52 = vrot.slane %v1286_v39, 7  ;;  %v806_v18 = vshll.u32 %v4676_v32, 16  ;;  %v706_v19 = vrot.slane %v4884_v40, 1  ;;  %v4582_v40 = vld [vmem:[%s6458_s3 + $0x358] sm:$0xff]  ;;  %v727_v13 = vpop.permute.xlu2 %726 }
 0x136   : > { %2846 = vmatmul.bf16.gmra.mxu1 %v5603_v50  ;;  %1375 = vrot.lane.b32.xlu1 %v5103_v15, %s4726_s16  ;;  %v1083_v57 = vsel %vm950_vm3, %v731_v24, %v5538_v14 }
 0x137   : > { %v1280_v23 = vrot.slane %v1278_v10, 7  ;;  %v1291_v4 = vor.u32 %v1289_v17, %v5790_v52  ;;  %v707_v39 = vsel %vm690_vm1, %v5258_v33, %v706_v19  ;;  %3204 = vmatpush.bf16.msrb.mxu1 %v4582_v40  ;;  %v1281_v10 = vshll.u32 %v5137_v38, 16  ;;  %v4561_v17 = vld [vmem:[%s6458_s3 + $0x2b0] sm:$0xff]  ;;  %v6525_v40 = vld [vmem:[#allocation9_spill] sm:$0xff] }
 0x138   : > { %v2604_v26 = vpop.f32.mrf.mxu2  ;;  %v2651_v50 = vpop.f32.mrf.mxu3  ;;  %v4569_v38 = vld [vmem:[%s6458_s3 + $0x2f0] sm:$0xff]  ;;  %3054 = vmatpush.bf16.msrb.mxu2 %v4561_v17 }
 0x139   : > { %v2605_v20 = vadd.f32 %v5589_v12, %v2604_v26  ;;  %v5787_v37 = vadd.f32 %v2651_v50, %v2603_v2  ;;  %v5801_v2 = vsel %vm1253_vm4, %v5717_v36, %v1275_v54  ;;  %v5817_v14 = vsel %vm1253_vm4, %v1280_v23, %v1291_v4  ;;  %v6524_v4 = vld [vmem:[#allocation2_spill] sm:$0xff]  ;;  %3103 = vmatpush.bf16.msrb.mxu3 %v4569_v38 }
 0x13a   : > { %1325 = vrot.lane.b32.xlu0 %v5801_v2, %s4726_s16  ;;  %v804_v36 = vshrl.u32 %v4676_v32, 16  ;;  %v808_v54 = vrot.slane %v806_v18, 1  ;;  %v1283_v19 = vor.u32 %v1281_v10, %v1280_v23 }
 0x13b   : > { %v2587_v21 = vpop.f32.mrf.mxu0  ;;  %v2633_v15 = vpop.f32.mrf.mxu1 }
 0x13c   : > { %v5796_v25 = vadd.f32 %v2633_v15, %v2585_v47  ;;  %v2588_v47 = vadd.f32 %v5589_v12, %v2587_v21  ;;  %v1056_v21 = vsel %vm950_vm3, %v707_v39, %v727_v13  ;;  %v809_v15 = vor.u32 %v808_v54, %v804_v36 }
 0x13d   : > { %2704 = vmatmul.bf16.gmra.mxu2 %v1024_v44  ;;  %1243 = vrot.lane.b32.xlu2 %v5308_v28, %s4726_s16  ;;  %v1294_v36 = vshrl.u32 %v6525_v40, 16  ;;  %v935_v17 = vpop.permute.xlu2 %934  ;;  %v6535_v28 = vld [vmem:[#allocation8_spill] sm:$0xff] }
 0x13e   : > { %2802 = vmatmul.bf16.gmra.mxu0 %v1083_v57  ;;  %1329 = vrot.lane.b32.xlu1 %v5817_v14, %s4726_s16  ;;  %v1205_v57 = vrot.slane %v5674_v6, 7  ;;  %v814_v23 = vsel %vm569_vm0, %v809_v15, %v6524_v4  ;;  %v6527_v15 = vld [vmem:[#allocation18_spill] sm:$0xff] }
 0x13f   : > { %v1105_v10 = vsel %vm950_vm3, %v814_v23, %v5498_v61  ;;  %v4577_v61 = vld [vmem:[%s6458_s3 + $0x330] sm:$0xff] }
 0x140   : > { %v2607_v26 = vpop.f32.mrf.mxu2  ;;  %v2653_v50 = vpop.f32.mrf.mxu3  ;;  %3152 = vmatpush.bf16.msrb.mxu0 %v4577_v61 }
 0x141   : > { %v2608_v51 = vadd.f32 %v5589_v12, %v2607_v26  ;;  %v5825_v24 = vadd.f32 %v2653_v50, %v2605_v20  ;;  %v5842_v20 = vsel %vm1253_vm4, %v5746_v35, %v1283_v19  ;;  %v5856_v26 = vrot.slane %v1294_v36, 7 }
 0x142   : > { %v1297_v50 = vshll.u32 %v6525_v40, 16  ;;  %v1136_v36 = vsel %vm950_vm3, %v5469_v1, %v935_v17 }
 0x143   : > { %v2589_v32 = vpop.f32.mrf.mxu0  ;;  %v2636_v18 = vpop.f32.mrf.mxu1 }
 0x144   : > { %v2590_v33 = vadd.f32 %v5589_v12, %v2589_v32  ;;  %v5830_v44 = vadd.f32 %v2636_v18, %v2588_v47 }
 0x145   : > { %2753 = vmatmul.bf16.gmra.mxu3 %v1056_v21  ;;  %1327 = vrot.lane.b32.xlu2 %v5842_v20, %s4726_s16 }
 0x146   : > { %2851 = vmatmul.bf16.gmra.mxu1 %v5658_v56  ;;  %1381 = vrot.lane.b32.xlu1 %v5165_v60, %s4726_s16  ;;  %v6526_v56 = vld [vmem:[#allocation4_spill] sm:$0xff] }
 0x147   : > { %v1207_v54 = vsel %vm1204_vm2, %v1205_v57, %v6526_v56 }
 0x148   : > { %v2609_v47 = vpop.f32.mrf.mxu2  ;;  %v2656_v35 = vpop.f32.mrf.mxu3  ;;  %v5863_v60 = vsel %vm950_vm3, %v1207_v54, %v5530_v30  ;;  %v4560_v54 = vld [vmem:[%s6458_s3 + $0x2a8] sm:$0xff] }
 0x149   : > { %v2610_v13 = vadd.f32 %v5589_v12, %v2609_v47  ;;  %v5854_v39 = vadd.f32 %v2656_v35, %v2608_v51  ;;  %v1397_v12 = vsel %vm950_vm3, %v1205_v57, %v1228_v16  ;;  %v1299_v51 = vor.u32 %v1297_v50, %v5856_v26  ;;  %v5881_v57 = vld [vmem:[%s5088_s14 + $0x10] sm:$0xff]  ;;  %v4568_v47 = vld [vmem:[%s6458_s3 + $0x2e8] sm:$0xff]  ;;  %3055 = vmatpush.bf16.msrb.mxu2 %v4560_v54  ;;  %v5898_v35 = vld [vmem:[%s5088_s14 + $0x18] sm:$0xff] }
 0x14a   : > { %v1533_v30 = vrot.slane %v5863_v60, 1  ;;  %3104 = vmatpush.bf16.msrb.mxu3 %v4568_v47 }
 0x14b   : > { %v2638_v32 = vpop.f32.mrf.mxu1  ;;  %v2768_v18 = vpop.f32.mrf.mxu0  ;;  %v5875_v19 = vsel %vm1253_vm4, %v5790_v52, %v1299_v51 }
 0x14c   : > { %v5865_v21 = vadd.f32 %v2638_v32, %v2590_v33  ;;  %v1532_v33 = vrot.slane %v1397_v12, 1  ;;  %1331 = vrot.lane.b32.xlu0 %v5875_v19, %s4726_s16 }
 0x14d   : > { %2865 = vmatmul.bf16.vlgmr.msra.gmra.mxu2 %v1105_v10  ;;  %1377 = vrot.lane.b32.xlu2 %v5881_v57, %s4726_s16 }
 0x14e   : > { %2963 = vmatmul.bf16.vlgmr.msra.gmra.mxu0 %v6527_v15  ;;  %v1534_v56 = vsel %vm690_vm1, %v1532_v33, %v1533_v30  ;;  %v6528_v15 = vld [vmem:[#allocation3_spill] sm:$0xff]  ;;  %v6529_v33 = vld [vmem:[#allocation6_spill] sm:$0xff] }
 0x150   : > { %v2658_v38 = vpop.f32.mrf.mxu3  ;;  %v2670_v4 = vpop.f32.mrf.mxu2 }
 0x151   : > { %v5885_v23 = vadd.f32 %v2658_v38, %v2610_v13  ;;  %v2671_v52 = vadd.f32 %v2670_v4, %v5620_v31  ;;  %v888_v31 = vpop.permute.xlu2 %887  ;;  %v5903_v13 = vld [vmem:[%s5088_s14 + $0x28] sm:$0xff]  ;;  %v5913_v38 = vsel %vm950_vm3, %v6529_v33, %v5545_v7 }
 0x152   : > { %v1109_v17 = vsel %vm950_vm3, %v6528_v15, %v888_v31  ;;  %v4576_v4 = vld [vmem:[%s6458_s3 + $0x328] sm:$0xff] }
 0x153   : > { %v2770_v16 = vpop.f32.mrf.mxu0  ;;  %v2817_v40 = vpop.f32.mrf.mxu1  ;;  %3153 = vmatpush.bf16.msrb.mxu0 %v4576_v4 }
 0x154   : > { %1383 = vrot.lane.b32.xlu0 %v5903_v13, %s4726_s16 }
 0x155   : > { %2914 = vmatmul.bf16.vlgmr.msra.gmra.mxu3 %v1136_v36  ;;  %1379 = vrot.lane.b32.xlu2 %v5898_v35, %s4726_s16  ;;  %v937_v36 = vpop.permute.xlu0 %936 }
 0x156   : > { %3012 = vmatmul.bf16.vlgmr.msra.gmra.mxu1 %v1534_v56 }
 0x158   : > { %v2672_v50 = vpop.f32.mrf.mxu2  ;;  %v2719_v10 = vpop.f32.mrf.mxu3 }
 0x159   : > { %v2673_v32 = vadd.f32 %v2672_v50, %v5638_v3  ;;  %v2720_v60 = vadd.f32 %v2719_v10, %v2671_v52  ;;  %v4581_v3 = vld [vmem:[%s6458_s3 + $0x350] sm:$0xff]  ;;  %v1139_v50 = vsel %vm950_vm3, %v5512_v11, %v937_v36  ;;  %v890_v15 = vpop.permute.xlu2 %889 }
 0x15a   : > { %3205 = vmatpush.bf16.msrb.mxu1 %v4581_v3  ;;  %v5940_v3 = vld [vmem:[%s5088_s14 + $0x30] sm:$0xff] }
 0x15b   : > { %v2773_v12 = vpop.f32.mrf.mxu0  ;;  %v2819_v51 = vpop.f32.mrf.mxu1  ;;  %v2769_v61 = vadd.f32 %v2768_v18, %v2720_v60  ;;  %v1549_v18 = vrot.slane %v5913_v38, 1 }
 0x15d   : > { %2870 = vmatmul.bf16.gmra.mxu2 %v1109_v17  ;;  %v5922_v52 = vadd.f32 %v2817_v40, %v2769_v61  ;;  %v4559_v40 = vld [vmem:[%s6458_s3 + $0x2a0] sm:$0xff]  ;;  %v1550_v60 = vsel %vm690_vm1, %v1533_v30, %v1549_v18  ;;  %v6530_v17 = vld [vmem:[#allocation12_spill] sm:$0xff]  ;;  %v1302_v30 = vshrl.u32 %v5940_v3, 16 }
 0x15e   : > { %2968 = vmatmul.bf16.gmra.mxu0 %v5428_v49  ;;  %3056 = vmatpush.bf16.msrb.mxu2 %v4559_v40  ;;  %v1310_v61 = vshrl.u32 %v6530_v17, 16 }
 0x160   : > { %v2675_v7 = vpop.f32.mrf.mxu2  ;;  %v2721_v56 = vpop.f32.mrf.mxu3  ;;  %v5943_v36 = vrot.slane %v1310_v61, 7 }
 0x161   : > { %v2676_v54 = vadd.f32 %v2675_v7, %v5684_v27  ;;  %v2722_v49 = vadd.f32 %v2721_v56, %v2673_v32  ;;  %v4567_v27 = vld [vmem:[%s6458_s3 + $0x2e0] sm:$0xff] }
 0x162   : > { %3105 = vmatpush.bf16.msrb.mxu3 %v4567_v27 }
 0x163   : > { %v2775_v47 = vpop.f32.mrf.mxu0  ;;  %v2822_v31 = vpop.f32.mrf.mxu1  ;;  %v2771_v10 = vadd.f32 %v2770_v16, %v2722_v49  ;;  %v1313_v49 = vshll.u32 %v6530_v17, 16 }
 0x165   : > { %2919 = vmatmul.bf16.gmra.mxu3 %v1139_v50  ;;  %v5935_v32 = vadd.f32 %v2819_v51, %v2771_v10  ;;  %v1113_v51 = vsel %vm950_vm3, %v5469_v1, %v890_v15  ;;  %v1304_v10 = vrot.slane %v1302_v30, 7  ;;  %v1315_v40 = vor.u32 %v1313_v49, %v5943_v36 }
 0x166   : > { %3017 = vmatmul.bf16.gmra.mxu1 %v1550_v60  ;;  %v4575_v60 = vld [vmem:[%s6458_s3 + $0x320] sm:$0xff] }
 0x167   : > { %v5961_v1 = vsel %vm1253_vm4, %v1304_v10, %v1315_v40  ;;  %3154 = vmatpush.bf16.msrb.mxu0 %v4575_v60  ;;  %v5988_v40 = vld [vmem:[%s5088_s14 + $0x38] sm:$0xff] }
 0x168   : > { %v2677_v16 = vpop.f32.mrf.mxu2  ;;  %v2724_v33 = vpop.f32.mrf.mxu3  ;;  %1335 = vrot.lane.b32.xlu1 %v5961_v1, %s4726_s16 }
 0x169   : > { %v2678_v38 = vadd.f32 %v2677_v16, %v5720_v45  ;;  %v2725_v4 = vadd.f32 %v2724_v33, %v2676_v54  ;;  %v6531_v45 = vld [vmem:[#allocation7_spill] sm:$0xff]  ;;  %v1305_v16 = vshll.u32 %v5940_v3, 16 }
 0x16a   : > { %v5952_v54 = vsel %vm950_vm3, %v6531_v45, %v5576_v59 }
 0x16b   : > { %v2778_v7 = vpop.f32.mrf.mxu0  ;;  %v2824_v56 = vpop.f32.mrf.mxu1  ;;  %v2774_v50 = vadd.f32 %v2773_v12, %v2725_v4  ;;  %v6489_v59 = vrot.slane %v5952_v54, 1  ;;  %v1307_v49 = vor.u32 %v1305_v16, %v1304_v10 }
 0x16c   : > { %v939_v12 = vpop.permute.xlu0 %938  ;;  %v892_v10 = vpop.permute.xlu2 %891 }
 0x16d   : > { %2875 = vmatmul.bf16.gmra.mxu2 %v1113_v51  ;;  %v5958_v27 = vadd.f32 %v2822_v31, %v2774_v50  ;;  %v1142_v4 = vsel %vm950_vm3, %v5558_v62, %v939_v12  ;;  %v4558_v51 = vld [vmem:[%s6458_s3 + $0x298] sm:$0xff]  ;;  %v5981_v50 = vsel %vm1253_vm4, %v5856_v26, %v1307_v49 }
 0x16e   : > { %2973 = vmatmul.bf16.gmra.mxu0 %v5474_v5  ;;  %3057 = vmatpush.bf16.msrb.mxu2 %v4558_v51  ;;  %v1117_v51 = vsel %vm950_vm3, %v5512_v11, %v892_v10 }
 0x16f   : > { %1333 = vrot.lane.b32.xlu2 %v5981_v50, %s4726_s16 }
 0x170   : > { %v2680_v15 = vpop.f32.mrf.mxu2  ;;  %v2726_v17 = vpop.f32.mrf.mxu3  ;;  %1387 = vrot.lane.b32.xlu1 %v5988_v40, %s4726_s16 }
 0x171   : > { %v2681_v5 = vadd.f32 %v2680_v15, %v5765_v22  ;;  %v2727_v61 = vadd.f32 %v2726_v17, %v2678_v38  ;;  %v1562_v22 = vsel %vm690_vm1, %v1549_v18, %v6489_v59  ;;  %v4566_v38 = vld [vmem:[%s6458_s3 + $0x2d8] sm:$0xff]  ;;  %v5993_v18 = vld [vmem:[%s5088_s14 + $0x40] sm:$0xff]  }
 0x172   : > { %3106 = vmatpush.bf16.msrb.mxu3 %v4566_v38  ;;  %6532 = vst [vmem:[#allocation2_spill] sm:$0xff] %v5993_v18  ;;  %v1341_v60 = vshrl.u32 %v5993_v18, 16  ;;  %v4601_v26 = vunpack.c.l.b16 %v5993_v18  ;;  %v1344_v16 = vshll.u32 %v5993_v18, 16 }
 0x173   : > { %v2780_v33 = vpop.f32.mrf.mxu0  ;;  %v2827_v31 = vpop.f32.mrf.mxu1  ;;  %v2776_v30 = vadd.f32 %v2775_v47, %v2727_v61 }
 0x174   : > { %v5998_v61 = vrot.slane %v1341_v60, 7  ;;  %v6003_v49 = vpack.c.b16 %v4601_v26, %v4601_v26 }
 0x175   : > { %2924 = vmatmul.bf16.gmra.mxu3 %v1142_v4  ;;  %v5983_v47 = vadd.f32 %v2824_v56, %v2776_v30 }
 0x176   : > { %3022 = vmatmul.bf16.gmra.mxu1 %v1562_v22  ;;  %6533 = vst [vmem:[#allocation9_spill] sm:$0xff] %v5998_v61  ;;  %v1346_v38 = vor.u32 %v1344_v16, %v5998_v61  ;;  %v1318_v59 = vshll.u32 %v6003_v49, 16 }
 0x177   : > { %6534 = vst [vmem:[#allocation4_spill] sm:$0xff] %v6003_v49  ;;  %1385 = vrot.lane.b32.xlu2 %v5940_v3, %s4726_s16 }
 0x178   : > { %v2682_v12 = vpop.f32.mrf.mxu2  ;;  %v2729_v56 = vpop.f32.mrf.mxu3  ;;  %v6016_v11 = vsel %vm1253_vm4, %v5943_v36, %v1346_v38 }
 0x179   : > { %v2683_v15 = vadd.f32 %v2682_v12, %v5796_v25  ;;  %v2730_v17 = vadd.f32 %v2729_v56, %v2681_v5  ;;  %v1409_v25 = vsel %vm950_vm3, %v6535_v28, %v5594_v58  ;;  %v4574_v5 = vld [vmem:[%s6458_s3 + $0x318] sm:$0xff]  ;;  %6536 = vst [vmem:[#allocation18_spill] sm:$0xff] %v6016_v11  ;;  %1369 = vrot.lane.b32.xlu0 %v6016_v11, %s4726_s16  ;;  %v941_v58 = vpop.permute.xlu0 %940  ;;  %v6547_v11 = vld [vmem:[#allocation23_spill] sm:$0xff] }
 0x17a   : > { %3155 = vmatpush.bf16.msrb.mxu0 %v4574_v5  ;;  %v1573_v60 = vrot.slane %v1409_v25, 1 }
 0x17b   : > { %v2783_v4 = vpop.f32.mrf.mxu0  ;;  %v2829_v30 = vpop.f32.mrf.mxu1  ;;  %v2779_v22 = vadd.f32 %v2778_v7, %v2730_v17  ;;  %v4580_v7 = vld [vmem:[%s6458_s3 + $0x348] sm:$0xff] }
 0x17c   : > { %3206 = vmatpush.bf16.msrb.mxu1 %v4580_v7 }
 0x17d   : > { %2880 = vmatmul.bf16.gmra.mxu2 %v1117_v51  ;;  %v6021_v10 = vadd.f32 %v2827_v31, %v2779_v22  ;;  %v1145_v51 = vsel %vm950_vm3, %v5607_v9, %v941_v58  ;;  %v6537_v22 = vrot.slane %v5952_v54, 1 }
 0x17e   : > { %2978 = vmatmul.bf16.gmra.mxu0 %v5518_v8  ;;  %v1320_v8 = vsel %vm1253_vm4, %v5943_v36, %v1318_v59  ;;  %v4557_v59 = vld [vmem:[%s6458_s3 + $0x290] sm:$0xff] }
 0x17f   : > { %1337 = vrot.lane.b32.xlu1 %v1320_v8, %s4726_s16  ;;  %v1574_v38 = vsel %vm690_vm1, %v6537_v22, %v1573_v60  ;;  %3058 = vmatpush.bf16.msrb.mxu2 %v4557_v59 }
 0x180   : > { %v2685_v26 = vpop.f32.mrf.mxu2  ;;  %v2731_v12 = vpop.f32.mrf.mxu3 }
 0x181   : > { %v2686_v31 = vadd.f32 %v2685_v26, %v5830_v44  ;;  %v2732_v56 = vadd.f32 %v2731_v12, %v2683_v15  ;;  %v4565_v44 = vld [vmem:[%s6458_s3 + $0x2d0] sm:$0xff]  ;;  %1389 = vrot.lane.b32.xlu0 %v5993_v18, %s4726_s16 }
 0x182   : > { %3107 = vmatpush.bf16.msrb.mxu3 %v4565_v44 }
 0x183   : > { %v2785_v17 = vpop.f32.mrf.mxu0  ;;  %v2832_v16 = vpop.f32.mrf.mxu1  ;;  %v2781_v36 = vadd.f32 %v2780_v33, %v2732_v56 }
 0x184   : > { %v894_v33 = vpop.permute.xlu2 %893 }
 0x185   : > { %2929 = vmatmul.bf16.gmra.mxu3 %v1145_v51  ;;  %v6042_v15 = vadd.f32 %v2829_v30, %v2781_v36  ;;  %v1121_v26 = vsel %vm950_vm3, %v5558_v62, %v894_v33  ;;  %v6538_v30 = vld [vmem:[#allocation10_spill] sm:$0xff]  ;;  %v4573_v51 = vld [vmem:[%s6458_s3 + $0x310] sm:$0xff] }
 0x186   : > { %3027 = vmatmul.bf16.gmra.mxu1 %v1574_v38  ;;  %v1412_v56 = vsel %vm950_vm3, %v6538_v30, %v5629_v29  ;;  %3156 = vmatpush.bf16.msrb.mxu0 %v4573_v51 }
 0x187   : > { %v1585_v59 = vrot.slane %v1412_v56, 1 }
 0x188   : > { %v2687_v25 = vpop.f32.mrf.mxu2  ;;  %v2734_v5 = vpop.f32.mrf.mxu3 }
 0x189   : > { %v2688_v54 = vadd.f32 %v2687_v25, %v5865_v21  ;;  %v2735_v7 = vadd.f32 %v2734_v5, %v2686_v31  ;;  %v943_v21 = vpop.permute.xlu0 %942  ;;  %v1586_v25 = vsel %vm690_vm1, %v1573_v60, %v1585_v59  ;;  %v4564_v5 = vld [vmem:[%s6458_s3 + $0x2c8] sm:$0xff] }
 0x18a   : > { %3108 = vmatpush.bf16.msrb.mxu3 %v4564_v5 }
 0x18b   : > { %v2788_v8 = vpop.f32.mrf.mxu0  ;;  %v2834_v58 = vpop.f32.mrf.mxu1  ;;  %v2784_v12 = vadd.f32 %v2783_v4, %v2735_v7 }
 0x18c   : > { %v896_v31 = vpop.permute.xlu2 %895 }
 0x18d   : > { %2885 = vmatmul.bf16.gmra.mxu2 %v1121_v26  ;;  %v6056_v36 = vadd.f32 %v2832_v16, %v2784_v12  ;;  %v4556_v16 = vld [vmem:[%s6458_s3 + $0x288] sm:$0xff]  ;;  %v6539_v26 = vld [vmem:[#allocation22_spill] sm:$0xff]  ;;  %v1125_v60 = vsel %vm950_vm3, %v5607_v9, %v896_v31 }
 0x18e   : > { %2983 = vmatmul.bf16.gmra.mxu0 %v5567_v46  ;;  %v1148_v46 = vsel %vm950_vm3, %v5665_v0, %v943_v21  ;;  %3059 = vmatpush.bf16.msrb.mxu2 %v4556_v16  ;;  %v6088_v9 = vld [vmem:[%s5088_s14 + $0x48] sm:$0xff]  }
 0x18f   : > { %6543 = vst [vmem:[#allocation3_spill] sm:$0xff] %v6088_v9  ;;  %v1356_v31 = vshrl.u32 %v6088_v9, 16 }
 0x190   : > { %v2690_v22 = vpop.f32.mrf.mxu2  ;;  %v2736_v62 = vpop.f32.mrf.mxu3 }
 0x191   : > { %v2691_v4 = vadd.f32 %v2690_v22, %v5632_v63  ;;  %v2737_v38 = vadd.f32 %v2736_v62, %v2688_v54  ;;  %v6540_v62 = vld [vmem:[#allocation20_spill] sm:$0xff] }
 0x193   : > { %v2790_v44 = vpop.f32.mrf.mxu0  ;;  %v2837_v29 = vpop.f32.mrf.mxu1  ;;  %v2786_v33 = vadd.f32 %v2785_v17, %v2737_v38  ;;  %v6541_v38 = vld [vmem:[#allocation11_spill] sm:$0xff] }
 0x194   : > { %v898_v54 = vpop.permute.xlu2 %897 }
 0x195   : > { %2934 = vmatmul.bf16.gmra.mxu3 %v1148_v46  ;;  %v6068_v63 = vadd.f32 %v2834_v58, %v2786_v33  ;;  %v6076_v58 = vsel %vm950_vm3, %v6541_v38, %v6540_v62  ;;  %v6542_v46 = vld [vmem:[#allocation19_spill] sm:$0xff] }
 0x196   : > { %3032 = vmatmul.bf16.gmra.mxu1 %v1586_v25  ;;  %v4572_v33 = vld [vmem:[%s6458_s3 + $0x308] sm:$0xff]  ;;  %v1597_v25 = vrot.slane %v6076_v58, 1 }
 0x197   : > { %3157 = vmatpush.bf16.msrb.mxu0 %v4572_v33  ;;  %v1359_v33 = vshll.u32 %v6088_v9, 16 }
 0x198   : > { %v2692_v7 = vpop.f32.mrf.mxu2  ;;  %v2739_v17 = vpop.f32.mrf.mxu3 }
 0x199   : > { %v2693_v12 = vadd.f32 %v2692_v7, %v6539_v26  ;;  %v2740_v56 = vadd.f32 %v2739_v17, %v2691_v4  ;;  %v4579_v4 = vld [vmem:[%s6458_s3 + $0x340] sm:$0xff] }
 0x19a   : > { %3207 = vmatpush.bf16.msrb.mxu1 %v4579_v4 }
 0x19b   : > { %v2793_v51 = vpop.f32.mrf.mxu0  ;;  %v2839_v21 = vpop.f32.mrf.mxu1  ;;  %v2789_v22 = vadd.f32 %v2788_v8, %v2740_v56 }
 0x19c   : > { %v945_v8 = vpop.permute.xlu0 %944  ;;  %v6093_v56 = vpop.permute.xlu2 %899 }
 0x19d   : > { %2890 = vmatmul.bf16.gmra.mxu2 %v1125_v60  ;;  %v6085_v16 = vadd.f32 %v2837_v29, %v2789_v22  ;;  %v6095_v60 = vrot.slane %v1356_v31, 7  ;;  %v1152_v62 = vsel %vm950_vm3, %v5732_v55, %v945_v8  ;;  %v4563_v55 = vld [vmem:[%s6458_s3 + $0x2c0] sm:$0xff] }
 0x19e   : > { %2988 = vmatmul.bf16.gmra.mxu0 %v6542_v46  ;;  %v4605_v46 = vunpack.c.l.b16 %v6088_v9  ;;  %3109 = vmatpush.bf16.msrb.mxu3 %v4563_v55 }
 0x19f   : > { %v1361_v31 = vor.u32 %v1359_v33, %v6095_v60 }
 0x1a0   : > { %v2695_v5 = vpop.f32.mrf.mxu2  ;;  %v2741_v7 = vpop.f32.mrf.mxu3  ;;  %v6105_v4 = vpack.c.b16 %v4605_v46, %v4605_v46 }
 0x1a1   : > { %v2696_v17 = vadd.f32 %v2695_v5, %v5712_v53  ;;  %v2742_v26 = vadd.f32 %v2741_v7, %v2693_v12  ;;  %v4555_v53 = vld [vmem:[%s6458_s3 + $0x280] sm:$0xff]  ;;  %v1598_v12 = vsel %vm690_vm1, %v1585_v59, %v1597_v25  ;;  %v6118_v59 = vld [vmem:[%s4946_s11 + $0x48] sm:$0xff]   ;;  %s3907_s11 = sshll.u32 %s6573_s25, 5 }
 0x1a2   : > { %6544 = vst [vmem:[#allocation6_spill] sm:$0xff] %v6105_v4  ;;  %3060 = vmatpush.bf16.msrb.mxu2 %v4555_v53  ;;  %1391 = vrot.lane.b32.xlu0 %v6105_v4, %s4726_s16  ;;  %v905_v5 = vshll.u32 %v6118_v59, 16  ;;  %v6546_v4 = vld [vmem:[#allocation14_spill] sm:$0xff] }
 0x1a3   : > { %v2795_v29 = vpop.f32.mrf.mxu0  ;;  %v2842_v22 = vpop.f32.mrf.mxu1  ;;  %v2791_v58 = vadd.f32 %v2790_v44, %v2742_v26  ;;  %v1362_v44 = vsel %vm1253_vm4, %v5998_v61, %v1361_v31  ;;  %v6545_v61 = vld [vmem:[#allocation24_spill] sm:$0xff] }
 0x1a4   : > { %1371 = vrot.lane.b32.xlu2 %v1362_v44, %s4726_s16  ;;  %v947_v33 = vpop.permute.xlu0 %946  ;;  %v907_v31 = vrot.slane %v905_v5, 1  ;;  %v1244_v44 = vpop.permute.xlu2 %1243  ;;  %v6131_v49 = vsel %vm950_vm3, %v6546_v4, %v6545_v61 }
 0x1a5   : > { %2939 = vmatmul.bf16.gmra.mxu3 %v1152_v62  ;;  %v6111_v8 = vadd.f32 %v2839_v21, %v2791_v58  ;;  %v4571_v21 = vld [vmem:[%s6458_s3 + $0x300] sm:$0xff] }
 0x1a6   : > { %3037 = vmatmul.bf16.gmra.mxu1 %v1598_v12  ;;  %v1129_v12 = vsel %vm950_vm3, %v5665_v0, %v898_v54  ;;  %3158 = vmatpush.bf16.msrb.mxu0 %v4571_v21 }
 0x1a8   : > { %v2697_v7 = vpop.f32.mrf.mxu2  ;;  %v2744_v26 = vpop.f32.mrf.mxu3 }
 0x1a9   : > { %v2698_v62 = vadd.f32 %v2697_v7, %v5750_v48  ;;  %v2745_v46 = vadd.f32 %v2744_v26, %v2696_v17  ;;  %v501_v17 = vld [vmem:[%s5088_s14 + $0x50] sm:$0xf]  ;;  %v908_v7 = vsel %vm569_vm0, %v5767_v42, %v907_v31  ;;  %v6549_v26 = vld [vmem:[#allocation21_spill] sm:$0xff] }
 0x1aa   : > { %v867_v0 = vshll.u32 %v6549_v26, 16  ;;  %v1353_v54 = vunpack.c.l.b16 %v501_v17  ;;  %v1324_v26 = vpop.permute.xlu1 %1323 }
 0x1ab   : > { %v2798_v58 = vpop.f32.mrf.mxu0  ;;  %v2844_v53 = vpop.f32.mrf.mxu1  ;;  %v2794_v55 = vadd.f32 %v2793_v51, %v2745_v46  ;;  %v1609_v51 = vrot.slane %v6131_v49, 1 }
 0x1ac   : > { %v6142_v18 = vpack.c.b16 %v1353_v54, %v1353_v54  ;;  %v869_v9 = vrot.slane %v867_v0, 1  ;;  %v6147_v49 = vpop.permute.xlu2 %1327  ;;  %v6550_v0 = vld [vmem:[#allocation17_spill] sm:$0xff] }
 0x1ad   : > { %2895 = vmatmul.bf16.gmra.mxu2 %v1129_v12  ;;  %v6134_v48 = vadd.f32 %v2842_v22, %v2794_v55  ;;  %v1156_v22 = vsel %vm950_vm3, %v908_v7, %v947_v33  ;;  %v1610_v42 = vsel %vm690_vm1, %v1597_v25, %v1609_v51  ;;  %v909_v25 = vshrl.u32 %v6118_v59, 16 }
 0x1ae   : > { %2993 = vmatmul.bf16.gmra.mxu0 %v6547_v11  ;;  %v1364_v17 = vshll.u32 %v6142_v18, 16  ;;  %v870_v33 = vsel %vm569_vm0, %v5722_v43, %v869_v9  ;;  %v913_v54 = vshll.u32 %v6550_v0, 16  ;;  %v6552_v0 = vld [vmem:[#allocation5_spill] sm:$0xff] }
 0x1af   : > { %6548 = vst [vmem:[#allocation12_spill] sm:$0xff] %v6134_v48  ;;  %v949_v48 = vpop.permute.xlu0 %948  ;;  %v911_v59 = vor.u32 %v909_v25, %v907_v31  ;;  %v1426_v31 = vsel %vm950_vm3, %v6531_v45, %v1324_v26 }
 0x1b0   : > { %v2700_v5 = vpop.f32.mrf.mxu2  ;;  %v2746_v21 = vpop.f32.mrf.mxu3 }
 0x1b1   : > { %v2701_v46 = vadd.f32 %v2700_v5, %v5787_v37  ;;  %v2747_v61 = vadd.f32 %v2746_v21, %v2698_v62  ;;  %v1366_v62 = vsel %vm1253_vm4, %v6095_v60, %v1364_v17 }
 0x1b2   : > { %1373 = vrot.lane.b32.xlu2 %v1366_v62, %s4726_s16  ;;  %s3906_s16 = sshll.u32 %s6579_s24, 3 }
 0x1b3   : > { %v2800_v12 = vpop.f32.mrf.mxu0  ;;  %v2847_v11 = vpop.f32.mrf.mxu1  ;;  %v2796_v55 = vadd.f32 %v2795_v29, %v2747_v61 }
 0x1b5   : > { %2944 = vmatmul.bf16.gmra.mxu3 %v1156_v22  ;;  %v6149_v37 = vadd.f32 %v2844_v53, %v2796_v55  ;;  %v1133_v22 = vsel %vm950_vm3, %v870_v33, %v6093_v56  ;;  %v915_v55 = vrot.slane %v913_v54, 1 }
 0x1b6   : > { %3042 = vmatmul.bf16.gmra.mxu1 %v1610_v42  ;;  %v6551_v42 = vld [vmem:[#allocation13_spill] sm:$0xff] }
 0x1b7   : > { %v1421_v43 = vsel %vm950_vm3, %v6551_v42, %v1244_v44  ;;  %v1322_v9 = vpop.permute.xlu0 %1321  ;;  %v916_v33 = vsel %vm569_vm0, %v911_v59, %v915_v55  ;;  %v1536_v42 = vrot.slane %v1426_v31, 1 }
 0x1b8   : > { %v2702_v29 = vpop.f32.mrf.mxu2  ;;  %v2749_v7 = vpop.f32.mrf.mxu3  ;;  %v1621_v62 = vrot.slane %v1421_v43, 1  ;;  %v1424_v44 = vsel %vm950_vm3, %v6552_v0, %v1322_v9 }
 0x1b9   : > { %v2703_v5 = vadd.f32 %v2702_v29, %v5825_v24  ;;  %v2750_v21 = vadd.f32 %v2749_v7, %v2701_v46  ;;  %v1378_v24 = vpop.permute.xlu2 %1377  ;;  %v1376_v46 = vpop.permute.xlu1 %1375  ;;  %v1535_v55 = vrot.slane %v1424_v44, 1 }
 0x1bb   : > { %v2803_v61 = vpop.f32.mrf.mxu0  ;;  %v2849_v53 = vpop.f32.mrf.mxu1  ;;  %v2799_v60 = vadd.f32 %v2798_v58, %v2750_v21 }
 0x1bd   : > { %2900 = vmatmul.bf16.gmra.mxu2 %v1133_v22  ;;  %v6164_v17 = vadd.f32 %v2847_v11, %v2799_v60  ;;  %v4684_v11 = vld [vmem:[%s5088_s14 + $0x8] sm:$0xff]  ;;  %v1467_v22 = vsel %vm950_vm3, %v5674_v6, %v1376_v46 }
 0x1be   : > { %2998 = vmatmul.bf16.gmra.mxu0 %v5762_v34  ;;  %v1469_v25 = vsel %vm950_vm3, %v4684_v11, %v1378_v24  ;;  %v1541_v43 = vrot.slane %v1467_v22, 1 }
 0x1bf   : > { %v1368_v9 = vpop.permute.xlu0 %1367 }
 0x1c0   : > { %v2705_v29 = vpop.f32.mrf.mxu2  ;;  %v2751_v7 = vpop.f32.mrf.mxu3  ;;  %v1446_v46 = vsel %vm950_vm3, %v5728_v41, %v1368_v9 }
 0x1c1   : > { %v2706_v56 = vadd.f32 %v2705_v29, %v5854_v39  ;;  %v2752_v58 = vadd.f32 %v2751_v7, %v2703_v5  ;;  %v1160_v39 = vsel %vm950_vm3, %v916_v33, %v949_v48  ;;  %v1622_v5 = vsel %vm690_vm1, %v1609_v51, %v1621_v62  ;;  %v1380_v0 = vpop.permute.xlu2 %1379 }
 0x1c2   : > { %v1537_v48 = vsel %vm690_vm1, %v1535_v55, %v1536_v42  ;;  %v1545_v33 = vrot.slane %v5898_v35, 1 }
 0x1c3   : > { %v2805_v54 = vpop.f32.mrf.mxu0  ;;  %v2852_v34 = vpop.f32.mrf.mxu1  ;;  %v2801_v21 = vadd.f32 %v2800_v12, %v2752_v58  ;;  %v1542_v12 = vrot.slane %v1469_v25, 1  ;;  %v1544_v58 = vrot.slane %v5881_v57, 1 }
 0x1c5   : > { %2949 = vmatmul.bf16.gmra.mxu3 %v1160_v39  ;;  %v6178_v60 = vadd.f32 %v2849_v53, %v2801_v21  ;;  %v1543_v51 = vsel %vm690_vm1, %v1541_v43, %v1542_v12  ;;  %v1448_v53 = vsel %vm950_vm3, %v5801_v2, %v6147_v49  ;;  %v1471_v39 = vsel %vm950_vm3, %v5881_v57, %v1380_v0 }
 0x1c6   : > { %3047 = vmatmul.bf16.gmra.mxu1 %v1622_v5  ;;  %v1555_v43 = vrot.slane %v1471_v39, 1 }
 0x1c7   : > { %v1326_v31 = vpop.permute.xlu0 %1325 }
 0x1c8   : > { %v2707_v45 = vpop.f32.mrf.mxu2  ;;  %v2754_v26 = vpop.f32.mrf.mxu3  ;;  %v1428_v5 = vsel %vm950_vm3, %v6535_v28, %v1326_v31 }
 0x1c9   : > { %v2708_v59 = vadd.f32 %v2707_v45, %v5885_v23  ;;  %v2755_v24 = vadd.f32 %v2754_v26, %v2706_v56  ;;  %v1539_v23 = vrot.slane %v1448_v53, 1  ;;  %v1538_v56 = vrot.slane %v1446_v46, 1  ;;  %v4685_v46 = vld [vmem:[%s5088_s14 + $0x20] sm:$0xff]  ;;  %s6348_s14 = sadd.s32 %s3907_s11, %s3906_s16 }
 0x1ca   : > { %v1551_v9 = vrot.slane %v1428_v5, 1  ;;  %s3908_s9 = sshll.u32 %s6348_s14, 2 }
 0x1cb   : > { %v2854_v29 = vpop.f32.mrf.mxu1  ;;  %v2964_v6 = vpop.f32.mrf.mxu0  ;;  %v2804_v62 = vadd.f32 %v2803_v61, %v2755_v24  ;;  %v1540_v61 = vsel %vm690_vm1, %v1538_v56, %v1539_v23  ;;  %s6356_s18 = scalar_lea.vmem %s6460_s5, %s3908_s9  ;;  %s6410_s21 = scalar_lea.vmem %s6461_s6, %s3908_s9 }
 0x1cd   : > { %3061 = vmatmul.bf16.vlgmr.msrb.gmra.mxu2 %v1537_v48  ;;  %v6188_v7 = vadd.f32 %v2852_v34, %v2804_v62  ;;  %v1546_v34 = vsel %vm690_vm1, %v1544_v58, %v1545_v33  ;;  %v1556_v48 = vsel %vm690_vm1, %v1542_v12, %v1555_v43  ;;  %v1557_v62 = vrot.slane %v4685_v46, 1 }
 0x1ce   : > { %3159 = vmatmul.bf16.vlgmr.msrb.gmra.mxu0 %v1543_v51  ;;  %v1552_v51 = vsel %vm690_vm1, %v1536_v42, %v1551_v9 }
 0x1cf   : > { %v1558_v42 = vsel %vm690_vm1, %v1545_v33, %v1557_v62 }
 0x1d0   : > { %v2756_v44 = vpop.f32.mrf.mxu3  ;;  %v2866_v21 = vpop.f32.mrf.mxu2 }
 0x1d1   : > { %v2757_v11 = vadd.f32 %v2756_v44, %v2708_v59  ;;  %v2867_v2 = vadd.f32 %v2866_v21, %v5922_v52  ;;  %v6202_v52 = vpop.permute.xlu1 %1329 }
 0x1d3   : > { %v2966_v25 = vpop.f32.mrf.mxu0  ;;  %v3013_v41 = vpop.f32.mrf.mxu1  ;;  %v2806_v22 = vadd.f32 %v2805_v54, %v2757_v11 }
 0x1d5   : > { %3110 = vmatmul.bf16.vlgmr.msrb.gmra.mxu3 %v1540_v61  ;;  %v6200_v55 = vadd.f32 %v2854_v29, %v2806_v22  ;;  %v1450_v29 = vsel %vm950_vm3, %v5842_v20, %v6202_v52  ;;  %v1332_v61 = vpop.permute.xlu0 %1331 }
 0x1d6   : > { %4441 = vmatmul.msk.bf16.vlgmr.msrb.gmra.mxu1 %vm950_vm3, %v1546_v34 }
 0x1d8   : > { %v2868_v45 = vpop.f32.mrf.mxu2  ;;  %v2915_v26 = vpop.f32.mrf.mxu3 }
 0x1d9   : > { %v2869_v54 = vadd.f32 %v2868_v45, %v5935_v32  ;;  %v2916_v59 = vadd.f32 %v2915_v26, %v2867_v2  ;;  %v1382_v56 = vpop.permute.xlu1 %1381  ;;  %v1553_v32 = vrot.slane %v1450_v29, 1  ;;  %v1430_v2 = vsel %vm950_vm3, %v6538_v30, %v6147_v49 }
 0x1da   : > { %v1473_v20 = vsel %vm950_vm3, %v5898_v35, %v1382_v56  ;;  %v1563_v34 = vrot.slane %v1430_v2, 1  ;;  %v1452_v49 = vsel %vm950_vm3, %v5817_v14, %v1332_v61  ;;  %v1581_v2 = vrot.slane %v5940_v3, 1 }
 0x1db   : > { %v2969_v24 = vpop.f32.mrf.mxu0  ;;  %v3015_v57 = vpop.f32.mrf.mxu1  ;;  %v2965_v28 = vadd.f32 %v2964_v6, %v2916_v59  ;;  %v1554_v11 = vsel %vm690_vm1, %v1539_v23, %v1553_v32 }
 0x1dc   : > { %v1564_v30 = vsel %vm690_vm1, %v1551_v9, %v1563_v34 }
 0x1dd   : > { %3066 = vmatmul.bf16.gmra.mxu2 %v1552_v51  ;;  %v6210_v53 = vadd.f32 %v3013_v41, %v2965_v28  ;;  %v1384_v59 = vpop.permute.xlu0 %1383 }
 0x1de   : > { %3164 = vmatmul.bf16.gmra.mxu0 %v1556_v48  ;;  %v1475_v14 = vsel %vm950_vm3, %v4685_v46, %v1384_v59 }
 0x1e0   : > { %v2871_v58 = vpop.f32.mrf.mxu2  ;;  %v2917_v0 = vpop.f32.mrf.mxu3 }
 0x1e1   : > { %v2872_v44 = vadd.f32 %v2871_v58, %v5958_v27  ;;  %v2918_v12 = vadd.f32 %v2917_v0, %v2869_v54  ;;  %v1567_v27 = vrot.slane %v1473_v20, 1  ;;  %v1569_v54 = vrot.slane %v5903_v13, 1  ;;  %v6260_v59 = vpop.permute.xlu1 %1335 }
 0x1e2   : > { %v1432_v58 = vsel %vm950_vm3, %v6541_v38, %v6202_v52 }
 0x1e3   : > { %v2971_v6 = vpop.f32.mrf.mxu0  ;;  %v3018_v21 = vpop.f32.mrf.mxu1  ;;  %v2967_v31 = vadd.f32 %v2966_v25, %v2918_v12  ;;  %v1568_v23 = vsel %vm690_vm1, %v1555_v43, %v1567_v27  ;;  %v1570_v9 = vsel %vm690_vm1, %v1557_v62, %v1569_v54  ;;  %v1575_v12 = vrot.slane %v1432_v58, 1 }
 0x1e5   : > { %3115 = vmatmul.bf16.gmra.mxu3 %v1554_v11  ;;  %v6222_v41 = vadd.f32 %v3015_v57, %v2967_v31  ;;  %v1565_v57 = vrot.slane %v1452_v49, 1  ;;  %v1576_v38 = vsel %vm690_vm1, %v1563_v34, %v1575_v12  ;;  %v1582_v34 = vsel %vm690_vm1, %v1569_v54, %v1581_v2 }
 0x1e6   : > { %4442 = vmatmul.msk.bf16.gmra.mxu1 %vm950_vm3, %v1558_v42 }
 0x1e7   : > { %v1566_v56 = vsel %vm690_vm1, %v1553_v32, %v1565_v57 }
 0x1e8   : > { %v2873_v22 = vpop.f32.mrf.mxu2  ;;  %v2920_v33 = vpop.f32.mrf.mxu3 }
 0x1e9   : > { %v2874_v25 = vadd.f32 %v2873_v22, %v5983_v47  ;;  %v2921_v39 = vadd.f32 %v2920_v33, %v2872_v44  ;;  %v1334_v44 = vpop.permute.xlu2 %1333  ;;  %v1388_v58 = vpop.permute.xlu1 %1387 }
 0x1ea   : > { %v1454_v52 = vsel %vm950_vm3, %v5875_v19, %v1334_v44 }
 0x1eb   : > { %v2974_v35 = vpop.f32.mrf.mxu0  ;;  %v3020_v5 = vpop.f32.mrf.mxu1  ;;  %v2970_v45 = vadd.f32 %v2969_v24, %v2921_v39  ;;  %v1577_v33 = vrot.slane %v1454_v52, 1 }
 0x1ed   : > { %3071 = vmatmul.bf16.gmra.mxu2 %v1564_v30  ;;  %v6229_v26 = vadd.f32 %v3018_v21, %v2970_v45  ;;  %v1578_v45 = vsel %vm690_vm1, %v1565_v57, %v1577_v33  ;;  %v1434_v30 = vsel %vm950_vm3, %v6546_v4, %v1332_v61  ;;  %v1456_v61 = vsel %vm950_vm3, %v5981_v50, %v6260_v59 }
 0x1ee   : > { %3169 = vmatmul.bf16.gmra.mxu0 %v1568_v23  ;;  %v1479_v50 = vsel %vm950_vm3, %v5940_v3, %v1388_v58 }
 0x1f0   : > { %v2876_v47 = vpop.f32.mrf.mxu2  ;;  %v2922_v48 = vpop.f32.mrf.mxu3 }
 0x1f1   : > { %v2877_v28 = vadd.f32 %v2876_v47, %v6021_v10  ;;  %v2923_v51 = vadd.f32 %v2922_v48, %v2874_v25  ;;  %v1579_v10 = vrot.slane %v1475_v14, 1  ;;  %v1386_v22 = vpop.permute.xlu2 %1385  ;;  %v1587_v47 = vrot.slane %v1434_v30, 1 }
 0x1f2   : > { %v1477_v19 = vsel %vm950_vm3, %v5903_v13, %v1386_v22  ;;  %v1589_v14 = vrot.slane %v1456_v61, 1 }
 0x1f3   : > { %v2976_v43 = vpop.f32.mrf.mxu0  ;;  %v3023_v24 = vpop.f32.mrf.mxu1  ;;  %v2972_v29 = vadd.f32 %v2971_v6, %v2923_v51  ;;  %v1580_v32 = vsel %vm690_vm1, %v1567_v27, %v1579_v10  ;;  %v1588_v4 = vsel %vm690_vm1, %v1575_v12, %v1587_v47 }
 0x1f5   : > { %3120 = vmatmul.bf16.gmra.mxu3 %v1566_v56  ;;  %v6240_v0 = vadd.f32 %v3020_v5, %v2972_v29  ;;  %v1593_v29 = vrot.slane %v5988_v40, 1 }
 0x1f6   : > { %4443 = vmatmul.msk.bf16.gmra.mxu1 %vm950_vm3, %v1570_v9 }
 0x1f7   : > { %v1594_v12 = vsel %vm690_vm1, %v1581_v2, %v1593_v29 }
 0x1f8   : > { %v2878_v21 = vpop.f32.mrf.mxu2  ;;  %v2925_v42 = vpop.f32.mrf.mxu3 }
 0x1f9   : > { %v2879_v62 = vadd.f32 %v2878_v21, %v6042_v15  ;;  %v2926_v6 = vadd.f32 %v2925_v42, %v2877_v28 }
 0x1fb   : > { %v2979_v46 = vpop.f32.mrf.mxu0  ;;  %v3025_v31 = vpop.f32.mrf.mxu1  ;;  %v2975_v20 = vadd.f32 %v2974_v35, %v2926_v6 }
 0x1fd   : > { %3076 = vmatmul.bf16.gmra.mxu2 %v1576_v38  ;;  %v6247_v11 = vadd.f32 %v3023_v24, %v2975_v20  ;;  %v1370_v38 = vpop.permute.xlu0 %1369 }
 0x1fe   : > { %3174 = vmatmul.bf16.gmra.mxu0 %v1580_v32 }
 0x200   : > { %v2881_v15 = vpop.f32.mrf.mxu2  ;;  %v2927_v25 = vpop.f32.mrf.mxu3 }
 0x201   : > { %v2882_v39 = vadd.f32 %v2881_v15, %v6056_v36  ;;  %v2928_v5 = vadd.f32 %v2927_v25, %v2879_v62  ;;  %v1591_v36 = vrot.slane %v1477_v19, 1  ;;  %v6555_v19 = vld [vmem:[#allocation2_spill] sm:$0xff] }
 0x203   : > { %v2981_v27 = vpop.f32.mrf.mxu0  ;;  %v3028_v35 = vpop.f32.mrf.mxu1  ;;  %v2977_v23 = vadd.f32 %v2976_v43, %v2928_v5  ;;  %v1592_v57 = vsel %vm690_vm1, %v1579_v10, %v1591_v36 }
 0x205   : > { %3125 = vmatmul.bf16.gmra.mxu3 %v1578_v45  ;;  %v6258_v49 = vadd.f32 %v3025_v31, %v2977_v23  ;;  %v6553_v31 = vld [vmem:[#allocation16_spill] sm:$0xff]  ;;  %v1605_v45 = vrot.slane %v6555_v19, 1 }
 0x206   : > { %4444 = vmatmul.msk.bf16.gmra.mxu1 %vm950_vm3, %v1582_v34  ;;  %v1437_v32 = vsel %vm950_vm3, %v6553_v31, %v1334_v44  ;;  %v6554_v34 = vld [vmem:[#allocation3_spill] sm:$0xff] }
 0x207   : > { %v1599_v52 = vrot.slane %v1437_v32, 1  ;;  %v1250_v23 = vrot.slane %v6554_v34, 7 }
 0x208   : > { %v2883_v48 = vpop.f32.mrf.mxu2  ;;  %v2930_v54 = vpop.f32.mrf.mxu3 }
 0x209   : > { %v2884_v28 = vadd.f32 %v2883_v48, %v6068_v63  ;;  %v2931_v51 = vadd.f32 %v2930_v54, %v2882_v39  ;;  %v1600_v44 = vsel %vm690_vm1, %v1587_v47, %v1599_v52 }
 0x20b   : > { %v2984_v13 = vpop.f32.mrf.mxu0  ;;  %v3030_v43 = vpop.f32.mrf.mxu1  ;;  %v2980_v24 = vadd.f32 %v2979_v46, %v2931_v51  ;;  %v1590_v46 = vsel %vm690_vm1, %v1577_v33, %v1589_v14 }
 0x20d   : > { %3081 = vmatmul.bf16.gmra.mxu2 %v1588_v4  ;;  %v6268_v9 = vadd.f32 %v3028_v35, %v2980_v24 }
 0x20e   : > { %3179 = vmatmul.bf16.gmra.mxu0 %v1592_v57  ;;  %v1606_v57 = vsel %vm690_vm1, %v1593_v29, %v1605_v45 }
 0x210   : > { %v2886_v63 = vpop.f32.mrf.mxu2  ;;  %v2932_v56 = vpop.f32.mrf.mxu3 }
 0x211   : > { %v2887_v21 = vadd.f32 %v2886_v63, %v6085_v16  ;;  %v2933_v10 = vadd.f32 %v2932_v56, %v2884_v28  ;;  %v1603_v16 = vrot.slane %v1479_v50, 1  ;;  %v6556_v28 = vld [vmem:[#allocation12_spill] sm:$0xff] }
 0x213   : > { %v2986_v42 = vpop.f32.mrf.mxu0  ;;  %v3033_v62 = vpop.f32.mrf.mxu1  ;;  %v2982_v6 = vadd.f32 %v2981_v27, %v2933_v10  ;;  %v1604_v33 = vsel %vm690_vm1, %v1591_v36, %v1603_v16  ;;  %v1459_v27 = vsel %vm950_vm3, %v5961_v1, %v1370_v38  ;;  %v1617_v38 = vrot.slane %v6554_v34, 1 }
 0x214   : > { %v1601_v30 = vrot.slane %v1459_v27, 1 }
 0x215   : > { %3130 = vmatmul.bf16.gmra.mxu3 %v1590_v46  ;;  %v6279_v20 = vadd.f32 %v3030_v43, %v2982_v6  ;;  %v6558_v46 = vld [vmem:[#allocation18_spill] sm:$0xff] }
 0x216   : > { %4445 = vmatmul.msk.bf16.gmra.mxu1 %vm950_vm3, %v1594_v12  ;;  %v1602_v61 = vsel %vm690_vm1, %v1589_v14, %v1601_v30  ;;  %v1372_v12 = vpop.permute.xlu2 %1371 }
 0x217   : > { %v1462_v31 = vsel %vm950_vm3, %v6558_v46, %v1372_v12 }
 0x218   : > { %v2888_v22 = vpop.f32.mrf.mxu2  ;;  %v2935_v15 = vpop.f32.mrf.mxu3 }
 0x219   : > { %v2889_v2 = vadd.f32 %v2888_v22, %v6111_v8  ;;  %v2936_v25 = vadd.f32 %v2935_v15, %v2887_v21  ;;  %v1390_v8 = vpop.permute.xlu0 %1389  ;;  %v1613_v15 = vrot.slane %v1462_v31, 1 }
 0x21a   : > { %v1481_v4 = vsel %vm950_vm3, %v5988_v40, %v1390_v8 }
 0x21b   : > { %v2989_v3 = vpop.f32.mrf.mxu0  ;;  %v3035_v39 = vpop.f32.mrf.mxu1  ;;  %v2985_v5 = vadd.f32 %v2984_v13, %v2936_v25  ;;  %v6557_v13 = vld [vmem:[#allocation15_spill] sm:$0xff]  ;;  %v1615_v58 = vrot.slane %v1481_v4, 1  ;;  %v1614_v19 = vsel %vm690_vm1, %v1601_v30, %v1613_v15 }
 0x21c   : > { %v1251_v47 = vsel %vm1204_vm2, %v6557_v13, %v1250_v23  ;;  %v1338_v25 = vpop.permute.xlu1 %1337 }
 0x21d   : > { %3086 = vmatmul.bf16.gmra.mxu2 %v1600_v44  ;;  %v6286_v35 = vadd.f32 %v3033_v62, %v2985_v5  ;;  %v1440_v63 = vsel %vm950_vm3, %v1251_v47, %v6260_v59  ;;  %v1616_v14 = vsel %vm690_vm1, %v1603_v16, %v1615_v58  ;;  %v6559_v44 = vld [vmem:[#allocation4_spill] sm:$0xff]  ;;  %v1443_v34 = vsel %vm950_vm3, %v1250_v23, %v1338_v25 }
 0x21e   : > { %3184 = vmatmul.bf16.gmra.mxu0 %v1604_v33  ;;  %v1611_v21 = vrot.slane %v1440_v63, 1 }
 0x220   : > { %v2891_v48 = vpop.f32.mrf.mxu2  ;;  %v2937_v54 = vpop.f32.mrf.mxu3  ;;  %v1612_v59 = vsel %vm690_vm1, %v1599_v52, %v1611_v21  ;;  %v1618_v52 = vsel %vm690_vm1, %v1605_v45, %v1617_v38 }
 0x221   : > { %v2892_v36 = vadd.f32 %v2891_v48, %v6556_v28  ;;  %v2938_v51 = vadd.f32 %v2937_v54, %v2889_v2  ;;  %v1392_v22 = vpop.permute.xlu0 %1391  ;;  %v6560_v48 = vld [vmem:[#allocation6_spill] sm:$0xff]  ;;  %v1623_v28 = vrot.slane %v1443_v34, 1  ;;  %v1374_v45 = vpop.permute.xlu2 %1373 }
 0x222   : > { %v1483_v27 = vsel %vm950_vm3, %v6559_v44, %v1392_v22 }
 0x223   : > { %v2991_v43 = vpop.f32.mrf.mxu0  ;;  %v3038_v1 = vpop.f32.mrf.mxu1  ;;  %v2987_v24 = vadd.f32 %v2986_v42, %v2938_v51  ;;  %v1627_v54 = vrot.slane %v1483_v27, 1  ;;  %v1624_v4 = vsel %vm690_vm1, %v1611_v21, %v1623_v28 }
 0x225   : > { %3135 = vmatmul.bf16.gmra.mxu3 %v1602_v61  ;;  %v6300_v56 = vadd.f32 %v3035_v39, %v2987_v24 }
 0x226   : > { %4446 = vmatmul.msk.bf16.gmra.mxu1 %vm950_vm3, %v1606_v57  ;;  %v1628_v57 = vsel %vm690_vm1, %v1615_v58, %v1627_v54 }
 0x228   : > { %v2893_v10 = vpop.f32.mrf.mxu2  ;;  %v2940_v62 = vpop.f32.mrf.mxu3 }
 0x229   : > { %v2894_v29 = vadd.f32 %v2893_v10, %v6149_v37  ;;  %v2941_v42 = vadd.f32 %v2940_v62, %v2892_v36  ;;  %v1629_v10 = vrot.slane %v6142_v18, 1 }
 0x22b   : > { %v2994_v50 = vpop.f32.mrf.mxu0  ;;  %v3040_v40 = vpop.f32.mrf.mxu1  ;;  %v2990_v6 = vadd.f32 %v2989_v3, %v2941_v42  ;;  %v1630_v58 = vsel %vm690_vm1, %v1617_v38, %v1629_v10 }
 0x22d   : > { %3091 = vmatmul.bf16.gmra.mxu2 %v1612_v59  ;;  %v6307_v32 = vadd.f32 %v3038_v1, %v2990_v6 }
 0x22e   : > { %3189 = vmatmul.bf16.gmra.mxu0 %v1616_v14 }
 0x230   : > { %v2896_v37 = vpop.f32.mrf.mxu2  ;;  %v2942_v2 = vpop.f32.mrf.mxu3 }
 0x231   : > { %v2897_v39 = vadd.f32 %v2896_v37, %v6164_v17  ;;  %v2943_v16 = vadd.f32 %v2942_v2, %v2894_v29  ;;  %v1349_v17 = vshll.u32 %v6560_v48, 16 }
 0x233   : > { %v2996_v3 = vpop.f32.mrf.mxu0  ;;  %v3043_v33 = vpop.f32.mrf.mxu1  ;;  %v2992_v5 = vadd.f32 %v2991_v43, %v2943_v16  ;;  %v6561_v43 = vld [vmem:[#allocation9_spill] sm:$0xff] }
 0x234   : > { %v1351_v30 = vsel %vm1253_vm4, %v6561_v43, %v1349_v17 }
 0x235   : > { %3140 = vmatmul.bf16.gmra.mxu3 %v1614_v19  ;;  %v6317_v8 = vadd.f32 %v3040_v40, %v2992_v5  ;;  %v1465_v61 = vsel %vm950_vm3, %v1351_v30, %v1374_v45 }
 0x236   : > { %4447 = vmatmul.msk.bf16.gmra.mxu1 %vm950_vm3, %v1618_v52 }
 0x238   : > { %v2898_v36 = vpop.f32.mrf.mxu2  ;;  %v2945_v51 = vpop.f32.mrf.mxu3 }
 0x239   : > { %v2899_v13 = vadd.f32 %v2898_v36, %v6178_v60  ;;  %v2946_v47 = vadd.f32 %v2945_v51, %v2897_v39  ;;  %v1625_v60 = vrot.slane %v1465_v61, 1 }
 0x23b   : > { %v2999_v1 = vpop.f32.mrf.mxu0  ;;  %v3045_v23 = vpop.f32.mrf.mxu1  ;;  %v2995_v24 = vadd.f32 %v2994_v50, %v2946_v47  ;;  %v1626_v50 = vsel %vm690_vm1, %v1613_v15, %v1625_v60 }
 0x23d   : > { %3096 = vmatmul.bf16.gmra.mxu2 %v1624_v4  ;;  %v6326_v63 = vadd.f32 %v3043_v33, %v2995_v24 }
 0x23e   : > { %3194 = vmatmul.bf16.gmra.mxu0 %v1628_v57 }
 0x240   : > { %v2901_v62 = vpop.f32.mrf.mxu2  ;;  %v2947_v12 = vpop.f32.mrf.mxu3 }
 0x241   : > { %v2902_v29 = vadd.f32 %v2901_v62, %v6188_v7  ;;  %v2948_v42 = vadd.f32 %v2947_v12, %v2899_v13 }
 0x243   : > { %v3001_v40 = vpop.f32.mrf.mxu0  ;;  %v3048_v14 = vpop.f32.mrf.mxu1  ;;  %v2997_v21 = vadd.f32 %v2996_v3, %v2948_v42 }
 0x245   : > { %3145 = vmatmul.bf16.gmra.mxu3 %v1626_v50  ;;  %v6333_v6 = vadd.f32 %v3045_v23, %v2997_v21 }
 0x246   : > { %4448 = vmatmul.msk.bf16.gmra.mxu1 %vm950_vm3, %v1630_v58 }
 0x248   : > { %v2903_v18 = vpop.f32.mrf.mxu2  ;;  %v2950_v59 = vpop.f32.mrf.mxu3 }
 0x249   : > { %v2904_v46 = vadd.f32 %v2903_v18, %v6200_v55  ;;  %v2951_v7 = vadd.f32 %v2950_v59, %v2902_v29 }
 0x24b   : > { %v3050_v31 = vpop.f32.mrf.mxu1  ;;  %v3160_v22 = vpop.f32.mrf.mxu0  ;;  %v3000_v37 = vadd.f32 %v2999_v1, %v2951_v7 }
 0x24d   : > { %v6336_v38 = vadd.f32 %v3048_v14, %v3000_v37 }
 0x250   : > { %v2952_v2 = vpop.f32.mrf.mxu3  ;;  %v3062_v25 = vpop.f32.mrf.mxu2 }
 0x251   : > { %v2953_v15 = vadd.f32 %v2952_v2, %v2904_v46  ;;  %v3063_v55 = vadd.f32 %v3062_v25, %v6210_v53 }
 0x253   : > { %v3162_v39 = vpop.f32.mrf.mxu0  ;;  %v3209_v16 = vpop.f32.mrf.mxu1  ;;  %v3002_v3 = vadd.f32 %v3001_v40, %v2953_v15 }
 0x255   : > { %v6342_v33 = vadd.f32 %v3050_v31, %v3002_v3 }
 0x258   : > { %v3064_v52 = vpop.f32.mrf.mxu2  ;;  %v3111_v5 = vpop.f32.mrf.mxu3 }
 0x259   : > { %v3065_v44 = vadd.f32 %v3064_v52, %v6222_v41  ;;  %v3112_v27 = vadd.f32 %v3111_v5, %v3063_v55 }
 0x25b   : > { %v3165_v19 = vpop.f32.mrf.mxu0  ;;  %v3211_v34 = vpop.f32.mrf.mxu1  ;;  %v3161_v48 = vadd.f32 %v3160_v22, %v3112_v27 }
 0x25d   : > { %v3210_v17 = vadd.f32 %v3209_v16, %v3161_v48 }
 0x25f   : > { %v3265_v54 = vmul.f32 0.05, %v3210_v17  ;;  %vm3249_vm5 = vcmp.ge.f32.partialorder %v3210_v17, 0.0 }
 0x260   : > { %v3067_v28 = vpop.f32.mrf.mxu2  ;;  %v3113_v53 = vpop.f32.mrf.mxu3 }
 0x261   : > { %v3114_v36 = vadd.f32 %v3113_v53, %v3065_v44  ;;  %v3281_v41 = vsel %vm3249_vm5, %v3210_v17, %v3265_v54  ;;  %v3068_v30 = vadd.f32 %v3067_v28, %v6229_v26  ;;  %vm3658_vm5 = vcmask 388096  }
 0x262   : > { %v3609_v13 = vpack.c.bf16 %v3281_v41, %v3281_v41  ;;  %v3570_v42 = vsel %vm950_vm3, %v3281_v41, 0.0 }
 0x263   : > { %v3167_v51 = vpop.f32.mrf.mxu0  ;;  %v3214_v45 = vpop.f32.mrf.mxu1  ;;  %v3163_v47 = vadd.f32 %v3162_v39, %v3114_v36 }
 0x264   : > { %3634 = vrot.lane.b32.xlu1 %v3609_v13, %s4727_s15  ;;  %3618 = vst.msk [vmem:[%s6356_s18] sm:$0xf] %vm3617_vm6, %v3609_v13 }
 0x265   : > { %v3212_v43 = vadd.f32 %v3211_v34, %v3163_v47 }
 0x267   : > { %vm3250_vm7 = vcmp.ge.f32.partialorder %v3212_v43, 0.0  ;;  %v3266_v1 = vmul.f32 0.05, %v3212_v43 }
 0x268   : > { %v3069_v23 = vpop.f32.mrf.mxu2  ;;  %v3116_v57 = vpop.f32.mrf.mxu3 }
 0x269   : > { %v3282_v24 = vsel %vm3250_vm7, %v3212_v43, %v3266_v1  ;;  %v3070_v4 = vadd.f32 %v3069_v23, %v6240_v0  ;;  %v3117_v61 = vadd.f32 %v3116_v57, %v3068_v30 }
 0x26a   : > { %v3555_v10 = vmul.f32 0.0, %v3282_v24 }
 0x26b   : > { %v3170_v60 = vpop.f32.mrf.mxu0  ;;  %v3216_v62 = vpop.f32.mrf.mxu1  ;;  %v3166_v12 = vadd.f32 %v3165_v19, %v3117_v61 }
 0x26c   : > { %v3571_v29 = vsel %vm950_vm3, %v3555_v10, 0.0 }
 0x26d   : > { %v3572_v40 = vadd.f32 %v3571_v29, %v3570_v42  ;;  %v3215_v14 = vadd.f32 %v3214_v45, %v3166_v12 }
 0x26f   : > { %v3267_v26 = vmul.f32 0.05, %v3215_v14  ;;  %vm3251_vm8 = vcmp.ge.f32.partialorder %v3215_v14, 0.0 }
 0x270   : > { %v3072_v58 = vpop.f32.mrf.mxu2  ;;  %v3118_v21 = vpop.f32.mrf.mxu3 }
 0x271   : > { %v3119_v50 = vadd.f32 %v3118_v21, %v3070_v4  ;;  %v3283_v18 = vsel %vm3251_vm8, %v3215_v14, %v3267_v26  ;;  %v3073_v2 = vadd.f32 %v3072_v58, %v6247_v11 }
 0x272   : > { %v3610_v46 = vpack.c.bf16 %v3283_v18, %v3283_v18  ;;  %v3573_v7 = vsel %vm950_vm3, %v3283_v18, 0.0 }
 0x273   : > { %v3172_v59 = vpop.f32.mrf.mxu0  ;;  %v3219_v0 = vpop.f32.mrf.mxu1  ;;  %v3168_v31 = vadd.f32 %v3167_v51, %v3119_v50  ;;  %v3574_v22 = vadd.f32 %v3573_v7, %v3572_v40 }
 0x274   : > { %3636 = vrot.lane.b32.xlu2 %v3610_v46, %s4727_s15  ;;  %3619 = vst.msk [vmem:[%s6356_s18 + $0x4] sm:$0xf] %vm3617_vm6, %v3610_v46 }
 0x275   : > { %v3217_v37 = vadd.f32 %v3216_v62, %v3168_v31 }
 0x277   : > { %vm3252_vm9 = vcmp.ge.f32.partialorder %v3217_v37, 0.0  ;;  %v3268_v25 = vmul.f32 0.05, %v3217_v37 }
 0x278   : > { %v3074_v15 = vpop.f32.mrf.mxu2  ;;  %v3121_v39 = vpop.f32.mrf.mxu3 }
 0x279   : > { %v3284_v16 = vsel %vm3252_vm9, %v3217_v37, %v3268_v25  ;;  %v3122_v3 = vadd.f32 %v3121_v39, %v3073_v2  ;;  %v3075_v48 = vadd.f32 %v3074_v15, %v6258_v49 }
 0x27a   : > { %v3557_v55 = vmul.f32 0.0, %v3284_v16 }
 0x27b   : > { %v3175_v52 = vpop.f32.mrf.mxu0  ;;  %v3221_v5 = vpop.f32.mrf.mxu1  ;;  %v3171_v44 = vadd.f32 %v3170_v60, %v3122_v3 }
 0x27c   : > { %v3575_v27 = vsel %vm950_vm3, %v3557_v55, 0.0 }
 0x27d   : > { %v3220_v19 = vadd.f32 %v3219_v0, %v3171_v44  ;;  %v3576_v34 = vadd.f32 %v3575_v27, %v3574_v22 }
 0x27f   : > { %v3269_v17 = vmul.f32 0.05, %v3220_v19  ;;  %vm3253_vm10 = vcmp.ge.f32.partialorder %v3220_v19, 0.0 }
 0x280   : > { %v3077_v11 = vpop.f32.mrf.mxu2  ;;  %v3123_v54 = vpop.f32.mrf.mxu3 }
 0x281   : > { %v3124_v28 = vadd.f32 %v3123_v54, %v3075_v48  ;;  %v3285_v53 = vsel %vm3253_vm10, %v3220_v19, %v3269_v17  ;;  %v3078_v49 = vadd.f32 %v3077_v11, %v6268_v9 }
 0x282   : > { %v3611_v51 = vpack.c.bf16 %v3285_v53, %v3285_v53  ;;  %v3577_v45 = vsel %vm950_vm3, %v3285_v53, 0.0 }
 0x283   : > { %v3177_v36 = vpop.f32.mrf.mxu0  ;;  %v3224_v41 = vpop.f32.mrf.mxu1  ;;  %v3173_v13 = vadd.f32 %v3172_v59, %v3124_v28  ;;  %v3578_v47 = vadd.f32 %v3577_v45, %v3576_v34 }
 0x284   : > { %3638 = vrot.lane.b32.xlu0 %v3611_v51, %s4727_s15  ;;  %3620 = vst.msk [vmem:[%s6356_s18 + $0x8] sm:$0xf] %vm3617_vm6, %v3611_v51 }
 0x285   : > { %v3222_v43 = vadd.f32 %v3221_v5, %v3173_v13 }
 0x287   : > { %vm3254_vm11 = vcmp.ge.f32.partialorder %v3222_v43, 0.0  ;;  %v3270_v30 = vmul.f32 0.05, %v3222_v43 }
 0x288   : > { %v3079_v1 = vpop.f32.mrf.mxu2  ;;  %v3126_v23 = vpop.f32.mrf.mxu3 }
 0x289   : > { %v3286_v57 = vsel %vm3254_vm11, %v3222_v43, %v3270_v30  ;;  %v3127_v24 = vadd.f32 %v3126_v23, %v3078_v49  ;;  %v3080_v42 = vadd.f32 %v3079_v1, %v6279_v20 }
 0x28a   : > { %v3559_v4 = vmul.f32 0.0, %v3286_v57 }
 0x28b   : > { %v3226_v61 = vpop.f32.mrf.mxu1  ;;  %v3176_v10 = vadd.f32 %v3175_v52, %v3127_v24  ;;  %v3180_v60 = vpop.f32.mrf.mxu0 }
 0x28c   : > { %v3579_v62 = vsel %vm950_vm3, %v3559_v4, 0.0 }
 0x28d   : > { %v3225_v12 = vadd.f32 %v3224_v41, %v3176_v10  ;;  %v3580_v29 = vadd.f32 %v3579_v62, %v3578_v47 }
 0x28f   : > { %v3271_v40 = vmul.f32 0.05, %v3225_v12  ;;  %vm3255_vm12 = vcmp.ge.f32.partialorder %v3225_v12, 0.0 }
 0x290   : > { %v3082_v9 = vpop.f32.mrf.mxu2  ;;  %v3128_v14 = vpop.f32.mrf.mxu3 }
 0x291   : > { %v3129_v26 = vadd.f32 %v3128_v14, %v3080_v42  ;;  %v3287_v58 = vsel %vm3255_vm12, %v3225_v12, %v3271_v40  ;;  %v3083_v20 = vadd.f32 %v3082_v9, %v6286_v35 }
 0x292   : > { %v3612_v50 = vpack.c.bf16 %v3287_v58, %v3287_v58  ;;  %v3581_v18 = vsel %vm950_vm3, %v3287_v58, 0.0 }
 0x293   : > { %v3229_v21 = vpop.f32.mrf.mxu1  ;;  %v3178_v59 = vadd.f32 %v3177_v36, %v3129_v26  ;;  %v3582_v0 = vadd.f32 %v3581_v18, %v3580_v29  ;;  %v3182_v7 = vpop.f32.mrf.mxu0 }
 0x294   : > { %3640 = vrot.lane.b32.xlu1 %v3612_v50, %s4727_s15  ;;  %3621 = vst.msk [vmem:[%s6356_s18 + $0xc] sm:$0xf] %vm3617_vm6, %v3612_v50 }
 0x295   : > { %v3227_v46 = vadd.f32 %v3226_v61, %v3178_v59 }
 0x297   : > { %vm3256_vm13 = vcmp.ge.f32.partialorder %v3227_v46, 0.0  ;;  %v3272_v31 = vmul.f32 0.05, %v3227_v46 }
 0x298   : > { %v3084_v22 = vpop.f32.mrf.mxu2  ;;  %v3131_v37 = vpop.f32.mrf.mxu3 }
 0x299   : > { %v3288_v2 = vsel %vm3256_vm13, %v3227_v46, %v3272_v31  ;;  %v3132_v25 = vadd.f32 %v3131_v37, %v3083_v20  ;;  %v3085_v5 = vadd.f32 %v3084_v22, %v6300_v56 }
 0x29a   : > { %v3561_v15 = vmul.f32 0.0, %v3288_v2 }
 0x29b   : > { %v3231_v39 = vpop.f32.mrf.mxu1  ;;  %v3181_v16 = vadd.f32 %v3180_v60, %v3132_v25  ;;  %v3185_v27 = vpop.f32.mrf.mxu0 }
 0x29c   : > { %v3583_v3 = vsel %vm950_vm3, %v3561_v15, 0.0 }
 0x29d   : > { %v3230_v55 = vadd.f32 %v3229_v21, %v3181_v16  ;;  %v3584_v52 = vadd.f32 %v3583_v3, %v3582_v0 }
 0x29f   : > { %v3273_v44 = vmul.f32 0.05, %v3230_v55  ;;  %vm3257_vm14 = vcmp.ge.f32.partialorder %v3230_v55, 0.0 }
 0x2a0   : > { %v3087_v35 = vpop.f32.mrf.mxu2  ;;  %v3133_v19 = vpop.f32.mrf.mxu3 }
 0x2a1   : > { %v3134_v34 = vadd.f32 %v3133_v19, %v3085_v5  ;;  %v3289_v48 = vsel %vm3257_vm14, %v3230_v55, %v3273_v44  ;;  %v3088_v56 = vadd.f32 %v3087_v35, %v6307_v32 }
 0x2a2   : > { %v3613_v11 = vpack.c.bf16 %v3289_v48, %v3289_v48  ;;  %v3585_v54 = vsel %vm950_vm3, %v3289_v48, 0.0 }
 0x2a3   : > { %v3234_v17 = vpop.f32.mrf.mxu1  ;;  %v3183_v28 = vadd.f32 %v3182_v7, %v3134_v34  ;;  %v3586_v53 = vadd.f32 %v3585_v54, %v3584_v52  ;;  %v3187_v47 = vpop.f32.mrf.mxu0 }
 0x2a4   : > { %3642 = vrot.lane.b32.xlu2 %v3613_v11, %s4727_s15  ;;  %3622 = vst.msk [vmem:[%s6356_s18 + $0x10] sm:$0xf] %vm3617_vm6, %v3613_v11 }
 0x2a5   : > { %v3232_v36 = vadd.f32 %v3231_v39, %v3183_v28 }
 0x2a7   : > { %vm3258_vm15 = vcmp.ge.f32.partialorder %v3232_v36, 0.0  ;;  %v3274_v41 = vmul.f32 0.05, %v3232_v36 }
 0x2a8   : > { %v3089_v51 = vpop.f32.mrf.mxu2  ;;  %v3136_v45 = vpop.f32.mrf.mxu3 }
 0x2a9   : > { %v3290_v13 = vsel %vm3258_vm15, %v3232_v36, %v3274_v41  ;;  %v3137_v43 = vadd.f32 %v3136_v45, %v3088_v56  ;;  %v3090_v4 = vadd.f32 %v3089_v51, %v6317_v8 }
 0x2aa   : > { %v3563_v49 = vmul.f32 0.0, %v3290_v13 }
 0x2ab   : > { %v3186_v30 = vadd.f32 %v3185_v27, %v3137_v43  ;;  %v3236_v1 = vpop.f32.mrf.mxu1  ;;  %v3190_v42 = vpop.f32.mrf.mxu0 }
 0x2ac   : > { %v3587_v23 = vsel %vm950_vm3, %v3563_v49, 0.0 }
 0x2ad   : > { %v3235_v57 = vadd.f32 %v3234_v17, %v3186_v30  ;;  %v3588_v24 = vadd.f32 %v3587_v23, %v3586_v53 }
 0x2af   : > { %v3275_v61 = vmul.f32 0.05, %v3235_v57  ;;  %vm3259_vm0 = vcmp.ge.f32.partialorder %v3235_v57, 0.0 }
 0x2b0   : > { %v3092_v32 = vpop.f32.mrf.mxu2  ;;  %v3138_v10 = vpop.f32.mrf.mxu3 }
 0x2b1   : > { %v3139_v60 = vadd.f32 %v3138_v10, %v3090_v4  ;;  %v3291_v62 = vsel %vm3259_vm0, %v3235_v57, %v3275_v61  ;;  %v3093_v8 = vadd.f32 %v3092_v32, %v6326_v63 }
 0x2b2   : > { %v3614_v12 = vpack.c.bf16 %v3291_v62, %v3291_v62  ;;  %v3589_v29 = vsel %vm950_vm3, %v3291_v62, 0.0 }
 0x2b3   : > { %v3188_v40 = vadd.f32 %v3187_v47, %v3139_v60  ;;  %v3590_v9 = vadd.f32 %v3589_v29, %v3588_v24  ;;  %v3239_v26 = vpop.f32.mrf.mxu1  ;;  %v3192_v20 = vpop.f32.mrf.mxu0 }
 0x2b4   : > { %3644 = vrot.lane.b32.xlu0 %v3614_v12, %s4727_s15  ;;  %3623 = vst.msk [vmem:[%s6356_s18 + $0x14] sm:$0xf] %vm3617_vm6, %v3614_v12 }
 0x2b5   : > { %v3237_v14 = vadd.f32 %v3236_v1, %v3188_v40 }
 0x2b7   : > { %vm3260_vm1 = vcmp.ge.f32.partialorder %v3237_v14, 0.0  ;;  %v3276_v58 = vmul.f32 0.05, %v3237_v14 }
 0x2b8   : > { %v3094_v21 = vpop.f32.mrf.mxu2  ;;  %v3141_v50 = vpop.f32.mrf.mxu3 }
 0x2b9   : > { %v3292_v18 = vsel %vm3260_vm1, %v3237_v14, %v3276_v58  ;;  %v3142_v59 = vadd.f32 %v3141_v50, %v3093_v8  ;;  %v3095_v37 = vadd.f32 %v3094_v21, %v6333_v6 }
 0x2ba   : > { %v3565_v0 = vmul.f32 0.0, %v3292_v18 }
 0x2bb   : > { %v3191_v46 = vadd.f32 %v3190_v42, %v3142_v59  ;;  %v3241_v25 = vpop.f32.mrf.mxu1  ;;  %v3195_v27 = vpop.f32.mrf.mxu0 }
 0x2bc   : > { %v3591_v7 = vsel %vm950_vm3, %v3565_v0, 0.0 }
 0x2bd   : > { %v3240_v31 = vadd.f32 %v3239_v26, %v3191_v46  ;;  %v3592_v22 = vadd.f32 %v3591_v7, %v3590_v9 }
 0x2bf   : > { %v3277_v2 = vmul.f32 0.05, %v3240_v31  ;;  %vm3261_vm2 = vcmp.ge.f32.partialorder %v3240_v31, 0.0 }
 0x2c0   : > { %v3143_v63 = vpop.f32.mrf.mxu3  ;;  %v3097_v16 = vpop.f32.mrf.mxu2 }
 0x2c1   : > { %v3144_v15 = vadd.f32 %v3143_v63, %v3095_v37  ;;  %v3293_v39 = vsel %vm3261_vm2, %v3240_v31, %v3277_v2  ;;  %v3098_v6 = vadd.f32 %v3097_v16, %v6336_v38 }
 0x2c2   : > { %v3615_v3 = vpack.c.bf16 %v3293_v39, %v3293_v39  ;;  %v3593_v55 = vsel %vm950_vm3, %v3293_v39, 0.0 }
 0x2c3   : > { %v3193_v52 = vadd.f32 %v3192_v20, %v3144_v15  ;;  %v3594_v5 = vadd.f32 %v3593_v55, %v3592_v22  ;;  %v3244_v34 = vpop.f32.mrf.mxu1  ;;  %v3197_v43 = vpop.f32.mrf.mxu0 }
 0x2c4   : > { %3646 = vrot.lane.b32.xlu1 %v3615_v3, %s4727_s15  ;;  %3624 = vst.msk [vmem:[%s6356_s18 + $0x18] sm:$0xf] %vm3617_vm6, %v3615_v3 }
 0x2c5   : > { %v3242_v44 = vadd.f32 %v3241_v25, %v3193_v52 }
 0x2c7   : > { %vm3262_vm4 = vcmp.ge.f32.partialorder %v3242_v44, 0.0  ;;  %v3278_v35 = vmul.f32 0.05, %v3242_v44 }
 0x2c8   : > { %v3146_v19 = vpop.f32.mrf.mxu3  ;;  %v3099_v28 = vpop.f32.mrf.mxu2 }
 0x2c9   : > { %v3294_v48 = vsel %vm3262_vm4, %v3242_v44, %v3278_v35  ;;  %v3147_v17 = vadd.f32 %v3146_v19, %v3098_v6  ;;  %v3100_v41 = vadd.f32 %v3099_v28, %v6342_v33 }
 0x2ca   : > { %v3567_v11 = vmul.f32 0.0, %v3294_v48 }
 0x2cb   : > { %v3196_v54 = vadd.f32 %v3195_v27, %v3147_v17  ;;  %v3246_v49 = vpop.f32.mrf.mxu1 }
 0x2cc   : > { %v3595_v53 = vsel %vm950_vm3, %v3567_v11, 0.0 }
 0x2cd   : > { %v3245_v38 = vadd.f32 %v3244_v34, %v3196_v54  ;;  %v3596_v36 = vadd.f32 %v3595_v53, %v3594_v5 }
 0x2ce   : > { %v3637_v56 = vpop.permute.xlu2 %3636 }
 0x2cf   : > { %vm3263_vm7 = vcmp.ge.f32.partialorder %v3245_v38, 0.0  ;;  %v3279_v51 = vmul.f32 0.05, %v3245_v38  ;;  %3660 = vst.msk [vmem:[%s6410_s21 + $0x4] sm:$0xf] %vm3658_vm5, %v3637_v56 }
 0x2d0   : > { %v3148_v45 = vpop.f32.mrf.mxu3 }
 0x2d1   : > { %v3149_v13 = vadd.f32 %v3148_v45, %v3100_v41  ;;  %v3295_v47 = vsel %vm3263_vm7, %v3245_v38, %v3279_v51 }
 0x2d2   : > { %v3616_v30 = vpack.c.bf16 %v3295_v47, %v3295_v47  ;;  %v3597_v1 = vsel %vm950_vm3, %v3295_v47, 0.0 }
 0x2d3   : > { %v3198_v23 = vadd.f32 %v3197_v43, %v3149_v13  ;;  %v3598_v57 = vadd.f32 %v3597_v1, %v3596_v36 }
 0x2d4   : > { %3648 = vrot.lane.b32.xlu2 %v3616_v30, %s4727_s15  ;;  %3625 = vst.msk [vmem:[%s6356_s18 + $0x1c] sm:$0xf] %vm3617_vm6, %v3616_v30  ;;  %vm3607_vm6 = vcmask 516096  }
 0x2d5   : > { %v3247_v33 = vadd.f32 %v3246_v49, %v3198_v23 }
 0x2d6   : > { %v3635_v24 = vpop.permute.xlu1 %3634 }
 0x2d7   : > { %vm3264_vm8 = vcmp.ge.f32.partialorder %v3247_v33, 0.0  ;;  %v3280_v4 = vmul.f32 0.05, %v3247_v33  ;;  %3659 = vst.msk [vmem:[%s6410_s21] sm:$0xf] %vm3658_vm5, %v3635_v24 }
 0x2d9   : > { %v3296_v61 = vsel %vm3264_vm8, %v3247_v33, %v3280_v4 }
 0x2da   : > { %v3569_v32 = vmul.f32 0.0, %v3296_v61 }
 0x2dc   : > { %v3599_v10 = vsel %vm950_vm3, %v3569_v32, 0.0 }
 0x2dd   : > { %v3600_v60 = vadd.f32 %v3599_v10, %v3598_v57 }
 0x2df   : > { %v3601_v62 = vrot.slane %v3600_v60, 4 }
 0x2e1   : > { %v3602_v12 = vadd.f32 %v3601_v62, %v3600_v60 }
 0x2e3   : > { %v3603_v29 = vrot.slane %v3602_v12, 2 }
 0x2e5   : > { %v3604_v42 = vadd.f32 %v3603_v29, %v3602_v12 }
 0x2e7   : > { %v3605_v40 = vrot.slane %v3604_v42, 1 }
 0x2e9   : > { %v3606_v9 = vadd.f32 %v3605_v40, %v3604_v42 }
 0x2eb   : > { %3608 = vst.msk [vmem:[%s437_s12] sm:$0x1] %vm3607_vm6, %v3606_v9 }
 0x2f6   : > { %v3639_v14 = vpop.permute.xlu0 %3638 }
 0x2f7   : > { %3661 = vst.msk [vmem:[%s6410_s21 + $0x8] sm:$0xf] %vm3658_vm5, %v3639_v14 }
 0x2fe   : > { %v3643_v26 = vpop.permute.xlu2 %3642 }
 0x2ff   : > { %3663 = vst.msk [vmem:[%s6410_s21 + $0x10] sm:$0xf] %vm3658_vm5, %v3643_v26 }
 0x306   : > { %v3641_v8 = vpop.permute.xlu1 %3640 }
 0x307   : > { %3662 = vst.msk [vmem:[%s6410_s21 + $0xc] sm:$0xf] %vm3658_vm5, %v3641_v8 }
 0x326   : > { %v3645_v58 = vpop.permute.xlu0 %3644 }
 0x327   : > { %3664 = vst.msk [vmem:[%s6410_s21 + $0x14] sm:$0xf] %vm3658_vm5, %v3645_v58 }
 0x32e   : > { %v3649_v21 = vpop.permute.xlu2 %3648 }
 0x32f   : > { %3666 = vst.msk [vmem:[%s6410_s21 + $0x1c] sm:$0xf] %vm3658_vm5, %v3649_v21 }
 0x336   : > { %v3647_v50 = vpop.permute.xlu1 %3646 }
 0x337   : > { %3665 = vst.msk [vmem:[%s6410_s21 + $0x18] sm:$0xf] %vm3658_vm5, %v3647_v50 }
 0x338 PF: > { %s18_s28 = sadd.s32 1, %s4724_s28   ;;  %s6562_s24 = smov %s4716_s26 }
 0x339   : > { %p15_p10 = scmp.ge.s32.totalorder %s18_s28, 10   ;;  %s6563_s25 = smov %s4720_s27 }
 0x33a   : > { %s6564_s26 = smov %s6567_s29  ;;  %s6565_s27 = smov %s6571_s30 }
 0x33b   :  { %17 = sbr.rel (!%p15_p10) target bundleno = 3 (0x3), region = 100 }

// kernel: pmcb_forward.7
= control target key start
LH: loop header
LB: loop body
LE: loop exit
PB: predicated region body
PF: predicated region fallthrough
CT: control target
= control target key end

     0   :  { %11 = vsyncpa [#allocation3], 0  ;;  %s2568_s0 = inlined_call_operand.vmem [shape: bf16[2,256,16], index: 0, kind: input, shape index: {}]   ;;  %s2569_s1 = inlined_call_operand.vmem [shape: bf16[2,256,16], index: 1, kind: input, shape index: {}]   ;;  %s2570_s2 = inlined_call_operand.vmem [shape: bf16[2,256,32], index: 2, kind: input, shape index: {}]   ;;  %s2571_s3 = inlined_call_operand.vmem [shape: f32[2,256,64], index: 3, kind: input, shape index: {}]   ;;  %s2572_s4 = inlined_call_operand.vmem [shape: f32[2,64,64], index: 4, kind: input, shape index: {}]   ;;  %s2573_s5 = inlined_call_operand.vmem [shape: f32[1,64], index: 5, kind: input, shape index: {}]   ;;  %s2574_s6 = inlined_call_operand.hbm [shape: f32[2,256,64], index: 6, kind: output, shape index: {}]  }
   0x1   :  { %13 = vsyncpa [#allocation3 + $0x1], 0  ;;  %s2109_s21 = smov 0   ;;  %s2111_s22 = smov 0  }
   0x2   :  { %s2113_s23 = smov 0   ;;  %s2115_s24 = smov 0  }
   0x3   :  { %s2117_s25 = smov 0   ;;  %s2119_s26 = smov 0  }
   0x4 LB: > { %s1566_s27 = sadd.s32 4294967295, %s2070_s26   ;;  %s1567_s28 = sadd.s32 4294967294, %s2070_s26   ;;  %s2070_s26 = sphi %s2119_s26, %s19_s26   ;;  %s2066_s25 = sphi %s2117_s25, %s2581_s25   ;;  %s2062_s24 = sphi %s2115_s24, %s2580_s24   ;;  %s2058_s23 = sphi %s2113_s23, %s2579_s23   ;;  %s2054_s22 = sphi %s2111_s22, %s2578_s22   ;;  %s2050_s21 = sphi %s2109_s21, %s2577_s21  }
   0x5   : > { %s31_s29 = sadd.s32 1, %s2066_s25  ;;  %s199_s30 = sadd.s32 1, %s2058_s23 }
   0x6   : > { %p33_p0 = scmp.ge.s32.totalorder %s31_s29, 2  ;;  %p209_p1 = scmp.ne.s32.totalorder %s2058_s23, %s2054_s22 }
   0x7   : > { %p210_p2 = scmp.eq.s32.totalorder %s1566_s27, 1  ;;  %p215_p3 = scmp.ne.s32.totalorder %s2054_s22, %s2050_s21 }
   0x8   : > { %s2583_s29 = smov (%p33_p0, %s31_s29), 0  ;;  %p216_p5 = scmp.eq.s32.totalorder %s1567_s28, 1 }
   0x9   : > { %p2149_p4 = por %p210_p2, %p209_p1  ;;  %s194_s8 = ssub.s32 %s2066_s25, %s2583_s29 }
   0xa   : > { %p1570_p6 = scmp.ge.s32.totalorder %s2070_s26, 1  ;;  %p197_p7 = scmp.eq.s32.totalorder %s194_s8, 0 }
   0xb   : > { %p2156_p8 = por %p216_p5, %p215_p3  ;;  %p297_p9 = scmp.lt.s32.totalorder %s2070_s26, 3 }
   0xc   : > { %s2162_s10 = scalar_select %p197_p7, %s2058_s23, %s199_s30  }
   0xd   : > { %p298_p10 = pnand %p1570_p6, %p297_p9 }
   0xe   : > { %p364_p11 = scmp.lt.s32.totalorder (!%p298_p10), %s2062_s24, 1  ;;  %s360_s14 = sand.u32 (!%p298_p10), 1, %s2054_s22  }
   0xf   : > { %301 = sbr.rel (%p298_p10) target bundleno = 361 (0x169), region = 44  ;;  %s1571_s27 = sshll.u32 (!%p298_p10), %s360_s14, 8 }
  0x10   : > { %s2327_s30 = scalar_lea.vmem (!%p298_p10), [#allocation2], %s1571_s27  ;;  %s2012_s20 = scalar_lea.hbm (!%p298_p10), %s2574_s6, 512 }
  0x14   : > { %s2166_s11 = scalar_select %p364_p11, %s2062_s24, 1  ;;  %vm545_vm0 = vcmask 130048   ;;  %vm1028_vm1 = vcmask 261120   ;;  %vm1370_vm2 = vcmask 523264  }
  0x16   : > { %s1683_s12 = sshll.u32 %s2166_s11, 7  ;;  %s1687_s19 = sshll.u32 %s2166_s11, 6 }
  0x17   : > { %s2172_s15 = scalar_lea.vmem %s2568_s0, %s1683_s12  ;;  %s2177_s18 = scalar_lea.vmem %s2569_s1, %s1683_s12 }
  0x18   : > { %v1754_v0 = vld [vmem:[%s2177_s18] sm:$0xff]   ;;  %s2187_s28 = scalar_lea.vmem %s2570_s2, %s1683_s12  ;;  %s407_s13 = scalar_lea.vmem %s2572_s4, %s1687_s19  ;;  %v1908_v16 = vld [vmem:[%s2177_s18 + $0x68] sm:$0xff]   ;;  %v1909_v28 = vld [vmem:[%s2177_s18 + $0x70] sm:$0xff]  }
  0x19   : > { %v2182_v1 = vld [vmem:[%s2177_s18 + $0x60] sm:$0xff]   ;;  %v412_v3 = vld [vmem:[%s407_s13 + $0x18] sm:$0xff]  ;;  %v410_v4 = vld [vmem:[%s407_s13 + $0x8] sm:$0xff]  ;;  %v1755_v9 = vunpack.c.l.bf16 %v1754_v0  ;;  %v1756_v17 = vunpack.c.h.bf16 %v1754_v0  ;;  %v1807_v18 = vunpack.c.l.bf16 %v1908_v16  ;;  %v1808_v24 = vunpack.c.h.bf16 %v1908_v16  ;;  %s1686_s12 = sshll.u32 %s2166_s11, 8 }
  0x1a   : > { %v1690_v2 = vld [vmem:[%s2172_s15] sm:$0xff]   ;;  %v416_v5 = vld [vmem:[%s407_s13 + $0x38] sm:$0xff]  ;;  %656 = vmatpush.msra.mxu0 %v412_v3  ;;  %1926 = vmatpush.msra.mxu3 %v412_v3  ;;  %v411_v6 = vld [vmem:[%s407_s13 + $0x10] sm:$0xff]  ;;  %v1804_v10 = vunpack.c.h.bf16 %v2182_v1  ;;  %v1811_v30 = vunpack.c.l.bf16 %v1909_v28  ;;  %v1812_v36 = vunpack.c.h.bf16 %v1909_v28  ;;  %s2306_s19 = scalar_lea.vmem %s2571_s3, %s1686_s12  ;;  %s1404_s12 = scalar_lea.sflag [#allocation3], %s360_s14 }
  0x1b   : > { %v409_v7 = vld [vmem:[%s407_s13] sm:$0xff]  ;;  %v415_v8 = vld [vmem:[%s407_s13 + $0x30] sm:$0xff]  ;;  %865 = vmatpush.msra.mxu1 %v410_v4  ;;  %1137 = vmatpush.msra.mxu2 %v416_v5  ;;  %v1691_v11 = vunpack.c.l.bf16 %v1690_v2  ;;  %v414_v13 = vld [vmem:[%s407_s13 + $0x28] sm:$0xff]  ;;  %v1692_v19 = vunpack.c.h.bf16 %v1690_v2 }
  0x1c   : > { %v1818_v12 = vld [vmem:[%s2187_s28] sm:$0xff]   ;;  %657 = vmatpush.msra.mxu0 %v411_v6  ;;  %1927 = vmatpush.msra.mxu3 %v411_v6  ;;  %v1896_v21 = vld [vmem:[%s2177_s18 + $0x8] sm:$0xff]   ;;  %v1897_v33 = vld [vmem:[%s2177_s18 + $0x10] sm:$0xff]  }
  0x1d   : > { %866 = vmatpush.msra.mxu1 %v409_v7  ;;  %1138 = vmatpush.msra.mxu2 %v415_v8  ;;  %v413_v14 = vld [vmem:[%s407_s13 + $0x20] sm:$0xff]  ;;  %v1819_v15 = vunpack.c.l.bf16 %v1818_v12  ;;  %v1820_v20 = vunpack.c.h.bf16 %v1818_v12  ;;  %v1881_v22 = vld [vmem:[%s2172_s15 + $0x8] sm:$0xff]   ;;  %v1759_v23 = vunpack.c.l.bf16 %v1896_v21  ;;  %v1760_v29 = vunpack.c.h.bf16 %v1896_v21  ;;  %v1882_v34 = vld [vmem:[%s2172_s15 + $0x10] sm:$0xff]  }
  0x1e   : > { %1582 = vmatmul.msk.f32.vlgmr.msra.gmra.mxu0 %vm545_vm0, %v1755_v9  ;;  %1607 = vmatmul.msk.f32.vlgmr.msra.gmra.mxu3 %vm545_vm0, %v1804_v10  ;;  %v1695_v25 = vunpack.c.l.bf16 %v1881_v22  ;;  %v1911_v26 = vld [vmem:[%s2187_s28 + $0x8] sm:$0xff]   ;;  %v1696_v31 = vunpack.c.h.bf16 %v1881_v22  ;;  %v1763_v35 = vunpack.c.l.bf16 %v1897_v33  ;;  %v1699_v37 = vunpack.c.l.bf16 %v1882_v34  ;;  %v1912_v38 = vld [vmem:[%s2187_s28 + $0x10] sm:$0xff]   ;;  %v1910_v40 = vld [vmem:[%s2177_s18 + $0x78] sm:$0xff]  }
  0x1f   : > { %1614 = vmatmul.msk.f32.vlgmr.msra.gmra.mxu1 %vm545_vm0, %v1691_v11  ;;  %1139 = vmatpush.msra.mxu2 %v414_v13  ;;  %v1823_v27 = vunpack.c.l.bf16 %v1911_v26  ;;  %v1824_v32 = vunpack.c.h.bf16 %v1911_v26  ;;  %v1827_v39 = vunpack.c.l.bf16 %v1912_v38  ;;  %v1764_v41 = vunpack.c.h.bf16 %v1897_v33  ;;  %v1898_v45 = vld [vmem:[%s2177_s18 + $0x18] sm:$0xff]   ;;  %v2235_v52 = vld [vmem:[%s2172_s15 + $0x60] sm:$0xff]   ;;  %v1893_v58 = vld [vmem:[%s2172_s15 + $0x68] sm:$0xff]  }
  0x20   : > { %1928 = vmatpush.msrb.mxu3 %v410_v4  ;;  %v1815_v42 = vunpack.c.l.bf16 %v1910_v40  ;;  %v1700_v43 = vunpack.c.h.bf16 %v1882_v34  ;;  %v1828_v44 = vunpack.c.h.bf16 %v1912_v38  ;;  %v1883_v46 = vld [vmem:[%s2172_s15 + $0x18] sm:$0xff]   ;;  %v1767_v47 = vunpack.c.l.bf16 %v1898_v45  ;;  %v1899_v57 = vld [vmem:[%s2177_s18 + $0x20] sm:$0xff]   ;;  %v1900_v6 = vld [vmem:[%s2177_s18 + $0x28] sm:$0xff]  }
  0x21   : > { %1140 = vmatpush.msra.mxu2 %v413_v14  ;;  %v1816_v48 = vunpack.c.h.bf16 %v1910_v40  ;;  %v1703_v49 = vunpack.c.l.bf16 %v1883_v46  ;;  %v1913_v50 = vld [vmem:[%s2187_s28 + $0x18] sm:$0xff]   ;;  %v1768_v53 = vunpack.c.h.bf16 %v1898_v45  ;;  %v1740_v54 = vunpack.c.h.bf16 %v2235_v52  ;;  %v1884_v59 = vld [vmem:[%s2172_s15 + $0x20] sm:$0xff]   ;;  %v1915_v12 = vld [vmem:[%s2187_s28 + $0x28] sm:$0xff]  }
  0x22   : > { %1646 = vmatmul.msk.f32.vlgmr.msra.gmra.mxu2 %vm1028_vm1, %v1819_v15  ;;  %1929 = vmatpush.msrb.mxu3 %v409_v7  ;;  %v1831_v51 = vunpack.c.l.bf16 %v1913_v50  ;;  %v1704_v55 = vunpack.c.h.bf16 %v1883_v46  ;;  %v1832_v56 = vunpack.c.h.bf16 %v1913_v50  ;;  %v1771_v60 = vunpack.c.l.bf16 %v1899_v57  ;;  %v1914_v63 = vld [vmem:[%s2187_s28 + $0x20] sm:$0xff]   ;;  %v1894_v7 = vld [vmem:[%s2172_s15 + $0x70] sm:$0xff]  }
  0x23   : > { %v1743_v61 = vunpack.c.l.bf16 %v1893_v58  ;;  %v1707_v62 = vunpack.c.l.bf16 %v1884_v59  ;;  %v1835_v0 = vunpack.c.l.bf16 %v1914_v63  ;;  %v1772_v2 = vunpack.c.h.bf16 %v1899_v57 }
  0x24   : > { %1930 = vmatpush.msra.mxu3 %v416_v5  ;;  %v1744_v3 = vunpack.c.h.bf16 %v1893_v58  ;;  %v1708_v4 = vunpack.c.h.bf16 %v1884_v59  ;;  %v1836_v5 = vunpack.c.h.bf16 %v1914_v63  ;;  %v1775_v9 = vunpack.c.l.bf16 %v1900_v6 }
  0x25   : > { %v1747_v10 = vunpack.c.l.bf16 %v1894_v7  ;;  %v1748_v15 = vunpack.c.h.bf16 %v1894_v7 }
  0x26   : > { %1931 = vmatpush.msra.mxu3 %v415_v8  ;;  %1583 = vmatmul.msk.f32.gmra.mxu0 %vm545_vm0, %v1756_v17  ;;  %v1885_v8 = vld [vmem:[%s2172_s15 + $0x28] sm:$0xff]   ;;  %v1840_v17 = vunpack.c.h.bf16 %v1915_v12 }
  0x27   : > { %1608 = vmatmul.msk.f32.gmra.mxu3 %vm545_vm0, %v1807_v18  ;;  %1615 = vmatmul.msk.f32.gmra.mxu1 %vm545_vm0, %v1692_v19  ;;  %v1711_v11 = vunpack.c.l.bf16 %v1885_v8  ;;  %v1712_v16 = vunpack.c.h.bf16 %v1885_v8  ;;  %v1901_v18 = vld [vmem:[%s2177_s18 + $0x30] sm:$0xff]   ;;  %v1895_v19 = vld [vmem:[%s2172_s15 + $0x78] sm:$0xff]  }
  0x28   : > { %1932 = vmatpush.msra.mxu3 %v414_v13  ;;  %v1839_v13 = vunpack.c.l.bf16 %v1915_v12  ;;  %v1779_v21 = vunpack.c.l.bf16 %v1901_v18  ;;  %v1751_v22 = vunpack.c.l.bf16 %v1895_v19  ;;  %v1780_v26 = vunpack.c.h.bf16 %v1901_v18  ;;  %v1919_v12 = vld [vmem:[%s2187_s28 + $0x48] sm:$0xff]  }
  0x29   : > { %v1307_v18 = vld [vmem:[%s2306_s19 + $0x8] sm:$0xff] }
  0x2a   : > { %1933 = vmatpush.msra.mxu3 %v413_v14  ;;  %1647 = vmatmul.msk.f32.gmra.mxu2 %vm1028_vm1, %v1820_v20  ;;  %v1776_v14 = vunpack.c.h.bf16 %v1900_v6  ;;  %v1886_v20 = vld [vmem:[%s2172_s15 + $0x30] sm:$0xff]  }
  0x2b   : > { %v1716_v28 = vunpack.c.h.bf16 %v1886_v20 }
  0x2e   : > { %1584 = vmatmul.msk.f32.gmra.mxu0 %vm545_vm0, %v1759_v23  ;;  %v1715_v23 = vunpack.c.l.bf16 %v1886_v20 }
  0x2f   : > { %1609 = vmatmul.msk.f32.gmra.mxu3 %vm545_vm0, %v1808_v24  ;;  %1616 = vmatmul.msk.f32.gmra.mxu1 %vm545_vm0, %v1695_v25  ;;  %v1916_v24 = vld [vmem:[%s2187_s28 + $0x30] sm:$0xff]  }
  0x30   : > { %v1843_v25 = vunpack.c.l.bf16 %v1916_v24 }
  0x32   : > { %1648 = vmatmul.msk.f32.gmra.mxu2 %vm1028_vm1, %v1823_v27  ;;  %v1752_v27 = vunpack.c.h.bf16 %v1895_v19 }
  0x36   : > { %1585 = vmatmul.msk.f32.gmra.mxu0 %vm545_vm0, %v1760_v29  ;;  %v1844_v29 = vunpack.c.h.bf16 %v1916_v24 }
  0x37   : > { %1610 = vmatmul.msk.f32.gmra.mxu3 %vm545_vm0, %v1811_v30  ;;  %1617 = vmatmul.msk.f32.gmra.mxu1 %vm545_vm0, %v1696_v31  ;;  %v1902_v30 = vld [vmem:[%s2177_s18 + $0x38] sm:$0xff]   ;;  %v1922_v31 = vld [vmem:[%s2187_s28 + $0x60] sm:$0xff]  }
  0x38   : > { %v1783_v33 = vunpack.c.l.bf16 %v1902_v30  ;;  %v1867_v34 = vunpack.c.l.bf16 %v1922_v31  ;;  %v1784_v38 = vunpack.c.h.bf16 %v1902_v30  ;;  %v1856_v30 = vunpack.c.h.bf16 %v1919_v12 }
  0x3a   : > { %1649 = vmatmul.msk.f32.gmra.mxu2 %vm1028_vm1, %v1824_v32  ;;  %v1887_v32 = vld [vmem:[%s2172_s15 + $0x38] sm:$0xff]  }
  0x3b   : > { %v1720_v40 = vunpack.c.h.bf16 %v1887_v32 }
  0x3e   : > { %1586 = vmatmul.msk.f32.gmra.mxu0 %vm545_vm0, %v1763_v35  ;;  %v1719_v35 = vunpack.c.l.bf16 %v1887_v32  ;;  %v1905_v32 = vld [vmem:[%s2177_s18 + $0x50] sm:$0xff]  }
  0x3f   : > { %1611 = vmatmul.msk.f32.gmra.mxu3 %vm545_vm0, %v1812_v36  ;;  %1618 = vmatmul.msk.f32.gmra.mxu1 %vm545_vm0, %v1699_v37  ;;  %v1917_v36 = vld [vmem:[%s2187_s28 + $0x38] sm:$0xff]  }
  0x40   : > { %v1847_v37 = vunpack.c.l.bf16 %v1917_v36 }
  0x42   : > { %1650 = vmatmul.msk.f32.gmra.mxu2 %vm1028_vm1, %v1827_v39  ;;  %v1868_v39 = vunpack.c.h.bf16 %v1922_v31  ;;  %v1308_v31 = vld [vmem:[%s2306_s19 + $0x10] sm:$0xff] }
  0x46   : > { %1587 = vmatmul.msk.f32.gmra.mxu0 %vm545_vm0, %v1764_v41  ;;  %v1848_v41 = vunpack.c.h.bf16 %v1917_v36 }
  0x47   : > { %1612 = vmatmul.msk.f32.gmra.mxu3 %vm545_vm0, %v1815_v42  ;;  %1619 = vmatmul.msk.f32.gmra.mxu1 %vm545_vm0, %v1700_v43  ;;  %v1903_v42 = vld [vmem:[%s2177_s18 + $0x40] sm:$0xff]   ;;  %v1923_v43 = vld [vmem:[%s2187_s28 + $0x68] sm:$0xff]  }
  0x48   : > { %v1787_v45 = vunpack.c.l.bf16 %v1903_v42  ;;  %v1871_v46 = vunpack.c.l.bf16 %v1923_v43 }
  0x4a   : > { %1651 = vmatmul.msk.f32.gmra.mxu2 %vm1028_vm1, %v1828_v44  ;;  %v1888_v44 = vld [vmem:[%s2172_s15 + $0x40] sm:$0xff]  }
  0x4b   : > { %v1724_v57 = vunpack.c.h.bf16 %v1888_v44 }
  0x4e   : > { %1588 = vmatmul.msk.f32.gmra.mxu0 %vm545_vm0, %v1767_v47 }
  0x4f   : > { %1613 = vmatmul.msk.f32.gmra.mxu3 %vm545_vm0, %v1816_v48  ;;  %1620 = vmatmul.msk.f32.gmra.mxu1 %vm545_vm0, %v1703_v49  ;;  %v1723_v48 = vunpack.c.l.bf16 %v1888_v44  ;;  %v1918_v49 = vld [vmem:[%s2187_s28 + $0x40] sm:$0xff]  }
  0x50   : > { %v1852_v63 = vunpack.c.h.bf16 %v1918_v49 }
  0x52   : > { %1652 = vmatmul.msk.f32.gmra.mxu2 %vm1028_vm1, %v1831_v51  ;;  %v1851_v51 = vunpack.c.l.bf16 %v1918_v49 }
  0x56   : > { %1589 = vmatmul.msk.f32.gmra.mxu0 %vm545_vm0, %v1768_v53 }
  0x57   : > { %1639 = vmatmul.msk.f32.vlgmr.msrb.gmra.mxu3 %vm545_vm0, %v1740_v54  ;;  %1621 = vmatmul.msk.f32.gmra.mxu1 %vm545_vm0, %v1704_v55  ;;  %v1788_v54 = vunpack.c.h.bf16 %v1903_v42  ;;  %v1872_v55 = vunpack.c.h.bf16 %v1923_v43  ;;  %v1920_v42 = vld [vmem:[%s2187_s28 + $0x50] sm:$0xff]  }
  0x5a   : > { %1653 = vmatmul.msk.f32.gmra.mxu2 %vm1028_vm1, %v1832_v56 }
  0x5e   : > { %1590 = vmatmul.msk.f32.gmra.mxu0 %vm545_vm0, %v1771_v60  ;;  %v2311_v60 = vld [vmem:[%s2573_s5] ss:$0 sm:$0xff] }
  0x5f   : > { %1640 = vmatmul.msk.f32.gmra.mxu3 %vm545_vm0, %v1743_v61  ;;  %1622 = vmatmul.msk.f32.gmra.mxu1 %vm545_vm0, %v1707_v62 }
  0x62   : > { %1654 = vmatmul.msk.f32.gmra.mxu2 %vm1028_vm1, %v1835_v0  ;;  %v1306_v0 = vld [vmem:[%s2306_s19] sm:$0xff] }
  0x66   : > { %1591 = vmatmul.msk.f32.gmra.mxu0 %vm545_vm0, %v1772_v2  ;;  %v1904_v2 = vld [vmem:[%s2177_s18 + $0x48] sm:$0xff]  }
  0x67   : > { %1641 = vmatmul.msk.f32.gmra.mxu3 %vm545_vm0, %v1744_v3  ;;  %1623 = vmatmul.msk.f32.gmra.mxu1 %vm545_vm0, %v1708_v4  ;;  %v1924_v3 = vld [vmem:[%s2187_s28 + $0x70] sm:$0xff]   ;;  %v1791_v8 = vunpack.c.l.bf16 %v1904_v2 }
  0x6a   : > { %1655 = vmatmul.msk.f32.gmra.mxu2 %vm1028_vm1, %v1836_v5  ;;  %v1889_v5 = vld [vmem:[%s2172_s15 + $0x48] sm:$0xff]  }
  0x6e   : > { %1592 = vmatmul.msk.f32.gmra.mxu0 %vm545_vm0, %v1775_v9  ;;  %v1875_v9 = vunpack.c.l.bf16 %v1924_v3 }
  0x6f   : > { %1642 = vmatmul.msk.f32.gmra.mxu3 %vm545_vm0, %v1747_v10  ;;  %1624 = vmatmul.msk.f32.gmra.mxu1 %vm545_vm0, %v1711_v11  ;;  %v1727_v11 = vunpack.c.l.bf16 %v1889_v5 }
  0x72   : > { %1656 = vmatmul.msk.f32.gmra.mxu2 %vm1028_vm1, %v1839_v13 }
  0x76   : > { %1593 = vmatmul.msk.f32.gmra.mxu0 %vm545_vm0, %v1776_v14 }
  0x77   : > { %1643 = vmatmul.msk.f32.gmra.mxu3 %vm545_vm0, %v1748_v15  ;;  %1625 = vmatmul.msk.f32.gmra.mxu1 %vm545_vm0, %v1712_v16 }
  0x7a   : > { %1657 = vmatmul.msk.f32.gmra.mxu2 %vm1028_vm1, %v1840_v17  ;;  %v1855_v17 = vunpack.c.l.bf16 %v1919_v12 }
  0x7e   : > { %1594 = vmatmul.msk.f32.gmra.mxu0 %vm545_vm0, %v1779_v21 }
  0x7f   : > { %1644 = vmatmul.msk.f32.gmra.mxu3 %vm545_vm0, %v1751_v22  ;;  %1626 = vmatmul.msk.f32.gmra.mxu1 %vm545_vm0, %v1715_v23  ;;  %v1792_v22 = vunpack.c.h.bf16 %v1904_v2  ;;  %v1876_v23 = vunpack.c.h.bf16 %v1924_v3  ;;  %v1906_v2 = vld [vmem:[%s2177_s18 + $0x58] sm:$0xff]  }
  0x82   : > { %1658 = vmatmul.msk.f32.gmra.mxu2 %vm1028_vm1, %v1843_v25  ;;  %v1728_v25 = vunpack.c.h.bf16 %v1889_v5 }
  0x86   : > { %1595 = vmatmul.msk.f32.gmra.mxu0 %vm545_vm0, %v1780_v26 }
  0x87   : > { %1645 = vmatmul.msk.f32.gmra.mxu3 %vm545_vm0, %v1752_v27  ;;  %1627 = vmatmul.msk.f32.gmra.mxu1 %vm545_vm0, %v1716_v28 }
  0x8a   : > { %1659 = vmatmul.msk.f32.gmra.mxu2 %vm1028_vm1, %v1844_v29 }
  0x8e   : > { %1596 = vmatmul.msk.f32.gmra.mxu0 %vm545_vm0, %v1783_v33  ;;  %v1925_v33 = vld [vmem:[%s2187_s28 + $0x78] sm:$0xff]  }
  0x8f   : > { %1670 = vmatmul.msk.f32.vlgmr.msra.gmra.mxu3 %vm1028_vm1, %v1867_v34  ;;  %1628 = vmatmul.msk.f32.gmra.mxu1 %vm545_vm0, %v1719_v35  ;;  %v1890_v35 = vld [vmem:[%s2172_s15 + $0x50] sm:$0xff]  }
  0x92   : > { %1660 = vmatmul.msk.f32.gmra.mxu2 %vm1028_vm1, %v1847_v37 }
  0x96   : > { %1597 = vmatmul.msk.f32.gmra.mxu0 %vm545_vm0, %v1784_v38  ;;  %v1795_v38 = vunpack.c.l.bf16 %v1905_v32 }
  0x97   : > { %1671 = vmatmul.msk.f32.gmra.mxu3 %vm1028_vm1, %v1868_v39  ;;  %1629 = vmatmul.msk.f32.gmra.mxu1 %vm545_vm0, %v1720_v40  ;;  %v1879_v39 = vunpack.c.l.bf16 %v1925_v33 }
  0x9a   : > { %1661 = vmatmul.msk.f32.gmra.mxu2 %vm1028_vm1, %v1848_v41  ;;  %v1731_v41 = vunpack.c.l.bf16 %v1890_v35 }
  0x9b   : > { %v659_v47 = vpop.f32.mrf.mxu0 }
  0x9c   : > { %v868_v50 = vpop.f32.mrf.mxu1 }
  0x9d   : > { %v869_v58 = vadd.f32 %v868_v50, %v659_v47  ;;  %v1859_v47 = vunpack.c.l.bf16 %v1920_v42 }
  0x9e   : > { %1598 = vmatmul.msk.f32.gmra.mxu0 %vm545_vm0, %v1787_v45 }
  0x9f   : > { %1672 = vmatmul.msk.f32.gmra.mxu3 %vm1028_vm1, %v1871_v46  ;;  %1630 = vmatmul.msk.f32.gmra.mxu1 %vm545_vm0, %v1723_v48  ;;  %v1309_v48 = vld [vmem:[%s2306_s19 + $0x18] sm:$0xff] }
  0xa1   : > { %v2299_v53 = vpop.f32.mrf.mxu3 }
  0xa2   : > { %1662 = vmatmul.msk.f32.gmra.mxu2 %vm1028_vm1, %v1851_v51 }
  0xa3   : > { %v662_v56 = vpop.f32.mrf.mxu0 }
  0xa4   : > { %v871_v59 = vpop.f32.mrf.mxu1 }
  0xa5   : > { %v1142_v61 = vpop.f32.mrf.mxu2  ;;  %v872_v13 = vadd.f32 %v871_v59, %v662_v56 }
  0xa6   : > { %v1238_v62 = vadd.f32 %v1142_v61, %v869_v58  ;;  %1599 = vmatmul.msk.f32.gmra.mxu0 %vm545_vm0, %v1788_v54  ;;  %v1796_v54 = vunpack.c.h.bf16 %v1905_v32 }
  0xa7   : > { %1673 = vmatmul.msk.f32.gmra.mxu3 %vm1028_vm1, %v1872_v55  ;;  %1631 = vmatmul.msk.f32.gmra.mxu1 %vm545_vm0, %v1724_v57  ;;  %v1880_v55 = vunpack.c.h.bf16 %v1925_v33  ;;  %v1732_v57 = vunpack.c.h.bf16 %v1890_v35  ;;  %v1803_v33 = vunpack.c.l.bf16 %v2182_v1 }
  0xa8   : > { %v1274_v4 = vadd.f32 %v2311_v60, %v1238_v62 }
  0xaa   : > { %v2323_v6 = vpop.f32.mrf.mxu3  ;;  %v1338_v7 = vadd.f32 %v1306_v0, %v1274_v4  ;;  %1663 = vmatmul.msk.f32.gmra.mxu2 %vm1028_vm1, %v1852_v63  ;;  %v1860_v63 = vunpack.c.h.bf16 %v1920_v42  ;;  %v1310_v0 = vld [vmem:[%s2306_s19 + $0x20] sm:$0xff]  ;;  %v1891_v4 = vld [vmem:[%s2172_s15 + $0x58] sm:$0xff]   ;;  %s1688_s15 = sshll.u32 %s2062_s24, 8  ;;  %s1418_s24 = sshll.u32 %s2327_s30, 4  ;;  %s1419_s24 = int_to_ptr.vmem [resolvable:$true] %s1418_s24 }
  0xab   : > { %v665_v10 = vpop.f32.mrf.mxu0  ;;  %v1313_v42 = vld [vmem:[%s2306_s19 + $0x38] sm:$0xff]  ;;  %s1417_s8 = scalar_lea.hbm %s2574_s6, %s1688_s15 }
  0xac   : > { %1371 = vst.msk [vmem:[%s2327_s30] sm:$0xff] %vm1370_vm2, %v1338_v7  ;;  %v874_v14 = vpop.f32.mrf.mxu1  ;;  %s1420_s13 = sshll.u32 %s1417_s8, 4  ;;  %s1421_s13 = int_to_ptr.hbm [resolvable:$true] %s1420_s13 }
  0xad   : > { %v1145_v15 = vpop.f32.mrf.mxu2  ;;  %v875_v26 = vadd.f32 %v874_v14, %v665_v10  ;;  %v1735_v10 = vunpack.c.l.bf16 %v1891_v4  ;;  %s2006_s16 = sshra.s32 %s1421_s13, 4  ;;  %s2007_s16 = int_to_ptr.hbm [resolvable:$true] %s2006_s16 }
  0xae   : > { %v1239_v16 = vadd.f32 %v1145_v15, %v872_v13  ;;  %1600 = vmatmul.msk.f32.gmra.mxu0 %vm545_vm0, %v1791_v8  ;;  %v1799_v8 = vunpack.c.l.bf16 %v1906_v2  ;;  %s2008_s17 = scalar_lea.hbm %s2007_s16, 256  ;;  %p2013_p1 = scmp.lt.s32.totalorder %s2007_s16, %s2574_s6 }
  0xaf   : > { %1674 = vmatmul.msk.f32.gmra.mxu3 %vm1028_vm1, %v1875_v9  ;;  %1632 = vmatmul.msk.f32.gmra.mxu1 %vm545_vm0, %v1727_v11  ;;  %v1921_v11 = vld [vmem:[%s2187_s28 + $0x58] sm:$0xff]   ;;  %p2009_p12 = scmp.ne.s32.totalorder %s2007_s16, %s2008_s17  ;;  %p2014_p2 = scmp.lt.s32.totalorder %s2012_s20, %s2008_s17 }
  0xb0   : > { %v1275_v19 = vadd.f32 %v2311_v60, %v1239_v16  ;;  %v1863_v16 = vunpack.c.l.bf16 %v1921_v11 }
  0xb1   : > { %p2010_p13 = pnand %p2009_p12, %p2149_p4  ;;  %p2015_p3 = por %p2014_p2, %p2013_p1 }
  0xb2   : > { %v2336_v20 = vpop.f32.mrf.mxu3  ;;  %v1339_v21 = vadd.f32 %v1307_v18, %v1275_v19  ;;  %1664 = vmatmul.msk.f32.gmra.mxu2 %vm1028_vm1, %v1855_v17  ;;  %v1311_v17 = vld [vmem:[%s2306_s19 + $0x28] sm:$0xff] }
  0xb3   : > { %v668_v24 = vpop.f32.mrf.mxu0  ;;  %p2011_p0 = pneg %p2010_p13 }
  0xb4   : > { %1372 = vst.msk [vmem:[%s2327_s30 + $0x8] sm:$0xff] %vm1370_vm2, %v1339_v21  ;;  %v877_v27 = vpop.f32.mrf.mxu1 }
  0xb5   : > { %v1148_v28 = vpop.f32.mrf.mxu2  ;;  %v878_v43 = vadd.f32 %v877_v27, %v668_v24  ;;  %v1736_v24 = vunpack.c.h.bf16 %v1891_v4  ;;  %p2016_p5 = pnand %p2015_p3, %p2011_p0 }
  0xb6   : > { %v1240_v29 = vadd.f32 %v1148_v28, %v875_v26  ;;  %1601 = vmatmul.msk.f32.gmra.mxu0 %vm545_vm0, %v1792_v22  ;;  %v1800_v22 = vunpack.c.h.bf16 %v1906_v2 }
  0xb7   : > { %1675 = vmatmul.msk.f32.gmra.mxu3 %vm1028_vm1, %v1876_v23  ;;  %1633 = vmatmul.msk.f32.gmra.mxu1 %vm545_vm0, %v1728_v25 }
  0xb8   : > { %v1276_v34 = vadd.f32 %v2311_v60, %v1240_v29  ;;  %v1864_v29 = vunpack.c.h.bf16 %v1921_v11 }
  0xba   : > { %v2349_v36 = vpop.f32.mrf.mxu3  ;;  %v1340_v37 = vadd.f32 %v1308_v31, %v1276_v34  ;;  %1665 = vmatmul.msk.f32.gmra.mxu2 %vm1028_vm1, %v1856_v30  ;;  %v1312_v30 = vld [vmem:[%s2306_s19 + $0x30] sm:$0xff] }
  0xbb   : > { %v671_v40 = vpop.f32.mrf.mxu0 }
  0xbc   : > { %1373 = vst.msk [vmem:[%s2327_s30 + $0x10] sm:$0xff] %vm1370_vm2, %v1340_v37  ;;  %v880_v44 = vpop.f32.mrf.mxu1  ;;  %v1739_v37 = vunpack.c.l.bf16 %v2235_v52 }
  0xbd   : > { %v1151_v45 = vpop.f32.mrf.mxu2  ;;  %v881_v58 = vadd.f32 %v880_v44, %v671_v40 }
  0xbe   : > { %v1241_v46 = vadd.f32 %v1151_v45, %v878_v43  ;;  %1602 = vmatmul.msk.f32.gmra.mxu0 %vm545_vm0, %v1795_v38 }
  0xbf   : > { %1676 = vmatmul.msk.f32.gmra.mxu3 %vm1028_vm1, %v1879_v39  ;;  %1634 = vmatmul.msk.f32.gmra.mxu1 %vm545_vm0, %v1731_v41 }
  0xc0   : > { %v1277_v49 = vadd.f32 %v2311_v60, %v1241_v46 }
  0xc2   : > { %v2360_v50 = vpop.f32.mrf.mxu3  ;;  %v1341_v51 = vadd.f32 %v1309_v48, %v1277_v49  ;;  %1666 = vmatmul.msk.f32.gmra.mxu2 %vm1028_vm1, %v1859_v47  ;;  %v1314_v49 = vld [vmem:[%s2306_s19 + $0x40] sm:$0xff] }
  0xc3   : > { %v674_v56 = vpop.f32.mrf.mxu0 }
  0xc4   : > { %1374 = vst.msk [vmem:[%s2327_s30 + $0x18] sm:$0xff] %vm1370_vm2, %v1341_v51  ;;  %v883_v59 = vpop.f32.mrf.mxu1 }
  0xc5   : > { %v1154_v61 = vpop.f32.mrf.mxu2  ;;  %v884_v12 = vadd.f32 %v883_v59, %v674_v56 }
  0xc6   : > { %v1242_v62 = vadd.f32 %v1154_v61, %v881_v58  ;;  %1603 = vmatmul.msk.f32.gmra.mxu0 %vm545_vm0, %v1796_v54 }
  0xc7   : > { %1677 = vmatmul.msk.f32.gmra.mxu3 %vm1028_vm1, %v1880_v55  ;;  %1635 = vmatmul.msk.f32.gmra.mxu1 %vm545_vm0, %v1732_v57 }
  0xc8   : > { %v1278_v3 = vadd.f32 %v2311_v60, %v1242_v62  ;;  %v1315_v62 = vld [vmem:[%s2306_s19 + $0x48] sm:$0xff] }
  0xca   : > { %v2372_v5 = vpop.f32.mrf.mxu3  ;;  %v1342_v7 = vadd.f32 %v1310_v0, %v1278_v3  ;;  %1667 = vmatmul.msk.f32.gmra.mxu2 %vm1028_vm1, %v1860_v63 }
  0xcb   : > { %v677_v9 = vpop.f32.mrf.mxu0 }
  0xcc   : > { %1375 = vst.msk [vmem:[%s2327_s30 + $0x20] sm:$0xff] %vm1370_vm2, %v1342_v7  ;;  %v886_v13 = vpop.f32.mrf.mxu1 }
  0xcd   : > { %v1157_v14 = vpop.f32.mrf.mxu2  ;;  %v887_v25 = vadd.f32 %v886_v13, %v677_v9 }
  0xce   : > { %v1243_v15 = vadd.f32 %v1157_v14, %v884_v12  ;;  %1604 = vmatmul.msk.f32.gmra.mxu0 %vm545_vm0, %v1799_v8 }
  0xcf   : > { %1636 = vmatmul.msk.f32.gmra.mxu1 %vm545_vm0, %v1735_v10  ;;  %v1316_v10 = vld [vmem:[%s2306_s19 + $0x50] sm:$0xff] }
  0xd0   : > { %v1279_v18 = vadd.f32 %v2311_v60, %v1243_v15 }
  0xd2   : > { %v2382_v19 = vpop.f32.mrf.mxu3  ;;  %v1343_v21 = vadd.f32 %v1311_v17, %v1279_v18  ;;  %1668 = vmatmul.msk.f32.gmra.mxu2 %vm1028_vm1, %v1863_v16 }
  0xd3   : > { %v680_v23 = vpop.f32.mrf.mxu0 }
  0xd4   : > { %1376 = vst.msk [vmem:[%s2327_s30 + $0x28] sm:$0xff] %vm1370_vm2, %v1343_v21  ;;  %v889_v26 = vpop.f32.mrf.mxu1  ;;  %v1317_v21 = vld [vmem:[%s2306_s19 + $0x58] sm:$0xff] }
  0xd5   : > { %v1160_v27 = vpop.f32.mrf.mxu2  ;;  %v890_v38 = vadd.f32 %v889_v26, %v680_v23 }
  0xd6   : > { %v1244_v28 = vadd.f32 %v1160_v27, %v887_v25  ;;  %1605 = vmatmul.msk.f32.gmra.mxu0 %vm545_vm0, %v1800_v22 }
  0xd7   : > { %1637 = vmatmul.msk.f32.gmra.mxu1 %vm545_vm0, %v1736_v24 }
  0xd8   : > { %v1280_v31 = vadd.f32 %v2311_v60, %v1244_v28 }
  0xda   : > { %v2391_v32 = vpop.f32.mrf.mxu3  ;;  %v1344_v34 = vadd.f32 %v1312_v30, %v1280_v31  ;;  %1669 = vmatmul.msk.f32.gmra.mxu2 %vm1028_vm1, %v1864_v29  ;;  %v1318_v30 = vld [vmem:[%s2306_s19 + $0x60] sm:$0xff] }
  0xdb   : > { %v683_v35 = vpop.f32.mrf.mxu0 }
  0xdc   : > { %1377 = vst.msk [vmem:[%s2327_s30 + $0x30] sm:$0xff] %vm1370_vm2, %v1344_v34  ;;  %v892_v39 = vpop.f32.mrf.mxu1 }
  0xdd   : > { %v1163_v40 = vpop.f32.mrf.mxu2  ;;  %v893_v52 = vadd.f32 %v892_v39, %v683_v35 }
  0xde   : > { %v1245_v41 = vadd.f32 %v1163_v40, %v890_v38  ;;  %1606 = vmatmul.msk.f32.gmra.mxu0 %vm545_vm0, %v1803_v33 }
  0xdf   : > { %1638 = vmatmul.msk.f32.gmra.mxu1 %vm545_vm0, %v1739_v37 }
  0xe0   : > { %v1281_v1 = vadd.f32 %v2311_v60, %v1245_v41  ;;  %v1319_v41 = vld [vmem:[%s2306_s19 + $0x68] sm:$0xff] }
  0xe2   : > { %v2402_v43 = vpop.f32.mrf.mxu3  ;;  %v1345_v44 = vadd.f32 %v1313_v42, %v1281_v1 }
  0xe3   : > { %v686_v45 = vpop.f32.mrf.mxu0 }
  0xe4   : > { %1378 = vst.msk [vmem:[%s2327_s30 + $0x38] sm:$0xff] %vm1370_vm2, %v1345_v44  ;;  %v895_v46 = vpop.f32.mrf.mxu1 }
  0xe5   : > { %v1166_v47 = vpop.f32.mrf.mxu2  ;;  %v896_v57 = vadd.f32 %v895_v46, %v686_v45 }
  0xe6   : > { %v1246_v48 = vadd.f32 %v1166_v47, %v893_v52 }
  0xe8   : > { %v1282_v51 = vadd.f32 %v2311_v60, %v1246_v48 }
  0xea   : > { %v2408_v54 = vpop.f32.mrf.mxu3  ;;  %v1346_v55 = vadd.f32 %v1314_v49, %v1282_v51  ;;  %v1320_v49 = vld [vmem:[%s2306_s19 + $0x70] sm:$0xff]  ;;  %v944_v51 = vadd.f32 %v2391_v32, %v2299_v53  ;;  %v1321_v53 = vld [vmem:[%s2306_s19 + $0x78] sm:$0xff]  ;;  %v947_v32 = vadd.f32 %v2402_v43, %v2323_v6 }
  0xeb   : > { %v689_v56 = vpop.f32.mrf.mxu0 }
  0xec   : > { %1379 = vst.msk [vmem:[%s2327_s30 + $0x40] sm:$0xff] %vm1370_vm2, %v1346_v55  ;;  %v898_v58 = vpop.f32.mrf.mxu1 }
  0xed   : > { %v1169_v59 = vpop.f32.mrf.mxu2  ;;  %v899_v4 = vadd.f32 %v898_v58, %v689_v56 }
  0xee   : > { %v1247_v61 = vadd.f32 %v1169_v59, %v896_v57  ;;  %v1331_v59 = vld [vmem:[%s2306_s19 + $0xc8] sm:$0xff] }
  0xf0   : > { %v1283_v63 = vadd.f32 %v2311_v60, %v1247_v61 }
  0xf2   : > { %v2414_v0 = vpop.f32.mrf.mxu3  ;;  %v1347_v2 = vadd.f32 %v1315_v62, %v1283_v63 }
  0xf3   : > { %v692_v3 = vpop.f32.mrf.mxu0 }
  0xf4   : > { %1380 = vst.msk [vmem:[%s2327_s30 + $0x48] sm:$0xff] %vm1370_vm2, %v1347_v2  ;;  %v901_v7 = vpop.f32.mrf.mxu1 }
  0xf5   : > { %v1172_v8 = vpop.f32.mrf.mxu2  ;;  %v902_v15 = vadd.f32 %v901_v7, %v692_v3 }
  0xf6   : > { %v1248_v9 = vadd.f32 %v1172_v8, %v899_v4 }
  0xf8   : > { %v1284_v11 = vadd.f32 %v2311_v60, %v1248_v9 }
  0xfa   : > { %v2420_v12 = vpop.f32.mrf.mxu3  ;;  %v1348_v13 = vadd.f32 %v1316_v10, %v1284_v11 }
  0xfb   : > { %v695_v14 = vpop.f32.mrf.mxu0 }
  0xfc   : > { %1381 = vst.msk [vmem:[%s2327_s30 + $0x50] sm:$0xff] %vm1370_vm2, %v1348_v13  ;;  %v904_v16 = vpop.f32.mrf.mxu1  ;;  %v1332_v13 = vld [vmem:[%s2306_s19 + $0xd0] sm:$0xff] }
  0xfd   : > { %v1175_v17 = vpop.f32.mrf.mxu2  ;;  %v905_v26 = vadd.f32 %v904_v16, %v695_v14 }
  0xfe   : > { %v1249_v18 = vadd.f32 %v1175_v17, %v902_v15 }
 0x100   : > { %v1285_v22 = vadd.f32 %v2311_v60, %v1249_v18 }
 0x102   : > { %v2426_v23 = vpop.f32.mrf.mxu3  ;;  %v1349_v24 = vadd.f32 %v1317_v21, %v1285_v22  ;;  %v1322_v21 = vld [vmem:[%s2306_s19 + $0x80] sm:$0xff]  ;;  %v950_v22 = vadd.f32 %v2408_v54, %v2336_v20 }
 0x103   : > { %v698_v25 = vpop.f32.mrf.mxu0 }
 0x104   : > { %1382 = vst.msk [vmem:[%s2327_s30 + $0x58] sm:$0xff] %vm1370_vm2, %v1349_v24  ;;  %v907_v27 = vpop.f32.mrf.mxu1 }
 0x105   : > { %v1178_v28 = vpop.f32.mrf.mxu2  ;;  %v908_v37 = vadd.f32 %v907_v27, %v698_v25 }
 0x106   : > { %v1250_v29 = vadd.f32 %v1178_v28, %v905_v26  ;;  %v1333_v28 = vld [vmem:[%s2306_s19 + $0xd8] sm:$0xff] }
 0x108   : > { %v1286_v31 = vadd.f32 %v2311_v60, %v1250_v29 }
 0x10a   : > { %v2432_v33 = vpop.f32.mrf.mxu3  ;;  %v1350_v34 = vadd.f32 %v1318_v30, %v1286_v31 }
 0x10b   : > { %v701_v35 = vpop.f32.mrf.mxu0 }
 0x10c   : > { %1383 = vst.msk [vmem:[%s2327_s30 + $0x60] sm:$0xff] %vm1370_vm2, %v1350_v34  ;;  %v910_v38 = vpop.f32.mrf.mxu1 }
 0x10d   : > { %v1181_v39 = vpop.f32.mrf.mxu2  ;;  %v911_v52 = vadd.f32 %v910_v38, %v701_v35  ;;  %v953_v38 = vadd.f32 %v2414_v0, %v2349_v36 }
 0x10e   : > { %v1251_v40 = vadd.f32 %v1181_v39, %v908_v37  ;;  %v1323_v37 = vld [vmem:[%s2306_s19 + $0x88] sm:$0xff] }
 0x110   : > { %v1287_v42 = vadd.f32 %v2311_v60, %v1251_v40 }
 0x112   : > { %v2438_v1 = vpop.f32.mrf.mxu3  ;;  %v1351_v44 = vadd.f32 %v1319_v41, %v1287_v42 }
 0x113   : > { %v704_v45 = vpop.f32.mrf.mxu0 }
 0x114   : > { %1384 = vst.msk [vmem:[%s2327_s30 + $0x68] sm:$0xff] %vm1370_vm2, %v1351_v44  ;;  %v913_v46 = vpop.f32.mrf.mxu1  ;;  %v1334_v44 = vld [vmem:[%s2306_s19 + $0xe0] sm:$0xff] }
 0x115   : > { %v1184_v47 = vpop.f32.mrf.mxu2  ;;  %v914_v62 = vadd.f32 %v913_v46, %v704_v45 }
 0x116   : > { %v1252_v48 = vadd.f32 %v1184_v47, %v911_v52 }
 0x118   : > { %v1288_v55 = vadd.f32 %v2311_v60, %v1252_v48 }
 0x11a   : > { %v1217_v56 = vpop.f32.mrf.mxu3  ;;  %v1352_v57 = vadd.f32 %v1320_v49, %v1288_v55  ;;  %v1324_v49 = vld [vmem:[%s2306_s19 + $0x90] sm:$0xff] }
 0x11b   : > { %v1263_v58 = vadd.f32 %v1217_v56, %v944_v51  ;;  %v707_v61 = vpop.f32.mrf.mxu0  ;;  %v956_v51 = vadd.f32 %v2420_v12, %v2360_v50 }
 0x11c   : > { %1385 = vst.msk [vmem:[%s2327_s30 + $0x70] sm:$0xff] %vm1370_vm2, %v1352_v57  ;;  %v916_v2 = vpop.f32.mrf.mxu1 }
 0x11d   : > { %v1299_v63 = vadd.f32 %v2311_v60, %v1263_v58  ;;  %v1187_v3 = vpop.f32.mrf.mxu2  ;;  %v917_v15 = vadd.f32 %v916_v2, %v707_v61 }
 0x11e   : > { %v1253_v7 = vadd.f32 %v1187_v3, %v914_v62 }
 0x11f   : > { %v1363_v4 = vadd.f32 %v1331_v59, %v1299_v63  ;;  %v1335_v59 = vld [vmem:[%s2306_s19 + $0xe8] sm:$0xff] }
 0x120   : > { %v1289_v8 = vadd.f32 %v2311_v60, %v1253_v7  ;;  %v959_v7 = vadd.f32 %v2426_v23, %v2372_v5 }
 0x121   : > { %1396 = vst.msk [vmem:[%s2327_s30 + $0xc8] sm:$0xff] %vm1370_vm2, %v1363_v4  ;;  %v1325_v4 = vld [vmem:[%s2306_s19 + $0x98] sm:$0xff] }
 0x122   : > { %v1220_v9 = vpop.f32.mrf.mxu3  ;;  %v1353_v10 = vadd.f32 %v1321_v53, %v1289_v8 }
 0x123   : > { %v1264_v11 = vadd.f32 %v1220_v9, %v947_v32  ;;  %v710_v14 = vpop.f32.mrf.mxu0 }
 0x124   : > { %1386 = vst.msk [vmem:[%s2327_s30 + $0x78] sm:$0xff] %vm1370_vm2, %v1353_v10  ;;  %v919_v17 = vpop.f32.mrf.mxu1  ;;  %v1336_v10 = vld [vmem:[%s2306_s19 + $0xf0] sm:$0xff] }
 0x125   : > { %v1300_v16 = vadd.f32 %v2311_v60, %v1264_v11  ;;  %v1190_v18 = vpop.f32.mrf.mxu2  ;;  %v920_v30 = vadd.f32 %v919_v17, %v710_v14  ;;  %v1326_v17 = vld [vmem:[%s2306_s19 + $0xa0] sm:$0xff] }
 0x126   : > { %v1254_v43 = vadd.f32 %v1190_v18, %v917_v15  ;;  %v962_v18 = vadd.f32 %v2432_v33, %v2382_v19 }
 0x127   : > { %v1364_v6 = vadd.f32 %v1332_v13, %v1300_v16 }
 0x128   : > { %v1290_v24 = vadd.f32 %v2311_v60, %v1254_v43 }
 0x129   : > { %1397 = vst.msk [vmem:[%s2327_s30 + $0xd0] sm:$0xff] %vm1370_vm2, %v1364_v6 }
 0x12a   : > { %v1223_v25 = vpop.f32.mrf.mxu3  ;;  %v1354_v26 = vadd.f32 %v1322_v21, %v1290_v24  ;;  %v1337_v24 = vld [vmem:[%s2306_s19 + $0xf8] sm:$0xff] }
 0x12b   : > { %v1265_v27 = vadd.f32 %v1223_v25, %v950_v22  ;;  %v713_v29 = vpop.f32.mrf.mxu0 }
 0x12c   : > { %1387 = vst.msk [vmem:[%s2327_s30 + $0x80] sm:$0xff] %vm1370_vm2, %v1354_v26  ;;  %v922_v34 = vpop.f32.mrf.mxu1 }
 0x12d   : > { %v1301_v31 = vadd.f32 %v2311_v60, %v1265_v27  ;;  %v1193_v35 = vpop.f32.mrf.mxu2  ;;  %v923_v52 = vadd.f32 %v922_v34, %v713_v29 }
 0x12e   : > { %v1255_v54 = vadd.f32 %v1193_v35, %v920_v30  ;;  %v1327_v30 = vld [vmem:[%s2306_s19 + $0xa8] sm:$0xff] }
 0x12f   : > { %v1365_v20 = vadd.f32 %v1333_v28, %v1301_v31 }
 0x130   : > { %v1291_v39 = vadd.f32 %v2311_v60, %v1255_v54 }
 0x131   : > { %1398 = vst.msk [vmem:[%s2327_s30 + $0xd8] sm:$0xff] %vm1370_vm2, %v1365_v20 }
 0x132   : > { %v1226_v40 = vpop.f32.mrf.mxu3  ;;  %v1355_v41 = vadd.f32 %v1323_v37, %v1291_v39  ;;  %v1328_v39 = vld [vmem:[%s2306_s19 + $0xb0] sm:$0xff] }
 0x133   : > { %v1266_v42 = vadd.f32 %v1226_v40, %v953_v38  ;;  %v716_v45 = vpop.f32.mrf.mxu0 }
 0x134   : > { %1388 = vst.msk [vmem:[%s2327_s30 + $0x88] sm:$0xff] %vm1370_vm2, %v1355_v41  ;;  %v925_v47 = vpop.f32.mrf.mxu1 }
 0x135   : > { %v1302_v46 = vadd.f32 %v2311_v60, %v1266_v42  ;;  %v1196_v48 = vpop.f32.mrf.mxu2  ;;  %v926_v62 = vadd.f32 %v925_v47, %v716_v45 }
 0x136   : > { %v1256_v0 = vadd.f32 %v1196_v48, %v923_v52 }
 0x137   : > { %v1366_v36 = vadd.f32 %v1334_v44, %v1302_v46 }
 0x138   : > { %v1292_v55 = vadd.f32 %v2311_v60, %v1256_v0  ;;  %v1330_v0 = vld [vmem:[%s2306_s19 + $0xc0] sm:$0xff] }
 0x139   : > { %1399 = vst.msk [vmem:[%s2327_s30 + $0xe0] sm:$0xff] %vm1370_vm2, %v1366_v36  ;;  %v1329_v36 = vld [vmem:[%s2306_s19 + $0xb8] sm:$0xff] }
 0x13a   : > { %v1229_v56 = vpop.f32.mrf.mxu3  ;;  %v1356_v57 = vadd.f32 %v1324_v49, %v1292_v55 }
 0x13b   : > { %v1267_v58 = vadd.f32 %v1229_v56, %v956_v51  ;;  %v719_v61 = vpop.f32.mrf.mxu0 }
 0x13c   : > { %1389 = vst.msk [vmem:[%s2327_s30 + $0x90] sm:$0xff] %vm1370_vm2, %v1356_v57  ;;  %v928_v2 = vpop.f32.mrf.mxu1 }
 0x13d   : > { %v1303_v63 = vadd.f32 %v2311_v60, %v1267_v58  ;;  %v1199_v3 = vpop.f32.mrf.mxu2  ;;  %v929_v13 = vadd.f32 %v928_v2, %v719_v61 }
 0x13e   : > { %v1257_v12 = vadd.f32 %v1199_v3, %v926_v62 }
 0x13f   : > { %v1367_v50 = vadd.f32 %v1335_v59, %v1303_v63 }
 0x140   : > { %v1293_v53 = vadd.f32 %v2311_v60, %v1257_v12 }
 0x141   : > { %1400 = vst.msk [vmem:[%s2327_s30 + $0xe8] sm:$0xff] %vm1370_vm2, %v1367_v50 }
 0x142   : > { %v1232_v32 = vpop.f32.mrf.mxu3  ;;  %v1357_v8 = vadd.f32 %v1325_v4, %v1293_v53 }
 0x143   : > { %v1268_v9 = vadd.f32 %v1232_v32, %v959_v7  ;;  %v722_v11 = vpop.f32.mrf.mxu0 }
 0x144   : > { %1390 = vst.msk [vmem:[%s2327_s30 + $0x98] sm:$0xff] %vm1370_vm2, %v1357_v8  ;;  %v931_v15 = vpop.f32.mrf.mxu1 }
 0x145   : > { %v1304_v14 = vadd.f32 %v2311_v60, %v1268_v9  ;;  %v1202_v16 = vpop.f32.mrf.mxu2  ;;  %v932_v26 = vadd.f32 %v931_v15, %v722_v11 }
 0x146   : > { %v1258_v23 = vadd.f32 %v1202_v16, %v929_v13 }
 0x147   : > { %v1368_v5 = vadd.f32 %v1336_v10, %v1304_v14 }
 0x148   : > { %v1294_v6 = vadd.f32 %v2311_v60, %v1258_v23 }
 0x149   : > { %1401 = vst.msk [vmem:[%s2327_s30 + $0xf0] sm:$0xff] %vm1370_vm2, %v1368_v5 }
 0x14a   : > { %v1235_v43 = vpop.f32.mrf.mxu3  ;;  %v1358_v21 = vadd.f32 %v1326_v17, %v1294_v6 }
 0x14b   : > { %v1269_v22 = vadd.f32 %v1235_v43, %v962_v18  ;;  %v725_v25 = vpop.f32.mrf.mxu0 }
 0x14c   : > { %1391 = vst.msk [vmem:[%s2327_s30 + $0xa0] sm:$0xff] %vm1370_vm2, %v1358_v21  ;;  %v934_v28 = vpop.f32.mrf.mxu1 }
 0x14d   : > { %v1305_v27 = vadd.f32 %v2311_v60, %v1269_v22  ;;  %v1205_v19 = vpop.f32.mrf.mxu2  ;;  %v935_v20 = vadd.f32 %v934_v28, %v725_v25 }
 0x14e   : > { %v1259_v29 = vadd.f32 %v1205_v19, %v932_v26 }
 0x14f   : > { %v1369_v33 = vadd.f32 %v1337_v24, %v1305_v27 }
 0x150   : > { %v1295_v31 = vadd.f32 %v2311_v60, %v1259_v29 }
 0x151   : > { %1402 = vst.msk [vmem:[%s2327_s30 + $0xf8] sm:$0xff] %vm1370_vm2, %v1369_v33 }
 0x152   : > { %v1359_v34 = vadd.f32 %v1327_v30, %v1295_v31 }
 0x153   : > { %v728_v35 = vpop.f32.mrf.mxu0 }
 0x154   : > { %1392 = vst.msk [vmem:[%s2327_s30 + $0xa8] sm:$0xff] %vm1370_vm2, %v1359_v34  ;;  %v937_v54 = vpop.f32.mrf.mxu1 }
 0x155   : > { %v1208_v37 = vpop.f32.mrf.mxu2  ;;  %v938_v44 = vadd.f32 %v937_v54, %v728_v35 }
 0x156   : > { %v1260_v38 = vadd.f32 %v1208_v37, %v935_v20 }
 0x158   : > { %v1296_v40 = vadd.f32 %v2311_v60, %v1260_v38 }
 0x15a   : > { %v1360_v41 = vadd.f32 %v1328_v39, %v1296_v40 }
 0x15b   : > { %v731_v42 = vpop.f32.mrf.mxu0 }
 0x15c   : > { %1393 = vst.msk [vmem:[%s2327_s30 + $0xb0] sm:$0xff] %vm1370_vm2, %v1360_v41  ;;  %v940_v45 = vpop.f32.mrf.mxu1 }
 0x15d   : > { %v941_v52 = vadd.f32 %v940_v45, %v731_v42  ;;  %v1211_v46 = vpop.f32.mrf.mxu2 }
 0x15e   : > { %v1261_v47 = vadd.f32 %v1211_v46, %v938_v44 }
 0x15f   : > { %v1262_v48 = vadd.f32 %v2438_v1, %v941_v52 }
 0x160   : > { %v1297_v49 = vadd.f32 %v2311_v60, %v1261_v47 }
 0x161   : > { %v1298_v51 = vadd.f32 %v2311_v60, %v1262_v48 }
 0x162   : > { %v1361_v55 = vadd.f32 %v1329_v36, %v1297_v49 }
 0x163   : > { %v1362_v56 = vadd.f32 %v1330_v0, %v1298_v51 }
 0x164   : > { %1394 = vst.msk [vmem:[%s2327_s30 + $0xb8] sm:$0xff] %vm1370_vm2, %v1361_v55 }
 0x165   : > { %1395 = vst.msk [vmem:[%s2327_s30 + $0xc0] sm:$0xff] %vm1370_vm2, %v1362_v56 }
 0x166   : > { %2019 = shalt.err (!%p2016_p5)
}
 0x167   : > { %s2072_s14 = smov 128   ;;  %s2073_s30 = smov 8  }
 0x168   : > { %1934 = dma.vmem_to_hbm [thread:$0]  (%p2149_p4), %s1419_s24, 4096, %s1421_s13, %s1404_s12, %s2072_s14, %s2072_s14, %s2073_s30  }
 0x169 PF: > { %p1940_p6 = scmp.ge.s32.totalorder %s2070_s26, 2  ;;  %s1435_s18 = sand.u32 1, %s2050_s21  }
 0x16a   : > { %s1436_s28 = scalar_lea.sflag [#allocation3], %s1435_s18 }
 0x16b   : > { %p1937_p7 = pnand %p1940_p6, %p2156_p8 }
 0x16d   : > { %p1938_p9 = pneg %p1937_p7 }
 0x16f   : > { %2045 = dma.done.wait (%p1938_p9), %s1436_s28, 4096  }
 0x170   : > { %2047 = vsyncadd (%p1938_p9), %s1436_s28, 4294963200  ;;  %s19_s26 = sadd.s32 1, %s2070_s26   ;;  %s2577_s21 = smov %s2054_s22 }
 0x171   : > { %p16_p10 = scmp.ge.s32.totalorder %s19_s26, 4   ;;  %s2578_s22 = smov %s2058_s23 }
 0x172   : > { %s2579_s23 = smov %s2162_s10  ;;  %s2580_s24 = smov %s2066_s25 }
 0x173   : > { %s2581_s25 = smov %s2583_s29  ;;  %18 = sbr.rel (!%p16_p10) target bundleno = 4 (0x4), region = 91 }
 0x178   :  { %1442 = vsyncpa [#allocation3], 1 }
 0x179   :  { %1444 = vsyncpa [#allocation3 + $0x1], 1 }

// kernel: pmcb_forward.6
= control target key start
LH: loop header
LB: loop body
LE: loop exit
PB: predicated region body
PF: predicated region fallthrough
CT: control target
= control target key end

     0   :  { %s2306_s21 = smov 0   ;;  %s2308_s22 = smov 0   ;;  %s3013_s0 = inlined_call_operand.vmem [shape: bf16[2,4,168,48], index: 0, kind: input, shape index: {}]   ;;  %s3014_s1 = inlined_call_operand.vmem [shape: bf16[432,64], index: 1, kind: input, shape index: {}]   ;;  %s3015_s2 = inlined_call_operand.vmem [shape: f32[1,64], index: 2, kind: input, shape index: {}]   ;;  %s3016_s3 = inlined_call_operand.vmem [shape: bf16[48,16], index: 3, kind: input, shape index: {}]   ;;  %s3017_s4 = inlined_call_operand.vmem [shape: f32[1,16], index: 4, kind: input, shape index: {}]   ;;  %s3018_s5 = inlined_call_operand.vmem [shape: bf16[2,4,8,8,32], index: 5, kind: output, shape index: {0}]   ;;  %s3019_s6 = inlined_call_operand.vmem [shape: f32[2,4,1,32], index: 6, kind: output, shape index: {1}]  }
   0x1   :  { %s2310_s23 = smov 0   ;;  %s2312_s24 = smov 0  }
   0x2   :  { %s2314_s25 = smov 0  }
   0x3 LB: > { %s26_s26 = sadd.s32 1, %s2254_s23  ;;  %s29_s27 = sadd.s32 1, %s2258_s24  ;;  %s2262_s25 = sphi %s2314_s25, %s17_s25   ;;  %s2258_s24 = sphi %s2312_s24, %s3023_s24   ;;  %s2254_s23 = sphi %s2310_s23, %s3022_s23   ;;  %s2250_s22 = sphi %s2308_s22, %s3021_s22   ;;  %s2246_s21 = sphi %s2306_s21, %s3020_s21  }
   0x4   : > { %p27_p0 = scmp.ge.s32.totalorder %s26_s26, 4  ;;  %p1930_p1 = scmp.ge.s32.totalorder %s2262_s25, 1 }
   0x5   : > { %p237_p2 = scmp.lt.s32.totalorder %s2262_s25, 9 }
   0x6   : > { %s3025_s26 = smov (%p27_p0, %s26_s26), 0  ;;  %s3027_s27 = smov (!%p27_p0, %s29_s27), %s2258_s24 }
   0x7   : > { %p238_p3 = pnand %p1930_p1, %p237_p2  ;;  %p31_p4 = scmp.ge.s32.totalorder %s3027_s27, 2 }
   0x8   : > { %p282_p5 = scmp.lt.s32.totalorder (!%p238_p3), %s2250_s22, 1  ;;  %p284_p6 = scmp.lt.s32.totalorder (!%p238_p3), %s2246_s21, 3 }
   0x9   : > { %s3029_s27 = smov (%p31_p4, %s3027_s27), 0  ;;  %241 = sbr.rel (%p238_p3) target bundleno = 871 (0x367), region = 40 }
   0xa   : > { %s2264_s11 = smov (!%p238_p3), 48   ;;  %s2265_s12 = smov (!%p238_p3), 96  }
   0xb   : > { %s2266_s13 = smov (!%p238_p3), 112   ;;  %s2267_s14 = smov (!%p238_p3), 32  }
   0xc   : > { %s2268_s15 = smov (!%p238_p3), 64   ;;  %s2269_s16 = smov (!%p238_p3), 16  }
   0xd   : > { %s2270_s17 = smov (!%p238_p3), 80  }
   0xe   : > { %s3031_s22 = smov (!%p282_p5, %s2250_s22), 1  ;;  %s3033_s21 = smov (!%p284_p6, %s2246_s21), 3  ;;  %vm412_vm0 = vsmask.f32 7424  ;;  %vm559_vm1 = vcmask 1046528   ;;  %v2121_v43 = vld [vmem:[%s3014_s1 + $0x38] sm:$0xff] }
   0xf   : > { %s2174_s28 = smul.u32 84, %s3031_s22  ;;  %1004 = vmatpush.bf16.msra.mxu0 %v2121_v43  ;;  %2154 = vmatpush.bf16.msra.mxu1 %v2121_v43  ;;  %v2120_v45 = vld [vmem:[%s3014_s1 + $0x30] sm:$0xff]  ;;  %v2119_v47 = vld [vmem:[%s3014_s1 + $0x28] sm:$0xff]  ;;  %v2118_v51 = vld [vmem:[%s3014_s1 + $0x20] sm:$0xff]  ;;  %vm617_vm2 = vcmask 392192   ;;  %vm634_vm3 = vcmask 785408  }
  0x10   : > { %s2173_s29 = smul.u32 21, %s3033_s21  ;;  %2155 = vmatpush.bf16.msra.mxu2 %v2121_v43  ;;  %v2117_v54 = vld [vmem:[%s3014_s1 + $0x18] sm:$0xff]  ;;  %v2116_v56 = vld [vmem:[%s3014_s1 + $0x10] sm:$0xff]  ;;  %v2115_v58 = vld [vmem:[%s3014_s1 + $0x8] sm:$0xff]  ;;  %vm718_vm4 = vcmask 261120   ;;  %vm659_vm5 = vcmask 130048  }
  0x11   : > { %v2114_v62 = vld [vmem:[%s3014_s1] sm:$0xff]  ;;  %vm735_vm6 = vcmask 654336   ;;  %vm676_vm7 = vcmask 523264   ;;  %vm693_vm8 = vcmask 916480  }
  0x12   : > { %s288_s30 = sadd.s32 %s2174_s28, %s2173_s29  ;;  %s1932_s28 = sshll.u32 %s3033_s21, 3 }
  0x13   : > { %s1931_s7 = sshll.u32 %s288_s30, 2  ;;  %1005 = vmatpush.bf16.msra.mxu0 %v2120_v45  ;;  %2156 = vmatpush.bf16.msra.mxu1 %v2120_v45  ;;  %s1933_s29 = sshll.u32 %s3031_s22, 5 }
  0x14   : > { %s2345_s10 = scalar_lea.vmem %s3013_s0, %s1931_s7  ;;  %2157 = vmatpush.bf16.msra.mxu2 %v2120_v45  ;;  %v2139_v45 = vld [vmem:[%s3014_s1 + $0xc8] sm:$0xff]  ;;  %s297_s30 = sadd.s32 %s1933_s29, %s1932_s28 }
  0x15   : > { %v2348_v0 = vld [vmem:[%s2345_s10 + $0x18] sm:$0xff]  ;;  %v2351_v1 = vld [vmem:[%s2345_s10 + $0x10] sm:$0xff]  ;;  %v2354_v2 = vld [vmem:[%s2345_s10 + $0x8] sm:$0xff]  ;;  %s1934_s7 = sshll.u32 %s297_s30, 2 }
  0x16   : > { %378 = vrot.lane.b32.xlu2 %v2348_v0, %s2264_s11  ;;  %376 = vrot.lane.b32.xlu1 %v2351_v1, %s2264_s11  ;;  %v2363_v3 = vld [vmem:[%s2345_s10 + $0x20] sm:$0xff]  ;;  %v2372_v4 = vld [vmem:[%s2345_s10 + $0x38] sm:$0xff]  ;;  %v429_v9 = vshll.u32 %v2351_v1, 16  ;;  %v433_v11 = vshrl.u32 %v2351_v1, 16  ;;  %v437_v12 = vshll.u32 %v2348_v0, 16  ;;  %v561_v17 = vrot.slane %v2354_v2, 1 }
  0x17   : > { %374 = vrot.lane.b32.xlu0 %v2354_v2, %s2264_s11  ;;  %v2375_v5 = vld [vmem:[%s2345_s10 + $0x30] sm:$0xff]  ;;  %v2384_v6 = vld [vmem:[%s2345_s10 + $0x48] sm:$0xff]   ;;  %v2387_v7 = vld [vmem:[%s2345_s10 + $0x40] sm:$0xff]   ;;  %v421_v18 = vshll.u32 %v2354_v2, 16  ;;  %v425_v23 = vshrl.u32 %v2354_v2, 16  ;;  %v563_v28 = vrot.slane %v2351_v1, 1  ;;  %1006 = vmatpush.bf16.msra.mxu0 %v2119_v47 }
  0x18   : > { %v2390_v8 = vld [vmem:[%s2345_s10 + $0x28] sm:$0xff]  ;;  %v431_v10 = vrot.slane %v429_v9, 1  ;;  %v2402_v13 = vld [vmem:[%s2345_s10] sm:$0xff]  ;;  %v439_v15 = vrot.slane %v437_v12, 1  ;;  %v441_v32 = vshrl.u32 %v2348_v0, 16  ;;  %v445_v33 = vshll.u32 %v2363_v3, 16  ;;  %2158 = vmatpush.bf16.msra.mxu1 %v2119_v47  ;;  %2159 = vmatpush.bf16.msra.mxu2 %v2119_v47 }
  0x19   : > { %v560_v16 = vrot.slane %v2402_v13, 1  ;;  %v416_v19 = vshll.u32 %v2402_v13, 16  ;;  %v423_v22 = vrot.slane %v421_v18, 1  ;;  %v414_v24 = vshrl.u32 %v2402_v13, 16 }
  0x1a   : > { %v435_v14 = vor.u32 %v433_v11, %v431_v10  ;;  %v564_v31 = vsel %vm559_vm1, %v561_v17, %v563_v28  ;;  %v565_v34 = vrot.slane %v2348_v0, 1  ;;  %v443_v35 = vor.u32 %v441_v32, %v439_v15  ;;  %v2134_v32 = vld [vmem:[%s3014_s1 + $0xa0] sm:$0xff] }
  0x1b   : > { %v562_v21 = vsel %vm559_vm1, %v560_v16, %v561_v17  ;;  %v418_v25 = vrot.slane %v416_v19, 1  ;;  %v427_v26 = vor.u32 %v425_v23, %v423_v22  ;;  %v447_v36 = vrot.slane %v445_v33, 1  ;;  %1007 = vmatpush.bf16.msra.mxu0 %v2118_v51  ;;  %v2136_v23 = vld [vmem:[%s3014_s1 + $0xb0] sm:$0xff] }
  0x1c   : > { %v440_v20 = vsel %vm412_vm0, %v435_v14, %v439_v15  ;;  %v2433_v37 = vsel %vm559_vm1, %v563_v28, %v565_v34  ;;  %v449_v38 = vshrl.u32 %v2363_v3, 16  ;;  %v453_v39 = vshll.u32 %v2390_v8, 16  ;;  %2160 = vmatpush.bf16.msra.mxu1 %v2118_v51  ;;  %2161 = vmatpush.bf16.msra.mxu2 %v2118_v51  ;;  %v2140_v15 = vld [vmem:[%s3014_s1 + $0xd0] sm:$0xff] }
  0x1d   : > { %v419_v27 = vor.u32 %v418_v25, %v414_v24  ;;  %v432_v29 = vsel %vm412_vm0, %v427_v26, %v431_v10  ;;  %v448_v40 = vsel %vm412_vm0, %v443_v35, %v447_v36  ;;  %v567_v46 = vrot.slane %v2363_v3, 1  ;;  %2170 = vmatpush.bf16.msra.mxu3 %v2140_v15  ;;  %v2128_v25 = vld [vmem:[%s3014_s1 + $0x70] sm:$0xff] }
  0x1e   : > { %399 = vrot.lane.b32.xlu2 %v2363_v3, %s2265_s12  ;;  %397 = vrot.lane.b32.xlu1 %v2348_v0, %s2265_s12  ;;  %v451_v41 = vor.u32 %v449_v38, %v447_v36  ;;  %v455_v42 = vrot.slane %v453_v39, 1  ;;  %v457_v49 = vshrl.u32 %v2390_v8, 16  ;;  %v461_v50 = vshll.u32 %v2375_v5, 16  ;;  %v2126_v36 = vld [vmem:[%s3014_s1 + $0x60] sm:$0xff]  ;;  %v328_v39 = vld [vmem:[%s2345_s10 + $0x50] sm:$0xf] }
  0x1f   : > { %395 = vrot.lane.b32.xlu0 %v2351_v1, %s2265_s12  ;;  %v424_v30 = vsel %vm412_vm0, %v419_v27, %v423_v22  ;;  %v2460_v48 = vsel %vm559_vm1, %v565_v34, %v567_v46  ;;  %1008 = vmatpush.bf16.msra.mxu0 %v2117_v54  ;;  %v569_v57 = vrot.slane %v2390_v8, 1  ;;  %v465_v60 = vshrl.u32 %v2375_v5, 16  ;;  %v2129_v22 = vld [vmem:[%s3014_s1 + $0x78] sm:$0xff]  ;;  %v2135_v27 = vld [vmem:[%s3014_s1 + $0xa8] sm:$0xff] }
  0x20   : > { %v2446_v44 = vsel %vm412_vm0, %v451_v41, %v455_v42  ;;  %v459_v52 = vor.u32 %v457_v49, %v455_v42  ;;  %v463_v53 = vrot.slane %v461_v50, 1  ;;  %2162 = vmatpush.bf16.msra.mxu1 %v2117_v54  ;;  %2163 = vmatpush.bf16.msra.mxu2 %v2117_v54  ;;  %v469_v61 = vshll.u32 %v2372_v4, 16 }
  0x21   : > { %v2488_v59 = vsel %vm559_vm1, %v567_v46, %v569_v57  ;;  %v571_v63 = vrot.slane %v2375_v5, 1  ;;  %v473_v12 = vshrl.u32 %v2372_v4, 16  ;;  %v499_v14 = vshll.u32 %v2387_v7, 16  ;;  %v2132_v46 = vld [vmem:[%s3014_s1 + $0x90] sm:$0xff]  ;;  %2171 = vmatpush.bf16.msra.mxu3 %v2139_v45 }
  0x22   : > { %v464_v55 = vsel %vm412_vm0, %v459_v52, %v463_v53  ;;  %v467_v9 = vor.u32 %v465_v60, %v463_v53  ;;  %v471_v10 = vrot.slane %v469_v61, 1  ;;  %v2541_v24 = vrot.slane %v2372_v4, 1  ;;  %v2124_v52 = vld [vmem:[%s3014_s1 + $0x50] sm:$0xff] }
  0x23   : > { %1009 = vmatpush.bf16.msra.mxu0 %v2116_v56  ;;  %v2502_v11 = vsel %vm559_vm1, %v569_v57, %v571_v63  ;;  %v501_v18 = vrot.slane %v499_v14, 1  ;;  %v528_v43 = vunpack.c.l.b16 %v328_v39  ;;  %v2146_v47 = vunpack.c.l.b16 %v2387_v7 }
  0x24   : > { %2164 = vmatpush.bf16.msra.mxu1 %v2116_v56  ;;  %2165 = vmatpush.bf16.msra.mxu2 %v2116_v56  ;;  %v2510_v16 = vsel %vm412_vm0, %v467_v9, %v471_v10  ;;  %v2518_v17 = vor.u32 %v473_v12, %v471_v10  ;;  %v2553_v28 = vsel %vm559_vm1, %v571_v63, %v2541_v24  ;;  %v2601_v50 = vrot.slane %v2387_v7, 1 }
  0x25   : > { %v2603_v51 = vpack.c.b16 %v528_v43, %v528_v43  ;;  %v411_v56 = vpack.c.b16 %v2146_v47, %v2146_v47  ;;  %v2150_v57 = vunpack.c.l.b16 %v2384_v6  ;;  %v535_v60 = vshrl.u32 %v2384_v6, 16 }
  0x26   : > { %380 = vrot.lane.b32.xlu2 %v2363_v3, %s2264_s11  ;;  %405 = vrot.lane.b32.xlu1 %v2372_v4, %s2265_s12 }
  0x27   : > { %384 = vrot.lane.b32.xlu0 %v2375_v5, %s2264_s11  ;;  %1010 = vmatpush.bf16.msra.mxu0 %v2115_v58  ;;  %v539_v61 = vshll.u32 %v2603_v51, 16  ;;  %v575_v9 = vrot.slane %v411_v56, 1  ;;  %v497_v10 = vpack.c.b16 %v2150_v57, %v2150_v57 }
  0x28   : > { %2166 = vmatpush.bf16.msra.mxu1 %v2115_v58  ;;  %2167 = vmatpush.bf16.msra.mxu2 %v2115_v58  ;;  %v2123_v58 = vld [vmem:[%s3014_s1 + $0x48] sm:$0xff] }
  0x2b   : > { %1011 = vmatpush.bf16.msra.mxu0 %v2114_v62 }
  0x2c   : > { %2168 = vmatpush.bf16.msra.mxu1 %v2114_v62  ;;  %2169 = vmatpush.bf16.msra.mxu2 %v2114_v62  ;;  %v2130_v62 = vld [vmem:[%s3014_s1 + $0x80] sm:$0xff] }
  0x2e   : > { %409 = vrot.lane.b32.xlu2 %v2384_v6, %s2265_s12  ;;  %388 = vrot.lane.b32.xlu1 %v2387_v7, %s2264_s11 }
  0x2f   : > { %401 = vrot.lane.b32.xlu0 %v2390_v8, %s2265_s12  ;;  %1156 = vmatpush.bf16.msrb.mxu0 %v2140_v15  ;;  %v541_v15 = vrot.slane %v539_v61, 1 }
  0x30   : > { %1053 = vmatpush.bf16.msrb.mxu1 %v2129_v22  ;;  %v576_v22 = vsel %vm559_vm1, %v2541_v24, %v575_v9 }
  0x33   : > { %1157 = vmatpush.bf16.msrb.mxu0 %v2139_v45 }
  0x34   : > { %1054 = vmatpush.bf16.msrb.mxu1 %v2128_v25 }
  0x36   : > { %382 = vrot.lane.b32.xlu2 %v2390_v8, %s2264_s11  ;;  %407 = vrot.lane.b32.xlu1 %v2387_v7, %s2265_s12 }
  0x37   : > { %386 = vrot.lane.b32.xlu0 %v2372_v4, %s2264_s11 }
  0x3e   : > { %543 = vrot.lane.b32.xlu1 %v440_v20, %s2266_s13  ;;  %577 = vrot.lane.b32.xlu2 %v562_v21, %s2267_s14  ;;  %v2527_v21 = vsel %vm412_vm0, %v2518_v17, %v501_v18 }
  0x3f   : > { %403 = vrot.lane.b32.xlu0 %v2375_v5, %s2265_s12 }
  0x46   : > { %511 = vrot.lane.b32.xlu2 %v432_v29, %s2268_s15  ;;  %481 = vrot.lane.b32.xlu1 %v424_v30, %s2269_s16  ;;  %v531_v30 = vshll.u32 %v2384_v6, 16 }
  0x47   : > { %597 = vrot.lane.b32.xlu0 %v564_v31, %s2270_s17 }
  0x48   : > { %v533_v34 = vrot.slane %v531_v30, 1 }
  0x4a   : > { %v537_v14 = vor.u32 %v535_v60, %v533_v34 }
  0x4c   : > { %v542_v25 = vsel %vm412_vm0, %v537_v14, %v541_v15 }
  0x4e   : > { %599 = vrot.lane.b32.xlu2 %v2433_v37, %s2270_s17  ;;  %579 = vrot.lane.b32.xlu1 %v564_v31, %s2267_s14  ;;  %v2127_v31 = vld [vmem:[%s3014_s1 + $0x68] sm:$0xff] }
  0x4f   : > { %545 = vrot.lane.b32.xlu0 %v448_v40, %s2266_s13  ;;  %1055 = vmatpush.bf16.msrb.mxu1 %v2127_v31 }
  0x53   : > { %1056 = vmatpush.bf16.msrb.mxu1 %v2126_v36 }
  0x56   : > { %547 = vrot.lane.b32.xlu2 %v2446_v44, %s2266_s13  ;;  %513 = vrot.lane.b32.xlu1 %v440_v20, %s2268_s15 }
  0x57   : > { %483 = vrot.lane.b32.xlu0 %v432_v29, %s2269_s16  ;;  %v503_v29 = vshrl.u32 %v2387_v7, 16  ;;  %v2131_v7 = vld [vmem:[%s3014_s1 + $0x88] sm:$0xff] }
  0x59   : > { %v2568_v33 = vor.u32 %v503_v29, %v501_v18  ;;  %v2122_v18 = vld [vmem:[%s3014_s1 + $0x40] sm:$0xff] }
  0x5b   : > { %v534_v41 = vsel %vm412_vm0, %v2568_v33, %v533_v34 }
  0x5e   : > { %485 = vrot.lane.b32.xlu2 %v440_v20, %s2269_s16  ;;  %601 = vrot.lane.b32.xlu1 %v2460_v48, %s2270_s17  ;;  %v2137_v20 = vld [vmem:[%s3014_s1 + $0xb8] sm:$0xff] }
  0x5f   : > { %581 = vrot.lane.b32.xlu0 %v2433_v37, %s2267_s14  ;;  %1102 = vmatpush.bf16.msrb.mxu2 %v2137_v20 }
  0x63   : > { %1103 = vmatpush.bf16.msrb.mxu2 %v2136_v23  ;;  %v507_v23 = vshll.u32 %v497_v10, 16 }
  0x66   : > { %583 = vrot.lane.b32.xlu2 %v2460_v48, %s2267_s14  ;;  %549 = vrot.lane.b32.xlu1 %v464_v55, %s2266_s13 }
  0x67   : > { %515 = vrot.lane.b32.xlu0 %v448_v40, %s2268_s15  ;;  %1104 = vmatpush.bf16.msrb.mxu2 %v2135_v27  ;;  %v477_v27 = vshll.u32 %v411_v56, 16 }
  0x6b   : > { %1105 = vmatpush.bf16.msrb.mxu2 %v2134_v32  ;;  %v479_v32 = vrot.slane %v477_v27, 1 }
  0x6e   : > { %517 = vrot.lane.b32.xlu2 %v2446_v44, %s2268_s15  ;;  %487 = vrot.lane.b32.xlu1 %v448_v40, %s2269_s16  ;;  %v2133_v40 = vld [vmem:[%s3014_s1 + $0x98] sm:$0xff] }
  0x6f   : > { %603 = vrot.lane.b32.xlu0 %v2488_v59, %s2270_s17  ;;  %1106 = vmatpush.bf16.msrb.mxu2 %v2133_v40 }
  0x70   : > { %v2520_v19 = vpop.permute.xlu2 %378 }
  0x71   : > { %v623_v45 = vsel %vm617_vm2, %v2351_v1, %v2520_v19 }
  0x73   : > { %1107 = vmatpush.bf16.msrb.mxu2 %v2132_v46 }
  0x76   : > { %605 = vrot.lane.b32.xlu2 %v2502_v11, %s2270_s17  ;;  %585 = vrot.lane.b32.xlu1 %v2488_v59, %s2267_s14 }
  0x77   : > { %551 = vrot.lane.b32.xlu0 %v2510_v16, %s2266_s13  ;;  %1108 = vmatpush.bf16.msrb.mxu2 %v2131_v7 }
  0x78   : > { %v2546_v26 = vpop.permute.xlu2 %399 }
  0x7b   : > { %1109 = vmatpush.bf16.msrb.mxu2 %v2130_v62 }
  0x7e   : > { %553 = vrot.lane.b32.xlu2 %v2527_v21, %s2266_s13  ;;  %519 = vrot.lane.b32.xlu1 %v464_v55, %s2268_s15 }
  0x7f   : > { %489 = vrot.lane.b32.xlu0 %v2446_v44, %s2269_s16  ;;  %v2125_v44 = vld [vmem:[%s3014_s1 + $0x58] sm:$0xff] }
  0x80   : > { %v2581_v42 = vpop.permute.xlu2 %380  ;;  %1057 = vmatpush.bf16.msrb.mxu1 %v2125_v44 }
  0x84   : > { %1058 = vmatpush.bf16.msrb.mxu1 %v2124_v52 }
  0x86   : > { %491 = vrot.lane.b32.xlu2 %v464_v55, %s2269_s16  ;;  %607 = vrot.lane.b32.xlu1 %v2553_v28, %s2270_s17 }
  0x87   : > { %587 = vrot.lane.b32.xlu0 %v2502_v11, %s2267_s14 }
  0x88   : > { %v2570_v35 = vpop.permute.xlu1 %376  ;;  %v2629_v63 = vpop.permute.xlu2 %409  ;;  %1059 = vmatpush.bf16.msrb.mxu1 %v2123_v58 }
  0x89   : > { %v375_v38 = vpop.permute.xlu0 %374  ;;  %v621_v29 = vsel %vm617_vm2, %v2354_v2, %v2570_v35  ;;  %v2138_v35 = vld [vmem:[%s3014_s1 + $0xc0] sm:$0xff] }
  0x8a   : > { %v619_v53 = vsel %vm617_vm2, %v2402_v13, %v375_v38  ;;  %v594_v13 = vsel %vm559_vm1, %v2541_v24, %v2601_v50  ;;  %1158 = vmatpush.bf16.msrb.mxu0 %v2138_v35  ;;  %2172 = vmatpush.bf16.msra.mxu3 %v2138_v35 }
  0x8c   : > { %1060 = vmatpush.bf16.msrb.mxu1 %v2122_v18 }
  0x8d   : > { %2081 = vmatmul.msk.bf16.vlgmr.msra.gmra.mxu3 %vm617_vm2, %v594_v13 }
  0x8e   : > { %555 = vrot.lane.b32.xlu1 %v534_v41, %s2266_s13  ;;  %589 = vrot.lane.b32.xlu2 %v2553_v28, %s2267_s14 }
  0x8f   : > { %521 = vrot.lane.b32.xlu0 %v2510_v16, %s2268_s15 }
  0x90   : > { %v2598_v49 = vpop.permute.xlu1 %397  ;;  %v2653_v30 = vpop.permute.xlu2 %382 }
  0x91   : > { %v2610_v54 = vpop.permute.xlu0 %395  ;;  %v639_v36 = vsel %vm634_vm3, %v621_v29, %v2598_v49 }
  0x92   : > { %v636_v55 = vsel %vm634_vm3, %v619_v53, %v2610_v54 }
  0x93   : > { %1012 = vmatmul.bf16.vlgmr.msra.gmra.mxu0 %v636_v55 }
  0x96   : > { %493 = vrot.lane.b32.xlu1 %v2510_v16, %s2269_s16  ;;  %523 = vrot.lane.b32.xlu2 %v2527_v21, %s2268_s15 }
  0x97   : > { %609 = vrot.lane.b32.xlu0 %v594_v13, %s2270_s17  ;;  %v625_v13 = vsel %vm617_vm2, %v2348_v0, %v2581_v42  ;;  %v627_v42 = vsel %vm617_vm2, %v2363_v3, %v2653_v30 }
  0x98   : > { %v2636_v12 = vpop.permute.xlu1 %405 }
  0x99   : > { %v385_v20 = vpop.permute.xlu0 %384 }
  0x9a   : > { %v629_v16 = vsel %vm617_vm2, %v2390_v8, %v385_v20  ;;  %v509_v8 = vrot.slane %v507_v23, 1 }
  0x9b   : > { %v651_v21 = vsel %vm634_vm3, %v629_v16, %v2636_v12 }
  0x9c   : > { %1037 = vmatmul.bf16.vlgmr.msra.gmra.mxu1 %v651_v21  ;;  %v510_v2 = vsel %vm412_vm0, %v2568_v33, %v509_v8  ;;  %v578_v33 = vpop.permute.xlu2 %577 }
  0x9e   : > { %591 = vrot.lane.b32.xlu1 %v576_v22, %s2267_s14 }
  0x9f   : > { %557 = vrot.lane.b32.xlu0 %v542_v25, %s2266_s13 }
  0xa0   : > { %v389_v31 = vpop.permute.xlu1 %388 }
  0xa1   : > { %v633_v24 = vsel %vm617_vm2, %v2372_v4, %v389_v31  ;;  %v2657_v34 = vpop.permute.xlu0 %401  ;;  %v480_v4 = vsel %vm412_vm0, %v2518_v17, %v479_v32  ;;  %v595_v17 = vrot.slane %v497_v10, 1 }
  0xa2   : > { %v657_v38 = vsel %vm634_vm3, %v633_v24, %v2629_v63  ;;  %v645_v62 = vsel %vm634_vm3, %v625_v13, %v2657_v34 }
  0xa3   : > { %1017 = vmatmul.bf16.gmra.mxu0 %v639_v36  ;;  %1047 = vmatmul.bf16.vlgmr.msra.gmra.mxu2 %v657_v38  ;;  %v596_v44 = vsel %vm559_vm1, %v2601_v50, %v595_v17 }
  0xa4   : > { %611 = vrot.lane.b32.xlu2 %v596_v44, %s2270_s17  ;;  %v512_v52 = vpop.permute.xlu2 %511 }
  0xa6   : > { %525 = vrot.lane.b32.xlu1 %v510_v2, %s2268_s15  ;;  %s2920_s15 = scalar_lea.vmem %s3018_s5, %s1934_s7 }
  0xa7   : > { %495 = vrot.lane.b32.xlu0 %v480_v4, %s2269_s16 }
  0xa8   : > { %v2672_v39 = vpop.permute.xlu1 %407 }
  0xa9   : > { %v387_v40 = vpop.permute.xlu0 %386 }
  0xaa   : > { %v631_v41 = vsel %vm617_vm2, %v2375_v5, %v387_v40  ;;  %v642_v5 = vsel %vm634_vm3, %v623_v45, %v2546_v26 }
  0xab   : > { %v654_v43 = vsel %vm634_vm3, %v631_v41, %v2672_v39 }
  0xac   : > { %1042 = vmatmul.bf16.gmra.mxu1 %v654_v43  ;;  %v600_v58 = vpop.permute.xlu2 %599 }
  0xb0   : > { %v544_v46 = vpop.permute.xlu1 %543 }
  0xb1   : > { %v2685_v47 = vpop.permute.xlu0 %403  ;;  %v720_v53 = vsel %vm718_vm4, %v544_v46, %v578_v33 }
  0xb2   : > { %v648_v23 = vsel %vm634_vm3, %v627_v42, %v2685_v47 }
  0xb3   : > { %1022 = vmatmul.bf16.gmra.mxu0 %v642_v5  ;;  %v613_v5 = vrot.slane %v2384_v6, 1 }
  0xb4   : > { %v548_v9 = vpop.permute.xlu2 %547 }
  0xb8   : > { %v482_v55 = vpop.permute.xlu1 %481 }
  0xb9   : > { %v598_v7 = vpop.permute.xlu0 %597  ;;  %v661_v1 = vsel %vm659_vm5, %v2610_v54, %v482_v55 }
  0xba   : > { %v737_v19 = vsel %vm735_vm6, %v720_v53, %v598_v7  ;;  %v678_v56 = vsel %vm676_vm7, %v661_v1, %v512_v52 }
  0xbb   : > { %1110 = vmatmul.bf16.vlgmr.msrb.gmra.mxu2 %v737_v19  ;;  %v695_v57 = vsel %vm693_vm8, %v678_v56, %v544_v46 }
  0xbc   : > { %1061 = vmatmul.bf16.vlgmr.msrb.gmra.mxu1 %v695_v57  ;;  %v486_v22 = vpop.permute.xlu2 %485 }
  0xbd   : > { %v665_v29 = vsel %vm659_vm5, %v2546_v26, %v486_v22 }
  0xc0   : > { %v580_v60 = vpop.permute.xlu1 %579 }
  0xc1   : > { %v546_v61 = vpop.permute.xlu0 %545 }
  0xc2   : > { %v722_v54 = vsel %vm718_vm4, %v546_v61, %v580_v60 }
  0xc3   : > { %1027 = vmatmul.bf16.gmra.mxu0 %v645_v62  ;;  %v740_v14 = vsel %vm735_vm6, %v722_v54, %v600_v58 }
  0xc4   : > { %v584_v30 = vpop.permute.xlu2 %583 }
  0xc8   : > { %v514_v10 = vpop.permute.xlu1 %513 }
  0xc9   : > { %v484_v15 = vpop.permute.xlu0 %483 }
  0xca   : > { %v663_v18 = vsel %vm659_vm5, %v2598_v49, %v484_v15 }
  0xcb   : > { %v680_v20 = vsel %vm676_vm7, %v663_v18, %v514_v10  ;;  %1115 = vmatmul.bf16.gmra.mxu2 %v740_v14 }
  0xcc   : > { %v698_v0 = vsel %vm693_vm8, %v680_v20, %v546_v61  ;;  %v518_v38 = vpop.permute.xlu2 %517 }
  0xcd   : > { %1066 = vmatmul.bf16.gmra.mxu1 %v698_v0 }
  0xd0   : > { %v602_v16 = vpop.permute.xlu1 %601 }
  0xd1   : > { %v582_v21 = vpop.permute.xlu0 %581 }
  0xd2   : > { %v724_v25 = vsel %vm718_vm4, %v548_v9, %v582_v21 }
  0xd3   : > { %1032 = vmatmul.bf16.gmra.mxu0 %v648_v23  ;;  %v743_v27 = vsel %vm735_vm6, %v724_v25, %v602_v16 }
  0xd4   : > { %v606_v41 = vpop.permute.xlu2 %605 }
  0xd8   : > { %v550_v49 = vpop.permute.xlu1 %549 }
  0xd9   : > { %v516_v8 = vpop.permute.xlu0 %515  ;;  %v726_v36 = vsel %vm718_vm4, %v550_v49, %v584_v30 }
  0xda   : > { %v682_v31 = vsel %vm676_vm7, %v665_v29, %v516_v8 }
  0xdb   : > { %1120 = vmatmul.bf16.gmra.mxu2 %v743_v27  ;;  %v701_v3 = vsel %vm693_vm8, %v682_v31, %v548_v9 }
  0xdc   : > { %v554_v46 = vpop.permute.xlu2 %553 }
  0xdd   : > { %1071 = vmatmul.bf16.gmra.mxu1 %v701_v3 }
  0xe0   : > { %v488_v32 = vpop.permute.xlu1 %487 }
  0xe1   : > { %v604_v24 = vpop.permute.xlu0 %603  ;;  %v667_v2 = vsel %vm659_vm5, %v2657_v34, %v488_v32 }
  0xe2   : > { %v746_v26 = vsel %vm735_vm6, %v726_v36, %v604_v24  ;;  %v684_v4 = vsel %vm676_vm7, %v667_v2, %v518_v38 }
  0xe3   : > { %2076 = vmatmul.msk.bf16.vlgmr.msrb.gmra.mxu0 %vm617_vm2, %v2433_v37  ;;  %v704_v33 = vsel %vm693_vm8, %v684_v4, %v550_v49 }
  0xe8   : > { %v586_v40 = vpop.permute.xlu1 %585 }
  0xe9   : > { %v552_v35 = vpop.permute.xlu0 %551 }
  0xea   : > { %v728_v17 = vsel %vm718_vm4, %v552_v35, %v586_v40 }
  0xeb   : > { %1125 = vmatmul.bf16.gmra.mxu2 %v746_v26  ;;  %v749_v44 = vsel %vm735_vm6, %v728_v17, %v606_v41  ;;  %v2789_v17 = vld [vmem:[%s3015_s2] ss:$0 sm:$0xff] }
  0xed   : > { %1076 = vmatmul.bf16.gmra.mxu1 %v704_v33 }
  0xf0   : > { %v520_v37 = vpop.permute.xlu1 %519 }
  0xf1   : > { %v490_v43 = vpop.permute.xlu0 %489 }
  0xf2   : > { %v669_v34 = vsel %vm659_vm5, %v2685_v47, %v490_v43  ;;  %v492_v47 = vpop.permute.xlu2 %491 }
  0xf3   : > { %2077 = vmatmul.msk.bf16.gmra.mxu0 %vm617_vm2, %v2460_v48  ;;  %v686_v45 = vsel %vm676_vm7, %v669_v34, %v520_v37  ;;  %v614_v48 = vsel %vm559_vm1, %v2601_v50, %v613_v5  ;;  %v671_v6 = vsel %vm659_vm5, %v2636_v12, %v492_v47  ;;  %v615_v50 = vrot.slane %v2603_v51, 1 }
  0xf4   : > { %v707_v53 = vsel %vm693_vm8, %v686_v45, %v552_v35  ;;  %2082 = vmatmul.msk.bf16.gmra.mxu3 %vm617_vm2, %v614_v48 }
  0xf8   : > { %v608_v55 = vpop.permute.xlu1 %607 }
  0xf9   : > { %v588_v52 = vpop.permute.xlu0 %587 }
  0xfa   : > { %v730_v7 = vsel %vm718_vm4, %v554_v46, %v588_v52  ;;  %v590_v58 = vpop.permute.xlu2 %589 }
  0xfb   : > { %1130 = vmatmul.bf16.gmra.mxu2 %v749_v44  ;;  %v752_v56 = vsel %vm735_vm6, %v730_v7, %v608_v55 }
  0xfd   : > { %1081 = vmatmul.bf16.gmra.mxu1 %v707_v53 }
 0x100   : > { %v556_v19 = vpop.permute.xlu1 %555 }
 0x101   : > { %v522_v1 = vpop.permute.xlu0 %521  ;;  %v732_v12 = vsel %vm718_vm4, %v556_v19, %v590_v58 }
 0x102   : > { %v688_v57 = vsel %vm676_vm7, %v671_v6, %v522_v1  ;;  %v524_v54 = vpop.permute.xlu2 %523 }
 0x103   : > { %2078 = vmatmul.msk.bf16.gmra.mxu0 %vm617_vm2, %v2488_v59  ;;  %v710_v13 = vsel %vm693_vm8, %v688_v57, %v554_v46  ;;  %v616_v59 = vsel %vm559_vm1, %v613_v5, %v615_v50 }
 0x104   : > { %2083 = vmatmul.msk.bf16.gmra.mxu3 %vm617_vm2, %v616_v59 }
 0x108   : > { %v494_v62 = vpop.permute.xlu1 %493 }
 0x109   : > { %v610_v60 = vpop.permute.xlu0 %609  ;;  %v673_v51 = vsel %vm659_vm5, %v2672_v39, %v494_v62 }
 0x10a   : > { %v755_v10 = vsel %vm735_vm6, %v732_v12, %v610_v60  ;;  %v690_v14 = vsel %vm676_vm7, %v673_v51, %v524_v54  ;;  %v612_v21 = vpop.permute.xlu2 %611 }
 0x10b   : > { %1135 = vmatmul.bf16.gmra.mxu2 %v752_v56  ;;  %v713_v0 = vsel %vm693_vm8, %v690_v14, %v556_v19 }
 0x10d   : > { %1086 = vmatmul.bf16.gmra.mxu1 %v710_v13 }
 0x110   : > { %v1013_v61 = vpop.f32.mrf.mxu0  ;;  %v592_v20 = vpop.permute.xlu1 %591 }
 0x111   : > { %v558_v15 = vpop.permute.xlu0 %557  ;;  %v1014_v44 = vadd.f32 %v2789_v17, %v1013_v61 }
 0x112   : > { %v734_v39 = vsel %vm718_vm4, %v558_v15, %v592_v20 }
 0x113   : > { %2079 = vmatmul.msk.bf16.gmra.mxu0 %vm617_vm2, %v2502_v11  ;;  %v758_v49 = vsel %vm735_vm6, %v734_v39, %v612_v21 }
 0x118   : > { %v1015_v9 = vpop.f32.mrf.mxu0  ;;  %v526_v23 = vpop.permute.xlu1 %525 }
 0x119   : > { %v2755_v18 = vpop.f32.mrf.mxu1  ;;  %v496_v16 = vpop.permute.xlu0 %495  ;;  %v1016_v52 = vadd.f32 %v2789_v17, %v1015_v9 }
 0x11a   : > { %v675_v22 = vsel %vm659_vm5, %v2629_v63, %v496_v16 }
 0x11b   : > { %1140 = vmatmul.bf16.gmra.mxu2 %v755_v10  ;;  %v692_v27 = vsel %vm676_vm7, %v675_v22, %v526_v23 }
 0x11c   : > { %v716_v31 = vsel %vm693_vm8, %v692_v27, %v558_v15 }
 0x11d   : > { %1091 = vmatmul.bf16.gmra.mxu1 %v713_v0 }
 0x120   : > { %v1018_v11 = vpop.f32.mrf.mxu0 }
 0x121   : > { %v2758_v42 = vpop.f32.mrf.mxu1  ;;  %v1019_v60 = vadd.f32 %v2789_v17, %v1018_v11 }
 0x123   : > { %2080 = vmatmul.msk.bf16.gmra.mxu0 %vm617_vm2, %v2553_v28 }
 0x126   : > { %v2769_v8 = vpop.f32.mrf.mxu2 }
 0x128   : > { %v1020_v25 = vpop.f32.mrf.mxu0 }
 0x129   : > { %v2767_v29 = vpop.f32.mrf.mxu1  ;;  %v1021_v51 = vadd.f32 %v2789_v17, %v1020_v25 }
 0x12b   : > { %1145 = vmatmul.bf16.gmra.mxu2 %v758_v49 }
 0x12d   : > { %1096 = vmatmul.bf16.gmra.mxu1 %v716_v31 }
 0x12e   : > { %v2774_v30 = vpop.f32.mrf.mxu2 }
 0x130   : > { %v1023_v28 = vpop.f32.mrf.mxu0 }
 0x131   : > { %v2772_v3 = vpop.f32.mrf.mxu1  ;;  %v1024_v49 = vadd.f32 %v2789_v17, %v1023_v28 }
 0x138   : > { %v2776_v63 = vpop.f32.mrf.mxu0 }
 0x139   : > { %v1062_v32 = vpop.f32.mrf.mxu1 }
 0x13a   : > { %v1063_v46 = vadd.f32 %v1062_v32, %v1014_v44 }
 0x13e   : > { %v1111_v24 = vpop.f32.mrf.mxu2 }
 0x13f   : > { %v1112_v53 = vadd.f32 %v1111_v24, %v1063_v46  ;;  %v1026_v24 = vadd.f32 %v2789_v17, %v2776_v63 }
 0x140   : > { %v2778_v36 = vpop.f32.mrf.mxu0 }
 0x141   : > { %v1064_v38 = vpop.f32.mrf.mxu1 }
 0x142   : > { %v1065_v48 = vadd.f32 %v1064_v38, %v1016_v52 }
 0x146   : > { %v1113_v2 = vpop.f32.mrf.mxu2 }
 0x147   : > { %v1114_v7 = vadd.f32 %v1113_v2, %v1065_v48  ;;  %v1185_v2 = vpop.f32.mrf.mxu3 }
 0x148   : > { %v2780_v26 = vpop.f32.mrf.mxu0 }
 0x14a   : > { %v1067_v35 = vpop.f32.mrf.mxu1 }
 0x14b   : > { %v1068_v62 = vadd.f32 %v1067_v35, %v1019_v60  ;;  %v2143_v60 = vld [vmem:[%s3016_s3 + $0x10] sm:$0xff] }
 0x14c   : > { %1337 = vmatpush.bf16.msrb.mxu3 %v2143_v60 }
 0x14e   : > { %v1116_v4 = vpop.f32.mrf.mxu2 }
 0x14f   : > { %v1117_v54 = vadd.f32 %v1116_v4, %v1068_v62  ;;  %v1187_v48 = vpop.f32.mrf.mxu3 }
 0x150   : > { %v2782_v40 = vpop.f32.mrf.mxu0 }
 0x152   : > { %v1069_v33 = vpop.f32.mrf.mxu1 }
 0x153   : > { %v1070_v9 = vadd.f32 %v1069_v33, %v1021_v51 }
 0x156   : > { %v1118_v41 = vpop.f32.mrf.mxu2 }
 0x157   : > { %v1119_v15 = vadd.f32 %v1118_v41, %v1070_v9 }
 0x158   : > { %v2784_v43 = vpop.f32.mrf.mxu0 }
 0x15a   : > { %v1072_v37 = vpop.f32.mrf.mxu1 }
 0x15b   : > { %v1073_v31 = vadd.f32 %v1072_v37, %v1024_v49  ;;  %v1039_v37 = vadd.f32 %v2789_v17, %v2755_v18  ;;  %v1041_v18 = vadd.f32 %v2789_v17, %v2758_v42 }
 0x15e   : > { %v1121_v34 = vpop.f32.mrf.mxu2 }
 0x15f   : > { %v1122_v38 = vadd.f32 %v1121_v34, %v1073_v31 }
 0x160   : > { %v1160_v45 = vpop.f32.mrf.mxu0 }
 0x161   : > { %v1161_v55 = vadd.f32 %v1160_v45, %v1112_v53 }
 0x162   : > { %v1074_v5 = vpop.f32.mrf.mxu1 }
 0x163   : > { %v1216_v6 = vmul.f32 0.05, %v1161_v55  ;;  %vm1200_vm9 = vcmp.ge.f32.partialorder %v1161_v55, 0.0  ;;  %v1075_v35 = vadd.f32 %v1074_v5, %v1026_v24 }
 0x165   : > { %v2793_v50 = vsel %vm1200_vm9, %v1161_v55, %v1216_v6  ;;  %v1029_v55 = vadd.f32 %v2789_v17, %v2778_v36 }
 0x166   : > { %v1123_v47 = vpop.f32.mrf.mxu2 }
 0x167   : > { %v1124_v41 = vadd.f32 %v1123_v47, %v1075_v35 }
 0x168   : > { %v1162_v1 = vpop.f32.mrf.mxu0 }
 0x169   : > { %v1163_v19 = vadd.f32 %v1162_v1, %v1114_v7 }
 0x16a   : > { %v1077_v56 = vpop.f32.mrf.mxu1 }
 0x16b   : > { %vm1201_vm10 = vcmp.ge.f32.partialorder %v1163_v19, 0.0  ;;  %v1217_v57 = vmul.f32 0.05, %v1163_v19  ;;  %v1078_v1 = vadd.f32 %v1077_v56, %v1029_v55 }
 0x16d   : > { %v2795_v58 = vsel %vm1201_vm10, %v1163_v19, %v1217_v57  ;;  %v1031_v57 = vadd.f32 %v2789_v17, %v2780_v26 }
 0x16e   : > { %v1126_v13 = vpop.f32.mrf.mxu2  ;;  %v1248_v59 = vpack.c.bf16 %v2795_v58, %v2793_v50 }
 0x170   : > { %v1165_v61 = vpop.f32.mrf.mxu0  ;;  %1274 = vrot.lane.b32.xlu2 %v1248_v59, %s2266_s13  ;;  %v1127_v59 = vadd.f32 %v1126_v13, %v1078_v1 }
 0x171   : > { %v1166_v10 = vadd.f32 %v1165_v61, %v1117_v54 }
 0x172   : > { %v1079_v12 = vpop.f32.mrf.mxu1 }
 0x173   : > { %v1218_v0 = vmul.f32 0.05, %v1166_v10  ;;  %vm1202_vm11 = vcmp.ge.f32.partialorder %v1166_v10, 0.0  ;;  %v1080_v61 = vadd.f32 %v1079_v12, %v1031_v57  ;;  %v1049_v57 = vadd.f32 %v2789_v17, %v2769_v8 }
 0x175   : > { %v2804_v21 = vsel %vm1202_vm11, %v1166_v10, %v1218_v0 }
 0x176   : > { %v1128_v14 = vpop.f32.mrf.mxu2 }
 0x177   : > { %v1129_v56 = vadd.f32 %v1128_v14, %v1080_v61 }
 0x178   : > { %v1167_v20 = vpop.f32.mrf.mxu0 }
 0x179   : > { %v1168_v16 = vadd.f32 %v1167_v20, %v1119_v15  ;;  %v1190_v15 = vpop.f32.mrf.mxu3 }
 0x17a   : > { %v2802_v39 = vpop.f32.mrf.mxu1 }
 0x17b   : > { %vm1203_vm12 = vcmp.ge.f32.partialorder %v1168_v16, 0.0  ;;  %v1219_v11 = vmul.f32 0.05, %v1168_v16 }
 0x17d   : > { %v2806_v22 = vsel %vm1203_vm12, %v1168_v16, %v1219_v11  ;;  %v1044_v11 = vadd.f32 %v2789_v17, %v2767_v29  ;;  %vm1771_vm12 = vcmask 253952  }
 0x17e   : > { %v2808_v23 = vpop.f32.mrf.mxu2  ;;  %v1249_v25 = vpack.c.bf16 %v2806_v22, %v2804_v21 }
 0x180   : > { %v1170_v27 = vpop.f32.mrf.mxu0  ;;  %1276 = vrot.lane.b32.xlu0 %v1249_v25, %s2266_s13 }
 0x181   : > { %v1171_v4 = vadd.f32 %v1170_v27, %v1122_v38 }
 0x182   : > { %v2814_v32 = vpop.f32.mrf.mxu1 }
 0x183   : > { %v1220_v45 = vmul.f32 0.05, %v1171_v4  ;;  %vm1204_vm13 = vcmp.ge.f32.partialorder %v1171_v4, 0.0 }
 0x185   : > { %v2822_v53 = vsel %vm1204_vm13, %v1171_v4, %v1220_v45  ;;  %v2142_v4 = vld [vmem:[%s3016_s3 + $0x8] sm:$0xff] }
 0x186   : > { %v2818_v33 = vpop.f32.mrf.mxu2  ;;  %1338 = vmatpush.bf16.msrb.mxu3 %v2142_v4 }
 0x188   : > { %v1172_v44 = vpop.f32.mrf.mxu0 }
 0x189   : > { %v1173_v46 = vadd.f32 %v1172_v44, %v1124_v41 }
 0x18a   : > { %v1087_v28 = vpop.f32.mrf.mxu1 }
 0x18b   : > { %vm1205_vm14 = vcmp.ge.f32.partialorder %v1173_v46, 0.0  ;;  %v1221_v52 = vmul.f32 0.05, %v1173_v46  ;;  %v1088_v47 = vadd.f32 %v1087_v28, %v1039_v37  ;;  %v1046_v28 = vadd.f32 %v2789_v17, %v2772_v3 }
 0x18d   : > { %v2824_v63 = vsel %vm1205_vm14, %v1173_v46, %v1221_v52  ;;  %v1192_v46 = vpop.f32.mrf.mxu3  ;;  %v1036_v52 = vadd.f32 %v2789_v17, %v2784_v43 }
 0x18e   : > { %v1136_v34 = vpop.f32.mrf.mxu2  ;;  %v1250_v5 = vpack.c.bf16 %v2824_v63, %v2822_v53 }
 0x18f   : > { %v1137_v6 = vadd.f32 %v1136_v34, %v1088_v47  ;;  %v1085_v34 = vadd.f32 %v2814_v32, %v1036_v52 }
 0x190   : > { %v1175_v7 = vpop.f32.mrf.mxu0  ;;  %1278 = vrot.lane.b32.xlu1 %v1250_v5, %s2266_s13 }
 0x191   : > { %v1176_v36 = vadd.f32 %v1175_v7, %v1127_v59  ;;  %v1186_v62 = vadd.f32 %v1185_v2, %v1137_v6  ;;  %v1034_v2 = vadd.f32 %v2789_v17, %v2782_v40  ;;  %v2141_v40 = vld [vmem:[%s3016_s3] sm:$0xff]  ;;  %v1134_v47 = vadd.f32 %v2818_v33, %v1085_v34 }
 0x192   : > { %v1089_v19 = vpop.f32.mrf.mxu1  ;;  %1339 = vmatpush.bf16.msrb.mxu3 %v2141_v40 }
 0x193   : > { %v1090_v51 = vadd.f32 %v1089_v19, %v1041_v18  ;;  %v1222_v20 = vmul.f32 0.05, %v1176_v36  ;;  %v1226_v42 = vmul.f32 0.05, %v1186_v62  ;;  %vm1206_vm15 = vcmp.ge.f32.partialorder %v1176_v36, 0.0 }
 0x194   : > { %vm1210_vm0 = vcmp.ge.f32.partialorder %v1186_v62, 0.0  ;;  %v1083_v41 = vadd.f32 %v2802_v39, %v1034_v2 }
 0x195   : > { %v2840_v25 = vsel %vm1206_vm15, %v1176_v36, %v1222_v20  ;;  %v2844_v49 = vsel %vm1210_vm0, %v1186_v62, %v1226_v42  ;;  %v1195_v59 = vpop.f32.mrf.mxu3 }
 0x196   : > { %v1138_v54 = vpop.f32.mrf.mxu2  ;;  %v1132_v37 = vadd.f32 %v2808_v23, %v1083_v41  ;;  %v2223_v41 = vld [vmem:[%s3017_s4] ss:$0 sm:$0xff] }
 0x197   : > { %v1139_v9 = vadd.f32 %v1138_v54, %v1090_v51 }
 0x198   : > { %v1177_v10 = vpop.f32.mrf.mxu0 }
 0x199   : > { %v1178_v0 = vadd.f32 %v1177_v10, %v1129_v56  ;;  %v1188_v16 = vadd.f32 %v1187_v48, %v1139_v9  ;;  %v1051_v10 = vadd.f32 %v2789_v17, %v2774_v30 }
 0x19a   : > { %v1092_v26 = vpop.f32.mrf.mxu1 }
 0x19b   : > { %vm1207_vm1 = vcmp.ge.f32.partialorder %v1178_v0, 0.0  ;;  %v1223_v13 = vmul.f32 0.05, %v1178_v0  ;;  %vm1211_vm3 = vcmp.ge.f32.partialorder %v1188_v16, 0.0  ;;  %v1227_v12 = vmul.f32 0.05, %v1188_v16 }
 0x19c   : > { %v1093_v35 = vadd.f32 %v1092_v26, %v1044_v11 }
 0x19d   : > { %v2842_v14 = vsel %vm1207_vm1, %v1178_v0, %v1223_v13  ;;  %v2846_v27 = vsel %vm1211_vm3, %v1188_v16, %v1227_v12  ;;  %v1197_v0 = vpop.f32.mrf.mxu3 }
 0x19e   : > { %v1141_v31 = vpop.f32.mrf.mxu2  ;;  %v1251_v24 = vpack.c.bf16 %v2842_v14, %v2840_v25  ;;  %v1253_v38 = vpack.c.bf16 %v2846_v27, %v2844_v49 }
 0x19f   : > { %v1142_v44 = vadd.f32 %v1141_v31, %v1093_v35 }
 0x1a0   : > { %v1180_v29 = vpop.f32.mrf.mxu0  ;;  %1280 = vrot.lane.b32.xlu2 %v1251_v24, %s2266_s13  ;;  %1284 = vrot.lane.b32.xlu1 %v1253_v38, %s2266_s13 }
 0x1a1   : > { %v1181_v5 = vadd.f32 %v1180_v29, %v1132_v37  ;;  %v1191_v39 = vadd.f32 %v1190_v15, %v1142_v44 }
 0x1a2   : > { %v1094_v45 = vpop.f32.mrf.mxu1 }
 0x1a3   : > { %v1095_v48 = vadd.f32 %v1094_v45, %v1046_v28  ;;  %v1224_v6 = vmul.f32 0.05, %v1181_v5  ;;  %v1228_v19 = vmul.f32 0.05, %v1191_v39  ;;  %vm1208_vm6 = vcmp.ge.f32.partialorder %v1181_v5, 0.0 }
 0x1a4   : > { %vm1212_vm7 = vcmp.ge.f32.partialorder %v1191_v39, 0.0 }
 0x1a5   : > { %v2872_v60 = vsel %vm1208_vm6, %v1181_v5, %v1224_v6  ;;  %v2876_v61 = vsel %vm1212_vm7, %v1191_v39, %v1228_v19 }
 0x1a6   : > { %v1143_v55 = vpop.f32.mrf.mxu2 }
 0x1a7   : > { %v1144_v7 = vadd.f32 %v1143_v55, %v1095_v48 }
 0x1a8   : > { %v1182_v1 = vpop.f32.mrf.mxu0 }
 0x1a9   : > { %v1183_v18 = vadd.f32 %v1182_v1, %v1134_v47  ;;  %v1193_v3 = vadd.f32 %v1192_v46, %v1144_v7 }
 0x1aa   : > { %v1097_v43 = vpop.f32.mrf.mxu1 }
 0x1ab   : > { %vm1209_vm8 = vcmp.ge.f32.partialorder %v1183_v18, 0.0  ;;  %v1225_v23 = vmul.f32 0.05, %v1183_v18  ;;  %vm1213_vm9 = vcmp.ge.f32.partialorder %v1193_v3, 0.0  ;;  %v1229_v32 = vmul.f32 0.05, %v1193_v3 }
 0x1ac   : > { %v1098_v56 = vadd.f32 %v1097_v43, %v1049_v57 }
 0x1ad   : > { %v2874_v33 = vsel %vm1209_vm8, %v1183_v18, %v1225_v23  ;;  %v2878_v36 = vsel %vm1213_vm9, %v1193_v3, %v1229_v32 }
 0x1ae   : > { %v1146_v62 = vpop.f32.mrf.mxu2  ;;  %v1252_v51 = vpack.c.bf16 %v2874_v33, %v2872_v60  ;;  %v1254_v54 = vpack.c.bf16 %v2878_v36, %v2876_v61 }
 0x1af   : > { %v1147_v8 = vadd.f32 %v1146_v62, %v1098_v56 }
 0x1b0   : > { %1282 = vrot.lane.b32.xlu0 %v1252_v51, %s2266_s13  ;;  %1286 = vrot.lane.b32.xlu2 %v1254_v54, %s2266_s13 }
 0x1b1   : > { %v1196_v15 = vadd.f32 %v1195_v59, %v1147_v8 }
 0x1b2   : > { %v1099_v9 = vpop.f32.mrf.mxu1 }
 0x1b3   : > { %v1100_v20 = vadd.f32 %v1099_v9, %v1051_v10  ;;  %v1230_v26 = vmul.f32 0.05, %v1196_v15  ;;  %vm1214_vm10 = vcmp.ge.f32.partialorder %v1196_v15, 0.0 }
 0x1b5   : > { %v2888_v11 = vsel %vm1214_vm10, %v1196_v15, %v1230_v26 }
 0x1b6   : > { %v1148_v42 = vpop.f32.mrf.mxu2 }
 0x1b7   : > { %v1149_v16 = vadd.f32 %v1148_v42, %v1100_v20 }
 0x1b9   : > { %v1198_v13 = vadd.f32 %v1197_v0, %v1149_v16 }
 0x1bb   : > { %vm1215_vm11 = vcmp.ge.f32.partialorder %v1198_v13, 0.0  ;;  %v1231_v12 = vmul.f32 0.05, %v1198_v13 }
 0x1bd   : > { %v2890_v31 = vsel %vm1215_vm11, %v1198_v13, %v1231_v12 }
 0x1be   : > { %v1255_v24 = vpack.c.bf16 %v2890_v31, %v2888_v11 }
 0x1c0   : > { %1288 = vrot.lane.b32.xlu0 %v1255_v24, %s2266_s13 }
 0x1ca   : > { %v1275_v30 = vpop.permute.xlu2 %1274 }
 0x1cb   : > { %2096 = vmatmul.msk.bf16.vlgmr.msrb.gmra.mxu3 %vm617_vm2, %v1275_v30 }
 0x1f2   : > { %v1277_v17 = vpop.permute.xlu0 %1276 }
 0x1f3   : > { %2097 = vmatmul.msk.bf16.gmra.mxu3 %vm617_vm2, %v1277_v17 }
 0x1fa   : > { %v1281_v2 = vpop.permute.xlu2 %1280 }
 0x202   : > { %v1279_v38 = vpop.permute.xlu1 %1278 }
 0x203   : > { %2098 = vmatmul.msk.bf16.gmra.mxu3 %vm617_vm2, %v1279_v38 }
 0x20a   : > { %v1287_v4 = vpop.permute.xlu2 %1286 }
 0x212   : > { %v1285_v29 = vpop.permute.xlu1 %1284 }
 0x213   : > { %2099 = vmatmul.msk.bf16.gmra.mxu3 %vm617_vm2, %v1281_v2 }
 0x222   : > { %v1283_v35 = vpop.permute.xlu0 %1282 }
 0x223   : > { %2100 = vmatmul.msk.bf16.gmra.mxu3 %vm617_vm2, %v1283_v35 }
 0x232   : > { %v1289_v46 = vpop.permute.xlu0 %1288 }
 0x233   : > { %2101 = vmatmul.msk.bf16.gmra.mxu3 %vm617_vm2, %v1285_v29 }
 0x243   : > { %2102 = vmatmul.msk.bf16.gmra.mxu3 %vm617_vm2, %v1287_v4 }
 0x24e   : > { %v1341_v44 = vpop.f32.mrf.mxu3 }
 0x24f   : > { %v1342_v45 = vadd.f32 %v2223_v41, %v1341_v44 }
 0x251   : > { %1397 = vrot.lane.b32.xlu2 %v1342_v45, %s2269_s16 }
 0x253   : > { %2103 = vmatmul.msk.bf16.gmra.mxu3 %vm617_vm2, %v1289_v46  ;;  %vm1781_vm2 = vcmask 257024  }
 0x256   : > { %v1343_v40 = vpop.f32.mrf.mxu3 }
 0x257   : > { %v1344_v28 = vadd.f32 %v2223_v41, %v1343_v40 }
 0x259   : > { %1399 = vrot.lane.b32.xlu1 %v1344_v28, %s2269_s16 }
 0x276   : > { %v1346_v52 = vpop.f32.mrf.mxu3 }
 0x277   : > { %v1347_v37 = vadd.f32 %v2223_v41, %v1346_v52 }
 0x279   : > { %1401 = vrot.lane.b32.xlu0 %v1347_v37, %s2269_s16 }
 0x27e   : > { %v1348_v34 = vpop.f32.mrf.mxu3 }
 0x27f   : > { %v1349_v5 = vadd.f32 %v2223_v41, %v1348_v34 }
 0x281   : > { %1403 = vrot.lane.b32.xlu1 %v1349_v5, %s2269_s16 }
 0x286   : > { %v1351_v39 = vpop.f32.mrf.mxu3 }
 0x287   : > { %v1352_v48 = vadd.f32 %v2223_v41, %v1351_v39 }
 0x289   : > { %1405 = vrot.lane.b32.xlu2 %v1352_v48, %s2269_s16 }
 0x28e   : > { %v1353_v55 = vpop.f32.mrf.mxu3 }
 0x28f   : > { %v1354_v47 = vadd.f32 %v2223_v41, %v1353_v55 }
 0x291   : > { %1407 = vrot.lane.b32.xlu0 %v1354_v47, %s2269_s16 }
 0x296   : > { %v1356_v7 = vpop.f32.mrf.mxu3 }
 0x297   : > { %v1357_v1 = vadd.f32 %v2223_v41, %v1356_v7 }
 0x299   : > { %1409 = vrot.lane.b32.xlu1 %v1357_v1, %s2269_s16 }
 0x29e   : > { %v1358_v6 = vpop.f32.mrf.mxu3 }
 0x29f   : > { %v1359_v19 = vadd.f32 %v2223_v41, %v1358_v6 }
 0x2a1   : > { %1411 = vrot.lane.b32.xlu2 %v1359_v19, %s2269_s16 }
 0x2a6   : > { %v1361_v18 = vpop.f32.mrf.mxu3 }
 0x2a7   : > { %v1362_v3 = vadd.f32 %v2223_v41, %v1361_v18 }
 0x2a9   : > { %1413 = vrot.lane.b32.xlu0 %v1362_v3, %s2269_s16 }
 0x2ab   : > { %v1398_v43 = vpop.permute.xlu2 %1397 }
 0x2ac   : > { %v1445_v23 = vsel %vm659_vm5, %v2793_v50, %v1398_v43 }
 0x2ad   : > { %v1773_v32 = vpack.c.bf16 %v1445_v23, %v1445_v23  ;;  %v1734_v38 = vsel %vm718_vm4, %v1445_v23, 0.0 }
 0x2ae   : > { %v1363_v57 = vpop.f32.mrf.mxu3 }
 0x2af   : > { %1782 = vst.msk [vmem:[%s2920_s15] sm:$0xf] %vm1781_vm2, %v1773_v32  ;;  %v1364_v59 = vadd.f32 %v2223_v41, %v1363_v57 }
 0x2b1   : > { %1415 = vrot.lane.b32.xlu1 %v1364_v59, %s2269_s16 }
 0x2b6   : > { %v1366_v62 = vpop.f32.mrf.mxu3 }
 0x2b7   : > { %v1367_v51 = vadd.f32 %v2223_v41, %v1366_v62 }
 0x2b9   : > { %1417 = vrot.lane.b32.xlu2 %v1367_v51, %s2269_s16 }
 0x2be   : > { %v1368_v54 = vpop.f32.mrf.mxu3 }
 0x2bf   : > { %v1369_v56 = vadd.f32 %v2223_v41, %v1368_v54 }
 0x2c1   : > { %1419 = vrot.lane.b32.xlu0 %v1369_v56, %s2269_s16 }
 0x2c6   : > { %v1371_v8 = vpop.f32.mrf.mxu3 }
 0x2c7   : > { %v1372_v9 = vadd.f32 %v2223_v41, %v1371_v8 }
 0x2c9   : > { %1421 = vrot.lane.b32.xlu1 %v1372_v9, %s2269_s16 }
 0x2cb   : > { %v1400_v0 = vpop.permute.xlu1 %1399 }
 0x2cc   : > { %v1446_v26 = vsel %vm659_vm5, %v2795_v58, %v1400_v0 }
 0x2cd   : > { %v1719_v24 = vmul.f32 0.0, %v1446_v26 }
 0x2ce   : > { %v1373_v50 = vpop.f32.mrf.mxu3 }
 0x2cf   : > { %v1374_v10 = vadd.f32 %v2223_v41, %v1373_v50  ;;  %v1735_v17 = vsel %vm718_vm4, %v1719_v24, 0.0 }
 0x2d0   : > { %v1736_v35 = vadd.f32 %v1735_v17, %v1734_v38 }
 0x2d1   : > { %1423 = vrot.lane.b32.xlu2 %v1374_v10, %s2269_s16 }
 0x2d6   : > { %v1376_v15 = vpop.f32.mrf.mxu3 }
 0x2d7   : > { %v1377_v20 = vadd.f32 %v2223_v41, %v1376_v15 }
 0x2d9   : > { %1425 = vrot.lane.b32.xlu0 %v1377_v20, %s2269_s16 }
 0x2de   : > { %v1378_v42 = vpop.f32.mrf.mxu3 }
 0x2df   : > { %v1379_v16 = vadd.f32 %v2223_v41, %v1378_v42 }
 0x2e1   : > { %1427 = vrot.lane.b32.xlu1 %v1379_v16, %s2269_s16  ;;  %s1935_s16 = sshll.u32 %s3031_s22, 2 }
 0x2e2   : > { %s305_s17 = sadd.s32 %s1935_s16, %s3033_s21 }
 0x2e3   : > { %v1406_v13 = vpop.permute.xlu2 %1405  ;;  %s306_s11 = scalar_lea.vmem %s3019_s6, %s305_s17 }
 0x2e4   : > { %v1449_v12 = vsel %vm659_vm5, %v2822_v53, %v1406_v13 }
 0x2e5   : > { %v1775_v30 = vpack.c.bf16 %v1449_v12, %v1449_v12  ;;  %v1741_v28 = vsel %vm718_vm4, %v1449_v12, 0.0 }
 0x2e7   : > { %1784 = vst.msk [vmem:[%s2920_s15 + $0x8] sm:$0xf] %vm1781_vm2, %v1775_v30 }
 0x2eb   : > { %v1402_v2 = vpop.permute.xlu0 %1401 }
 0x2ec   : > { %v1447_v29 = vsel %vm659_vm5, %v2804_v21, %v1402_v2 }
 0x2ed   : > { %v1737_v58 = vsel %vm718_vm4, %v1447_v29, 0.0  ;;  %v1774_v4 = vpack.c.bf16 %v1447_v29, %v1447_v29 }
 0x2ee   : > { %v1738_v41 = vadd.f32 %v1737_v58, %v1736_v35 }
 0x2ef   : > { %1783 = vst.msk [vmem:[%s2920_s15 + $0x4] sm:$0xf] %vm1781_vm2, %v1774_v4 }
 0x2f3   : > { %v1404_v53 = vpop.permute.xlu1 %1403 }
 0x2f4   : > { %v1448_v44 = vsel %vm659_vm5, %v2806_v22, %v1404_v53 }
 0x2f5   : > { %v1721_v45 = vmul.f32 0.0, %v1448_v44 }
 0x2f7   : > { %v1739_v46 = vsel %vm718_vm4, %v1721_v45, 0.0 }
 0x2f8   : > { %v1740_v40 = vadd.f32 %v1739_v46, %v1738_v41 }
 0x2fa   : > { %v1742_v21 = vadd.f32 %v1741_v28, %v1740_v40 }
 0x2fb   : > { %v1412_v52 = vpop.permute.xlu2 %1411 }
 0x303   : > { %v1408_v39 = vpop.permute.xlu0 %1407 }
 0x304   : > { %v1450_v6 = vsel %vm659_vm5, %v2824_v63, %v1408_v39 }
 0x305   : > { %v1723_v19 = vmul.f32 0.0, %v1450_v6 }
 0x307   : > { %v1743_v18 = vsel %vm718_vm4, %v1723_v19, 0.0 }
 0x308   : > { %v1744_v32 = vadd.f32 %v1743_v18, %v1742_v21 }
 0x30b   : > { %v1410_v37 = vpop.permute.xlu1 %1409 }
 0x30c   : > { %v1451_v34 = vsel %vm659_vm5, %v2840_v25, %v1410_v37 }
 0x30d   : > { %v1776_v5 = vpack.c.bf16 %v1451_v34, %v1451_v34  ;;  %v1745_v23 = vsel %vm718_vm4, %v1451_v34, 0.0 }
 0x30e   : > { %v1746_v63 = vadd.f32 %v1745_v23, %v1744_v32 }
 0x30f   : > { %1785 = vst.msk [vmem:[%s2920_s15 + $0xc] sm:$0xf] %vm1781_vm2, %v1776_v5 }
 0x313   : > { %v1418_v48 = vpop.permute.xlu2 %1417 }
 0x314   : > { %v1455_v22 = vsel %vm659_vm5, %v2844_v49, %v1418_v48  ;;  %v1452_v49 = vsel %vm659_vm5, %v2842_v14, %v1412_v52 }
 0x315   : > { %v1778_v55 = vpack.c.bf16 %v1455_v22, %v1455_v22  ;;  %v1725_v59 = vmul.f32 0.0, %v1452_v49  ;;  %v1753_v15 = vsel %vm718_vm4, %v1455_v22, 0.0 }
 0x317   : > { %1787 = vst.msk [vmem:[%s2920_s15 + $0x14] sm:$0xf] %vm1781_vm2, %v1778_v55  ;;  %v1747_v54 = vsel %vm718_vm4, %v1725_v59, 0.0 }
 0x318   : > { %v1748_v56 = vadd.f32 %v1747_v54, %v1746_v63 }
 0x31b   : > { %v1414_v47 = vpop.permute.xlu0 %1413 }
 0x31c   : > { %v1453_v7 = vsel %vm659_vm5, %v2872_v60, %v1414_v47 }
 0x31d   : > { %v1777_v1 = vpack.c.bf16 %v1453_v7, %v1453_v7  ;;  %v1749_v14 = vsel %vm718_vm4, %v1453_v7, 0.0 }
 0x31e   : > { %v1750_v9 = vadd.f32 %v1749_v14, %v1748_v56 }
 0x31f   : > { %1786 = vst.msk [vmem:[%s2920_s15 + $0x10] sm:$0xf] %vm1781_vm2, %v1777_v1 }
 0x323   : > { %v1416_v25 = vpop.permute.xlu1 %1415 }
 0x324   : > { %v1454_v57 = vsel %vm659_vm5, %v2874_v33, %v1416_v25 }
 0x325   : > { %v1727_v62 = vmul.f32 0.0, %v1454_v57 }
 0x327   : > { %v1751_v8 = vsel %vm718_vm4, %v1727_v62, 0.0 }
 0x328   : > { %v1752_v33 = vadd.f32 %v1751_v8, %v1750_v9 }
 0x32a   : > { %v1754_v16 = vadd.f32 %v1753_v15, %v1752_v33 }
 0x32b   : > { %v1424_v10 = vpop.permute.xlu2 %1423 }
 0x32c   : > { %v1458_v0 = vsel %vm659_vm5, %v2878_v36, %v1424_v10 }
 0x32d   : > { %v1731_v24 = vmul.f32 0.0, %v1458_v0 }
 0x32f   : > { %v1759_v17 = vsel %vm718_vm4, %v1731_v24, 0.0 }
 0x333   : > { %v1420_v51 = vpop.permute.xlu0 %1419 }
 0x33b   : > { %v1422_v3 = vpop.permute.xlu1 %1421 }
 0x33c   : > { %v1457_v43 = vsel %vm659_vm5, %v2876_v61, %v1422_v3  ;;  %v1456_v61 = vsel %vm659_vm5, %v2846_v27, %v1420_v51 }
 0x33d   : > { %v1779_v60 = vpack.c.bf16 %v1457_v43, %v1457_v43  ;;  %v1729_v50 = vmul.f32 0.0, %v1456_v61  ;;  %v1757_v27 = vsel %vm718_vm4, %v1457_v43, 0.0 }
 0x33f   : > { %1788 = vst.msk [vmem:[%s2920_s15 + $0x18] sm:$0xf] %vm1781_vm2, %v1779_v60  ;;  %v1755_v20 = vsel %vm718_vm4, %v1729_v50, 0.0 }
 0x340   : > { %v1756_v12 = vadd.f32 %v1755_v20, %v1754_v16 }
 0x342   : > { %v1758_v30 = vadd.f32 %v1757_v27, %v1756_v12 }
 0x344   : > { %v1760_v36 = vadd.f32 %v1759_v17, %v1758_v30 }
 0x34b   : > { %v1426_v42 = vpop.permute.xlu0 %1425 }
 0x34c   : > { %v1459_v26 = vsel %vm659_vm5, %v2888_v11, %v1426_v42 }
 0x34d   : > { %v1780_v13 = vpack.c.bf16 %v1459_v26, %v1459_v26  ;;  %v1761_v38 = vsel %vm718_vm4, %v1459_v26, 0.0 }
 0x34e   : > { %v1762_v29 = vadd.f32 %v1761_v38, %v1760_v36 }
 0x34f   : > { %1789 = vst.msk [vmem:[%s2920_s15 + $0x1c] sm:$0xf] %vm1781_vm2, %v1780_v13 }
 0x353   : > { %v1428_v2 = vpop.permute.xlu1 %1427 }
 0x354   : > { %v1460_v35 = vsel %vm659_vm5, %v2890_v31, %v1428_v2 }
 0x355   : > { %v1733_v11 = vmul.f32 0.0, %v1460_v35 }
 0x357   : > { %v1763_v58 = vsel %vm718_vm4, %v1733_v11, 0.0 }
 0x358   : > { %v1764_v4 = vadd.f32 %v1763_v58, %v1762_v29 }
 0x35a   : > { %v1765_v41 = vrot.slane %v1764_v4, 4 }
 0x35c   : > { %v1766_v53 = vadd.f32 %v1765_v41, %v1764_v4 }
 0x35e   : > { %v1767_v44 = vrot.slane %v1766_v53, 2 }
 0x360   : > { %v1768_v45 = vadd.f32 %v1767_v44, %v1766_v53 }
 0x362   : > { %v1769_v46 = vrot.slane %v1768_v45, 1 }
 0x364   : > { %v1770_v40 = vadd.f32 %v1769_v46, %v1768_v45 }
 0x366   : > { %1772 = vst.msk [vmem:[%s306_s11] sm:$0x1] %vm1771_vm12, %v1770_v40 }
 0x367 PF: > { %s17_s25 = sadd.s32 1, %s2262_s25   ;;  %s3020_s21 = smov %s2254_s23 }
 0x368   : > { %p14_p7 = scmp.ge.s32.totalorder %s17_s25, 10   ;;  %s3021_s22 = smov %s2258_s24 }
 0x369   : > { %s3022_s23 = smov %s3025_s26  ;;  %s3023_s24 = smov %s3029_s27 }
 0x36a   :  { %16 = sbr.rel (!%p14_p7) target bundleno = 3 (0x3), region = 82 }

</bundles_post_ra>
